<compile_context>
chip_gen: v5e
topology: v5e:2x2
jax: 0.10.0
libtpu: 0.0.40
codegen_flags: <defaults>
</compile_context>

<pallas_src>
import math
import functools
import numpy as np

import jax
import jax.numpy as jnp
from jax.experimental import pallas as pl
from jax.experimental.pallas import tpu as pltpu  # noqa: F401  (TPU backend)

# ----------------------------- model hyper-params ---------------------------
ENC_IN = 4
DEC_IN = 4
C_OUT = 4
D_MODEL = 32
N_HEADS = 4
D_HEAD = D_MODEL // N_HEADS
E_LAYERS = 2          # encoder layers (distil=True -> E_LAYERS-1 ConvLayers)
D_LAYERS = 1          # decoder layers
D_FF = 64             # encoder FFN width
DEC_FF = 4 * D_MODEL  # decoder FFN width (d_ff default -> 4*d_model)

B = 2
L_ENC = 16
L_ENC1 = L_ENC // 2   # after distil MaxPool(3,2,1)
L_DEC = 12
OUT_LEN = 6

LN_EPS = 1e-5
BN_EPS = 1e-5
NEG_BIG = -1e30       # finite mask value (avoids -inf NaN risk)
ATT_SCALE = 1.0 / math.sqrt(D_HEAD)


# ------------------- host-built constants (numpy, packed once) --------------
def _block_mask(n_blocks, lq, lk, causal):
    """Additive mask: 0 inside each diagonal (head,batch) block, NEG_BIG off."""
    m = np.full((n_blocks * lq, n_blocks * lk), NEG_BIG, np.float32)
    blk = np.zeros((lq, lk), np.float32)
    if causal:
        r = np.arange(lq)[:, None]
        c = np.arange(lk)[None, :]
        blk = np.where(c > r, NEG_BIG, 0.0).astype(np.float32)
    for i in range(n_blocks):
        m[i * lq:(i + 1) * lq, i * lk:(i + 1) * lk] = blk
    return m


def _rep_mat(bl):
    """(H*BL, BL): vertical stack of H identities (row replication per head)."""
    return np.tile(np.eye(bl, dtype=np.float32), (N_HEADS, 1))


def _head_lane_mask(bl):
    """(H*BL, D_MODEL): block h keeps only lanes of head h."""
    m = np.zeros((N_HEADS * bl, D_MODEL), np.float32)
    for h in range(N_HEADS):
        m[h * bl:(h + 1) * bl, h * D_HEAD:(h + 1) * D_HEAD] = 1.0
    return m


def _conv_shift_mats(bn, l):
    """Block-diag per-batch circular +-1 shifts over stacked (B*L, .) rows."""
    sm1 = np.zeros((bn * l, bn * l), np.float32)
    sp1 = np.zeros_like(sm1)
    for b in range(bn):
        for t in range(l):
            sm1[b * l + t, b * l + (t - 1) % l] = 1.0
            sp1[b * l + t, b * l + (t + 1) % l] = 1.0
    return sm1, sp1


def _pool_select(bn, l):
    """MaxPool1d(k=3,s=2,p=1) windows as a single (3*B*Lo, B*L) 0/1 selector."""
    lo = (l - 1) // 2 + 1
    p = np.zeros((3 * bn * lo, bn * l), np.float32)
    for b in range(bn):
        for j in range(lo):
            p[0 * bn * lo + b * lo + j, b * l + max(2 * j - 1, 0)] = 1.0
            p[1 * bn * lo + b * lo + j, b * l + 2 * j] = 1.0
            p[2 * bn * lo + b * lo + j, b * l + min(2 * j + 1, l - 1)] = 1.0
    return p


def _mix_select(bn, l):
    """torch mix=True view (B,H,L,E)->(B,L,H*E) as a row gather over the
    head-stacked context rows (h*B*L + b*L + l)."""
    bl = bn * l
    n = N_HEADS * bl
    m = np.zeros((n, n), np.float32)
    for hh in range(N_HEADS):
        for b in range(bn):
            for pos in range(l):
                g = N_HEADS * pos + hh
                hs, ls = divmod(g, l)
                m[hh * bl + b * l + pos, hs * bl + b * l + ls] = 1.0
    return m


# ------------------------------ slab packing ---------------------------------
def _pack_params(params):
    """Pack every weight/constant into one lane-dense (rows, 128) f32 slab."""
    w = params["weights"]
    entries = {}

    def put(name, arr):
        a = np.asarray(arr, np.float32)
        if a.ndim == 1:
            a = a[None, :]
        entries[name] = a

    for name, arr in w.items():
        if name == "dec_sa_wo":
            continue                      # replaced by dec_sa_womix below
        put(name, arr)

    # mix=True output projection: per target group hh, tile Wo[hh*E:(hh+1)*E]
    # vertically so it can be applied directly to the block-lane context.
    wo = np.asarray(w["dec_sa_wo"], np.float32)
    put("dec_sa_womix",
        np.concatenate([np.tile(wo[hh * D_HEAD:(hh + 1) * D_HEAD, :],
                                (N_HEADS, 1)) for hh in range(N_HEADS)], axis=0))

    nb = N_HEADS * B
    put("mask_enc0", _block_mask(nb, L_ENC, L_ENC, False))
    put("mask_enc1", _block_mask(nb, L_ENC1, L_ENC1, False))
    put("mask_dec", _block_mask(nb, L_DEC, L_DEC, True))
    put("mask_cross", _block_mask(nb, L_DEC, L_ENC1, False))
    put("rep_enc0", _rep_mat(B * L_ENC))
    put("rep_enc1", _rep_mat(B * L_ENC1))
    put("rep_dec", _rep_mat(B * L_DEC))
    put("hmask_enc0", _head_lane_mask(B * L_ENC))
    put("hmask_enc1", _head_lane_mask(B * L_ENC1))
    put("hmask_dec", _head_lane_mask(B * L_DEC))
    sm1, sp1 = _conv_shift_mats(B, L_ENC)
    put("conv_sm1", sm1)
    put("conv_sp1", sp1)
    put("pool_sel", _pool_select(B, L_ENC))
    put("mix_sel", _mix_select(B, L_DEC))

    layout = {}
    blocks = []
    r = 0
    for name, a in entries.items():
        nr, nc = a.shape
        assert nc <= 128
        pr = (-nr) % 8                    # 8-aligned row offsets for clean slices
        buf = np.zeros((nr + pr, 128), np.float32)
        buf[:nr, :nc] = a
        layout[name] = (r, nr, nc)
        blocks.append(buf)
        r += nr + pr
    slab = np.concatenate(blocks, axis=0)
    return jnp.asarray(slab), layout


# ------------------------------ in-kernel helpers ---------------------------
def _dot(a, b):
    return jnp.dot(a, b, preferred_element_type=jnp.float32)


def _ln(x, gamma, beta, eps=LN_EPS):
    mu = jnp.mean(x, axis=-1, keepdims=True)
    xc = x - mu
    var = jnp.mean(xc * xc, axis=-1, keepdims=True)
    return xc * jax.lax.rsqrt(var + eps) * gamma + beta


def _softmax_rows(s):
    m = jnp.max(s, axis=-1, keepdims=True)
    p = jnp.exp(s - m)
    denom = jnp.sum(p, axis=-1, keepdims=True)
    return p * pl.reciprocal(denom, approx=True)


def _mha_self(x, g, pfx, bl, rep, hmask, mask, mix_sel=None, womix=None):
    """Self-attention over the whole batch in one stack.

    x: (B*L, D).  Rows are replicated per head (block-diag rep matmul), the
    per-head structure is realized with a head-lane mask on K/V plus an
    additive block-diagonal(+causal) score mask; ctx comes out in block-lane
    form ((H*BL, D) with head-h values in head-h lanes only)."""
    x_rep = _dot(g(rep), x)                                   # (H*BL, D)
    f = _dot(x_rep, g(pfx + "wqkv")) + g(pfx + "bqkv")        # (H*BL, 3D)
    hm = g(hmask)                                             # (H*BL, D)
    q = f[:, 0:D_MODEL]                                       # unmasked is fine:
    k = f[:, D_MODEL:2 * D_MODEL] * hm                        # K mask selects head
    v = f[:, 2 * D_MODEL:3 * D_MODEL] * hm
    s = jax.lax.dot_general(q, k, (((1,), (1,)), ((), ())),
                            preferred_element_type=jnp.float32)
    p = _softmax_rows(s * ATT_SCALE + g(mask))                # (H*BL, H*BL)
    ctx = _dot(p, v)                                          # (H*BL, D) block-lane
    if mix_sel is None:
        # non-mix: summing the head blocks reconstructs (B*L, H*E) directly.
        merged = (ctx[0:bl] + ctx[bl:2 * bl]
                  + ctx[2 * bl:3 * bl] + ctx[3 * bl:4 * bl])
        out = _dot(merged, g(pfx + "wo"))
    else:
        # mix=True: gather scrambled (head,pos) rows, then apply tiled Wo blocks.
        gsel = _dot(g(mix_sel), ctx)                          # (H*BL, D)
        wm = g(womix)                                         # (H*D, D)
        out = None
        for hh in range(N_HEADS):
            t = _dot(gsel[hh * bl:(hh + 1) * bl],
                     wm[hh * D_MODEL:(hh + 1) * D_MODEL])
            out = t if out is None else out + t
    return out + g(pfx + "bo")


def _mha_cross(x, mem, g, blq, blk):
    q_rep = _dot(g("rep_dec"), x)                             # (H*BLq, D)
    qf = _dot(q_rep, g("dec_cr_wq")) + g("dec_cr_bq")
    m_rep = _dot(g("rep_enc1"), mem)                          # (H*BLk, D)
    kvf = _dot(m_rep, g("dec_cr_wkv")) + g("dec_cr_bkv")      # (H*BLk, 2D)
    hmk = g("hmask_enc1")
    k = kvf[:, 0:D_MODEL] * hmk
    v = kvf[:, D_MODEL:2 * D_MODEL] * hmk
    s = jax.lax.dot_general(qf, k, (((1,), (1,)), ((), ())),
                            preferred_element_type=jnp.float32)
    p = _softmax_rows(s * ATT_SCALE + g("mask_cross"))
    ctx = _dot(p, v)                                          # (H*BLq, D)
    merged = (ctx[0:blq] + ctx[blq:2 * blq]
              + ctx[2 * blq:3 * blq] + ctx[3 * blq:4 * blq])
    return _dot(merged, g("dec_cr_wo")) + g("dec_cr_bo")


def _ffn(x, g, w1, b1, w2, b2):
    # TODO(synk): PyTorch F.gelu is erf-exact; tanh-approx used for guaranteed
    # Mosaic lowering (difference ~1e-3).
    h = jax.nn.gelu(_dot(x, g(w1)) + g(b1), approximate=True)
    return _dot(h, g(w2)) + g(b2)


def _encoder_layer(x, g, pfx, bl, rep, hmask, mask):
    a = _mha_self(x, g, pfx, bl, rep, hmask, mask)
    x = _ln(x + a, g(pfx + "ln1_g"), g(pfx + "ln1_b"))
    y = _ffn(x, g, pfx + "ff1_w", pfx + "ff1_b", pfx + "ff2_w", pfx + "ff2_b")
    return _ln(x + y, g(pfx + "ln2_g"), g(pfx + "ln2_b"))


def _distil(x, g, blo):
    """ConvLayer: circular Conv1d(k=3) -> BatchNorm (train stats) -> ELU ->
    MaxPool(3,2,1), all on the stacked (B*L, D) tile."""
    xm1 = _dot(g("conv_sm1"), x)                              # per-batch t-1
    xp1 = _dot(g("conv_sp1"), x)                              # per-batch t+1
    w = g("conv_w")                                           # (3D, D) tap-major
    y = (_dot(xm1, w[0:D_MODEL]) + _dot(x, w[D_MODEL:2 * D_MODEL])
         + _dot(xp1, w[2 * D_MODEL:3 * D_MODEL]) + g("conv_b"))
    # BatchNorm1d, training-mode batch statistics over (B, L) per channel.
    mean = jnp.mean(y, axis=0, keepdims=True)
    d = y - mean
    var = jnp.mean(d * d, axis=0, keepdims=True)
    z = d * jax.lax.rsqrt(var + BN_EPS) * g("conv_bn_g") + g("conv_bn_b")
    # TODO(synk): jnp.expm1 would be more precise near 0; exp(z)-1 kept as in
    # the previously compiled kernel.
    z = jnp.where(z > 0, z, jnp.exp(z) - 1.0)                 # ELU(alpha=1)
    p3 = _dot(g("pool_sel"), z)                               # (3*B*Lo, D)
    return jnp.maximum(jnp.maximum(p3[0:blo], p3[blo:2 * blo]),
                       p3[2 * blo:3 * blo])


def _decoder_layer(y, mem, g):
    bl = B * L_DEC
    a = _mha_self(y, g, "dec_sa_", bl, "rep_dec", "hmask_dec", "mask_dec",
                  mix_sel="mix_sel", womix="dec_sa_womix")
    y = _ln(y + a, g("dec_ln1_g"), g("dec_ln1_b"))
    a = _mha_cross(y, mem, g, bl, B * L_ENC1)
    y = _ln(y + a, g("dec_ln2_g"), g("dec_ln2_b"))
    z = _ffn(y, g, "dec_ff1_w", "dec_ff1_b", "dec_ff2_w", "dec_ff2_b")
    return _ln(y + z, g("dec_ln3_g"), g("dec_ln3_b"))


# ------------------------------ fused kernel body ---------------------------
def _informer_kernel(layout, slab_ref, enc_unf_ref, enc_add_ref,
                     dec_unf_ref, dec_add_ref, out_ref):
    def g(name):
        r0, nr, nc = layout[name]
        return slab_ref[r0:r0 + nr, 0:nc]

    ble0 = B * L_ENC
    ble1 = B * L_ENC1

    # ---- encoder ----
    x = _dot(enc_unf_ref[...], g("enc_tok_w")) + g("enc_tok_b") + enc_add_ref[...]
    x = _encoder_layer(x, g, "enc0_", ble0, "rep_enc0", "hmask_enc0", "mask_enc0")
    x = _distil(x, g, ble1)
    x = _encoder_layer(x, g, "enc1_", ble1, "rep_enc1", "hmask_enc1", "mask_enc1")
    x = _ln(x, g("enc_norm_g"), g("enc_norm_b"))

    # ---- decoder ----
    y = _dot(dec_unf_ref[...], g("dec_tok_w")) + g("dec_tok_b") + dec_add_ref[...]
    y = _decoder_layer(y, x, g)
    y = _ln(y, g("dec_norm_g"), g("dec_norm_b"))

    # ---- projection (single merged store) ----
    out_ref[...] = (_dot(y, g("proj_w")) + g("proj_b")).astype(out_ref.dtype)


# ---------------------------------- wrapper ----------------------------------
def make_informer_forward(params):
    slab, layout = _pack_params(params)
    tables = params["emb_tables"]
    kern = functools.partial(_informer_kernel, layout)

    def _emb_add(x_mark, length):
        # Fixed sinusoid temporal tables (embed='fixed', freq='h') + positional
        # embedding.  The tiny gathers stay in XLA; their sum is added in-kernel.
        m = x_mark.astype(jnp.int32)
        t = (jnp.take(tables["month"], m[..., 0], axis=0)
             + jnp.take(tables["day"], m[..., 1], axis=0)
             + jnp.take(tables["weekday"], m[..., 2], axis=0)
             + jnp.take(tables["hour"], m[..., 3], axis=0))
        t = t + tables["pe"][:length][None, :, :]
        return t.reshape(-1, D_MODEL)

    def _unfold(x):
        # Circular Conv1d(k=3) unfold done on the host: [x[t-1], x[t], x[t+1]].
        u = jnp.concatenate([jnp.roll(x, 1, axis=1), x, jnp.roll(x, -1, axis=1)],
                            axis=-1)
        return u.reshape(-1, u.shape[-1])

    @jax.jit
    def forward(x_enc, x_mark_enc, x_dec, x_mark_dec):
        enc_unf = _unfold(x_enc.astype(jnp.float32))
        dec_unf = _unfold(x_dec.astype(jnp.float32))
        enc_add = _emb_add(x_mark_enc, L_ENC)
        dec_add = _emb_add(x_mark_dec, L_DEC)
        out = pl.pallas_call(
            kern,
            out_shape=jax.ShapeDtypeStruct((B * L_DEC, C_OUT), jnp.float32),
        )(slab, enc_unf, enc_add, dec_unf, dec_add)
        return out.reshape(B, L_DEC, C_OUT)[:, -OUT_LEN:, :]

    return forward


# ------------------------------ parameter init ------------------------------
def sinusoid_table(n_pos, d_model):
    pos = np.arange(n_pos, dtype=np.float32)[:, None]
    div = np.exp(np.arange(0, d_model, 2, dtype=np.float32)
                 * -(math.log(10000.0) / d_model))
    w = np.zeros((n_pos, d_model), np.float32)
    w[:, 0::2] = np.sin(pos * div)
    w[:, 1::2] = np.cos(pos * div)
    return jnp.asarray(w)


def key_iter(seed):
    key = jax.random.PRNGKey(seed)
    while True:
        key, sub = jax.random.split(key)
        yield sub


def init_params(seed=0):
    kit = key_iter(seed)

    def unif(shape, fan_in):
        s = 1.0 / math.sqrt(fan_in)
        return jax.random.uniform(next(kit), shape, jnp.float32, -s, s)

    def lin(din, dout):
        return unif((din, dout), din), unif((1, dout), din)

    ones = lambda: jnp.ones((1, D_MODEL), jnp.float32)
    zeros = lambda: jnp.zeros((1, D_MODEL), jnp.float32)

    w = {}

    def add_attn_self(pfx):
        wq, bq = lin(D_MODEL, D_MODEL)
        wk, bk = lin(D_MODEL, D_MODEL)
        wv, bv = lin(D_MODEL, D_MODEL)
        wo, bo = lin(D_MODEL, D_MODEL)
        w[pfx + "wqkv"] = jnp.concatenate([wq, wk, wv], axis=1)
        w[pfx + "bqkv"] = jnp.concatenate([bq, bk, bv], axis=1)
        w[pfx + "wo"] = wo
        w[pfx + "bo"] = bo

    def add_enc_layer(pfx):
        add_attn_self(pfx)
        w[pfx + "ln1_g"], w[pfx + "ln1_b"] = ones(), zeros()
        w[pfx + "ff1_w"], w[pfx + "ff1_b"] = lin(D_MODEL, D_FF)
        w[pfx + "ff2_w"], w[pfx + "ff2_b"] = lin(D_FF, D_MODEL)
        w[pfx + "ln2_g"], w[pfx + "ln2_b"] = ones(), zeros()

    # TokenEmbedding (Conv1d k=3 circular), taps ordered [t-1, t, t+1]
    w["enc_tok_w"] = unif((3 * ENC_IN, D_MODEL), 3 * ENC_IN)
    w["enc_tok_b"] = unif((1, D_MODEL), 3 * ENC_IN)
    w["dec_tok_w"] = unif((3 * DEC_IN, D_MODEL), 3 * DEC_IN)
    w["dec_tok_b"] = unif((1, D_MODEL), 3 * DEC_IN)

    add_enc_layer("enc0_")
    add_enc_layer("enc1_")
    w["conv_w"] = unif((3 * D_MODEL, D_MODEL), 3 * D_MODEL)
    w["conv_b"] = unif((1, D_MODEL), 3 * D_MODEL)
    w["conv_bn_g"], w["conv_bn_b"] = ones(), zeros()
    w["enc_norm_g"], w["enc_norm_b"] = ones(), zeros()

    add_attn_self("dec_sa_")
    w["dec_ln1_g"], w["dec_ln1_b"] = ones(), zeros()
    cq, cbq = lin(D_MODEL, D_MODEL)
    ck, cbk = lin(D_MODEL, D_MODEL)
    cv, cbv = lin(D_MODEL, D_MODEL)
    co, cbo = lin(D_MODEL, D_MODEL)
    w["dec_cr_wq"], w["dec_cr_bq"] = cq, cbq
    w["dec_cr_wkv"] = jnp.concatenate([ck, cv], axis=1)
    w["dec_cr_bkv"] = jnp.concatenate([cbk, cbv], axis=1)
    w["dec_cr_wo"], w["dec_cr_bo"] = co, cbo
    w["dec_ln2_g"], w["dec_ln2_b"] = ones(), zeros()
    w["dec_ff1_w"], w["dec_ff1_b"] = lin(D_MODEL, DEC_FF)
    w["dec_ff2_w"], w["dec_ff2_b"] = lin(DEC_FF, D_MODEL)
    w["dec_ln3_g"], w["dec_ln3_b"] = ones(), zeros()
    w["dec_norm_g"], w["dec_norm_b"] = ones(), zeros()
    w["proj_w"], w["proj_b"] = lin(D_MODEL, C_OUT)

    emb = dict(pe=sinusoid_table(max(L_ENC, L_DEC), D_MODEL),
               month=sinusoid_table(13, D_MODEL),
               day=sinusoid_table(32, D_MODEL),
               weekday=sinusoid_table(7, D_MODEL),
               hour=sinusoid_table(24, D_MODEL))
    return dict(weights=w, emb_tables=emb)


# ---------------------------------- main -------------------------------------
if __name__ == "__main__":
    params = init_params(0)
    fwd = make_informer_forward(params)

    k = jax.random.PRNGKey(0)
    k1, k2, k3, k4, k5, k6, k7, k8, k9, k10 = jax.random.split(k, 10)
    x_enc = jax.random.normal(k1, (B, L_ENC, ENC_IN), jnp.float32)
    x_dec = jax.random.normal(k2, (B, L_DEC, DEC_IN), jnp.float32)

    def make_marks(ka, kb, kc, kd, L):
        month = jax.random.randint(ka, (B, L, 1), 0, 13)
        day = jax.random.randint(kb, (B, L, 1), 0, 32)
        weekday = jax.random.randint(kc, (B, L, 1), 0, 7)
        hour = jax.random.randint(kd, (B, L, 1), 0, 24)
        return jnp.concatenate([month, day, weekday, hour],
                               axis=-1).astype(jnp.int32)

    x_mark_enc = make_marks(k3, k4, k5, k6, L_ENC)
    x_mark_dec = make_marks(k7, k8, k9, k10, L_DEC)

    out = fwd(x_enc, x_mark_enc, x_dec, x_mark_dec)
    out = jax.block_until_ready(out)

    assert out.shape == (B, OUT_LEN, C_OUT), out.shape
    assert bool(jnp.all(jnp.isfinite(out)))
    print("KERNEL_OK")
</pallas_src>

<mosaic_0001>
module attributes {stable_mosaic.version = 11 : i64} {
  func.func @_informer_kernel(%arg0: memref<2376x128xf32, #tpu.memory_space<vmem>>, %arg1: memref<32x12xf32, #tpu.memory_space<vmem>>, %arg2: memref<32x32xf32, #tpu.memory_space<vmem>>, %arg3: memref<24x12xf32, #tpu.memory_space<vmem>>, %arg4: memref<24x32xf32, #tpu.memory_space<vmem>>, %arg5: memref<24x4xf32, #tpu.memory_space<vmem>>) attributes {dimension_semantics = [], scalar_prefetch = 0 : i64, scratch_operands = 0 : i64, tpu.core_type = #tpu.core_type<tc>} {
    %c0 = arith.constant 0 : index
    %c0_0 = arith.constant 0 : index
    %0 = vector.load %arg1[%c0, %c0_0] : memref<32x12xf32, #tpu.memory_space<vmem>>, vector<32x12xf32>
    %c0_1 = arith.constant 0 : index
    %c0_2 = arith.constant 0 : index
    %1 = vector.load %arg0[%c0_1, %c0_2] : memref<2376x128xf32, #tpu.memory_space<vmem>>, vector<12x32xf32>
    %cst = arith.constant dense<0.000000e+00> : vector<32x32xf32>
    %2 = tpu.matmul %0, %1, %cst {dimension_numbers = #tpu.dot_dimension_numbers<[1], [0], [0], [1], [0, 0, 1, 1], [], []>} : vector<32x12xf32>, vector<12x32xf32>, vector<32x32xf32> -> vector<32x32xf32>
    %c16 = arith.constant 16 : index
    %c0_3 = arith.constant 0 : index
    %3 = vector.load %arg0[%c16, %c0_3] : memref<2376x128xf32, #tpu.memory_space<vmem>>, vector<1x32xf32>
    %4 = vector.broadcast %3 : vector<1x32xf32> to vector<32x32xf32>
    %5 = arith.addf %2, %4 : vector<32x32xf32>
    %c0_4 = arith.constant 0 : index
    %c0_5 = arith.constant 0 : index
    %6 = vector.load %arg2[%c0_4, %c0_5] : memref<32x32xf32, #tpu.memory_space<vmem>>, vector<32x32xf32>
    %7 = arith.addf %5, %6 : vector<32x32xf32>
    %c1592 = arith.constant 1592 : index
    %c0_6 = arith.constant 0 : index
    %8 = vector.load %arg0[%c1592, %c0_6] : memref<2376x128xf32, #tpu.memory_space<vmem>>, vector<128x32xf32>
    %cst_7 = arith.constant dense<0.000000e+00> : vector<128x32xf32>
    %9 = tpu.matmul %8, %7, %cst_7 {dimension_numbers = #tpu.dot_dimension_numbers<[1], [0], [0], [1], [0, 0, 1, 1], [], []>} : vector<128x32xf32>, vector<32x32xf32>, vector<128x32xf32> -> vector<128x32xf32>
    %c48 = arith.constant 48 : index
    %c0_8 = arith.constant 0 : index
    %10 = vector.load %arg0[%c48, %c0_8] : memref<2376x128xf32, #tpu.memory_space<vmem>>, vector<32x96xf32>
    %cst_9 = arith.constant dense<0.000000e+00> : vector<128x96xf32>
    %11 = tpu.matmul %9, %10, %cst_9 {dimension_numbers = #tpu.dot_dimension_numbers<[1], [0], [0], [1], [0, 0, 1, 1], [], []>} : vector<128x32xf32>, vector<32x96xf32>, vector<128x96xf32> -> vector<128x96xf32>
    %c80 = arith.constant 80 : index
    %c0_10 = arith.constant 0 : index
    %12 = vector.load %arg0[%c80, %c0_10] : memref<2376x128xf32, #tpu.memory_space<vmem>>, vector<1x96xf32>
    %13 = vector.broadcast %12 : vector<1x96xf32> to vector<128x96xf32>
    %14 = arith.addf %11, %13 : vector<128x96xf32>
    %c1880 = arith.constant 1880 : index
    %c0_11 = arith.constant 0 : index
    %15 = vector.load %arg0[%c1880, %c0_11] : memref<2376x128xf32, #tpu.memory_space<vmem>>, vector<128x32xf32>
    %16 = vector.extract_strided_slice %14 {offsets = [0, 0], sizes = [128, 32], strides = [1, 1]} : vector<128x96xf32> to vector<128x32xf32>
    %17 = vector.extract_strided_slice %14 {offsets = [0, 32], sizes = [128, 32], strides = [1, 1]} : vector<128x96xf32> to vector<128x32xf32>
    %18 = arith.mulf %17, %15 : vector<128x32xf32>
    %19 = vector.extract_strided_slice %14 {offsets = [0, 64], sizes = [128, 32], strides = [1, 1]} : vector<128x96xf32> to vector<128x32xf32>
    %20 = arith.mulf %19, %15 : vector<128x32xf32>
    %cst_12 = arith.constant dense<0.000000e+00> : vector<128x128xf32>
    %21 = tpu.matmul %16, %18, %cst_12 {dimension_numbers = #tpu.dot_dimension_numbers<[1], [1], [0], [0], [0, 0, 1, 0], [], []>} : vector<128x32xf32>, vector<128x32xf32>, vector<128x128xf32> -> vector<128x128xf32>
    %cst_13 = arith.constant 0.353553385 : f32
    %22 = vector.broadcast %cst_13 : f32 to vector<128x128xf32>
    %23 = arith.mulf %21, %22 : vector<128x128xf32>
    %c1208 = arith.constant 1208 : index
    %c0_14 = arith.constant 0 : index
    %24 = vector.load %arg0[%c1208, %c0_14] : memref<2376x128xf32, #tpu.memory_space<vmem>>, vector<128x128xf32>
    %25 = arith.addf %23, %24 : vector<128x128xf32>
    %cst_15 = arith.constant dense<0xFF800000> : vector<128xf32>
    %26 = vector.multi_reduction <maximumf>, %25, %cst_15 [1] : vector<128x128xf32> to vector<128xf32>
    %27 = vector.shape_cast %26 : vector<128xf32> to vector<128x1xf32>
    %28 = vector.broadcast %27 : vector<128x1xf32> to vector<128x128xf32>
    %29 = arith.subf %25, %28 : vector<128x128xf32>
    %30 = math.exp %29 : vector<128x128xf32>
    %cst_16 = arith.constant dense<0.000000e+00> : vector<128xf32>
    %31 = vector.multi_reduction <add>, %30, %cst_16 [1] : vector<128x128xf32> to vector<128xf32>
    %32 = vector.shape_cast %31 : vector<128xf32> to vector<128x1xf32>
    %33 = tpu.reciprocal %32 {approx = true} : vector<128x1xf32> -> vector<128x1xf32>
    %34 = vector.broadcast %33 : vector<128x1xf32> to vector<128x128xf32>
    %35 = arith.mulf %30, %34 : vector<128x128xf32>
    %cst_17 = arith.constant dense<0.000000e+00> : vector<128x32xf32>
    %36 = tpu.matmul %35, %20, %cst_17 {dimension_numbers = #tpu.dot_dimension_numbers<[1], [0], [0], [1], [0, 0, 1, 1], [], []>} : vector<128x128xf32>, vector<128x32xf32>, vector<128x32xf32> -> vector<128x32xf32>
    %37 = vector.extract_strided_slice %36 {offsets = [0, 0], sizes = [32, 32], strides = [1, 1]} : vector<128x32xf32> to vector<32x32xf32>
    %38 = vector.extract_strided_slice %36 {offsets = [32, 0], sizes = [32, 32], strides = [1, 1]} : vector<128x32xf32> to vector<32x32xf32>
    %39 = arith.addf %37, %38 : vector<32x32xf32>
    %40 = vector.extract_strided_slice %36 {offsets = [64, 0], sizes = [32, 32], strides = [1, 1]} : vector<128x32xf32> to vector<32x32xf32>
    %41 = arith.addf %39, %40 : vector<32x32xf32>
    %42 = vector.extract_strided_slice %36 {offsets = [96, 0], sizes = [32, 32], strides = [1, 1]} : vector<128x32xf32> to vector<32x32xf32>
    %43 = arith.addf %41, %42 : vector<32x32xf32>
    %c88 = arith.constant 88 : index
    %c0_18 = arith.constant 0 : index
    %44 = vector.load %arg0[%c88, %c0_18] : memref<2376x128xf32, #tpu.memory_space<vmem>>, vector<32x32xf32>
    %cst_19 = arith.constant dense<0.000000e+00> : vector<32x32xf32>
    %45 = tpu.matmul %43, %44, %cst_19 {dimension_numbers = #tpu.dot_dimension_numbers<[1], [0], [0], [1], [0, 0, 1, 1], [], []>} : vector<32x32xf32>, vector<32x32xf32>, vector<32x32xf32> -> vector<32x32xf32>
    %c120 = arith.constant 120 : index
    %c0_20 = arith.constant 0 : index
    %46 = vector.load %arg0[%c120, %c0_20] : memref<2376x128xf32, #tpu.memory_space<vmem>>, vector<1x32xf32>
    %47 = vector.broadcast %46 : vector<1x32xf32> to vector<32x32xf32>
    %48 = arith.addf %45, %47 : vector<32x32xf32>
    %49 = arith.addf %7, %48 : vector<32x32xf32>
    %c128 = arith.constant 128 : index
    %c0_21 = arith.constant 0 : index
    %50 = vector.load %arg0[%c128, %c0_21] : memref<2376x128xf32, #tpu.memory_space<vmem>>, vector<1x32xf32>
    %c136 = arith.constant 136 : index
    %c0_22 = arith.constant 0 : index
    %51 = vector.load %arg0[%c136, %c0_22] : memref<2376x128xf32, #tpu.memory_space<vmem>>, vector<1x32xf32>
    %cst_23 = arith.constant dense<0.000000e+00> : vector<32xf32>
    %52 = vector.multi_reduction <add>, %49, %cst_23 [1] : vector<32x32xf32> to vector<32xf32>
    %53 = vector.shape_cast %52 : vector<32xf32> to vector<32x1xf32>
    %cst_24 = arith.constant 3.200000e+01 : f32
    %54 = vector.broadcast %cst_24 : f32 to vector<32x1xf32>
    %55 = arith.divf %53, %54 : vector<32x1xf32>
    %56 = vector.broadcast %55 : vector<32x1xf32> to vector<32x32xf32>
    %57 = arith.subf %49, %56 : vector<32x32xf32>
    %58 = arith.mulf %57, %57 : vector<32x32xf32>
    %cst_25 = arith.constant dense<0.000000e+00> : vector<32xf32>
    %59 = vector.multi_reduction <add>, %58, %cst_25 [1] : vector<32x32xf32> to vector<32xf32>
    %60 = vector.shape_cast %59 : vector<32xf32> to vector<32x1xf32>
    %cst_26 = arith.constant 3.200000e+01 : f32
    %61 = vector.broadcast %cst_26 : f32 to vector<32x1xf32>
    %62 = arith.divf %60, %61 : vector<32x1xf32>
    %cst_27 = arith.constant 9.99999974E-6 : f32
    %63 = vector.broadcast %cst_27 : f32 to vector<32x1xf32>
    %64 = arith.addf %62, %63 : vector<32x1xf32>
    %65 = math.rsqrt %64 : vector<32x1xf32>
    %66 = vector.broadcast %65 : vector<32x1xf32> to vector<32x32xf32>
    %67 = arith.mulf %57, %66 : vector<32x32xf32>
    %68 = vector.broadcast %50 : vector<1x32xf32> to vector<32x32xf32>
    %69 = arith.mulf %67, %68 : vector<32x32xf32>
    %70 = vector.broadcast %51 : vector<1x32xf32> to vector<32x32xf32>
    %71 = arith.addf %69, %70 : vector<32x32xf32>
    %c144 = arith.constant 144 : index
    %c0_28 = arith.constant 0 : index
    %72 = vector.load %arg0[%c144, %c0_28] : memref<2376x128xf32, #tpu.memory_space<vmem>>, vector<32x64xf32>
    %cst_29 = arith.constant dense<0.000000e+00> : vector<32x64xf32>
    %73 = tpu.matmul %71, %72, %cst_29 {dimension_numbers = #tpu.dot_dimension_numbers<[1], [0], [0], [1], [0, 0, 1, 1], [], []>} : vector<32x32xf32>, vector<32x64xf32>, vector<32x64xf32> -> vector<32x64xf32>
    %c176 = arith.constant 176 : index
    %c0_30 = arith.constant 0 : index
    %74 = vector.load %arg0[%c176, %c0_30] : memref<2376x128xf32, #tpu.memory_space<vmem>>, vector<1x64xf32>
    %75 = vector.broadcast %74 : vector<1x64xf32> to vector<32x64xf32>
    %76 = arith.addf %73, %75 : vector<32x64xf32>
    %77 = arith.mulf %76, %76 : vector<32x64xf32>
    %78 = arith.mulf %76, %77 : vector<32x64xf32>
    %cst_31 = arith.constant 4.471500e-02 : f32
    %79 = vector.broadcast %cst_31 : f32 to vector<32x64xf32>
    %80 = arith.mulf %79, %78 : vector<32x64xf32>
    %81 = arith.addf %76, %80 : vector<32x64xf32>
    %cst_32 = arith.constant 0.797884583 : f32
    %82 = vector.broadcast %cst_32 : f32 to vector<32x64xf32>
    %83 = arith.mulf %82, %81 : vector<32x64xf32>
    %84 = math.tanh %83 : vector<32x64xf32>
    %cst_33 = arith.constant 1.000000e+00 : f32
    %85 = vector.broadcast %cst_33 : f32 to vector<32x64xf32>
    %86 = arith.addf %85, %84 : vector<32x64xf32>
    %cst_34 = arith.constant 5.000000e-01 : f32
    %87 = vector.broadcast %cst_34 : f32 to vector<32x64xf32>
    %88 = arith.mulf %87, %86 : vector<32x64xf32>
    %89 = arith.mulf %76, %88 : vector<32x64xf32>
    %c184 = arith.constant 184 : index
    %c0_35 = arith.constant 0 : index
    %90 = vector.load %arg0[%c184, %c0_35] : memref<2376x128xf32, #tpu.memory_space<vmem>>, vector<64x32xf32>
    %cst_36 = arith.constant dense<0.000000e+00> : vector<32x32xf32>
    %91 = tpu.matmul %89, %90, %cst_36 {dimension_numbers = #tpu.dot_dimension_numbers<[1], [0], [0], [1], [0, 0, 1, 1], [], []>} : vector<32x64xf32>, vector<64x32xf32>, vector<32x32xf32> -> vector<32x32xf32>
    %c248 = arith.constant 248 : index
    %c0_37 = arith.constant 0 : index
    %92 = vector.load %arg0[%c248, %c0_37] : memref<2376x128xf32, #tpu.memory_space<vmem>>, vector<1x32xf32>
    %93 = vector.broadcast %92 : vector<1x32xf32> to vector<32x32xf32>
    %94 = arith.addf %91, %93 : vector<32x32xf32>
    %95 = arith.addf %71, %94 : vector<32x32xf32>
    %c256 = arith.constant 256 : index
    %c0_38 = arith.constant 0 : index
    %96 = vector.load %arg0[%c256, %c0_38] : memref<2376x128xf32, #tpu.memory_space<vmem>>, vector<1x32xf32>
    %c264 = arith.constant 264 : index
    %c0_39 = arith.constant 0 : index
    %97 = vector.load %arg0[%c264, %c0_39] : memref<2376x128xf32, #tpu.memory_space<vmem>>, vector<1x32xf32>
    %cst_40 = arith.constant dense<0.000000e+00> : vector<32xf32>
    %98 = vector.multi_reduction <add>, %95, %cst_40 [1] : vector<32x32xf32> to vector<32xf32>
    %99 = vector.shape_cast %98 : vector<32xf32> to vector<32x1xf32>
    %cst_41 = arith.constant 3.200000e+01 : f32
    %100 = vector.broadcast %cst_41 : f32 to vector<32x1xf32>
    %101 = arith.divf %99, %100 : vector<32x1xf32>
    %102 = vector.broadcast %101 : vector<32x1xf32> to vector<32x32xf32>
    %103 = arith.subf %95, %102 : vector<32x32xf32>
    %104 = arith.mulf %103, %103 : vector<32x32xf32>
    %cst_42 = arith.constant dense<0.000000e+00> : vector<32xf32>
    %105 = vector.multi_reduction <add>, %104, %cst_42 [1] : vector<32x32xf32> to vector<32xf32>
    %106 = vector.shape_cast %105 : vector<32xf32> to vector<32x1xf32>
    %cst_43 = arith.constant 3.200000e+01 : f32
    %107 = vector.broadcast %cst_43 : f32 to vector<32x1xf32>
    %108 = arith.divf %106, %107 : vector<32x1xf32>
    %cst_44 = arith.constant 9.99999974E-6 : f32
    %109 = vector.broadcast %cst_44 : f32 to vector<32x1xf32>
    %110 = arith.addf %108, %109 : vector<32x1xf32>
    %111 = math.rsqrt %110 : vector<32x1xf32>
    %112 = vector.broadcast %111 : vector<32x1xf32> to vector<32x32xf32>
    %113 = arith.mulf %103, %112 : vector<32x32xf32>
    %114 = vector.broadcast %96 : vector<1x32xf32> to vector<32x32xf32>
    %115 = arith.mulf %113, %114 : vector<32x32xf32>
    %116 = vector.broadcast %97 : vector<1x32xf32> to vector<32x32xf32>
    %117 = arith.addf %115, %116 : vector<32x32xf32>
    %c2168 = arith.constant 2168 : index
    %c0_45 = arith.constant 0 : index
    %118 = vector.load %arg0[%c2168, %c0_45] : memref<2376x128xf32, #tpu.memory_space<vmem>>, vector<32x32xf32>
    %cst_46 = arith.constant dense<0.000000e+00> : vector<32x32xf32>
    %119 = tpu.matmul %118, %117, %cst_46 {dimension_numbers = #tpu.dot_dimension_numbers<[1], [0], [0], [1], [0, 0, 1, 1], [], []>} : vector<32x32xf32>, vector<32x32xf32>, vector<32x32xf32> -> vector<32x32xf32>
    %c2200 = arith.constant 2200 : index
    %c0_47 = arith.constant 0 : index
    %120 = vector.load %arg0[%c2200, %c0_47] : memref<2376x128xf32, #tpu.memory_space<vmem>>, vector<32x32xf32>
    %cst_48 = arith.constant dense<0.000000e+00> : vector<32x32xf32>
    %121 = tpu.matmul %120, %117, %cst_48 {dimension_numbers = #tpu.dot_dimension_numbers<[1], [0], [0], [1], [0, 0, 1, 1], [], []>} : vector<32x32xf32>, vector<32x32xf32>, vector<32x32xf32> -> vector<32x32xf32>
    %c496 = arith.constant 496 : index
    %c0_49 = arith.constant 0 : index
    %122 = vector.load %arg0[%c496, %c0_49] : memref<2376x128xf32, #tpu.memory_space<vmem>>, vector<96x32xf32>
    %123 = vector.extract_strided_slice %122 {offsets = [0, 0], sizes = [32, 32], strides = [1, 1]} : vector<96x32xf32> to vector<32x32xf32>
    %cst_50 = arith.constant dense<0.000000e+00> : vector<32x32xf32>
    %124 = tpu.matmul %119, %123, %cst_50 {dimension_numbers = #tpu.dot_dimension_numbers<[1], [0], [0], [1], [0, 0, 1, 1], [], []>} : vector<32x32xf32>, vector<32x32xf32>, vector<32x32xf32> -> vector<32x32xf32>
    %125 = vector.extract_strided_slice %122 {offsets = [32, 0], sizes = [32, 32], strides = [1, 1]} : vector<96x32xf32> to vector<32x32xf32>
    %cst_51 = arith.constant dense<0.000000e+00> : vector<32x32xf32>
    %126 = tpu.matmul %117, %125, %cst_51 {dimension_numbers = #tpu.dot_dimension_numbers<[1], [0], [0], [1], [0, 0, 1, 1], [], []>} : vector<32x32xf32>, vector<32x32xf32>, vector<32x32xf32> -> vector<32x32xf32>
    %127 = arith.addf %124, %126 : vector<32x32xf32>
    %128 = vector.extract_strided_slice %122 {offsets = [64, 0], sizes = [32, 32], strides = [1, 1]} : vector<96x32xf32> to vector<32x32xf32>
    %cst_52 = arith.constant dense<0.000000e+00> : vector<32x32xf32>
    %129 = tpu.matmul %121, %128, %cst_52 {dimension_numbers = #tpu.dot_dimension_numbers<[1], [0], [0], [1], [0, 0, 1, 1], [], []>} : vector<32x32xf32>, vector<32x32xf32>, vector<32x32xf32> -> vector<32x32xf32>
    %130 = arith.addf %127, %129 : vector<32x32xf32>
    %c592 = arith.constant 592 : index
    %c0_53 = arith.constant 0 : index
    %131 = vector.load %arg0[%c592, %c0_53] : memref<2376x128xf32, #tpu.memory_space<vmem>>, vector<1x32xf32>
    %132 = vector.broadcast %131 : vector<1x32xf32> to vector<32x32xf32>
    %133 = arith.addf %130, %132 : vector<32x32xf32>
    %cst_54 = arith.constant dense<0.000000e+00> : vector<32xf32>
    %134 = vector.multi_reduction <add>, %133, %cst_54 [0] : vector<32x32xf32> to vector<32xf32>
    %135 = vector.shape_cast %134 : vector<32xf32> to vector<1x32xf32>
    %cst_55 = arith.constant 3.200000e+01 : f32
    %136 = vector.broadcast %cst_55 : f32 to vector<1x32xf32>
    %137 = arith.divf %135, %136 : vector<1x32xf32>
    %138 = vector.broadcast %137 : vector<1x32xf32> to vector<32x32xf32>
    %139 = arith.subf %133, %138 : vector<32x32xf32>
    %140 = arith.mulf %139, %139 : vector<32x32xf32>
    %cst_56 = arith.constant dense<0.000000e+00> : vector<32xf32>
    %141 = vector.multi_reduction <add>, %140, %cst_56 [0] : vector<32x32xf32> to vector<32xf32>
    %142 = vector.shape_cast %141 : vector<32xf32> to vector<1x32xf32>
    %cst_57 = arith.constant 3.200000e+01 : f32
    %143 = vector.broadcast %cst_57 : f32 to vector<1x32xf32>
    %144 = arith.divf %142, %143 : vector<1x32xf32>
    %cst_58 = arith.constant 9.99999974E-6 : f32
    %145 = vector.broadcast %cst_58 : f32 to vector<1x32xf32>
    %146 = arith.addf %144, %145 : vector<1x32xf32>
    %147 = math.rsqrt %146 : vector<1x32xf32>
    %148 = vector.broadcast %147 : vector<1x32xf32> to vector<32x32xf32>
    %149 = arith.mulf %139, %148 : vector<32x32xf32>
    %c600 = arith.constant 600 : index
    %c0_59 = arith.constant 0 : index
    %150 = vector.load %arg0[%c600, %c0_59] : memref<2376x128xf32, #tpu.memory_space<vmem>>, vector<1x32xf32>
    %151 = vector.broadcast %150 : vector<1x32xf32> to vector<32x32xf32>
    %152 = arith.mulf %149, %151 : vector<32x32xf32>
    %c608 = arith.constant 608 : index
    %c0_60 = arith.constant 0 : index
    %153 = vector.load %arg0[%c608, %c0_60] : memref<2376x128xf32, #tpu.memory_space<vmem>>, vector<1x32xf32>
    %154 = vector.broadcast %153 : vector<1x32xf32> to vector<32x32xf32>
    %155 = arith.addf %152, %154 : vector<32x32xf32>
    %cst_61 = arith.constant 0.000000e+00 : f32
    %156 = vector.broadcast %cst_61 : f32 to vector<32x32xf32>
    %157 = arith.cmpf ogt, %155, %156 : vector<32x32xf32>
    %158 = math.exp %155 : vector<32x32xf32>
    %cst_62 = arith.constant 1.000000e+00 : f32
    %159 = vector.broadcast %cst_62 : f32 to vector<32x32xf32>
    %160 = arith.subf %158, %159 : vector<32x32xf32>
    %161 = arith.select %157, %155, %160 : vector<32x32xi1>, vector<32x32xf32>
    %c2232 = arith.constant 2232 : index
    %c0_63 = arith.constant 0 : index
    %162 = vector.load %arg0[%c2232, %c0_63] : memref<2376x128xf32, #tpu.memory_space<vmem>>, vector<48x32xf32>
    %cst_64 = arith.constant dense<0.000000e+00> : vector<48x32xf32>
    %163 = tpu.matmul %162, %161, %cst_64 {dimension_numbers = #tpu.dot_dimension_numbers<[1], [0], [0], [1], [0, 0, 1, 1], [], []>} : vector<48x32xf32>, vector<32x32xf32>, vector<48x32xf32> -> vector<48x32xf32>
    %164 = vector.extract_strided_slice %163 {offsets = [0, 0], sizes = [16, 32], strides = [1, 1]} : vector<48x32xf32> to vector<16x32xf32>
    %165 = vector.extract_strided_slice %163 {offsets = [16, 0], sizes = [16, 32], strides = [1, 1]} : vector<48x32xf32> to vector<16x32xf32>
    %166 = arith.maximumf %164, %165 : vector<16x32xf32>
    %167 = vector.extract_strided_slice %163 {offsets = [32, 0], sizes = [16, 32], strides = [1, 1]} : vector<48x32xf32> to vector<16x32xf32>
    %168 = arith.maximumf %166, %167 : vector<16x32xf32>
    %c1720 = arith.constant 1720 : index
    %c0_65 = arith.constant 0 : index
    %169 = vector.load %arg0[%c1720, %c0_65] : memref<2376x128xf32, #tpu.memory_space<vmem>>, vector<64x16xf32>
    %cst_66 = arith.constant dense<0.000000e+00> : vector<64x32xf32>
    %170 = tpu.matmul %169, %168, %cst_66 {dimension_numbers = #tpu.dot_dimension_numbers<[1], [0], [0], [1], [0, 0, 1, 1], [], []>} : vector<64x16xf32>, vector<16x32xf32>, vector<64x32xf32> -> vector<64x32xf32>
    %c272 = arith.constant 272 : index
    %c0_67 = arith.constant 0 : index
    %171 = vector.load %arg0[%c272, %c0_67] : memref<2376x128xf32, #tpu.memory_space<vmem>>, vector<32x96xf32>
    %cst_68 = arith.constant dense<0.000000e+00> : vector<64x96xf32>
    %172 = tpu.matmul %170, %171, %cst_68 {dimension_numbers = #tpu.dot_dimension_numbers<[1], [0], [0], [1], [0, 0, 1, 1], [], []>} : vector<64x32xf32>, vector<32x96xf32>, vector<64x96xf32> -> vector<64x96xf32>
    %c304 = arith.constant 304 : index
    %c0_69 = arith.constant 0 : index
    %173 = vector.load %arg0[%c304, %c0_69] : memref<2376x128xf32, #tpu.memory_space<vmem>>, vector<1x96xf32>
    %174 = vector.broadcast %173 : vector<1x96xf32> to vector<64x96xf32>
    %175 = arith.addf %172, %174 : vector<64x96xf32>
    %c2008 = arith.constant 2008 : index
    %c0_70 = arith.constant 0 : index
    %176 = vector.load %arg0[%c2008, %c0_70] : memref<2376x128xf32, #tpu.memory_space<vmem>>, vector<64x32xf32>
    %177 = vector.extract_strided_slice %175 {offsets = [0, 0], sizes = [64, 32], strides = [1, 1]} : vector<64x96xf32> to vector<64x32xf32>
    %178 = vector.extract_strided_slice %175 {offsets = [0, 32], sizes = [64, 32], strides = [1, 1]} : vector<64x96xf32> to vector<64x32xf32>
    %179 = arith.mulf %178, %176 : vector<64x32xf32>
    %180 = vector.extract_strided_slice %175 {offsets = [0, 64], sizes = [64, 32], strides = [1, 1]} : vector<64x96xf32> to vector<64x32xf32>
    %181 = arith.mulf %180, %176 : vector<64x32xf32>
    %cst_71 = arith.constant dense<0.000000e+00> : vector<64x64xf32>
    %182 = tpu.matmul %177, %179, %cst_71 {dimension_numbers = #tpu.dot_dimension_numbers<[1], [1], [0], [0], [0, 0, 1, 0], [], []>} : vector<64x32xf32>, vector<64x32xf32>, vector<64x64xf32> -> vector<64x64xf32>
    %cst_72 = arith.constant 0.353553385 : f32
    %183 = vector.broadcast %cst_72 : f32 to vector<64x64xf32>
    %184 = arith.mulf %182, %183 : vector<64x64xf32>
    %c1336 = arith.constant 1336 : index
    %c0_73 = arith.constant 0 : index
    %185 = vector.load %arg0[%c1336, %c0_73] : memref<2376x128xf32, #tpu.memory_space<vmem>>, vector<64x64xf32>
    %186 = arith.addf %184, %185 : vector<64x64xf32>
    %cst_74 = arith.constant dense<0xFF800000> : vector<64xf32>
    %187 = vector.multi_reduction <maximumf>, %186, %cst_74 [1] : vector<64x64xf32> to vector<64xf32>
    %188 = vector.shape_cast %187 : vector<64xf32> to vector<64x1xf32>
    %189 = vector.broadcast %188 : vector<64x1xf32> to vector<64x64xf32>
    %190 = arith.subf %186, %189 : vector<64x64xf32>
    %191 = math.exp %190 : vector<64x64xf32>
    %cst_75 = arith.constant dense<0.000000e+00> : vector<64xf32>
    %192 = vector.multi_reduction <add>, %191, %cst_75 [1] : vector<64x64xf32> to vector<64xf32>
    %193 = vector.shape_cast %192 : vector<64xf32> to vector<64x1xf32>
    %194 = tpu.reciprocal %193 {approx = true} : vector<64x1xf32> -> vector<64x1xf32>
    %195 = vector.broadcast %194 : vector<64x1xf32> to vector<64x64xf32>
    %196 = arith.mulf %191, %195 : vector<64x64xf32>
    %cst_76 = arith.constant dense<0.000000e+00> : vector<64x32xf32>
    %197 = tpu.matmul %196, %181, %cst_76 {dimension_numbers = #tpu.dot_dimension_numbers<[1], [0], [0], [1], [0, 0, 1, 1], [], []>} : vector<64x64xf32>, vector<64x32xf32>, vector<64x32xf32> -> vector<64x32xf32>
    %198 = vector.extract_strided_slice %197 {offsets = [0, 0], sizes = [16, 32], strides = [1, 1]} : vector<64x32xf32> to vector<16x32xf32>
    %199 = vector.extract_strided_slice %197 {offsets = [16, 0], sizes = [16, 32], strides = [1, 1]} : vector<64x32xf32> to vector<16x32xf32>
    %200 = arith.addf %198, %199 : vector<16x32xf32>
    %201 = vector.extract_strided_slice %197 {offsets = [32, 0], sizes = [16, 32], strides = [1, 1]} : vector<64x32xf32> to vector<16x32xf32>
    %202 = arith.addf %200, %201 : vector<16x32xf32>
    %203 = vector.extract_strided_slice %197 {offsets = [48, 0], sizes = [16, 32], strides = [1, 1]} : vector<64x32xf32> to vector<16x32xf32>
    %204 = arith.addf %202, %203 : vector<16x32xf32>
    %c312 = arith.constant 312 : index
    %c0_77 = arith.constant 0 : index
    %205 = vector.load %arg0[%c312, %c0_77] : memref<2376x128xf32, #tpu.memory_space<vmem>>, vector<32x32xf32>
    %cst_78 = arith.constant dense<0.000000e+00> : vector<16x32xf32>
    %206 = tpu.matmul %204, %205, %cst_78 {dimension_numbers = #tpu.dot_dimension_numbers<[1], [0], [0], [1], [0, 0, 1, 1], [], []>} : vector<16x32xf32>, vector<32x32xf32>, vector<16x32xf32> -> vector<16x32xf32>
    %c344 = arith.constant 344 : index
    %c0_79 = arith.constant 0 : index
    %207 = vector.load %arg0[%c344, %c0_79] : memref<2376x128xf32, #tpu.memory_space<vmem>>, vector<1x32xf32>
    %208 = vector.broadcast %207 : vector<1x32xf32> to vector<16x32xf32>
    %209 = arith.addf %206, %208 : vector<16x32xf32>
    %210 = arith.addf %168, %209 : vector<16x32xf32>
    %c352 = arith.constant 352 : index
    %c0_80 = arith.constant 0 : index
    %211 = vector.load %arg0[%c352, %c0_80] : memref<2376x128xf32, #tpu.memory_space<vmem>>, vector<1x32xf32>
    %c360 = arith.constant 360 : index
    %c0_81 = arith.constant 0 : index
    %212 = vector.load %arg0[%c360, %c0_81] : memref<2376x128xf32, #tpu.memory_space<vmem>>, vector<1x32xf32>
    %cst_82 = arith.constant dense<0.000000e+00> : vector<16xf32>
    %213 = vector.multi_reduction <add>, %210, %cst_82 [1] : vector<16x32xf32> to vector<16xf32>
    %214 = vector.shape_cast %213 : vector<16xf32> to vector<16x1xf32>
    %cst_83 = arith.constant 3.200000e+01 : f32
    %215 = vector.broadcast %cst_83 : f32 to vector<16x1xf32>
    %216 = arith.divf %214, %215 : vector<16x1xf32>
    %217 = vector.broadcast %216 : vector<16x1xf32> to vector<16x32xf32>
    %218 = arith.subf %210, %217 : vector<16x32xf32>
    %219 = arith.mulf %218, %218 : vector<16x32xf32>
    %cst_84 = arith.constant dense<0.000000e+00> : vector<16xf32>
    %220 = vector.multi_reduction <add>, %219, %cst_84 [1] : vector<16x32xf32> to vector<16xf32>
    %221 = vector.shape_cast %220 : vector<16xf32> to vector<16x1xf32>
    %cst_85 = arith.constant 3.200000e+01 : f32
    %222 = vector.broadcast %cst_85 : f32 to vector<16x1xf32>
    %223 = arith.divf %221, %222 : vector<16x1xf32>
    %cst_86 = arith.constant 9.99999974E-6 : f32
    %224 = vector.broadcast %cst_86 : f32 to vector<16x1xf32>
    %225 = arith.addf %223, %224 : vector<16x1xf32>
    %226 = math.rsqrt %225 : vector<16x1xf32>
    %227 = vector.broadcast %226 : vector<16x1xf32> to vector<16x32xf32>
    %228 = arith.mulf %218, %227 : vector<16x32xf32>
    %229 = vector.broadcast %211 : vector<1x32xf32> to vector<16x32xf32>
    %230 = arith.mulf %228, %229 : vector<16x32xf32>
    %231 = vector.broadcast %212 : vector<1x32xf32> to vector<16x32xf32>
    %232 = arith.addf %230, %231 : vector<16x32xf32>
    %c368 = arith.constant 368 : index
    %c0_87 = arith.constant 0 : index
    %233 = vector.load %arg0[%c368, %c0_87] : memref<2376x128xf32, #tpu.memory_space<vmem>>, vector<32x64xf32>
    %cst_88 = arith.constant dense<0.000000e+00> : vector<16x64xf32>
    %234 = tpu.matmul %232, %233, %cst_88 {dimension_numbers = #tpu.dot_dimension_numbers<[1], [0], [0], [1], [0, 0, 1, 1], [], []>} : vector<16x32xf32>, vector<32x64xf32>, vector<16x64xf32> -> vector<16x64xf32>
    %c400 = arith.constant 400 : index
    %c0_89 = arith.constant 0 : index
    %235 = vector.load %arg0[%c400, %c0_89] : memref<2376x128xf32, #tpu.memory_space<vmem>>, vector<1x64xf32>
    %236 = vector.broadcast %235 : vector<1x64xf32> to vector<16x64xf32>
    %237 = arith.addf %234, %236 : vector<16x64xf32>
    %238 = arith.mulf %237, %237 : vector<16x64xf32>
    %239 = arith.mulf %237, %238 : vector<16x64xf32>
    %cst_90 = arith.constant 4.471500e-02 : f32
    %240 = vector.broadcast %cst_90 : f32 to vector<16x64xf32>
    %241 = arith.mulf %240, %239 : vector<16x64xf32>
    %242 = arith.addf %237, %241 : vector<16x64xf32>
    %cst_91 = arith.constant 0.797884583 : f32
    %243 = vector.broadcast %cst_91 : f32 to vector<16x64xf32>
    %244 = arith.mulf %243, %242 : vector<16x64xf32>
    %245 = math.tanh %244 : vector<16x64xf32>
    %cst_92 = arith.constant 1.000000e+00 : f32
    %246 = vector.broadcast %cst_92 : f32 to vector<16x64xf32>
    %247 = arith.addf %246, %245 : vector<16x64xf32>
    %cst_93 = arith.constant 5.000000e-01 : f32
    %248 = vector.broadcast %cst_93 : f32 to vector<16x64xf32>
    %249 = arith.mulf %248, %247 : vector<16x64xf32>
    %250 = arith.mulf %237, %249 : vector<16x64xf32>
    %c408 = arith.constant 408 : index
    %c0_94 = arith.constant 0 : index
    %251 = vector.load %arg0[%c408, %c0_94] : memref<2376x128xf32, #tpu.memory_space<vmem>>, vector<64x32xf32>
    %cst_95 = arith.constant dense<0.000000e+00> : vector<16x32xf32>
    %252 = tpu.matmul %250, %251, %cst_95 {dimension_numbers = #tpu.dot_dimension_numbers<[1], [0], [0], [1], [0, 0, 1, 1], [], []>} : vector<16x64xf32>, vector<64x32xf32>, vector<16x32xf32> -> vector<16x32xf32>
    %c472 = arith.constant 472 : index
    %c0_96 = arith.constant 0 : index
    %253 = vector.load %arg0[%c472, %c0_96] : memref<2376x128xf32, #tpu.memory_space<vmem>>, vector<1x32xf32>
    %254 = vector.broadcast %253 : vector<1x32xf32> to vector<16x32xf32>
    %255 = arith.addf %252, %254 : vector<16x32xf32>
    %256 = arith.addf %232, %255 : vector<16x32xf32>
    %c480 = arith.constant 480 : index
    %c0_97 = arith.constant 0 : index
    %257 = vector.load %arg0[%c480, %c0_97] : memref<2376x128xf32, #tpu.memory_space<vmem>>, vector<1x32xf32>
    %c488 = arith.constant 488 : index
    %c0_98 = arith.constant 0 : index
    %258 = vector.load %arg0[%c488, %c0_98] : memref<2376x128xf32, #tpu.memory_space<vmem>>, vector<1x32xf32>
    %cst_99 = arith.constant dense<0.000000e+00> : vector<16xf32>
    %259 = vector.multi_reduction <add>, %256, %cst_99 [1] : vector<16x32xf32> to vector<16xf32>
    %260 = vector.shape_cast %259 : vector<16xf32> to vector<16x1xf32>
    %cst_100 = arith.constant 3.200000e+01 : f32
    %261 = vector.broadcast %cst_100 : f32 to vector<16x1xf32>
    %262 = arith.divf %260, %261 : vector<16x1xf32>
    %263 = vector.broadcast %262 : vector<16x1xf32> to vector<16x32xf32>
    %264 = arith.subf %256, %263 : vector<16x32xf32>
    %265 = arith.mulf %264, %264 : vector<16x32xf32>
    %cst_101 = arith.constant dense<0.000000e+00> : vector<16xf32>
    %266 = vector.multi_reduction <add>, %265, %cst_101 [1] : vector<16x32xf32> to vector<16xf32>
    %267 = vector.shape_cast %266 : vector<16xf32> to vector<16x1xf32>
    %cst_102 = arith.constant 3.200000e+01 : f32
    %268 = vector.broadcast %cst_102 : f32 to vector<16x1xf32>
    %269 = arith.divf %267, %268 : vector<16x1xf32>
    %cst_103 = arith.constant 9.99999974E-6 : f32
    %270 = vector.broadcast %cst_103 : f32 to vector<16x1xf32>
    %271 = arith.addf %269, %270 : vector<16x1xf32>
    %272 = math.rsqrt %271 : vector<16x1xf32>
    %273 = vector.broadcast %272 : vector<16x1xf32> to vector<16x32xf32>
    %274 = arith.mulf %264, %273 : vector<16x32xf32>
    %275 = vector.broadcast %257 : vector<1x32xf32> to vector<16x32xf32>
    %276 = arith.mulf %274, %275 : vector<16x32xf32>
    %277 = vector.broadcast %258 : vector<1x32xf32> to vector<16x32xf32>
    %278 = arith.addf %276, %277 : vector<16x32xf32>
    %c616 = arith.constant 616 : index
    %c0_104 = arith.constant 0 : index
    %279 = vector.load %arg0[%c616, %c0_104] : memref<2376x128xf32, #tpu.memory_space<vmem>>, vector<1x32xf32>
    %c624 = arith.constant 624 : index
    %c0_105 = arith.constant 0 : index
    %280 = vector.load %arg0[%c624, %c0_105] : memref<2376x128xf32, #tpu.memory_space<vmem>>, vector<1x32xf32>
    %cst_106 = arith.constant dense<0.000000e+00> : vector<16xf32>
    %281 = vector.multi_reduction <add>, %278, %cst_106 [1] : vector<16x32xf32> to vector<16xf32>
    %282 = vector.shape_cast %281 : vector<16xf32> to vector<16x1xf32>
    %cst_107 = arith.constant 3.200000e+01 : f32
    %283 = vector.broadcast %cst_107 : f32 to vector<16x1xf32>
    %284 = arith.divf %282, %283 : vector<16x1xf32>
    %285 = vector.broadcast %284 : vector<16x1xf32> to vector<16x32xf32>
    %286 = arith.subf %278, %285 : vector<16x32xf32>
    %287 = arith.mulf %286, %286 : vector<16x32xf32>
    %cst_108 = arith.constant dense<0.000000e+00> : vector<16xf32>
    %288 = vector.multi_reduction <add>, %287, %cst_108 [1] : vector<16x32xf32> to vector<16xf32>
    %289 = vector.shape_cast %288 : vector<16xf32> to vector<16x1xf32>
    %cst_109 = arith.constant 3.200000e+01 : f32
    %290 = vector.broadcast %cst_109 : f32 to vector<16x1xf32>
    %291 = arith.divf %289, %290 : vector<16x1xf32>
    %cst_110 = arith.constant 9.99999974E-6 : f32
    %292 = vector.broadcast %cst_110 : f32 to vector<16x1xf32>
    %293 = arith.addf %291, %292 : vector<16x1xf32>
    %294 = math.rsqrt %293 : vector<16x1xf32>
    %295 = vector.broadcast %294 : vector<16x1xf32> to vector<16x32xf32>
    %296 = arith.mulf %286, %295 : vector<16x32xf32>
    %297 = vector.broadcast %279 : vector<1x32xf32> to vector<16x32xf32>
    %298 = arith.mulf %296, %297 : vector<16x32xf32>
    %299 = vector.broadcast %280 : vector<1x32xf32> to vector<16x32xf32>
    %300 = arith.addf %298, %299 : vector<16x32xf32>
    %c0_111 = arith.constant 0 : index
    %c0_112 = arith.constant 0 : index
    %301 = vector.load %arg3[%c0_111, %c0_112] : memref<24x12xf32, #tpu.memory_space<vmem>>, vector<24x12xf32>
    %c24 = arith.constant 24 : index
    %c0_113 = arith.constant 0 : index
    %302 = vector.load %arg0[%c24, %c0_113] : memref<2376x128xf32, #tpu.memory_space<vmem>>, vector<12x32xf32>
    %cst_114 = arith.constant dense<0.000000e+00> : vector<24x32xf32>
    %303 = tpu.matmul %301, %302, %cst_114 {dimension_numbers = #tpu.dot_dimension_numbers<[1], [0], [0], [1], [0, 0, 1, 1], [], []>} : vector<24x12xf32>, vector<12x32xf32>, vector<24x32xf32> -> vector<24x32xf32>
    %c40 = arith.constant 40 : index
    %c0_115 = arith.constant 0 : index
    %304 = vector.load %arg0[%c40, %c0_115] : memref<2376x128xf32, #tpu.memory_space<vmem>>, vector<1x32xf32>
    %305 = vector.broadcast %304 : vector<1x32xf32> to vector<24x32xf32>
    %306 = arith.addf %303, %305 : vector<24x32xf32>
    %c0_116 = arith.constant 0 : index
    %c0_117 = arith.constant 0 : index
    %307 = vector.load %arg4[%c0_116, %c0_117] : memref<24x32xf32, #tpu.memory_space<vmem>>, vector<24x32xf32>
    %308 = arith.addf %306, %307 : vector<24x32xf32>
    %c1784 = arith.constant 1784 : index
    %c0_118 = arith.constant 0 : index
    %309 = vector.load %arg0[%c1784, %c0_118] : memref<2376x128xf32, #tpu.memory_space<vmem>>, vector<96x24xf32>
    %cst_119 = arith.constant dense<0.000000e+00> : vector<96x32xf32>
    %310 = tpu.matmul %309, %308, %cst_119 {dimension_numbers = #tpu.dot_dimension_numbers<[1], [0], [0], [1], [0, 0, 1, 1], [], []>} : vector<96x24xf32>, vector<24x32xf32>, vector<96x32xf32> -> vector<96x32xf32>
    %c632 = arith.constant 632 : index
    %c0_120 = arith.constant 0 : index
    %311 = vector.load %arg0[%c632, %c0_120] : memref<2376x128xf32, #tpu.memory_space<vmem>>, vector<32x96xf32>
    %cst_121 = arith.constant dense<0.000000e+00> : vector<96x96xf32>
    %312 = tpu.matmul %310, %311, %cst_121 {dimension_numbers = #tpu.dot_dimension_numbers<[1], [0], [0], [1], [0, 0, 1, 1], [], []>} : vector<96x32xf32>, vector<32x96xf32>, vector<96x96xf32> -> vector<96x96xf32>
    %c664 = arith.constant 664 : index
    %c0_122 = arith.constant 0 : index
    %313 = vector.load %arg0[%c664, %c0_122] : memref<2376x128xf32, #tpu.memory_space<vmem>>, vector<1x96xf32>
    %314 = vector.broadcast %313 : vector<1x96xf32> to vector<96x96xf32>
    %315 = arith.addf %312, %314 : vector<96x96xf32>
    %c2072 = arith.constant 2072 : index
    %c0_123 = arith.constant 0 : index
    %316 = vector.load %arg0[%c2072, %c0_123] : memref<2376x128xf32, #tpu.memory_space<vmem>>, vector<96x32xf32>
    %317 = vector.extract_strided_slice %315 {offsets = [0, 0], sizes = [96, 32], strides = [1, 1]} : vector<96x96xf32> to vector<96x32xf32>
    %318 = vector.extract_strided_slice %315 {offsets = [0, 32], sizes = [96, 32], strides = [1, 1]} : vector<96x96xf32> to vector<96x32xf32>
    %319 = arith.mulf %318, %316 : vector<96x32xf32>
    %320 = vector.extract_strided_slice %315 {offsets = [0, 64], sizes = [96, 32], strides = [1, 1]} : vector<96x96xf32> to vector<96x32xf32>
    %321 = arith.mulf %320, %316 : vector<96x32xf32>
    %cst_124 = arith.constant dense<0.000000e+00> : vector<96x96xf32>
    %322 = tpu.matmul %317, %319, %cst_124 {dimension_numbers = #tpu.dot_dimension_numbers<[1], [1], [0], [0], [0, 0, 1, 0], [], []>} : vector<96x32xf32>, vector<96x32xf32>, vector<96x96xf32> -> vector<96x96xf32>
    %cst_125 = arith.constant 0.353553385 : f32
    %323 = vector.broadcast %cst_125 : f32 to vector<96x96xf32>
    %324 = arith.mulf %322, %323 : vector<96x96xf32>
    %c1400 = arith.constant 1400 : index
    %c0_126 = arith.constant 0 : index
    %325 = vector.load %arg0[%c1400, %c0_126] : memref<2376x128xf32, #tpu.memory_space<vmem>>, vector<96x96xf32>
    %326 = arith.addf %324, %325 : vector<96x96xf32>
    %cst_127 = arith.constant dense<0xFF800000> : vector<96xf32>
    %327 = vector.multi_reduction <maximumf>, %326, %cst_127 [1] : vector<96x96xf32> to vector<96xf32>
    %328 = vector.shape_cast %327 : vector<96xf32> to vector<96x1xf32>
    %329 = vector.broadcast %328 : vector<96x1xf32> to vector<96x96xf32>
    %330 = arith.subf %326, %329 : vector<96x96xf32>
    %331 = math.exp %330 : vector<96x96xf32>
    %cst_128 = arith.constant dense<0.000000e+00> : vector<96xf32>
    %332 = vector.multi_reduction <add>, %331, %cst_128 [1] : vector<96x96xf32> to vector<96xf32>
    %333 = vector.shape_cast %332 : vector<96xf32> to vector<96x1xf32>
    %334 = tpu.reciprocal %333 {approx = true} : vector<96x1xf32> -> vector<96x1xf32>
    %335 = vector.broadcast %334 : vector<96x1xf32> to vector<96x96xf32>
    %336 = arith.mulf %331, %335 : vector<96x96xf32>
    %cst_129 = arith.constant dense<0.000000e+00> : vector<96x32xf32>
    %337 = tpu.matmul %336, %321, %cst_129 {dimension_numbers = #tpu.dot_dimension_numbers<[1], [0], [0], [1], [0, 0, 1, 1], [], []>} : vector<96x96xf32>, vector<96x32xf32>, vector<96x32xf32> -> vector<96x32xf32>
    %c2280 = arith.constant 2280 : index
    %c0_130 = arith.constant 0 : index
    %338 = vector.load %arg0[%c2280, %c0_130] : memref<2376x128xf32, #tpu.memory_space<vmem>>, vector<96x96xf32>
    %cst_131 = arith.constant dense<0.000000e+00> : vector<96x32xf32>
    %339 = tpu.matmul %338, %337, %cst_131 {dimension_numbers = #tpu.dot_dimension_numbers<[1], [0], [0], [1], [0, 0, 1, 1], [], []>} : vector<96x96xf32>, vector<96x32xf32>, vector<96x32xf32> -> vector<96x32xf32>
    %c1080 = arith.constant 1080 : index
    %c0_132 = arith.constant 0 : index
    %340 = vector.load %arg0[%c1080, %c0_132] : memref<2376x128xf32, #tpu.memory_space<vmem>>, vector<128x32xf32>
    %341 = vector.extract_strided_slice %339 {offsets = [0, 0], sizes = [24, 32], strides = [1, 1]} : vector<96x32xf32> to vector<24x32xf32>
    %342 = vector.extract_strided_slice %340 {offsets = [0, 0], sizes = [32, 32], strides = [1, 1]} : vector<128x32xf32> to vector<32x32xf32>
    %cst_133 = arith.constant dense<0.000000e+00> : vector<24x32xf32>
    %343 = tpu.matmul %341, %342, %cst_133 {dimension_numbers = #tpu.dot_dimension_numbers<[1], [0], [0], [1], [0, 0, 1, 1], [], []>} : vector<24x32xf32>, vector<32x32xf32>, vector<24x32xf32> -> vector<24x32xf32>
    %344 = vector.extract_strided_slice %339 {offsets = [24, 0], sizes = [24, 32], strides = [1, 1]} : vector<96x32xf32> to vector<24x32xf32>
    %345 = vector.extract_strided_slice %340 {offsets = [32, 0], sizes = [32, 32], strides = [1, 1]} : vector<128x32xf32> to vector<32x32xf32>
    %cst_134 = arith.constant dense<0.000000e+00> : vector<24x32xf32>
    %346 = tpu.matmul %344, %345, %cst_134 {dimension_numbers = #tpu.dot_dimension_numbers<[1], [0], [0], [1], [0, 0, 1, 1], [], []>} : vector<24x32xf32>, vector<32x32xf32>, vector<24x32xf32> -> vector<24x32xf32>
    %347 = arith.addf %343, %346 : vector<24x32xf32>
    %348 = vector.extract_strided_slice %339 {offsets = [48, 0], sizes = [24, 32], strides = [1, 1]} : vector<96x32xf32> to vector<24x32xf32>
    %349 = vector.extract_strided_slice %340 {offsets = [64, 0], sizes = [32, 32], strides = [1, 1]} : vector<128x32xf32> to vector<32x32xf32>
    %cst_135 = arith.constant dense<0.000000e+00> : vector<24x32xf32>
    %350 = tpu.matmul %348, %349, %cst_135 {dimension_numbers = #tpu.dot_dimension_numbers<[1], [0], [0], [1], [0, 0, 1, 1], [], []>} : vector<24x32xf32>, vector<32x32xf32>, vector<24x32xf32> -> vector<24x32xf32>
    %351 = arith.addf %347, %350 : vector<24x32xf32>
    %352 = vector.extract_strided_slice %339 {offsets = [72, 0], sizes = [24, 32], strides = [1, 1]} : vector<96x32xf32> to vector<24x32xf32>
    %353 = vector.extract_strided_slice %340 {offsets = [96, 0], sizes = [32, 32], strides = [1, 1]} : vector<128x32xf32> to vector<32x32xf32>
    %cst_136 = arith.constant dense<0.000000e+00> : vector<24x32xf32>
    %354 = tpu.matmul %352, %353, %cst_136 {dimension_numbers = #tpu.dot_dimension_numbers<[1], [0], [0], [1], [0, 0, 1, 1], [], []>} : vector<24x32xf32>, vector<32x32xf32>, vector<24x32xf32> -> vector<24x32xf32>
    %355 = arith.addf %351, %354 : vector<24x32xf32>
    %c672 = arith.constant 672 : index
    %c0_137 = arith.constant 0 : index
    %356 = vector.load %arg0[%c672, %c0_137] : memref<2376x128xf32, #tpu.memory_space<vmem>>, vector<1x32xf32>
    %357 = vector.broadcast %356 : vector<1x32xf32> to vector<24x32xf32>
    %358 = arith.addf %355, %357 : vector<24x32xf32>
    %359 = arith.addf %308, %358 : vector<24x32xf32>
    %c680 = arith.constant 680 : index
    %c0_138 = arith.constant 0 : index
    %360 = vector.load %arg0[%c680, %c0_138] : memref<2376x128xf32, #tpu.memory_space<vmem>>, vector<1x32xf32>
    %c688 = arith.constant 688 : index
    %c0_139 = arith.constant 0 : index
    %361 = vector.load %arg0[%c688, %c0_139] : memref<2376x128xf32, #tpu.memory_space<vmem>>, vector<1x32xf32>
    %cst_140 = arith.constant dense<0.000000e+00> : vector<24xf32>
    %362 = vector.multi_reduction <add>, %359, %cst_140 [1] : vector<24x32xf32> to vector<24xf32>
    %363 = vector.shape_cast %362 : vector<24xf32> to vector<24x1xf32>
    %cst_141 = arith.constant 3.200000e+01 : f32
    %364 = vector.broadcast %cst_141 : f32 to vector<24x1xf32>
    %365 = arith.divf %363, %364 : vector<24x1xf32>
    %366 = vector.broadcast %365 : vector<24x1xf32> to vector<24x32xf32>
    %367 = arith.subf %359, %366 : vector<24x32xf32>
    %368 = arith.mulf %367, %367 : vector<24x32xf32>
    %cst_142 = arith.constant dense<0.000000e+00> : vector<24xf32>
    %369 = vector.multi_reduction <add>, %368, %cst_142 [1] : vector<24x32xf32> to vector<24xf32>
    %370 = vector.shape_cast %369 : vector<24xf32> to vector<24x1xf32>
    %cst_143 = arith.constant 3.200000e+01 : f32
    %371 = vector.broadcast %cst_143 : f32 to vector<24x1xf32>
    %372 = arith.divf %370, %371 : vector<24x1xf32>
    %cst_144 = arith.constant 9.99999974E-6 : f32
    %373 = vector.broadcast %cst_144 : f32 to vector<24x1xf32>
    %374 = arith.addf %372, %373 : vector<24x1xf32>
    %375 = math.rsqrt %374 : vector<24x1xf32>
    %376 = vector.broadcast %375 : vector<24x1xf32> to vector<24x32xf32>
    %377 = arith.mulf %367, %376 : vector<24x32xf32>
    %378 = vector.broadcast %360 : vector<1x32xf32> to vector<24x32xf32>
    %379 = arith.mulf %377, %378 : vector<24x32xf32>
    %380 = vector.broadcast %361 : vector<1x32xf32> to vector<24x32xf32>
    %381 = arith.addf %379, %380 : vector<24x32xf32>
    %c1784_145 = arith.constant 1784 : index
    %c0_146 = arith.constant 0 : index
    %382 = vector.load %arg0[%c1784_145, %c0_146] : memref<2376x128xf32, #tpu.memory_space<vmem>>, vector<96x24xf32>
    %cst_147 = arith.constant dense<0.000000e+00> : vector<96x32xf32>
    %383 = tpu.matmul %382, %381, %cst_147 {dimension_numbers = #tpu.dot_dimension_numbers<[1], [0], [0], [1], [0, 0, 1, 1], [], []>} : vector<96x24xf32>, vector<24x32xf32>, vector<96x32xf32> -> vector<96x32xf32>
    %c696 = arith.constant 696 : index
    %c0_148 = arith.constant 0 : index
    %384 = vector.load %arg0[%c696, %c0_148] : memref<2376x128xf32, #tpu.memory_space<vmem>>, vector<32x32xf32>
    %cst_149 = arith.constant dense<0.000000e+00> : vector<96x32xf32>
    %385 = tpu.matmul %383, %384, %cst_149 {dimension_numbers = #tpu.dot_dimension_numbers<[1], [0], [0], [1], [0, 0, 1, 1], [], []>} : vector<96x32xf32>, vector<32x32xf32>, vector<96x32xf32> -> vector<96x32xf32>
    %c728 = arith.constant 728 : index
    %c0_150 = arith.constant 0 : index
    %386 = vector.load %arg0[%c728, %c0_150] : memref<2376x128xf32, #tpu.memory_space<vmem>>, vector<1x32xf32>
    %387 = vector.broadcast %386 : vector<1x32xf32> to vector<96x32xf32>
    %388 = arith.addf %385, %387 : vector<96x32xf32>
    %c1720_151 = arith.constant 1720 : index
    %c0_152 = arith.constant 0 : index
    %389 = vector.load %arg0[%c1720_151, %c0_152] : memref<2376x128xf32, #tpu.memory_space<vmem>>, vector<64x16xf32>
    %cst_153 = arith.constant dense<0.000000e+00> : vector<64x32xf32>
    %390 = tpu.matmul %389, %300, %cst_153 {dimension_numbers = #tpu.dot_dimension_numbers<[1], [0], [0], [1], [0, 0, 1, 1], [], []>} : vector<64x16xf32>, vector<16x32xf32>, vector<64x32xf32> -> vector<64x32xf32>
    %c736 = arith.constant 736 : index
    %c0_154 = arith.constant 0 : index
    %391 = vector.load %arg0[%c736, %c0_154] : memref<2376x128xf32, #tpu.memory_space<vmem>>, vector<32x64xf32>
    %cst_155 = arith.constant dense<0.000000e+00> : vector<64x64xf32>
    %392 = tpu.matmul %390, %391, %cst_155 {dimension_numbers = #tpu.dot_dimension_numbers<[1], [0], [0], [1], [0, 0, 1, 1], [], []>} : vector<64x32xf32>, vector<32x64xf32>, vector<64x64xf32> -> vector<64x64xf32>
    %c768 = arith.constant 768 : index
    %c0_156 = arith.constant 0 : index
    %393 = vector.load %arg0[%c768, %c0_156] : memref<2376x128xf32, #tpu.memory_space<vmem>>, vector<1x64xf32>
    %394 = vector.broadcast %393 : vector<1x64xf32> to vector<64x64xf32>
    %395 = arith.addf %392, %394 : vector<64x64xf32>
    %c2008_157 = arith.constant 2008 : index
    %c0_158 = arith.constant 0 : index
    %396 = vector.load %arg0[%c2008_157, %c0_158] : memref<2376x128xf32, #tpu.memory_space<vmem>>, vector<64x32xf32>
    %397 = vector.extract_strided_slice %395 {offsets = [0, 0], sizes = [64, 32], strides = [1, 1]} : vector<64x64xf32> to vector<64x32xf32>
    %398 = arith.mulf %397, %396 : vector<64x32xf32>
    %399 = vector.extract_strided_slice %395 {offsets = [0, 32], sizes = [64, 32], strides = [1, 1]} : vector<64x64xf32> to vector<64x32xf32>
    %400 = arith.mulf %399, %396 : vector<64x32xf32>
    %cst_159 = arith.constant dense<0.000000e+00> : vector<96x64xf32>
    %401 = tpu.matmul %388, %398, %cst_159 {dimension_numbers = #tpu.dot_dimension_numbers<[1], [1], [0], [0], [0, 0, 1, 0], [], []>} : vector<96x32xf32>, vector<64x32xf32>, vector<96x64xf32> -> vector<96x64xf32>
    %cst_160 = arith.constant 0.353553385 : f32
    %402 = vector.broadcast %cst_160 : f32 to vector<96x64xf32>
    %403 = arith.mulf %401, %402 : vector<96x64xf32>
    %c1496 = arith.constant 1496 : index
    %c0_161 = arith.constant 0 : index
    %404 = vector.load %arg0[%c1496, %c0_161] : memref<2376x128xf32, #tpu.memory_space<vmem>>, vector<96x64xf32>
    %405 = arith.addf %403, %404 : vector<96x64xf32>
    %cst_162 = arith.constant dense<0xFF800000> : vector<96xf32>
    %406 = vector.multi_reduction <maximumf>, %405, %cst_162 [1] : vector<96x64xf32> to vector<96xf32>
    %407 = vector.shape_cast %406 : vector<96xf32> to vector<96x1xf32>
    %408 = vector.broadcast %407 : vector<96x1xf32> to vector<96x64xf32>
    %409 = arith.subf %405, %408 : vector<96x64xf32>
    %410 = math.exp %409 : vector<96x64xf32>
    %cst_163 = arith.constant dense<0.000000e+00> : vector<96xf32>
    %411 = vector.multi_reduction <add>, %410, %cst_163 [1] : vector<96x64xf32> to vector<96xf32>
    %412 = vector.shape_cast %411 : vector<96xf32> to vector<96x1xf32>
    %413 = tpu.reciprocal %412 {approx = true} : vector<96x1xf32> -> vector<96x1xf32>
    %414 = vector.broadcast %413 : vector<96x1xf32> to vector<96x64xf32>
    %415 = arith.mulf %410, %414 : vector<96x64xf32>
    %cst_164 = arith.constant dense<0.000000e+00> : vector<96x32xf32>
    %416 = tpu.matmul %415, %400, %cst_164 {dimension_numbers = #tpu.dot_dimension_numbers<[1], [0], [0], [1], [0, 0, 1, 1], [], []>} : vector<96x64xf32>, vector<64x32xf32>, vector<96x32xf32> -> vector<96x32xf32>
    %417 = vector.extract_strided_slice %416 {offsets = [0, 0], sizes = [24, 32], strides = [1, 1]} : vector<96x32xf32> to vector<24x32xf32>
    %418 = vector.extract_strided_slice %416 {offsets = [24, 0], sizes = [24, 32], strides = [1, 1]} : vector<96x32xf32> to vector<24x32xf32>
    %419 = arith.addf %417, %418 : vector<24x32xf32>
    %420 = vector.extract_strided_slice %416 {offsets = [48, 0], sizes = [24, 32], strides = [1, 1]} : vector<96x32xf32> to vector<24x32xf32>
    %421 = arith.addf %419, %420 : vector<24x32xf32>
    %422 = vector.extract_strided_slice %416 {offsets = [72, 0], sizes = [24, 32], strides = [1, 1]} : vector<96x32xf32> to vector<24x32xf32>
    %423 = arith.addf %421, %422 : vector<24x32xf32>
    %c776 = arith.constant 776 : index
    %c0_165 = arith.constant 0 : index
    %424 = vector.load %arg0[%c776, %c0_165] : memref<2376x128xf32, #tpu.memory_space<vmem>>, vector<32x32xf32>
    %cst_166 = arith.constant dense<0.000000e+00> : vector<24x32xf32>
    %425 = tpu.matmul %423, %424, %cst_166 {dimension_numbers = #tpu.dot_dimension_numbers<[1], [0], [0], [1], [0, 0, 1, 1], [], []>} : vector<24x32xf32>, vector<32x32xf32>, vector<24x32xf32> -> vector<24x32xf32>
    %c808 = arith.constant 808 : index
    %c0_167 = arith.constant 0 : index
    %426 = vector.load %arg0[%c808, %c0_167] : memref<2376x128xf32, #tpu.memory_space<vmem>>, vector<1x32xf32>
    %427 = vector.broadcast %426 : vector<1x32xf32> to vector<24x32xf32>
    %428 = arith.addf %425, %427 : vector<24x32xf32>
    %429 = arith.addf %381, %428 : vector<24x32xf32>
    %c816 = arith.constant 816 : index
    %c0_168 = arith.constant 0 : index
    %430 = vector.load %arg0[%c816, %c0_168] : memref<2376x128xf32, #tpu.memory_space<vmem>>, vector<1x32xf32>
    %c824 = arith.constant 824 : index
    %c0_169 = arith.constant 0 : index
    %431 = vector.load %arg0[%c824, %c0_169] : memref<2376x128xf32, #tpu.memory_space<vmem>>, vector<1x32xf32>
    %cst_170 = arith.constant dense<0.000000e+00> : vector<24xf32>
    %432 = vector.multi_reduction <add>, %429, %cst_170 [1] : vector<24x32xf32> to vector<24xf32>
    %433 = vector.shape_cast %432 : vector<24xf32> to vector<24x1xf32>
    %cst_171 = arith.constant 3.200000e+01 : f32
    %434 = vector.broadcast %cst_171 : f32 to vector<24x1xf32>
    %435 = arith.divf %433, %434 : vector<24x1xf32>
    %436 = vector.broadcast %435 : vector<24x1xf32> to vector<24x32xf32>
    %437 = arith.subf %429, %436 : vector<24x32xf32>
    %438 = arith.mulf %437, %437 : vector<24x32xf32>
    %cst_172 = arith.constant dense<0.000000e+00> : vector<24xf32>
    %439 = vector.multi_reduction <add>, %438, %cst_172 [1] : vector<24x32xf32> to vector<24xf32>
    %440 = vector.shape_cast %439 : vector<24xf32> to vector<24x1xf32>
    %cst_173 = arith.constant 3.200000e+01 : f32
    %441 = vector.broadcast %cst_173 : f32 to vector<24x1xf32>
    %442 = arith.divf %440, %441 : vector<24x1xf32>
    %cst_174 = arith.constant 9.99999974E-6 : f32
    %443 = vector.broadcast %cst_174 : f32 to vector<24x1xf32>
    %444 = arith.addf %442, %443 : vector<24x1xf32>
    %445 = math.rsqrt %444 : vector<24x1xf32>
    %446 = vector.broadcast %445 : vector<24x1xf32> to vector<24x32xf32>
    %447 = arith.mulf %437, %446 : vector<24x32xf32>
    %448 = vector.broadcast %430 : vector<1x32xf32> to vector<24x32xf32>
    %449 = arith.mulf %447, %448 : vector<24x32xf32>
    %450 = vector.broadcast %431 : vector<1x32xf32> to vector<24x32xf32>
    %451 = arith.addf %449, %450 : vector<24x32xf32>
    %c832 = arith.constant 832 : index
    %c0_175 = arith.constant 0 : index
    %452 = vector.load %arg0[%c832, %c0_175] : memref<2376x128xf32, #tpu.memory_space<vmem>>, vector<32x128xf32>
    %cst_176 = arith.constant dense<0.000000e+00> : vector<24x128xf32>
    %453 = tpu.matmul %451, %452, %cst_176 {dimension_numbers = #tpu.dot_dimension_numbers<[1], [0], [0], [1], [0, 0, 1, 1], [], []>} : vector<24x32xf32>, vector<32x128xf32>, vector<24x128xf32> -> vector<24x128xf32>
    %c864 = arith.constant 864 : index
    %c0_177 = arith.constant 0 : index
    %454 = vector.load %arg0[%c864, %c0_177] : memref<2376x128xf32, #tpu.memory_space<vmem>>, vector<1x128xf32>
    %455 = vector.broadcast %454 : vector<1x128xf32> to vector<24x128xf32>
    %456 = arith.addf %453, %455 : vector<24x128xf32>
    %457 = arith.mulf %456, %456 : vector<24x128xf32>
    %458 = arith.mulf %456, %457 : vector<24x128xf32>
    %cst_178 = arith.constant 4.471500e-02 : f32
    %459 = vector.broadcast %cst_178 : f32 to vector<24x128xf32>
    %460 = arith.mulf %459, %458 : vector<24x128xf32>
    %461 = arith.addf %456, %460 : vector<24x128xf32>
    %cst_179 = arith.constant 0.797884583 : f32
    %462 = vector.broadcast %cst_179 : f32 to vector<24x128xf32>
    %463 = arith.mulf %462, %461 : vector<24x128xf32>
    %464 = math.tanh %463 : vector<24x128xf32>
    %cst_180 = arith.constant 1.000000e+00 : f32
    %465 = vector.broadcast %cst_180 : f32 to vector<24x128xf32>
    %466 = arith.addf %465, %464 : vector<24x128xf32>
    %cst_181 = arith.constant 5.000000e-01 : f32
    %467 = vector.broadcast %cst_181 : f32 to vector<24x128xf32>
    %468 = arith.mulf %467, %466 : vector<24x128xf32>
    %469 = arith.mulf %456, %468 : vector<24x128xf32>
    %c872 = arith.constant 872 : index
    %c0_182 = arith.constant 0 : index
    %470 = vector.load %arg0[%c872, %c0_182] : memref<2376x128xf32, #tpu.memory_space<vmem>>, vector<128x32xf32>
    %cst_183 = arith.constant dense<0.000000e+00> : vector<24x32xf32>
    %471 = tpu.matmul %469, %470, %cst_183 {dimension_numbers = #tpu.dot_dimension_numbers<[1], [0], [0], [1], [0, 0, 1, 1], [], []>} : vector<24x128xf32>, vector<128x32xf32>, vector<24x32xf32> -> vector<24x32xf32>
    %c1000 = arith.constant 1000 : index
    %c0_184 = arith.constant 0 : index
    %472 = vector.load %arg0[%c1000, %c0_184] : memref<2376x128xf32, #tpu.memory_space<vmem>>, vector<1x32xf32>
    %473 = vector.broadcast %472 : vector<1x32xf32> to vector<24x32xf32>
    %474 = arith.addf %471, %473 : vector<24x32xf32>
    %475 = arith.addf %451, %474 : vector<24x32xf32>
    %c1008 = arith.constant 1008 : index
    %c0_185 = arith.constant 0 : index
    %476 = vector.load %arg0[%c1008, %c0_185] : memref<2376x128xf32, #tpu.memory_space<vmem>>, vector<1x32xf32>
    %c1016 = arith.constant 1016 : index
    %c0_186 = arith.constant 0 : index
    %477 = vector.load %arg0[%c1016, %c0_186] : memref<2376x128xf32, #tpu.memory_space<vmem>>, vector<1x32xf32>
    %cst_187 = arith.constant dense<0.000000e+00> : vector<24xf32>
    %478 = vector.multi_reduction <add>, %475, %cst_187 [1] : vector<24x32xf32> to vector<24xf32>
    %479 = vector.shape_cast %478 : vector<24xf32> to vector<24x1xf32>
    %cst_188 = arith.constant 3.200000e+01 : f32
    %480 = vector.broadcast %cst_188 : f32 to vector<24x1xf32>
    %481 = arith.divf %479, %480 : vector<24x1xf32>
    %482 = vector.broadcast %481 : vector<24x1xf32> to vector<24x32xf32>
    %483 = arith.subf %475, %482 : vector<24x32xf32>
    %484 = arith.mulf %483, %483 : vector<24x32xf32>
    %cst_189 = arith.constant dense<0.000000e+00> : vector<24xf32>
    %485 = vector.multi_reduction <add>, %484, %cst_189 [1] : vector<24x32xf32> to vector<24xf32>
    %486 = vector.shape_cast %485 : vector<24xf32> to vector<24x1xf32>
    %cst_190 = arith.constant 3.200000e+01 : f32
    %487 = vector.broadcast %cst_190 : f32 to vector<24x1xf32>
    %488 = arith.divf %486, %487 : vector<24x1xf32>
    %cst_191 = arith.constant 9.99999974E-6 : f32
    %489 = vector.broadcast %cst_191 : f32 to vector<24x1xf32>
    %490 = arith.addf %488, %489 : vector<24x1xf32>
    %491 = math.rsqrt %490 : vector<24x1xf32>
    %492 = vector.broadcast %491 : vector<24x1xf32> to vector<24x32xf32>
    %493 = arith.mulf %483, %492 : vector<24x32xf32>
    %494 = vector.broadcast %476 : vector<1x32xf32> to vector<24x32xf32>
    %495 = arith.mulf %493, %494 : vector<24x32xf32>
    %496 = vector.broadcast %477 : vector<1x32xf32> to vector<24x32xf32>
    %497 = arith.addf %495, %496 : vector<24x32xf32>
    %c1024 = arith.constant 1024 : index
    %c0_192 = arith.constant 0 : index
    %498 = vector.load %arg0[%c1024, %c0_192] : memref<2376x128xf32, #tpu.memory_space<vmem>>, vector<1x32xf32>
    %c1032 = arith.constant 1032 : index
    %c0_193 = arith.constant 0 : index
    %499 = vector.load %arg0[%c1032, %c0_193] : memref<2376x128xf32, #tpu.memory_space<vmem>>, vector<1x32xf32>
    %cst_194 = arith.constant dense<0.000000e+00> : vector<24xf32>
    %500 = vector.multi_reduction <add>, %497, %cst_194 [1] : vector<24x32xf32> to vector<24xf32>
    %501 = vector.shape_cast %500 : vector<24xf32> to vector<24x1xf32>
    %cst_195 = arith.constant 3.200000e+01 : f32
    %502 = vector.broadcast %cst_195 : f32 to vector<24x1xf32>
    %503 = arith.divf %501, %502 : vector<24x1xf32>
    %504 = vector.broadcast %503 : vector<24x1xf32> to vector<24x32xf32>
    %505 = arith.subf %497, %504 : vector<24x32xf32>
    %506 = arith.mulf %505, %505 : vector<24x32xf32>
    %cst_196 = arith.constant dense<0.000000e+00> : vector<24xf32>
    %507 = vector.multi_reduction <add>, %506, %cst_196 [1] : vector<24x32xf32> to vector<24xf32>
    %508 = vector.shape_cast %507 : vector<24xf32> to vector<24x1xf32>
    %cst_197 = arith.constant 3.200000e+01 : f32
    %509 = vector.broadcast %cst_197 : f32 to vector<24x1xf32>
    %510 = arith.divf %508, %509 : vector<24x1xf32>
    %cst_198 = arith.constant 9.99999974E-6 : f32
    %511 = vector.broadcast %cst_198 : f32 to vector<24x1xf32>
    %512 = arith.addf %510, %511 : vector<24x1xf32>
    %513 = math.rsqrt %512 : vector<24x1xf32>
    %514 = vector.broadcast %513 : vector<24x1xf32> to vector<24x32xf32>
    %515 = arith.mulf %505, %514 : vector<24x32xf32>
    %516 = vector.broadcast %498 : vector<1x32xf32> to vector<24x32xf32>
    %517 = arith.mulf %515, %516 : vector<24x32xf32>
    %518 = vector.broadcast %499 : vector<1x32xf32> to vector<24x32xf32>
    %519 = arith.addf %517, %518 : vector<24x32xf32>
    %c1040 = arith.constant 1040 : index
    %c0_199 = arith.constant 0 : index
    %520 = vector.load %arg0[%c1040, %c0_199] : memref<2376x128xf32, #tpu.memory_space<vmem>>, vector<32x4xf32>
    %cst_200 = arith.constant dense<0.000000e+00> : vector<24x4xf32>
    %521 = tpu.matmul %519, %520, %cst_200 {dimension_numbers = #tpu.dot_dimension_numbers<[1], [0], [0], [1], [0, 0, 1, 1], [], []>} : vector<24x32xf32>, vector<32x4xf32>, vector<24x4xf32> -> vector<24x4xf32>
    %c1072 = arith.constant 1072 : index
    %c0_201 = arith.constant 0 : index
    %522 = vector.load %arg0[%c1072, %c0_201] : memref<2376x128xf32, #tpu.memory_space<vmem>>, vector<1x4xf32>
    %523 = vector.broadcast %522 : vector<1x4xf32> to vector<24x4xf32>
    %524 = arith.addf %521, %523 : vector<24x4xf32>
    %c0_202 = arith.constant 0 : index
    %c0_203 = arith.constant 0 : index
    %525 = vector.load %arg5[%c0_202, %c0_203] : memref<24x4xf32, #tpu.memory_space<vmem>>, vector<24x4xf32>
    tpu.vector_store %arg5[%c0_202, %c0_203], %524 {strides = array<i32>} : memref<24x4xf32, #tpu.memory_space<vmem>>, vector<24x4xf32>,
    return
  }
}

</mosaic_0001>

<bundles_post_ra>
// kernel: forward.1
= control target key start
LH: loop header
LB: loop body
LE: loop exit
PB: predicated region body
PF: predicated region fallthrough
CT: control target
= control target key end

     0   :  { %vm41_vm0 = vcmask 1043456   ;;  %vm28_vm1 = vcmask 97280   ;;  %vm98_vm2 = vcmask 261120   ;;  %s5705_s26 = smov 32   ;;  %s5706_s27 = smov 96   ;;  %s8290_s0 = inlined_call_operand.vmem [shape: f32[2376,128], index: 0, kind: input, shape index: {}]   ;;  %s8291_s1 = inlined_call_operand.vmem [shape: f32[32,12], index: 1, kind: input, shape index: {}]   ;;  %s8292_s2 = inlined_call_operand.vmem [shape: f32[32,32], index: 2, kind: input, shape index: {}]   ;;  %s8293_s3 = inlined_call_operand.vmem [shape: f32[24,12], index: 3, kind: input, shape index: {}]   ;;  %s8294_s4 = inlined_call_operand.vmem [shape: f32[24,32], index: 4, kind: input, shape index: {}]   ;;  %s8295_s5 = inlined_call_operand.vmem [shape: f32[24,4], index: 5, kind: output, shape index: {}]  }
   0x1   :  { %v25_v0 = vld [vmem:[%s8290_s0 + $0x8] sm:$0xf]  ;;  %v24_v1 = vld [vmem:[%s8290_s0] sm:$0xff]  ;;  %v22_v4 = vld [vmem:[%s8291_s1 + $0x10] sm:$0xff] }
   0x2   :  { %4920 = vmatpush.msk.msra.mxu0 %vm41_vm0, %v25_v0  ;;  %v20_v2 = vld [vmem:[%s8291_s1] sm:$0xff]  ;;  %v21_v3 = vld [vmem:[%s8291_s1 + $0x8] sm:$0xff]  ;;  %v23_v5 = vld [vmem:[%s8291_s1 + $0x18] sm:$0xff]  ;;  %s5707_s1 = smov 64  }
   0x3   :  { %v5364_v9 = vld [vmem:[%s8290_s0 + $0x10] ss:$0 sm:$0xff]  ;;  %v77_v11 = vld [vmem:[%s8292_s2 + $0x18] sm:$0xff]  ;;  %v75_v17 = vld [vmem:[%s8292_s2 + $0x8] sm:$0xff] }
   0x4   :  { %60 = vmatpush.msra.mxu0 %v24_v1  ;;  %v76_v14 = vld [vmem:[%s8292_s2 + $0x10] sm:$0xff]  ;;  %v74_v20 = vld [vmem:[%s8292_s2] sm:$0xff]  ;;  %v82_v23 = vld [vmem:[%s8290_s0 + $0x638] sm:$0xff] }
   0x5   :  { %4921 = vmatmul.msk.f32.vlgmr.msra.gmra.mxu0 %vm28_vm1, %v20_v2  ;;  %v83_v24 = vld [vmem:[%s8290_s0 + $0x640] sm:$0xff]  ;;  %v84_v25 = vld [vmem:[%s8290_s0 + $0x648] sm:$0xff]  ;;  %v85_v26 = vld [vmem:[%s8290_s0 + $0x650] sm:$0xff] }
   0x6   :  { %v86_v27 = vld [vmem:[%s8290_s0 + $0x658] sm:$0xff]  ;;  %v87_v28 = vld [vmem:[%s8290_s0 + $0x660] sm:$0xff]  ;;  %v88_v29 = vld [vmem:[%s8290_s0 + $0x668] sm:$0xff] }
   0x7   :  { %v89_v30 = vld [vmem:[%s8290_s0 + $0x670] sm:$0xff]  ;;  %v90_v31 = vld [vmem:[%s8290_s0 + $0x678] sm:$0xff]  ;;  %v91_v32 = vld [vmem:[%s8290_s0 + $0x680] sm:$0xff] }
   0x8   :  { %v92_v33 = vld [vmem:[%s8290_s0 + $0x688] sm:$0xff]  ;;  %v93_v35 = vld [vmem:[%s8290_s0 + $0x690] sm:$0xff]  ;;  %v214_v36 = vld [vmem:[%s8290_s0 + $0x40] sm:$0xff] }
   0x9   :  { %v215_v34 = vld [vmem:[%s8290_s0 + $0x48] sm:$0xff]  ;;  %v213_v37 = vld [vmem:[%s8290_s0 + $0x38] sm:$0xff]  ;;  %v212_v38 = vld [vmem:[%s8290_s0 + $0x30] sm:$0xff] }
   0xa   :  { %278 = vmatpush.msra.mxu2 %v215_v34  ;;  %v94_v39 = vld [vmem:[%s8290_s0 + $0x698] sm:$0xff]  ;;  %v95_v40 = vld [vmem:[%s8290_s0 + $0x6a0] sm:$0xff]  ;;  %v96_v41 = vld [vmem:[%s8290_s0 + $0x6a8] sm:$0xff] }
   0xb   :  { %v5863_v42 = vld [vmem:[%s8290_s0 + $0x7d0] sm:$0xff]  ;;  %v5874_v44 = vld [vmem:[%s8290_s0 + $0x7c8] sm:$0xff]  ;;  %v5883_v46 = vld [vmem:[%s8290_s0 + $0x7c0] sm:$0xff] }
   0xc   :  { %279 = vmatpush.msra.mxu2 %v214_v36  ;;  %393 = vrot.lane.b32.xlu0 %v5863_v42, %s5705_s26  ;;  %v97_v43 = vld [vmem:[%s8290_s0 + $0x6b0] sm:$0xff]  ;;  %v5888_v47 = vld [vmem:[%s8290_s0 + $0x7a0] sm:$0xff]  ;;  %v5898_v49 = vld [vmem:[%s8290_s0 + $0x7b8] sm:$0xff] }
   0xd   :  { %4922 = vmatmul.msk.f32.gmra.mxu0 %vm28_vm1, %v21_v3  ;;  %389 = vrot.lane.b32.xlu1 %v5883_v46, %s5705_s26  ;;  %v5903_v50 = vld [vmem:[%s8290_s0 + $0x788] sm:$0xff]  ;;  %v5913_v52 = vld [vmem:[%s8290_s0 + $0x798] sm:$0xff]  ;;  %v5928_v55 = vld [vmem:[%s8290_s0 + $0x780] sm:$0xff] }
   0xe   :  { %280 = vmatpush.msra.mxu2 %v213_v37  ;;  %v5918_v53 = vld [vmem:[%s8290_s0 + $0x778] sm:$0xff]  ;;  %v5938_v59 = vld [vmem:[%s8290_s0 + $0x7b0] sm:$0xff]  ;;  %v5946_v61 = vld [vmem:[%s8290_s0 + $0x7a8] sm:$0xff] }
   0xf   :  { %385 = vrot.lane.b32.xlu2 %v5938_v59, %s5705_s26  ;;  %v5954_v63 = vld [vmem:[%s8290_s0 + $0x790] sm:$0xff]  ;;  %v5991_v34 = vld [vmem:[%s8290_s0 + $0x760] sm:$0xff] }
  0x10   :  { %281 = vmatpush.msra.mxu2 %v212_v38 }
  0x14   :  { %391 = vrot.lane.b32.xlu0 %v5874_v44, %s5705_s26 }
  0x15   :  { %4923 = vmatmul.msk.f32.gmra.mxu0 %vm28_vm1, %v22_v4  ;;  %387 = vrot.lane.b32.xlu1 %v5898_v49, %s5705_s26 }
  0x17   :  { %383 = vrot.lane.b32.xlu2 %v5946_v61, %s5705_s26 }
  0x1c   :  { %381 = vrot.lane.b32.xlu0 %v5888_v47, %s5705_s26 }
  0x1d   :  { %4924 = vmatmul.msk.f32.gmra.mxu0 %vm28_vm1, %v23_v5  ;;  %379 = vrot.lane.b32.xlu1 %v5913_v52, %s5705_s26 }
  0x1f   :  { %377 = vrot.lane.b32.xlu2 %v5954_v63, %s5705_s26 }
  0x24   :  { %375 = vrot.lane.b32.xlu0 %v5903_v50, %s5705_s26 }
  0x25   :  { %373 = vrot.lane.b32.xlu1 %v5928_v55, %s5705_s26 }
  0x2c   :  { %371 = vrot.lane.b32.xlu0 %v5918_v53, %s5705_s26 }
  0x82   :  { %v62_v6 = vpop.f32.mrf.mxu0 }
  0x83   :  { %v63_v18 = vadd.f32 %v5364_v9, %v62_v6 }
  0x85   :  { %v5786_v22 = vadd.f32 %v74_v20, %v63_v18 }
  0x8a   :  { %v65_v7 = vpop.f32.mrf.mxu0 }
  0x8b   :  { %v66_v15 = vadd.f32 %v5364_v9, %v65_v7 }
  0x8d   :  { %v5783_v21 = vadd.f32 %v75_v17, %v66_v15 }
  0x92   :  { %v68_v8 = vpop.f32.mrf.mxu0 }
  0x93   :  { %v69_v12 = vadd.f32 %v5364_v9, %v68_v8 }
  0x95   :  { %v5777_v19 = vadd.f32 %v76_v14, %v69_v12 }
  0x9a   :  { %v71_v10 = vpop.f32.mrf.mxu0 }
  0x9b   :  { %v72_v13 = vadd.f32 %v5364_v9, %v71_v10 }
  0x9d   :  { %v5771_v16 = vadd.f32 %v77_v11, %v72_v13 }
  0x9f   :  { %159 = vmatpush.msra.mxu1 %v5771_v16 }
  0xa1   :  { %160 = vmatpush.msra.mxu1 %v5777_v19 }
  0xa3   :  { %161 = vmatpush.msra.mxu1 %v5783_v21 }
  0xa5   :  { %162 = vmatpush.msra.mxu1 %v5786_v22 }
  0xa6   :  { %4925 = vmatmul.msk.f32.vlgmr.msra.gmra.mxu1 %vm98_vm2, %v82_v23  ;;  %v394_v23 = vpop.permute.xlu0 %393 }
  0xae   :  { %4926 = vmatmul.msk.f32.gmra.mxu1 %vm98_vm2, %v83_v24 }
  0xb6   :  { %4927 = vmatmul.msk.f32.gmra.mxu1 %vm98_vm2, %v84_v25  ;;  %v5978_v25 = vld [vmem:[%s8290_s0 + $0x50] ss:$0 sm:$0xff] }
  0xbe   :  { %4928 = vmatmul.msk.f32.gmra.mxu1 %vm98_vm2, %v85_v26 }
  0xc6   :  { %4929 = vmatmul.msk.f32.gmra.mxu1 %vm98_vm2, %v86_v27 }
  0xce   :  { %4930 = vmatmul.msk.f32.gmra.mxu1 %vm98_vm2, %v87_v28  ;;  %v392_v28 = vpop.permute.xlu0 %391 }
  0xd6   :  { %4931 = vmatmul.msk.f32.gmra.mxu1 %vm98_vm2, %v88_v29  ;;  %v390_v29 = vpop.permute.xlu1 %389  ;;  %v382_v36 = vpop.permute.xlu0 %381 }
  0xde   :  { %4932 = vmatmul.msk.f32.gmra.mxu1 %vm98_vm2, %v89_v30 }
  0xe6   :  { %4933 = vmatmul.msk.f32.gmra.mxu1 %vm98_vm2, %v90_v31  ;;  %v386_v31 = vpop.permute.xlu2 %385 }
  0xee   :  { %4934 = vmatmul.msk.f32.gmra.mxu1 %vm98_vm2, %v91_v32  ;;  %v384_v37 = vpop.permute.xlu2 %383 }
  0xf6   :  { %4935 = vmatmul.msk.f32.gmra.mxu1 %vm98_vm2, %v92_v33 }
  0xfe   :  { %4936 = vmatmul.msk.f32.gmra.mxu1 %vm98_vm2, %v93_v35 }
 0x106   :  { %4937 = vmatmul.msk.f32.gmra.mxu1 %vm98_vm2, %v94_v39 }
 0x10e   :  { %4938 = vmatmul.msk.f32.gmra.mxu1 %vm98_vm2, %v95_v40 }
 0x116   :  { %4939 = vmatmul.msk.f32.gmra.mxu1 %vm98_vm2, %v96_v41  ;;  %v6006_v41 = vld [vmem:[%s8290_s0 + $0x768] sm:$0xff] }
 0x11e   :  { %4940 = vmatmul.msk.f32.gmra.mxu1 %vm98_vm2, %v97_v43 }
 0x123   :  { %v164_v45 = vpop.f32.mrf.mxu1 }
 0x124   :  { %4941 = vmatmul.msk.f32.vlgmr.msra.gmra.mxu2 %vm98_vm2, %v164_v45 }
 0x12b   :  { %v167_v48 = vpop.f32.mrf.mxu1 }
 0x12c   :  { %4942 = vmatmul.msk.f32.gmra.mxu2 %vm98_vm2, %v167_v48  ;;  %v376_v48 = vpop.permute.xlu0 %375 }
 0x133   :  { %v170_v51 = vpop.f32.mrf.mxu1 }
 0x134   :  { %4943 = vmatmul.msk.f32.gmra.mxu2 %vm98_vm2, %v170_v51 }
 0x13b   :  { %v173_v54 = vpop.f32.mrf.mxu1 }
 0x13c   :  { %4944 = vmatmul.msk.f32.gmra.mxu2 %vm98_vm2, %v173_v54 }
 0x143   :  { %v176_v56 = vpop.f32.mrf.mxu1 }
 0x144   :  { %4945 = vmatmul.msk.f32.gmra.mxu2 %vm98_vm2, %v176_v56  ;;  %v378_v56 = vpop.permute.xlu2 %377 }
 0x14b   :  { %v179_v57 = vpop.f32.mrf.mxu1 }
 0x14c   :  { %4946 = vmatmul.msk.f32.gmra.mxu2 %vm98_vm2, %v179_v57 }
 0x153   :  { %v182_v58 = vpop.f32.mrf.mxu1 }
 0x154   :  { %4947 = vmatmul.msk.f32.gmra.mxu2 %vm98_vm2, %v182_v58 }
 0x15b   :  { %v185_v60 = vpop.f32.mrf.mxu1 }
 0x15c   :  { %4948 = vmatmul.msk.f32.gmra.mxu2 %vm98_vm2, %v185_v60  ;;  %v6025_v60 = vld [vmem:[%s8290_s0 + $0x770] sm:$0xff] }
 0x163   :  { %v188_v62 = vpop.f32.mrf.mxu1 }
 0x164   :  { %4949 = vmatmul.msk.f32.gmra.mxu2 %vm98_vm2, %v188_v62 }
 0x16b   :  { %v191_v0 = vpop.f32.mrf.mxu1 }
 0x16c   :  { %4950 = vmatmul.msk.f32.gmra.mxu2 %vm98_vm2, %v191_v0 }
 0x173   :  { %v194_v1 = vpop.f32.mrf.mxu1 }
 0x174   :  { %4951 = vmatmul.msk.f32.gmra.mxu2 %vm98_vm2, %v194_v1  ;;  %v372_v1 = vpop.permute.xlu0 %371 }
 0x17b   :  { %v197_v2 = vpop.f32.mrf.mxu1 }
 0x17c   :  { %4952 = vmatmul.msk.f32.gmra.mxu2 %vm98_vm2, %v197_v2 }
 0x183   :  { %v200_v3 = vpop.f32.mrf.mxu1 }
 0x184   :  { %4953 = vmatmul.msk.f32.gmra.mxu2 %vm98_vm2, %v200_v3  ;;  %v388_v3 = vpop.permute.xlu1 %387 }
 0x18b   :  { %v203_v4 = vpop.f32.mrf.mxu1 }
 0x18c   :  { %4954 = vmatmul.msk.f32.gmra.mxu2 %vm98_vm2, %v203_v4 }
 0x193   :  { %v206_v5 = vpop.f32.mrf.mxu1 }
 0x194   :  { %4955 = vmatmul.msk.f32.gmra.mxu2 %vm98_vm2, %v206_v5 }
 0x19b   :  { %v209_v6 = vpop.f32.mrf.mxu1 }
 0x19c   :  { %4956 = vmatmul.msk.f32.gmra.mxu2 %vm98_vm2, %v209_v6 }
 0x1a7   :  { %v5965_v7 = vpop.f32.mrf.mxu2 }
 0x1af   :  { %v5967_v8 = vpop.f32.mrf.mxu2 }
 0x1b7   :  { %v5969_v9 = vpop.f32.mrf.mxu2 }
 0x1bf   :  { %v5971_v10 = vpop.f32.mrf.mxu2 }
 0x1c7   :  { %v295_v11 = vpop.f32.mrf.mxu2 }
 0x1c8   :  { %v6032_v62 = vadd.f32 %v5978_v25, %v295_v11 }
 0x1ca   :  { %v415_v4 = vmul.f32 %v372_v1, %v6032_v62 }
 0x1cf   :  { %v5973_v12 = vpop.f32.mrf.mxu2 }
 0x1d7   :  { %v301_v13 = vpop.f32.mrf.mxu2 }
 0x1d8   :  { %v6047_v11 = vadd.f32 %v5978_v25, %v301_v13  ;;  %v6062_v13 = vadd.f32 %v5978_v25, %v5973_v12  ;;  %v6075_v12 = vadd.f32 %v5978_v25, %v5967_v8 }
 0x1df   :  { %v304_v14 = vpop.f32.mrf.mxu2 }
 0x1e0   :  { %v6015_v51 = vadd.f32 %v5978_v25, %v304_v14  ;;  %v417_v14 = vmul.f32 %v376_v48, %v6047_v11 }
 0x1e2   :  { %v418_v57 = vmul.f32 %v378_v56, %v6015_v51 }
 0x1e7   :  { %v307_v15 = vpop.f32.mrf.mxu2 }
 0x1ef   :  { %v310_v17 = vpop.f32.mrf.mxu2 }
 0x1f0   :  { %v6035_v0 = vadd.f32 %v5978_v25, %v310_v17  ;;  %v331_v17 = vld [vmem:[%s8290_s0 + $0x758] sm:$0xff] }
 0x1f2   :  { %v420_v5 = vmul.f32 %v382_v36, %v6035_v0 }
 0x1f7   :  { %v313_v18 = vpop.f32.mrf.mxu2 }
 0x1f8   :  { %v5998_v38 = vadd.f32 %v5978_v25, %v313_v18  ;;  %v380_v18 = vpop.permute.xlu1 %379 }
 0x1fa   :  { %v421_v43 = vmul.f32 %v384_v37, %v5998_v38 }
 0x1ff   :  { %v316_v20 = vpop.f32.mrf.mxu2 }
 0x200   :  { %v6018_v54 = vadd.f32 %v5978_v25, %v316_v20  ;;  %v6056_v20 = vadd.f32 %v5978_v25, %v307_v15  ;;  %v6069_v15 = vadd.f32 %v5978_v25, %v5971_v10  ;;  %v6083_v10 = vadd.f32 %v5978_v25, %v5969_v9 }
 0x202   :  { %v422_v58 = vmul.f32 %v386_v31, %v6018_v54 }
 0x207   :  { %v319_v24 = vpop.f32.mrf.mxu2 }
 0x208   :  { %v6038_v2 = vadd.f32 %v5978_v25, %v319_v24  ;;  %v374_v24 = vpop.permute.xlu1 %373 }
 0x20a   :  { %v423_v6 = vmul.f32 %v388_v3, %v6038_v2 }
 0x20f   :  { %v322_v26 = vpop.f32.mrf.mxu2 }
 0x210   :  { %v5981_v27 = vadd.f32 %v5978_v25, %v322_v26  ;;  %v416_v26 = vmul.f32 %v374_v24, %v6062_v13 }
 0x212   :  { %v424_v30 = vmul.f32 %v390_v29, %v5981_v27 }
 0x214   :  { %533 = vrot.lane.b32.xlu0 %v424_v30, %s5706_s27 }
 0x217   :  { %v325_v32 = vpop.f32.mrf.mxu2 }
 0x218   :  { %v5986_v33 = vadd.f32 %v5978_v25, %v325_v32 }
 0x21a   :  { %v425_v35 = vmul.f32 %v392_v28, %v5986_v33 }
 0x21c   :  { %365 = vrot.lane.b32.xlu0 %v5991_v34, %s5705_s26  ;;  %535 = vrot.lane.b32.xlu1 %v425_v35, %s5706_s27 }
 0x21f   :  { %v328_v39 = vpop.f32.mrf.mxu2 }
 0x220   :  { %v6001_v40 = vadd.f32 %v5978_v25, %v328_v39  ;;  %v6087_v39 = vadd.f32 %v5978_v25, %v5965_v7 }
 0x222   :  { %v426_v45 = vmul.f32 %v394_v23, %v6001_v40  ;;  %v419_v23 = vmul.f32 %v380_v18, %v6056_v20  ;;  %v700_v18 = vld [vmem:[%s8290_s0 + $0x4b8] sm:$0xff] }
 0x224   :  { %527 = vrot.lane.b32.xlu0 %v421_v43, %s5706_s27  ;;  %367 = vrot.lane.b32.xlu1 %v6006_v41, %s5705_s26 }
 0x225   :  { %537 = vrot.lane.b32.xlu2 %v426_v45, %s5706_s27 }
 0x22c   :  { %521 = vrot.lane.b32.xlu0 %v418_v57, %s5706_s27  ;;  %529 = vrot.lane.b32.xlu1 %v422_v58, %s5706_s27 }
 0x22d   :  { %369 = vrot.lane.b32.xlu2 %v6025_v60, %s5705_s26 }
 0x234   :  { %515 = vrot.lane.b32.xlu0 %v415_v4, %s5706_s27  ;;  %525 = vrot.lane.b32.xlu1 %v420_v5, %s5706_s27 }
 0x235   :  { %531 = vrot.lane.b32.xlu2 %v423_v6, %s5706_s27 }
 0x23c   :  { %519 = vrot.lane.b32.xlu1 %v417_v14, %s5706_s27 }
 0x23d   :  { %363 = vrot.lane.b32.xlu2 %v331_v17, %s5705_s26 }
 0x245   :  { %523 = vrot.lane.b32.xlu2 %v419_v23, %s5706_s27 }
 0x24d   :  { %517 = vrot.lane.b32.xlu2 %v416_v26, %s5706_s27 }
 0x27f   :  { %v538_v28 = vpop.permute.xlu2 %537 }
 0x280   :  { %4957 = vmatpush.xpose.msk.msra.mxu3 %vm98_vm2, %v538_v28 }
 0x286   :  { %v534_v29 = vpop.permute.xlu0 %533 }
 0x287   :  { %v370_v30 = vpop.permute.xlu2 %369 }
 0x288   :  { %v414_v31 = vmul.f32 %v370_v30, %v6069_v15  ;;  %v702_v30 = vld [vmem:[%s8290_s0 + $0x4c8] sm:$0xff] }
 0x28a   :  { %513 = vrot.lane.b32.xlu1 %v414_v31, %s5706_s27 }
 0x28e   :  { %v366_v32 = vpop.permute.xlu0 %365  ;;  %v536_v35 = vpop.permute.xlu1 %535 }
 0x28f   :  { %v412_v36 = vmul.f32 %v366_v32, %v6075_v12  ;;  %v532_v37 = vpop.permute.xlu2 %531  ;;  %4958 = vmatpush.xpose.msk.msra.mxu3 %vm98_vm2, %v536_v35 }
 0x291   :  { %509 = vrot.lane.b32.xlu0 %v412_v36, %s5706_s27 }
 0x293   :  { %4959 = vmatpush.xpose.msk.msra.mxu3 %vm98_vm2, %v534_v29 }
 0x296   :  { %v368_v8 = vpop.permute.xlu1 %367  ;;  %v528_v7 = vpop.permute.xlu0 %527 }
 0x297   :  { %v413_v43 = vmul.f32 %v368_v8, %v6083_v10  ;;  %v364_v45 = vpop.permute.xlu2 %363  ;;  %4960 = vmatpush.xpose.msk.msra.mxu3 %vm98_vm2, %v532_v37 }
 0x298   :  { %v411_v48 = vmul.f32 %v364_v45, %v6087_v39 }
 0x299   :  { %455 = vrot.lane.b32.xlu0 %v5874_v44, %s5707_s1  ;;  %511 = vrot.lane.b32.xlu2 %v413_v43, %s5706_s27 }
 0x29a   :  { %507 = vrot.lane.b32.xlu1 %v411_v48, %s5706_s27 }
 0x29e   :  { %v530_v9 = vpop.permute.xlu1 %529 }
 0x29f   :  { %4961 = vmatpush.xpose.msk.msra.mxu3 %vm98_vm2, %v530_v9  ;;  %v524_v25 = vpop.permute.xlu2 %523 }
 0x2a1   :  { %449 = vrot.lane.b32.xlu0 %v5938_v59, %s5707_s1  ;;  %457 = vrot.lane.b32.xlu2 %v5863_v42, %s5707_s1  ;;  %v522_v42 = vpop.permute.xlu0 %521 }
 0x2a2   :  { %453 = vrot.lane.b32.xlu1 %v5883_v46, %s5707_s1 }
 0x2a3   :  { %4962 = vmatpush.xpose.msk.msra.mxu3 %vm98_vm2, %v528_v7 }
 0x2a6   :  { %v526_v44 = vpop.permute.xlu1 %525 }
 0x2a7   :  { %4963 = vmatpush.xpose.msk.msra.mxu3 %vm98_vm2, %v526_v44 }
 0x2a9   :  { %445 = vrot.lane.b32.xlu0 %v5888_v47, %s5707_s1  ;;  %451 = vrot.lane.b32.xlu2 %v5898_v49, %s5707_s1  ;;  %v518_v47 = vpop.permute.xlu2 %517  ;;  %v516_v49 = vpop.permute.xlu0 %515 }
 0x2aa   :  { %447 = vrot.lane.b32.xlu1 %v5946_v61, %s5707_s1 }
 0x2ab   :  { %4964 = vmatpush.xpose.msk.msra.mxu3 %vm98_vm2, %v524_v25  ;;  %v704_v25 = vld [vmem:[%s8290_s0 + $0x4d8] sm:$0xff] }
 0x2ae   :  { %v520_v46 = vpop.permute.xlu1 %519 }
 0x2af   :  { %4965 = vmatpush.xpose.msk.msra.mxu3 %vm98_vm2, %v522_v42 }
 0x2b1   :  { %441 = vrot.lane.b32.xlu0 %v5954_v63, %s5707_s1  ;;  %431 = vrot.lane.b32.xlu2 %v6006_v41, %s5707_s1 }
 0x2b2   :  { %443 = vrot.lane.b32.xlu1 %v5913_v52, %s5707_s1 }
 0x2b3   :  { %4966 = vmatpush.xpose.msk.msra.mxu3 %vm98_vm2, %v520_v46 }
 0x2b7   :  { %4967 = vmatpush.xpose.msk.msra.mxu3 %vm98_vm2, %v518_v47 }
 0x2b9   :  { %427 = vrot.lane.b32.xlu0 %v331_v17, %s5707_s1  ;;  %429 = vrot.lane.b32.xlu2 %v5991_v34, %s5707_s1 }
 0x2ba   :  { %439 = vrot.lane.b32.xlu1 %v5903_v50, %s5707_s1 }
 0x2bb   :  { %4968 = vmatpush.xpose.msk.msra.mxu3 %vm98_vm2, %v516_v49 }
 0x2c2   :  { %437 = vrot.lane.b32.xlu1 %v5928_v55, %s5707_s1 }
 0x2ca   :  { %435 = vrot.lane.b32.xlu1 %v5918_v53, %s5707_s1 }
 0x2d2   :  { %433 = vrot.lane.b32.xlu1 %v6025_v60, %s5707_s1 }
 0x2f3   :  { %v512_v59 = vpop.permute.xlu2 %511 }
 0x2fb   :  { %v458_v50 = vpop.permute.xlu2 %457 }
 0x2fc   :  { %v514_v52 = vpop.permute.xlu1 %513  ;;  %v490_v34 = vmul.f32 %v458_v50, %v6001_v40 }
 0x2fd   :  { %4969 = vmatpush.xpose.msk.msra.mxu3 %vm98_vm2, %v514_v52 }
 0x301   :  { %4970 = vmatpush.xpose.msk.msra.mxu3 %vm98_vm2, %v512_v59  ;;  %v703_v59 = vld [vmem:[%s8290_s0 + $0x4d0] sm:$0xff] }
 0x303   :  { %v510_v61 = vpop.permute.xlu0 %509  ;;  %v452_v43 = vpop.permute.xlu2 %451 }
 0x304   :  { %v487_v9 = vmul.f32 %v452_v43, %v6038_v2 }
 0x305   :  { %4971 = vmatpush.xpose.msk.msra.mxu3 %vm98_vm2, %v510_v61 }
 0x30b   :  { %v456_v63 = vpop.permute.xlu0 %455 }
 0x30c   :  { %v489_v55 = vmul.f32 %v456_v63, %v5986_v33  ;;  %v508_v41 = vpop.permute.xlu1 %507 }
 0x30d   :  { %4972 = vmatpush.xpose.msk.msra.mxu3 %vm98_vm2, %v508_v41  ;;  %v707_v41 = vld [vmem:[%s8290_s0 + $0x4f0] sm:$0xff] }
 0x30e   :  { %v5254_v53 = vpack.i.bf16 %v489_v55, %v490_v34 }
 0x310   :  { %4973 = vmatmul.msk.f32.vlgmr.msra.gmra.mxu3 %vm98_vm2, %v6087_v39  ;;  %5255 = vrot.lane.b32.xlu0 %v5254_v53, %s5707_s1 }
 0x313   :  { %v450_v57 = vpop.permute.xlu0 %449 }
 0x314   :  { %v454_v56 = vpop.permute.xlu1 %453  ;;  %v486_v60 = vmul.f32 %v450_v57, %v6018_v54 }
 0x315   :  { %v488_v45 = vmul.f32 %v454_v56, %v5981_v27 }
 0x317   :  { %v5259_v7 = vpack.i.bf16 %v487_v9, %v488_v45 }
 0x318   :  { %4974 = vmatmul.msk.f32.gmra.mxu3 %vm98_vm2, %v6075_v12 }
 0x31b   :  { %v446_v4 = vpop.permute.xlu0 %445 }
 0x31c   :  { %v448_v58 = vpop.permute.xlu1 %447  ;;  %v484_v8 = vmul.f32 %v446_v4, %v6035_v0 }
 0x31d   :  { %v485_v1 = vmul.f32 %v448_v58, %v5998_v38 }
 0x31f   :  { %v5264_v3 = vpack.i.bf16 %v485_v1, %v486_v60 }
 0x320   :  { %4975 = vmatmul.msk.f32.gmra.mxu3 %vm98_vm2, %v6083_v10 }
 0x321   :  { %5265 = vrot.lane.b32.xlu1 %v5264_v3, %s5707_s1  ;;  %v432_v3 = vpop.permute.xlu2 %431 }
 0x323   :  { %v442_v5 = vpop.permute.xlu0 %441 }
 0x324   :  { %v444_v35 = vpop.permute.xlu1 %443 }
 0x325   :  { %v483_v36 = vmul.f32 %v444_v35, %v6056_v20 }
 0x327   :  { %v5269_v48 = vpack.i.bf16 %v483_v36, %v484_v8  ;;  %v711_v8 = vld [vmem:[%s8290_s0 + $0x510] sm:$0xff] }
 0x328   :  { %4976 = vmatmul.msk.f32.gmra.mxu3 %vm98_vm2, %v6069_v15 }
 0x32b   :  { %v6171_v6 = vpop.permute.xlu0 %427 }
 0x330   :  { %4977 = vmatmul.msk.f32.gmra.mxu3 %vm98_vm2, %v6032_v62 }
 0x338   :  { %4978 = vmatmul.msk.f32.gmra.mxu3 %vm98_vm2, %v6062_v13 }
 0x340   :  { %4979 = vmatmul.msk.f32.gmra.mxu3 %vm98_vm2, %v6047_v11 }
 0x348   :  { %4980 = vmatmul.msk.f32.gmra.mxu3 %vm98_vm2, %v6015_v51 }
 0x350   :  { %4981 = vmatmul.msk.f32.gmra.mxu3 %vm98_vm2, %v6056_v20 }
 0x358   :  { %4982 = vmatmul.msk.f32.gmra.mxu3 %vm98_vm2, %v6035_v0  ;;  %v440_v0 = vpop.permute.xlu1 %439 }
 0x359   :  { %v481_v46 = vmul.f32 %v440_v0, %v6047_v11  ;;  %v705_v11 = vld [vmem:[%s8290_s0 + $0x4e0] sm:$0xff] }
 0x360   :  { %4983 = vmatmul.msk.f32.gmra.mxu3 %vm98_vm2, %v5998_v38  ;;  %v438_v63 = vpop.permute.xlu1 %437 }
 0x361   :  { %v480_v60 = vmul.f32 %v438_v63, %v6062_v13  ;;  %v430_v13 = vpop.permute.xlu2 %429 }
 0x368   :  { %4984 = vmatmul.msk.f32.gmra.mxu3 %vm98_vm2, %v6018_v54  ;;  %v436_v56 = vpop.permute.xlu1 %435 }
 0x369   :  { %v479_v58 = vmul.f32 %v436_v56, %v6032_v62 }
 0x36b   :  { %v5279_v1 = vpack.i.bf16 %v479_v58, %v480_v60 }
 0x370   :  { %4985 = vmatmul.msk.f32.gmra.mxu3 %vm98_vm2, %v6038_v2  ;;  %v482_v2 = vmul.f32 %v442_v5, %v6015_v51  ;;  %v434_v4 = vpop.permute.xlu1 %433 }
 0x371   :  { %v478_v5 = vmul.f32 %v434_v4, %v6069_v15  ;;  %v476_v15 = vmul.f32 %v430_v13, %v6075_v12 }
 0x372   :  { %v5274_v47 = vpack.i.bf16 %v481_v46, %v482_v2 }
 0x378   :  { %4986 = vmatmul.msk.f32.gmra.mxu3 %vm98_vm2, %v5981_v27 }
 0x380   :  { %4987 = vmatmul.msk.f32.gmra.mxu3 %vm98_vm2, %v5986_v33  ;;  %v701_v33 = vld [vmem:[%s8290_s0 + $0x4c0] sm:$0xff] }
 0x382   :  { %v5256_v14 = vpop.permute.xlu0 %5255 }
 0x383   :  { %v5257_v17 = vunpack.i.l.bf16 %v5256_v14  ;;  %v5258_v38 = vunpack.i.h.bf16 %v5256_v14 }
 0x385   :  { %940 = vmatpush.msrb.mxu0 %v5257_v17  ;;  %v477_v17 = vmul.f32 %v432_v3, %v6083_v10 }
 0x387   :  { %941 = vmatpush.msrb.mxu0 %v5258_v38 }
 0x388   :  { %4988 = vmatmul.msk.f32.gmra.mxu3 %vm98_vm2, %v6001_v40 }
 0x393   :  { %v636_v54 = vpop.f32.mrf.mxu3 }
 0x394   :  { %v684_v23 = vmul.f32 0.35355338, %v636_v54  ;;  %v706_v54 = vld [vmem:[%s8290_s0 + $0x4e8] sm:$0xff] }
 0x396   :  { %v6180_v24 = vadd.f32 %v700_v18, %v684_v23  ;;  %v5284_v18 = vpack.i.bf16 %v477_v17, %v478_v5  ;;  %v475_v23 = vmul.f32 %v6171_v6, %v6087_v39  ;;  %v710_v39 = vld [vmem:[%s8290_s0 + $0x508] sm:$0xff] }
 0x398   :  { %732 = vmax.xlane.f32.xlu2 %v6180_v24 }
 0x39b   :  { %v639_v26 = vpop.f32.mrf.mxu3 }
 0x39c   :  { %v685_v28 = vmul.f32 0.35355338, %v639_v26 }
 0x39e   :  { %v6186_v29 = vadd.f32 %v701_v33, %v685_v28  ;;  %v709_v33 = vld [vmem:[%s8290_s0 + $0x500] sm:$0xff]  ;;  %v5289_v28 = vpack.i.bf16 %v475_v23, %v476_v15 }
 0x3a0   :  { %734 = vmax.xlane.f32.xlu0 %v6186_v29 }
 0x3a3   :  { %v642_v40 = vpop.f32.mrf.mxu3 }
 0x3a4   :  { %v686_v31 = vmul.f32 0.35355338, %v642_v40 }
 0x3a6   :  { %v6192_v32 = vadd.f32 %v702_v30, %v686_v31 }
 0x3a8   :  { %736 = vmax.xlane.f32.xlu1 %v6192_v32 }
 0x3ab   :  { %v645_v37 = vpop.f32.mrf.mxu3 }
 0x3ac   :  { %v687_v49 = vmul.f32 0.35355338, %v645_v37 }
 0x3ae   :  { %v6213_v61 = vadd.f32 %v703_v59, %v687_v49  ;;  %v708_v49 = vld [vmem:[%s8290_s0 + $0x4f8] sm:$0xff] }
 0x3b0   :  { %5270 = vrot.lane.b32.xlu2 %v5269_v48, %s5707_s1  ;;  %v5266_v48 = vpop.permute.xlu1 %5265 }
 0x3b1   :  { %v5268_v56 = vunpack.i.h.bf16 %v5266_v48 }
 0x3b3   :  { %v648_v44 = vpop.f32.mrf.mxu3 }
 0x3b4   :  { %v688_v42 = vmul.f32 0.35355338, %v648_v44  ;;  %5260 = vrot.lane.b32.xlu0 %v5259_v7, %s5707_s1 }
 0x3b6   :  { %v6204_v20 = vadd.f32 %v704_v25, %v688_v42  ;;  %v712_v42 = vld [vmem:[%s8290_s0 + $0x518] sm:$0xff] }
 0x3b8   :  { %740 = vmax.xlane.f32.xlu1 %v6204_v20 }
 0x3bb   :  { %v651_v27 = vpop.f32.mrf.mxu3 }
 0x3bc   :  { %v689_v50 = vmul.f32 0.35355338, %v651_v27 }
 0x3be   :  { %v6219_v51 = vadd.f32 %v705_v11, %v689_v50 }
 0x3c3   :  { %v654_v52 = vpop.f32.mrf.mxu3 }
 0x3c4   :  { %v690_v38 = vmul.f32 0.35355338, %v654_v52 }
 0x3c6   :  { %v6237_v62 = vadd.f32 %v706_v54, %v690_v38 }
 0x3cb   :  { %v657_v34 = vpop.f32.mrf.mxu3 }
 0x3cc   :  { %v691_v55 = vmul.f32 0.35355338, %v657_v34  ;;  %v5267_v34 = vunpack.i.l.bf16 %v5266_v48 }
 0x3ce   :  { %v6225_v53 = vadd.f32 %v707_v41, %v691_v55 }
 0x3d1   :  { %5275 = vrot.lane.b32.xlu1 %v5274_v47, %s5707_s1 }
 0x3d3   :  { %v660_v57 = vpop.f32.mrf.mxu3 }
 0x3d4   :  { %v692_v47 = vmul.f32 0.35355338, %v660_v57  ;;  %v713_v57 = vld [vmem:[%s8290_s0 + $0x520] sm:$0xff] }
 0x3d6   :  { %v6283_v11 = vadd.f32 %v708_v49, %v692_v47 }
 0x3d9   :  { %738 = vmax.xlane.f32.xlu2 %v6213_v61 }
 0x3db   :  { %v663_v14 = vpop.f32.mrf.mxu3 }
 0x3dc   :  { %v693_v26 = vmul.f32 0.35355338, %v663_v14 }
 0x3de   :  { %742 = vmax.xlane.f32.xlu0 %v6219_v51  ;;  %v6247_v40 = vadd.f32 %v709_v33, %v693_v26 }
 0x3e3   :  { %v666_v10 = vpop.f32.mrf.mxu3 }
 0x3e4   :  { %v694_v30 = vmul.f32 0.35355338, %v666_v10 }
 0x3e6   :  { %746 = vmax.xlane.f32.xlu0 %v6225_v53  ;;  %v6253_v12 = vadd.f32 %v710_v39, %v694_v30 }
 0x3eb   :  { %v669_v6 = vpop.f32.mrf.mxu3 }
 0x3ec   :  { %v695_v36 = vmul.f32 0.35355338, %v669_v6 }
 0x3ee   :  { %v6260_v43 = vadd.f32 %v711_v8, %v695_v36 }
 0x3f1   :  { %5280 = vrot.lane.b32.xlu2 %v5279_v1, %s5707_s1 }
 0x3f3   :  { %v672_v45 = vpop.f32.mrf.mxu3 }
 0x3f4   :  { %v696_v44 = vmul.f32 0.35355338, %v672_v45 }
 0x3f6   :  { %v6270_v0 = vadd.f32 %v712_v42, %v696_v44  ;;  %v715_v44 = vld [vmem:[%s8290_s0 + $0x530] sm:$0xff] }
 0x3f9   :  { %5285 = vrot.lane.b32.xlu2 %v5284_v18, %s5707_s1 }
 0x3fb   :  { %744 = vmax.xlane.f32.xlu1 %v6237_v62 }
 0x401   :  { %5290 = vrot.lane.b32.xlu2 %v5289_v28, %s5707_s1 }
 0x403   :  { %750 = vmax.xlane.f32.xlu1 %v6247_v40 }
 0x40b   :  { %752 = vmax.xlane.f32.xlu1 %v6253_v12  ;;  %v733_v31 = vpop.xlane.xlu2 %732 }
 0x40c   :  { %v764_v35 = vsub.f32 %v6180_v24, %v733_v31 }
 0x40e   :  { %v780_v37 = vmul.f32 1.442695, %v764_v35 }
 0x410   :  { %5403 = vpow2.f32 %v780_v37 }
 0x413   :  { %754 = vmax.xlane.f32.xlu1 %v6260_v43  ;;  %v735_v9 = vpop.xlane.xlu0 %734  ;;  %v5271_v41 = vpop.permute.xlu2 %5270 }
 0x414   :  { %v765_v7 = vsub.f32 %v6186_v29, %v735_v9  ;;  %v5272_v58 = vunpack.i.l.bf16 %v5271_v41  ;;  %v5273_v1 = vunpack.i.h.bf16 %v5271_v41 }
 0x416   :  { %v6264_v25 = vpop.eup %5403  ;;  %v782_v24 = vmul.f32 1.442695, %v765_v7 }
 0x417   :  { %812 = vadd.xlane.f32.xlu0 %v6264_v25 }
 0x418   :  { %5405 = vpow2.f32 %v782_v24 }
 0x41b   :  { %v737_v27 = vpop.xlane.xlu1 %736  ;;  %756 = vmax.xlane.f32.xlu1 %v6270_v0 }
 0x41c   :  { %v766_v46 = vsub.f32 %v6192_v32, %v737_v27  ;;  %v675_v32 = vpop.f32.mrf.mxu3 }
 0x41d   :  { %v697_v55 = vmul.f32 0.35355338, %v675_v32 }
 0x41e   :  { %v6274_v2 = vpop.eup %5405  ;;  %v784_v29 = vmul.f32 1.442695, %v766_v46 }
 0x41f   :  { %814 = vadd.xlane.f32.xlu0 %v6274_v2  ;;  %v6289_v60 = vadd.f32 %v713_v57, %v697_v55 }
 0x420   :  { %5407 = vpow2.f32 %v784_v29 }
 0x426   :  { %v6280_v52 = vpop.eup %5407  ;;  %v5261_v59 = vpop.permute.xlu0 %5260 }
 0x427   :  { %816 = vadd.xlane.f32.xlu0 %v6280_v52  ;;  %v5262_v50 = vunpack.i.l.bf16 %v5261_v59  ;;  %v5263_v63 = vunpack.i.h.bf16 %v5261_v59 }
 0x429   :  { %942 = vmatpush.msrb.mxu0 %v5262_v50  ;;  %v714_v50 = vld [vmem:[%s8290_s0 + $0x528] sm:$0xff] }
 0x42a   :  { %748 = vmax.xlane.f32.xlu2 %v6283_v11 }
 0x42b   :  { %943 = vmatpush.msrb.mxu0 %v5263_v63  ;;  %v741_v3 = vpop.xlane.xlu1 %740 }
 0x42c   :  { %v768_v18 = vsub.f32 %v6204_v20, %v741_v3 }
 0x42d   :  { %944 = vmatpush.msrb.mxu0 %v5267_v34 }
 0x42e   :  { %v788_v15 = vmul.f32 1.442695, %v768_v18 }
 0x42f   :  { %945 = vmatpush.msrb.mxu0 %v5268_v56 }
 0x431   :  { %946 = vmatpush.msrb.mxu0 %v5272_v58 }
 0x432   :  { %758 = vmax.xlane.f32.xlu2 %v6289_v60 }
 0x433   :  { %947 = vmatpush.msrb.mxu0 %v5273_v1 }
 0x443   :  { %v5276_v4 = vpop.permute.xlu1 %5275 }
 0x444   :  { %v5277_v5 = vunpack.i.l.bf16 %v5276_v4  ;;  %v5278_v14 = vunpack.i.h.bf16 %v5276_v4 }
 0x446   :  { %948 = vmatpush.msrb.mxu0 %v5277_v5 }
 0x448   :  { %949 = vmatpush.msrb.mxu0 %v5278_v14 }
 0x44c   :  { %v739_v17 = vpop.xlane.xlu2 %738 }
 0x44d   :  { %v767_v38 = vsub.f32 %v6213_v61, %v739_v17  ;;  %v678_v61 = vpop.f32.mrf.mxu3 }
 0x44e   :  { %v698_v59 = vmul.f32 0.35355338, %v678_v61 }
 0x44f   :  { %v786_v54 = vmul.f32 1.442695, %v767_v38 }
 0x450   :  { %v6322_v34 = vadd.f32 %v714_v50, %v698_v59 }
 0x451   :  { %5409 = vpow2.f32 %v786_v54  ;;  %v743_v13 = vpop.xlane.xlu0 %742 }
 0x452   :  { %5411 = vpow2.f32 %v788_v15  ;;  %v769_v28 = vsub.f32 %v6219_v51, %v743_v13 }
 0x454   :  { %v5281_v23 = vpop.permute.xlu2 %5280  ;;  %v790_v31 = vmul.f32 1.442695, %v769_v28 }
 0x455   :  { %v5282_v26 = vunpack.i.l.bf16 %v5281_v23  ;;  %v5283_v33 = vunpack.i.h.bf16 %v5281_v23  ;;  %v681_v51 = vpop.f32.mrf.mxu3 }
 0x456   :  { %v699_v9 = vmul.f32 0.35355338, %v681_v51 }
 0x457   :  { %v6294_v10 = vpop.eup %5409  ;;  %950 = vmatpush.msrb.mxu0 %v5282_v26 }
 0x458   :  { %818 = vadd.xlane.f32.xlu0 %v6294_v10  ;;  %v6299_v36 = vpop.eup %5411  ;;  %v6311_v24 = vadd.f32 %v715_v44, %v699_v9 }
 0x459   :  { %v747_v30 = vpop.xlane.xlu0 %746  ;;  %951 = vmatpush.msrb.mxu0 %v5283_v33 }
 0x45a   :  { %v771_v39 = vsub.f32 %v6225_v53, %v747_v30 }
 0x45c   :  { %v794_v20 = vmul.f32 1.442695, %v771_v39  ;;  %v5286_v6 = vpop.permute.xlu2 %5285 }
 0x45d   :  { %v5287_v35 = vunpack.i.l.bf16 %v5286_v6  ;;  %v5288_v37 = vunpack.i.h.bf16 %v5286_v6 }
 0x45e   :  { %5413 = vpow2.f32 %v794_v20 }
 0x45f   :  { %952 = vmatpush.msrb.mxu0 %v5287_v35  ;;  %5415 = vpow2.f32 %v790_v31 }
 0x460   :  { %820 = vadd.xlane.f32.xlu0 %v6299_v36 }
 0x461   :  { %953 = vmatpush.msrb.mxu0 %v5288_v37 }
 0x464   :  { %v6302_v8 = vpop.eup %5413  ;;  %v5291_v45 = vpop.permute.xlu2 %5290 }
 0x465   :  { %826 = vadd.xlane.f32.xlu1 %v6302_v8  ;;  %v5292_v53 = vunpack.i.l.bf16 %v5291_v45  ;;  %v6305_v48 = vpop.eup %5415  ;;  %v5293_v7 = vunpack.i.h.bf16 %v5291_v45 }
 0x467   :  { %954 = vmatpush.msrb.mxu0 %v5292_v53 }
 0x468   :  { %822 = vadd.xlane.f32.xlu0 %v6305_v48 }
 0x469   :  { %955 = vmatpush.msrb.mxu0 %v5293_v7 }
 0x46d   :  { %762 = vmax.xlane.f32.xlu1 %v6311_v24 }
 0x46e   :  { %v745_v42 = vpop.xlane.xlu1 %744 }
 0x46f   :  { %v770_v27 = vsub.f32 %v6237_v62, %v745_v42 }
 0x471   :  { %v792_v46 = vmul.f32 1.442695, %v770_v27 }
 0x473   :  { %5417 = vpow2.f32 %v792_v46 }
 0x476   :  { %v751_v29 = vpop.xlane.xlu1 %750 }
 0x477   :  { %v773_v49 = vsub.f32 %v6247_v40, %v751_v29 }
 0x479   :  { %v6315_v47 = vpop.eup %5417  ;;  %v798_v63 = vmul.f32 1.442695, %v773_v49 }
 0x47a   :  { %824 = vadd.xlane.f32.xlu0 %v6315_v47 }
 0x47b   :  { %5419 = vpow2.f32 %v798_v63 }
 0x47e   :  { %v753_v32 = vpop.xlane.xlu1 %752 }
 0x47f   :  { %v774_v15 = vsub.f32 %v6253_v12, %v753_v32 }
 0x481   :  { %v6326_v41 = vpop.eup %5419  ;;  %v800_v26 = vmul.f32 1.442695, %v774_v15 }
 0x482   :  { %760 = vmax.xlane.f32.xlu0 %v6322_v34 }
 0x486   :  { %v755_v62 = vpop.xlane.xlu1 %754 }
 0x487   :  { %v775_v55 = vsub.f32 %v6260_v43, %v755_v62 }
 0x489   :  { %v802_v56 = vmul.f32 1.442695, %v775_v55 }
 0x48a   :  { %v813_v57 = vpop.xlane.xlu0 %812  ;;  %830 = vadd.xlane.f32.xlu0 %v6326_v41 }
 0x48b   :  { %5421 = vpow2.f32 %v802_v56 }
 0x48c   :  { %5423 = vrcp.f32 %v813_v57 }
 0x48e   :  { %v757_v40 = vpop.xlane.xlu1 %756 }
 0x48f   :  { %v776_v58 = vsub.f32 %v6270_v0, %v757_v40 }
 0x491   :  { %v6330_v1 = vpop.eup %5421  ;;  %v804_v3 = vmul.f32 1.442695, %v776_v58 }
 0x492   :  { %v5424_v4 = vpop.eup %5423  ;;  %834 = vadd.xlane.f32.xlu1 %v6330_v1  ;;  %v815_v5 = vpop.xlane.xlu0 %814 }
 0x493   :  { %5425 = vpow2.f32 %v804_v3  ;;  %v860_v43 = vmul.f32 %v5424_v4, %v6264_v25 }
 0x494   :  { %5427 = vrcp.f32 %v815_v5 }
 0x495   :  { %956 = vmatmul.f32.vlgmr.msrb.gmra.mxu0 %v860_v43 }
 0x499   :  { %v6334_v14 = vpop.eup %5425 }
 0x49a   :  { %v5428_v17 = vpop.eup %5427  ;;  %v817_v38 = vpop.xlane.xlu0 %816  ;;  %836 = vadd.xlane.f32.xlu0 %v6334_v14 }
 0x49b   :  { %5429 = vrcp.f32 %v817_v38  ;;  %v861_v0 = vmul.f32 %v5428_v17, %v6274_v2 }
 0x49d   :  { %959 = vmatmul.f32.gmra.mxu0 %v861_v0  ;;  %v749_v54 = vpop.xlane.xlu2 %748 }
 0x49e   :  { %v772_v18 = vsub.f32 %v6283_v11, %v749_v54 }
 0x4a0   :  { %v796_v13 = vmul.f32 1.442695, %v772_v18 }
 0x4a1   :  { %v5430_v23 = vpop.eup %5429 }
 0x4a2   :  { %5431 = vpow2.f32 %v796_v13  ;;  %v862_v25 = vmul.f32 %v5430_v23, %v6280_v52 }
 0x4a3   :  { %5433 = vpow2.f32 %v800_v26 }
 0x4a5   :  { %962 = vmatmul.f32.gmra.mxu0 %v862_v25  ;;  %v759_v33 = vpop.xlane.xlu2 %758 }
 0x4a6   :  { %v777_v30 = vsub.f32 %v6289_v60, %v759_v33  ;;  %v1020_v33 = vld [vmem:[%s8290_s0 + $0x70] sm:$0xff] }
 0x4a7   :  { %1047 = vmatpush.msrb.mxu1 %v1020_v33 }
 0x4a8   :  { %v5432_v28 = vpop.eup %5431  ;;  %v806_v2 = vmul.f32 1.442695, %v777_v30  ;;  %v1019_v30 = vld [vmem:[%s8290_s0 + $0x68] sm:$0xff] }
 0x4a9   :  { %828 = vadd.xlane.f32.xlu2 %v5432_v28  ;;  %v5434_v61 = vpop.eup %5433  ;;  %1048 = vmatpush.msrb.mxu1 %v1019_v30 }
 0x4aa   :  { %5435 = vpow2.f32 %v806_v2 }
 0x4b0   :  { %v6342_v11 = vpop.eup %5435 }
 0x4b1   :  { %832 = vadd.xlane.f32.xlu2 %v5434_v61 }
 0x4b9   :  { %838 = vadd.xlane.f32.xlu2 %v6342_v11 }
 0x4cb   :  { %v819_v12 = vpop.xlane.xlu0 %818 }
 0x4cc   :  { %5437 = vrcp.f32 %v819_v12 }
 0x4d2   :  { %v5438_v39 = vpop.eup %5437 }
 0x4d3   :  { %v821_v52 = vpop.xlane.xlu0 %820  ;;  %v863_v20 = vmul.f32 %v5438_v39, %v6294_v10 }
 0x4d4   :  { %5439 = vrcp.f32 %v821_v52 }
 0x4d5   :  { %965 = vmatmul.f32.gmra.mxu0 %v863_v20 }
 0x4d8   :  { %v827_v6 = vpop.xlane.xlu1 %826 }
 0x4da   :  { %v5440_v31 = vpop.eup %5439 }
 0x4db   :  { %v823_v35 = vpop.xlane.xlu0 %822  ;;  %v864_v60 = vmul.f32 %v5440_v31, %v6299_v36 }
 0x4dc   :  { %5441 = vrcp.f32 %v823_v35 }
 0x4dd   :  { %968 = vmatmul.f32.gmra.mxu0 %v864_v60 }
 0x4e0   :  { %v763_v37 = vpop.xlane.xlu1 %762 }
 0x4e1   :  { %v779_v51 = vsub.f32 %v6311_v24, %v763_v37 }
 0x4e2   :  { %v5442_v45 = vpop.eup %5441 }
 0x4e3   :  { %v810_v53 = vmul.f32 1.442695, %v779_v51  ;;  %v865_v9 = vmul.f32 %v5442_v45, %v6305_v48 }
 0x4e5   :  { %5443 = vpow2.f32 %v810_v53  ;;  %971 = vmatmul.f32.gmra.mxu0 %v865_v9 }
 0x4eb   :  { %v5444_v7 = vpop.eup %5443 }
 0x4ec   :  { %842 = vadd.xlane.f32.xlu0 %v5444_v7 }
 0x4ed   :  { %v825_v10 = vpop.xlane.xlu0 %824 }
 0x4ee   :  { %5445 = vrcp.f32 %v825_v10 }
 0x4ef   :  { %5447 = vrcp.f32 %v827_v6 }
 0x4f4   :  { %v5446_v44 = vpop.eup %5445 }
 0x4f5   :  { %v761_v42 = vpop.xlane.xlu0 %760  ;;  %v866_v36 = vmul.f32 %v5446_v44, %v6315_v47  ;;  %v5448_v24 = vpop.eup %5447 }
 0x4f6   :  { %v778_v27 = vsub.f32 %v6322_v34, %v761_v42  ;;  %v867_v29 = vmul.f32 %v5448_v24, %v6302_v8 }
 0x4f7   :  { %974 = vmatmul.f32.gmra.mxu0 %v866_v36 }
 0x4f8   :  { %v808_v46 = vmul.f32 1.442695, %v778_v27 }
 0x4fa   :  { %5449 = vpow2.f32 %v808_v46  ;;  %v5366_v46 = vld [vmem:[%s8290_s0 + $0x78] ss:$0 sm:$0xff] }
 0x4fd   :  { %v831_v59 = vpop.xlane.xlu0 %830 }
 0x4ff   :  { %977 = vmatmul.f32.gmra.mxu0 %v867_v29 }
 0x500   :  { %v5450_v48 = vpop.eup %5449 }
 0x501   :  { %840 = vadd.xlane.f32.xlu1 %v5450_v48 }
 0x505   :  { %v835_v62 = vpop.xlane.xlu1 %834 }
 0x50d   :  { %v837_v56 = vpop.xlane.xlu0 %836 }
 0x512   :  { %v957_v43 = vpop.f32.mrf.mxu0 }
 0x51a   :  { %v960_v17 = vpop.f32.mrf.mxu0 }
 0x51c   :  { %v829_v49 = vpop.xlane.xlu2 %828 }
 0x51d   :  { %5451 = vrcp.f32 %v829_v49 }
 0x51e   :  { %5453 = vrcp.f32 %v831_v59 }
 0x522   :  { %v963_v38 = vpop.f32.mrf.mxu0 }
 0x523   :  { %v5452_v50 = vpop.eup %5451 }
 0x524   :  { %v868_v32 = vmul.f32 %v5452_v50, %v5432_v28  ;;  %v833_v63 = vpop.xlane.xlu2 %832  ;;  %v5454_v47 = vpop.eup %5453 }
 0x525   :  { %5455 = vrcp.f32 %v833_v63  ;;  %v869_v34 = vmul.f32 %v5454_v47, %v6326_v41 }
 0x526   :  { %980 = vmatmul.f32.gmra.mxu0 %v868_v32  ;;  %5457 = vrcp.f32 %v835_v62 }
 0x527   :  { %5459 = vrcp.f32 %v837_v56 }
 0x52b   :  { %v5456_v55 = vpop.eup %5455 }
 0x52c   :  { %v870_v8 = vmul.f32 %v5456_v55, %v5434_v61  ;;  %v5458_v57 = vpop.eup %5457  ;;  %v839_v58 = vpop.xlane.xlu2 %838  ;;  %v1018_v61 = vld [vmem:[%s8290_s0 + $0x60] sm:$0xff] }
 0x52d   :  { %v871_v40 = vmul.f32 %v5458_v57, %v6330_v1  ;;  %v5460_v3 = vpop.eup %5459  ;;  %5461 = vrcp.f32 %v839_v58  ;;  %1049 = vmatpush.msrb.mxu1 %v1018_v61 }
 0x52e   :  { %983 = vmatmul.f32.gmra.mxu0 %v869_v34  ;;  %v872_v4 = vmul.f32 %v5460_v3, %v6334_v14 }
 0x533   :  { %v5462_v5 = vpop.eup %5461 }
 0x534   :  { %v873_v41 = vmul.f32 %v5462_v5, %v6342_v11  ;;  %v1017_v11 = vld [vmem:[%s8290_s0 + $0x58] sm:$0xff] }
 0x535   :  { %1050 = vmatpush.msrb.mxu1 %v1017_v11  ;;  %v1178_v11 = vld [vmem:[%s8290_s0 + $0xa8] sm:$0xff] }
 0x536   :  { %986 = vmatmul.f32.gmra.mxu0 %v870_v8  ;;  %1205 = vmatpush.msrb.mxu2 %v1178_v11 }
 0x537   :  { %5246 = vmatpush.msrb.mxu3 %v1178_v11  ;;  %v1260_v11 = vld [vmem:[%s8290_s0 + $0xc8] sm:$0xff] }
 0x53e   :  { %989 = vmatmul.f32.gmra.mxu0 %v871_v40  ;;  %v5708_v40 = vmov 32.0  }
 0x546   :  { %992 = vmatmul.f32.gmra.mxu0 %v872_v4 }
 0x54e   :  { %995 = vmatmul.f32.gmra.mxu0 %v873_v41 }
 0x552   :  { %v966_v54 = vpop.f32.mrf.mxu0 }
 0x55a   :  { %v969_v23 = vpop.f32.mrf.mxu0 }
 0x55b   :  { %v1005_v20 = vadd.f32 %v969_v23, %v957_v43 }
 0x55f   :  { %v843_v18 = vpop.xlane.xlu0 %842 }
 0x562   :  { %v972_v14 = vpop.f32.mrf.mxu0 }
 0x563   :  { %v1006_v60 = vadd.f32 %v972_v14, %v960_v17 }
 0x574   :  { %v841_v0 = vpop.xlane.xlu1 %840  ;;  %v975_v26 = vpop.f32.mrf.mxu0 }
 0x575   :  { %5463 = vrcp.f32 %v841_v0  ;;  %v1007_v53 = vadd.f32 %v975_v26, %v963_v38 }
 0x576   :  { %5465 = vrcp.f32 %v843_v18 }
 0x577   :  { %5467 = vrcp.f32 %v5708_v40 }
 0x57b   :  { %v5464_v13 = vpop.eup %5463 }
 0x57c   :  { %v874_v1 = vmul.f32 %v5464_v13, %v5450_v48  ;;  %v5466_v15 = vpop.eup %5465  ;;  %v978_v28 = vpop.f32.mrf.mxu0 }
 0x57d   :  { %v875_v25 = vmul.f32 %v5466_v15, %v5444_v7  ;;  %v1008_v44 = vadd.f32 %v978_v28, %v966_v54 }
 0x57e   :  { %998 = vmatmul.f32.gmra.mxu0 %v874_v1 }
 0x586   :  { %1001 = vmatmul.f32.gmra.mxu0 %v875_v25 }
 0x5a3   :  { %v981_v2 = vpop.f32.mrf.mxu0 }
 0x5a4   :  { %v1009_v6 = vadd.f32 %v1005_v20, %v981_v2 }
 0x5ab   :  { %v984_v12 = vpop.f32.mrf.mxu0 }
 0x5ac   :  { %v1010_v37 = vadd.f32 %v1006_v60, %v984_v12  ;;  %v1177_v12 = vld [vmem:[%s8290_s0 + $0xa0] sm:$0xff] }
 0x5ad   :  { %1206 = vmatpush.msrb.mxu2 %v1177_v12  ;;  %5247 = vmatpush.msrb.mxu3 %v1177_v12  ;;  %v1259_v12 = vld [vmem:[%s8290_s0 + $0xc0] sm:$0xff] }
 0x5b3   :  { %v987_v39 = vpop.f32.mrf.mxu0 }
 0x5b4   :  { %v1011_v9 = vadd.f32 %v1007_v53, %v987_v39  ;;  %v1176_v39 = vld [vmem:[%s8290_s0 + $0x98] sm:$0xff] }
 0x5b5   :  { %1207 = vmatpush.msrb.mxu2 %v1176_v39  ;;  %5248 = vmatpush.msrb.mxu3 %v1176_v39  ;;  %v1258_v39 = vld [vmem:[%s8290_s0 + $0xb8] sm:$0xff] }
 0x5bb   :  { %v990_v52 = vpop.f32.mrf.mxu0 }
 0x5bc   :  { %v1012_v42 = vadd.f32 %v1008_v44, %v990_v52  ;;  %v1175_v52 = vld [vmem:[%s8290_s0 + $0x90] sm:$0xff] }
 0x5bd   :  { %1208 = vmatpush.msrb.mxu2 %v1175_v52  ;;  %5249 = vmatpush.msrb.mxu3 %v1175_v52  ;;  %v5369_v52 = vld [vmem:[%s8290_s0 + $0xb0] ss:$0 sm:$0xff] }
 0x5c3   :  { %v993_v31 = vpop.f32.mrf.mxu0 }
 0x5c4   :  { %v1013_v35 = vadd.f32 %v1009_v6, %v993_v31 }
 0x5c6   :  { %4989 = vmatmul.msk.f32.vlgmr.msrb.gmra.mxu1 %vm98_vm2, %v1013_v35 }
 0x5cb   :  { %v996_v51 = vpop.f32.mrf.mxu0 }
 0x5cc   :  { %v1014_v45 = vadd.f32 %v1010_v37, %v996_v51 }
 0x5ce   :  { %4990 = vmatmul.msk.f32.gmra.mxu1 %vm98_vm2, %v1014_v45 }
 0x5fb   :  { %v999_v7 = vpop.f32.mrf.mxu0 }
 0x5fc   :  { %v1015_v10 = vadd.f32 %v1011_v9, %v999_v7 }
 0x5fe   :  { %4991 = vmatmul.msk.f32.gmra.mxu1 %vm98_vm2, %v1015_v10 }
 0x603   :  { %v1002_v36 = vpop.f32.mrf.mxu0 }
 0x604   :  { %v1016_v27 = vadd.f32 %v1012_v42, %v1002_v36  ;;  %v5367_v36 = vld [vmem:[%s8290_s0 + $0x80] ss:$0 sm:$0xff] }
 0x606   :  { %4992 = vmatmul.msk.f32.gmra.mxu1 %vm98_vm2, %v1016_v27 }
 0x643   :  { %v1052_v24 = vpop.f32.mrf.mxu1 }
 0x644   :  { %v1053_v29 = vadd.f32 %v5366_v46, %v1052_v24 }
 0x646   :  { %v1064_v48 = vadd.f32 %v1053_v29, %v5786_v22  ;;  %v5368_v29 = vld [vmem:[%s8290_s0 + $0x88] ss:$0 sm:$0xff] }
 0x648   :  { %v1070_v49 = vsel %vm98_vm2, %v1064_v48, 0.0 }
 0x649   :  { %1071 = vadd.xlane.f32.xlu2 %v1070_v49 }
 0x64b   :  { %v1055_v59 = vpop.f32.mrf.mxu1 }
 0x64c   :  { %v1056_v50 = vadd.f32 %v5366_v46, %v1055_v59 }
 0x64e   :  { %v1065_v32 = vadd.f32 %v1056_v50, %v5783_v21  ;;  %v5468_v21 = vpop.eup %5467 }
 0x64f   :  { %v1083_v58 = vmul.f32 32.0, %v5468_v21  ;;  %vm1087_vm3 = vweird.f32 %v5468_v21 }
 0x650   :  { %v1073_v63 = vsel %vm98_vm2, %v1065_v32, 0.0 }
 0x651   :  { %1074 = vadd.xlane.f32.xlu1 %v1073_v63  ;;  %v1084_v3 = vsub.f32 1.0, %v1083_v58 }
 0x653   :  { %v1085_v4 = vmul.f32 %v5468_v21, %v1084_v3 }
 0x655   :  { %v1086_v5 = vadd.f32 %v5468_v21, %v1085_v4 }
 0x657   :  { %v6383_v41 = vsel %vm1087_vm3, %v5468_v21, %v1086_v5  ;;  %vm1268_vm3 = vcmask 523264  }
 0x67b   :  { %v1058_v47 = vpop.f32.mrf.mxu1 }
 0x67c   :  { %v1059_v34 = vadd.f32 %v5366_v46, %v1058_v47 }
 0x67e   :  { %v1066_v62 = vadd.f32 %v1059_v34, %v5777_v19 }
 0x680   :  { %v1076_v55 = vsel %vm98_vm2, %v1066_v62, 0.0 }
 0x681   :  { %1077 = vadd.xlane.f32.xlu0 %v1076_v55 }
 0x683   :  { %v1061_v8 = vpop.f32.mrf.mxu1 }
 0x684   :  { %v1062_v56 = vadd.f32 %v5366_v46, %v1061_v8 }
 0x686   :  { %v1067_v22 = vadd.f32 %v1062_v56, %v5771_v16 }
 0x688   :  { %v1079_v57 = vsel %vm98_vm2, %v1067_v22, 0.0 }
 0x689   :  { %1080 = vadd.xlane.f32.xlu2 %v1079_v57 }
 0x6bc   :  { %v1072_v19 = vpop.xlane.xlu2 %1071 }
 0x6bd   :  { %v1089_v43 = vmul.f32 %v6383_v41, %v1072_v19 }
 0x6bf   :  { %v1093_v17 = vsub.f32 %v1064_v48, %v1089_v43 }
 0x6c1   :  { %v1097_v38 = vmul.f32 %v1093_v17, %v1093_v17 }
 0x6c3   :  { %v1101_v16 = vsel %vm98_vm2, %v1097_v38, 0.0 }
 0x6c4   :  { %1102 = vadd.xlane.f32.xlu1 %v1101_v16  ;;  %v1075_v0 = vpop.xlane.xlu1 %1074 }
 0x6c5   :  { %v1090_v54 = vmul.f32 %v6383_v41, %v1075_v0 }
 0x6c7   :  { %v6388_v18 = vsub.f32 %v1065_v32, %v1090_v54 }
 0x6c9   :  { %v1098_v13 = vmul.f32 %v6388_v18, %v6388_v18 }
 0x6cb   :  { %v1104_v1 = vsel %vm98_vm2, %v1098_v13, 0.0 }
 0x6cc   :  { %1105 = vadd.xlane.f32.xlu0 %v1104_v1 }
 0x6f4   :  { %v1078_v23 = vpop.xlane.xlu0 %1077 }
 0x6f5   :  { %v1091_v15 = vmul.f32 %v6383_v41, %v1078_v23 }
 0x6f7   :  { %v6394_v25 = vsub.f32 %v1066_v62, %v1091_v15 }
 0x6f9   :  { %v1099_v14 = vmul.f32 %v6394_v25, %v6394_v25 }
 0x6fb   :  { %v1107_v26 = vsel %vm98_vm2, %v1099_v14, 0.0 }
 0x6fc   :  { %1108 = vadd.xlane.f32.xlu2 %v1107_v26  ;;  %v1081_v33 = vpop.xlane.xlu2 %1080 }
 0x6fd   :  { %v1092_v28 = vmul.f32 %v6383_v41, %v1081_v33 }
 0x6ff   :  { %v6400_v30 = vsub.f32 %v1067_v22, %v1092_v28  ;;  %v1264_v28 = vld [vmem:[%s8290_s0 + $0xe8] sm:$0xff] }
 0x701   :  { %v1100_v2 = vmul.f32 %v6400_v30, %v6400_v30 }
 0x703   :  { %v1110_v61 = vsel %vm98_vm2, %v1100_v2, 0.0  ;;  %v1262_v2 = vld [vmem:[%s8290_s0 + $0xd8] sm:$0xff] }
 0x704   :  { %1111 = vadd.xlane.f32.xlu1 %v1110_v61  ;;  %v1261_v61 = vld [vmem:[%s8290_s0 + $0xd0] sm:$0xff] }
 0x737   :  { %v1103_v20 = vpop.xlane.xlu1 %1102 }
 0x738   :  { %v1113_v6 = vmul.f32 %v1103_v20, %v6383_v41 }
 0x73a   :  { %v1117_v31 = vadd.f32 1e-05, %v1113_v6 }
 0x73c   :  { %5469 = vrsqrt.f32 %v1117_v31  ;;  %vm1127_vm5 = vweird.f32 %v1117_v31 }
 0x73f   :  { %v1106_v35 = vpop.xlane.xlu0 %1105 }
 0x740   :  { %v1114_v60 = vmul.f32 %v1106_v35, %v6383_v41 }
 0x742   :  { %v5470_v37 = vpop.eup %5469  ;;  %v1118_v51 = vadd.f32 1e-05, %v1114_v60 }
 0x743   :  { %v1122_v45 = vmul.f32 %v5470_v37, %v1117_v31  ;;  %vm1128_vm4 = vweird.f32 %v5470_v37 }
 0x744   :  { %5471 = vrsqrt.f32 %v1118_v51  ;;  %vm1129_vm6 = vmor %vm1127_vm5, %vm1128_vm4  ;;  %vm1137_vm8 = vweird.f32 %v1118_v51 }
 0x745   :  { %v1123_v53 = vmul.f32 %v5470_v37, %v1122_v45 }
 0x747   :  { %v1124_v9 = vmul.f32 0.5, %v1123_v53 }
 0x749   :  { %v1125_v7 = vsub.f32 1.5, %v1124_v9 }
 0x74a   :  { %v5472_v10 = vpop.eup %5471 }
 0x74b   :  { %v1126_v44 = vmul.f32 %v5470_v37, %v1125_v7  ;;  %v1132_v42 = vmul.f32 %v5472_v10, %v1118_v51  ;;  %vm1138_vm7 = vweird.f32 %v5472_v10 }
 0x74c   :  { %vm1139_vm9 = vmor %vm1137_vm8, %vm1138_vm7 }
 0x74d   :  { %v1130_v27 = vsel %vm1129_vm6, %v5470_v37, %v1126_v44  ;;  %v1133_v46 = vmul.f32 %v5472_v10, %v1132_v42 }
 0x74e   :  { %v1161_v24 = vmul.f32 %v1130_v27, %v1093_v17 }
 0x74f   :  { %v1134_v48 = vmul.f32 0.5, %v1133_v46 }
 0x750   :  { %v1166_v49 = vmul.f32 %v5367_v36, %v1161_v24 }
 0x751   :  { %v1135_v59 = vsub.f32 1.5, %v1134_v48 }
 0x752   :  { %v6425_v50 = vadd.f32 %v5368_v29, %v1166_v49 }
 0x753   :  { %v1136_v32 = vmul.f32 %v5472_v10, %v1135_v59 }
 0x754   :  { %4993 = vmatmul.msk.f32.vlgmr.msrb.gmra.mxu2 %vm98_vm2, %v6425_v50 }
 0x755   :  { %v1140_v63 = vsel %vm1139_vm9, %v5472_v10, %v1136_v32 }
 0x756   :  { %v1162_v47 = vmul.f32 %v1140_v63, %v6388_v18 }
 0x758   :  { %v1167_v34 = vmul.f32 %v5367_v36, %v1162_v47 }
 0x75a   :  { %v6430_v62 = vadd.f32 %v5368_v29, %v1167_v34 }
 0x75c   :  { %4994 = vmatmul.msk.f32.gmra.mxu2 %vm98_vm2, %v6430_v62 }
 0x76f   :  { %v1109_v55 = vpop.xlane.xlu2 %1108 }
 0x770   :  { %v1115_v8 = vmul.f32 %v1109_v55, %v6383_v41 }
 0x772   :  { %v1119_v56 = vadd.f32 1e-05, %v1115_v8 }
 0x774   :  { %5473 = vrsqrt.f32 %v1119_v56  ;;  %vm1147_vm11 = vweird.f32 %v1119_v56 }
 0x777   :  { %v1112_v22 = vpop.xlane.xlu1 %1111 }
 0x778   :  { %v1116_v57 = vmul.f32 %v1112_v22, %v6383_v41 }
 0x77a   :  { %v5474_v40 = vpop.eup %5473  ;;  %v1120_v21 = vadd.f32 1e-05, %v1116_v57 }
 0x77b   :  { %v1142_v58 = vmul.f32 %v5474_v40, %v1119_v56  ;;  %vm1148_vm10 = vweird.f32 %v5474_v40 }
 0x77c   :  { %5475 = vrsqrt.f32 %v1120_v21  ;;  %vm1149_vm12 = vmor %vm1147_vm11, %vm1148_vm10  ;;  %vm1157_vm14 = vweird.f32 %v1120_v21 }
 0x77d   :  { %v1143_v3 = vmul.f32 %v5474_v40, %v1142_v58 }
 0x77f   :  { %v1144_v4 = vmul.f32 0.5, %v1143_v3 }
 0x781   :  { %v1145_v5 = vsub.f32 1.5, %v1144_v4 }
 0x782   :  { %v5476_v19 = vpop.eup %5475 }
 0x783   :  { %v1146_v43 = vmul.f32 %v5474_v40, %v1145_v5  ;;  %v1152_v17 = vmul.f32 %v5476_v19, %v1120_v21  ;;  %vm1158_vm13 = vweird.f32 %v5476_v19 }
 0x784   :  { %vm1159_vm15 = vmor %vm1157_vm14, %vm1158_vm13 }
 0x785   :  { %v1153_v38 = vmul.f32 %v5476_v19, %v1152_v17  ;;  %v1150_v16 = vsel %vm1149_vm12, %v5474_v40, %v1146_v43 }
 0x786   :  { %v1163_v0 = vmul.f32 %v1150_v16, %v6394_v25  ;;  %v1265_v25 = vld [vmem:[%s8290_s0 + $0xf0] sm:$0xff] }
 0x787   :  { %v1154_v54 = vmul.f32 0.5, %v1153_v38  ;;  %1289 = vmatpush.msra.mxu0 %v1265_v25 }
 0x788   :  { %v1168_v18 = vmul.f32 %v5367_v36, %v1163_v0 }
 0x789   :  { %v1155_v13 = vsub.f32 1.5, %v1154_v54  ;;  %1290 = vmatpush.msra.mxu0 %v1264_v28 }
 0x78a   :  { %v6437_v1 = vadd.f32 %v5368_v29, %v1168_v18 }
 0x78b   :  { %v1156_v23 = vmul.f32 %v5476_v19, %v1155_v13  ;;  %v5370_v13 = vld [vmem:[%s8290_s0 + $0xf8] ss:$0 sm:$0xff] }
 0x78c   :  { %4995 = vmatmul.msk.f32.gmra.mxu2 %vm98_vm2, %v6437_v1 }
 0x78d   :  { %v1160_v15 = vsel %vm1159_vm15, %v5476_v19, %v1156_v23 }
 0x78e   :  { %v1164_v14 = vmul.f32 %v1160_v15, %v6400_v30  ;;  %v1263_v30 = vld [vmem:[%s8290_s0 + $0xe0] sm:$0xff] }
 0x78f   :  { %1291 = vmatpush.msra.mxu0 %v1263_v30 }
 0x790   :  { %v1169_v26 = vmul.f32 %v5367_v36, %v1164_v14 }
 0x791   :  { %1292 = vmatpush.msra.mxu0 %v1262_v2 }
 0x792   :  { %v6442_v33 = vadd.f32 %v5368_v29, %v1169_v26 }
 0x793   :  { %1293 = vmatpush.msra.mxu0 %v1261_v61 }
 0x794   :  { %4996 = vmatmul.msk.f32.vlgmr.msrb.gmra.mxu3 %vm98_vm2, %v6442_v33 }
 0x795   :  { %1294 = vmatpush.msra.mxu0 %v1260_v11 }
 0x797   :  { %1295 = vmatpush.msra.mxu0 %v1259_v12 }
 0x799   :  { %1296 = vmatpush.msra.mxu0 %v1258_v39 }
 0x7d7   :  { %v1210_v20 = vpop.f32.mrf.mxu2 }
 0x7d8   :  { %v1211_v6 = vadd.f32 %v5369_v52, %v1210_v20 }
 0x7da   :  { %v1222_v31 = vmul.f32 %v1211_v6, %v1211_v6 }
 0x7dc   :  { %v1226_v35 = vmul.f32 %v1222_v31, %v1211_v6 }
 0x7de   :  { %v1230_v60 = vmul.f32 0.044715, %v1226_v35 }
 0x7df   :  { %v1213_v37 = vpop.f32.mrf.mxu2 }
 0x7e0   :  { %v1234_v51 = vadd.f32 %v1230_v60, %v1211_v6  ;;  %v1214_v45 = vadd.f32 %v5369_v52, %v1213_v37 }
 0x7e2   :  { %v1238_v53 = vmul.f32 0.7978846, %v1234_v51  ;;  %v1223_v9 = vmul.f32 %v1214_v45, %v1214_v45 }
 0x7e4   :  { %5477 = vtanh.f32 %v1238_v53  ;;  %v1227_v7 = vmul.f32 %v1223_v9, %v1214_v45 }
 0x7e6   :  { %v1231_v10 = vmul.f32 0.044715, %v1227_v7 }
 0x7e8   :  { %v1235_v44 = vadd.f32 %v1231_v10, %v1214_v45 }
 0x7ea   :  { %v5478_v42 = vpop.eup %5477  ;;  %v1239_v36 = vmul.f32 0.7978846, %v1235_v44 }
 0x7eb   :  { %v1246_v27 = vadd.f32 1.0, %v5478_v42 }
 0x7ec   :  { %5479 = vtanh.f32 %v1239_v36 }
 0x7ed   :  { %v1250_v46 = vmul.f32 0.5, %v1246_v27 }
 0x7ef   :  { %v1254_v24 = vmul.f32 %v1250_v46, %v1211_v6 }
 0x7f1   :  { %4997 = vmatmul.msk.f32.vlgmr.msra.gmra.mxu0 %vm1268_vm3, %v1254_v24 }
 0x7f2   :  { %v5480_v29 = vpop.eup %5479 }
 0x7f3   :  { %v1247_v48 = vadd.f32 1.0, %v5480_v29 }
 0x7f5   :  { %v1251_v49 = vmul.f32 0.5, %v1247_v48 }
 0x7f7   :  { %v1255_v59 = vmul.f32 %v1251_v49, %v1214_v45 }
 0x7f9   :  { %4998 = vmatmul.msk.f32.gmra.mxu0 %vm1268_vm3, %v1255_v59 }
 0x80f   :  { %v1216_v32 = vpop.f32.mrf.mxu2 }
 0x810   :  { %v1217_v63 = vadd.f32 %v5369_v52, %v1216_v32 }
 0x812   :  { %v1224_v47 = vmul.f32 %v1217_v63, %v1217_v63 }
 0x814   :  { %v1228_v34 = vmul.f32 %v1224_v47, %v1217_v63 }
 0x816   :  { %v1232_v55 = vmul.f32 0.044715, %v1228_v34  ;;  %v1511_v34 = vld [vmem:[%s8290_s0 + $0x228] sm:$0xff] }
 0x817   :  { %v1219_v8 = vpop.f32.mrf.mxu3  ;;  %1540 = vmatpush.msra.mxu3 %v1511_v34  ;;  %v1515_v34 = vld [vmem:[%s8290_s0 + $0x248] sm:$0xff] }
 0x818   :  { %v1220_v56 = vadd.f32 %v5369_v52, %v1219_v8  ;;  %v1236_v22 = vadd.f32 %v1232_v55, %v1217_v63  ;;  %v1510_v55 = vld [vmem:[%s8290_s0 + $0x220] sm:$0xff] }
 0x819   :  { %1541 = vmatpush.msra.mxu3 %v1510_v55  ;;  %v1514_v55 = vld [vmem:[%s8290_s0 + $0x240] sm:$0xff] }
 0x81a   :  { %v1225_v57 = vmul.f32 %v1220_v56, %v1220_v56  ;;  %v1240_v40 = vmul.f32 0.7978846, %v1236_v22 }
 0x81c   :  { %v1229_v21 = vmul.f32 %v1225_v57, %v1220_v56  ;;  %5481 = vtanh.f32 %v1240_v40  ;;  %v1509_v57 = vld [vmem:[%s8290_s0 + $0x218] sm:$0xff]  ;;  %v1508_v40 = vld [vmem:[%s8290_s0 + $0x210] sm:$0xff] }
 0x81d   :  { %1542 = vmatpush.msra.mxu3 %v1509_v57 }
 0x81e   :  { %v1233_v58 = vmul.f32 0.044715, %v1229_v21 }
 0x81f   :  { %1543 = vmatpush.msra.mxu3 %v1508_v40 }
 0x820   :  { %v1237_v3 = vadd.f32 %v1233_v58, %v1220_v56 }
 0x822   :  { %v5482_v4 = vpop.eup %5481  ;;  %v1241_v5 = vmul.f32 0.7978846, %v1237_v3 }
 0x823   :  { %v1248_v19 = vadd.f32 1.0, %v5482_v4 }
 0x824   :  { %5483 = vtanh.f32 %v1241_v5 }
 0x825   :  { %v1252_v43 = vmul.f32 0.5, %v1248_v19 }
 0x827   :  { %v1256_v17 = vmul.f32 %v1252_v43, %v1217_v63 }
 0x829   :  { %4999 = vmatmul.msk.f32.gmra.mxu0 %vm1268_vm3, %v1256_v17 }
 0x82a   :  { %v5484_v38 = vpop.eup %5483 }
 0x82b   :  { %v1249_v16 = vadd.f32 1.0, %v5484_v38 }
 0x82d   :  { %v1253_v0 = vmul.f32 0.5, %v1249_v16 }
 0x82f   :  { %v1257_v54 = vmul.f32 %v1253_v0, %v1220_v56 }
 0x831   :  { %5000 = vmatmul.msk.f32.gmra.mxu0 %vm1268_vm3, %v1257_v54 }
 0x86e   :  { %v1298_v18 = vpop.f32.mrf.mxu0 }
 0x86f   :  { %v1299_v39 = vadd.f32 %v5370_v13, %v1298_v18 }
 0x876   :  { %v1301_v23 = vpop.f32.mrf.mxu0 }
 0x877   :  { %v1302_v15 = vadd.f32 %v5370_v13, %v1301_v23 }
 0x879   :  { %v1311_v14 = vadd.f32 %v1302_v15, %v6430_v62  ;;  %v1310_v62 = vadd.f32 %v1299_v39, %v6425_v50 }
 0x87b   :  { %v1319_v26 = vsel %vm98_vm2, %v1311_v14, 0.0  ;;  %v1316_v20 = vsel %vm98_vm2, %v1310_v62, 0.0 }
 0x87c   :  { %1320 = vadd.xlane.f32.xlu1 %v1319_v26 }
 0x8a6   :  { %v1304_v25 = vpop.f32.mrf.mxu0 }
 0x8a7   :  { %v1305_v28 = vadd.f32 %v5370_v13, %v1304_v25 }
 0x8a9   :  { %v1312_v30 = vadd.f32 %v1305_v28, %v6437_v1 }
 0x8ab   :  { %v1322_v2 = vsel %vm98_vm2, %v1312_v30, 0.0 }
 0x8ac   :  { %1323 = vadd.xlane.f32.xlu2 %v1322_v2 }
 0x8ae   :  { %v1307_v61 = vpop.f32.mrf.mxu0 }
 0x8af   :  { %v1308_v11 = vadd.f32 %v5370_v13, %v1307_v61 }
 0x8b1   :  { %v1313_v12 = vadd.f32 %v1308_v11, %v6442_v33 }
 0x8b3   :  { %v1325_v52 = vsel %vm98_vm2, %v1313_v12, 0.0 }
 0x8b4   :  { %1326 = vadd.xlane.f32.xlu0 %v1325_v52 }
 0x8bc   :  { %1317 = vadd.xlane.f32.xlu0 %v1316_v20  ;;  %v5371_v20 = vld [vmem:[%s8290_s0 + $0x100] ss:$0 sm:$0xff] }
 0x8ef   :  { %v1321_v6 = vpop.xlane.xlu1 %1320 }
 0x8f0   :  { %v1329_v31 = vmul.f32 %v1321_v6, %v6383_v41 }
 0x8f2   :  { %v6489_v1 = vsub.f32 %v1311_v14, %v1329_v31 }
 0x8f4   :  { %v1337_v35 = vmul.f32 %v6489_v1, %v6489_v1 }
 0x8f6   :  { %v1343_v60 = vsel %vm98_vm2, %v1337_v35, 0.0 }
 0x8f7   :  { %1344 = vadd.xlane.f32.xlu0 %v1343_v60  ;;  %v5372_v60 = vld [vmem:[%s8290_s0 + $0x108] ss:$0 sm:$0xff] }
 0x91f   :  { %v1324_v33 = vpop.xlane.xlu2 %1323 }
 0x920   :  { %v1330_v37 = vmul.f32 %v1324_v33, %v6383_v41 }
 0x922   :  { %v6495_v51 = vsub.f32 %v1312_v30, %v1330_v37 }
 0x924   :  { %v1338_v50 = vmul.f32 %v6495_v51, %v6495_v51 }
 0x926   :  { %v1346_v45 = vsel %vm98_vm2, %v1338_v50, 0.0 }
 0x927   :  { %v1327_v53 = vpop.xlane.xlu0 %1326  ;;  %1347 = vadd.xlane.f32.xlu1 %v1346_v45 }
 0x928   :  { %v1331_v9 = vmul.f32 %v1327_v53, %v6383_v41 }
 0x92a   :  { %v6501_v7 = vsub.f32 %v1313_v12, %v1331_v9 }
 0x92c   :  { %v1339_v10 = vmul.f32 %v6501_v7, %v6501_v7 }
 0x92e   :  { %v1349_v44 = vsel %vm98_vm2, %v1339_v10, 0.0  ;;  %v1507_v10 = vld [vmem:[%s8290_s0 + $0x208] sm:$0xff] }
 0x92f   :  { %v1318_v42 = vpop.xlane.xlu0 %1317  ;;  %1350 = vadd.xlane.f32.xlu2 %v1349_v44  ;;  %v1506_v44 = vld [vmem:[%s8290_s0 + $0x200] sm:$0xff]  ;;  %1581 = vmatpush.msrb.mxu0 %v1507_v10 }
 0x930   :  { %v1328_v36 = vmul.f32 %v1318_v42, %v6383_v41 }
 0x931   :  { %1582 = vmatpush.msrb.mxu0 %v1506_v44 }
 0x932   :  { %v6507_v27 = vsub.f32 %v1310_v62, %v1328_v36  ;;  %v1505_v36 = vld [vmem:[%s8290_s0 + $0x1f8] sm:$0xff] }
 0x933   :  { %1583 = vmatpush.msrb.mxu0 %v1505_v36 }
 0x934   :  { %v1336_v46 = vmul.f32 %v6507_v27, %v6507_v27 }
 0x936   :  { %v1340_v24 = vsel %vm98_vm2, %v1336_v46, 0.0 }
 0x937   :  { %1341 = vadd.xlane.f32.xlu2 %v1340_v24  ;;  %v1459_v24 = vld [vmem:[%s8290_s0 + $0x898] sm:$0xff] }
 0x96a   :  { %v1345_v29 = vpop.xlane.xlu0 %1344 }
 0x96b   :  { %v1353_v48 = vmul.f32 %v1345_v29, %v6383_v41  ;;  %v1415_v29 = vld [vmem:[%s8290_s0 + $0x880] sm:$0xff] }
 0x96d   :  { %v1357_v49 = vadd.f32 1e-05, %v1353_v48  ;;  %v1460_v48 = vld [vmem:[%s8290_s0 + $0x8a0] sm:$0xff] }
 0x96f   :  { %5485 = vrsqrt.f32 %v1357_v49  ;;  %vm1376_vm8 = vweird.f32 %v1357_v49 }
 0x975   :  { %v5486_v47 = vpop.eup %5485 }
 0x976   :  { %v1371_v8 = vmul.f32 %v5486_v47, %v1357_v49  ;;  %vm1377_vm5 = vweird.f32 %v5486_v47  ;;  %v1416_v49 = vld [vmem:[%s8290_s0 + $0x888] sm:$0xff] }
 0x977   :  { %vm1378_vm10 = vmor %vm1376_vm8, %vm1377_vm5 }
 0x978   :  { %v1372_v3 = vmul.f32 %v5486_v47, %v1371_v8  ;;  %v1513_v8 = vld [vmem:[%s8290_s0 + $0x238] sm:$0xff] }
 0x97a   :  { %v1373_v19 = vmul.f32 0.5, %v1372_v3 }
 0x97c   :  { %v1374_v18 = vsub.f32 1.5, %v1373_v19 }
 0x97e   :  { %v1375_v14 = vmul.f32 %v5486_v47, %v1374_v18 }
 0x980   :  { %v1379_v11 = vsel %vm1378_vm10, %v5486_v47, %v1375_v14  ;;  %v1504_v47 = vld [vmem:[%s8290_s0 + $0x1f0] sm:$0xff] }
 0x981   :  { %v1401_v6 = vmul.f32 %v1379_v11, %v6489_v1  ;;  %1584 = vmatpush.msrb.mxu0 %v1504_v47 }
 0x983   :  { %v1406_v50 = vmul.f32 %v5371_v20, %v1401_v6 }
 0x985   :  { %v1411_v1 = vadd.f32 %v5372_v60, %v1406_v50 }
 0x99a   :  { %v1348_v59 = vpop.xlane.xlu1 %1347 }
 0x99b   :  { %v1354_v32 = vmul.f32 %v1348_v59, %v6383_v41  ;;  %v1461_v59 = vld [vmem:[%s8290_s0 + $0x8a8] sm:$0xff] }
 0x99d   :  { %v1358_v63 = vadd.f32 1e-05, %v1354_v32  ;;  %v1417_v32 = vld [vmem:[%s8290_s0 + $0x890] sm:$0xff] }
 0x99f   :  { %5487 = vrsqrt.f32 %v1358_v63  ;;  %vm1386_vm6 = vweird.f32 %v1358_v63 }
 0x9a2   :  { %v1351_v56 = vpop.xlane.xlu2 %1350 }
 0x9a3   :  { %v1355_v22 = vmul.f32 %v1351_v56, %v6383_v41  ;;  %v1512_v56 = vld [vmem:[%s8290_s0 + $0x230] sm:$0xff] }
 0x9a5   :  { %v5488_v21 = vpop.eup %5487  ;;  %v1359_v58 = vadd.f32 1e-05, %v1355_v22 }
 0x9a6   :  { %v1381_v4 = vmul.f32 %v5488_v21, %v1358_v63  ;;  %vm1387_vm4 = vweird.f32 %v5488_v21  ;;  %v1462_v63 = vld [vmem:[%s8290_s0 + $0x8b0] sm:$0xff] }
 0x9a7   :  { %5489 = vrsqrt.f32 %v1359_v58  ;;  %vm1388_vm7 = vmor %vm1386_vm6, %vm1387_vm4  ;;  %vm1396_vm11 = vweird.f32 %v1359_v58 }
 0x9a8   :  { %v1382_v5 = vmul.f32 %v5488_v21, %v1381_v4 }
 0x9aa   :  { %v1383_v43 = vmul.f32 0.5, %v1382_v5  ;;  %v1342_v17 = vpop.xlane.xlu2 %1341 }
 0x9ab   :  { %v1352_v38 = vmul.f32 %v1342_v17, %v6383_v41 }
 0x9ac   :  { %v1384_v16 = vsub.f32 1.5, %v1383_v43 }
 0x9ad   :  { %v5490_v0 = vpop.eup %5489  ;;  %v1356_v54 = vadd.f32 1e-05, %v1352_v38 }
 0x9ae   :  { %v1391_v13 = vmul.f32 %v5490_v0, %v1359_v58  ;;  %v1385_v23 = vmul.f32 %v5488_v21, %v1384_v16  ;;  %vm1397_vm9 = vweird.f32 %v5490_v0 }
 0x9af   :  { %5491 = vrsqrt.f32 %v1356_v54  ;;  %vm1398_vm12 = vmor %vm1396_vm11, %vm1397_vm9  ;;  %vm1366_vm14 = vweird.f32 %v1356_v54  ;;  %vm1803_vm11 = vcmask 130048  }
 0x9b0   :  { %v1392_v15 = vmul.f32 %v5490_v0, %v1391_v13  ;;  %v1389_v28 = vsel %vm1388_vm7, %v5488_v21, %v1385_v23 }
 0x9b1   :  { %v1402_v12 = vmul.f32 %v1389_v28, %v6495_v51  ;;  %v5373_v28 = vld [vmem:[%s8290_s0 + $0x250] ss:$0 sm:$0xff] }
 0x9b2   :  { %v1393_v26 = vmul.f32 0.5, %v1392_v15 }
 0x9b3   :  { %v1407_v33 = vmul.f32 %v5371_v20, %v1402_v12 }
 0x9b4   :  { %v1394_v25 = vsub.f32 1.5, %v1393_v26 }
 0x9b5   :  { %v5492_v30 = vpop.eup %5491  ;;  %v1412_v53 = vadd.f32 %v5372_v60, %v1407_v33 }
 0x9b6   :  { %v1395_v2 = vmul.f32 %v5490_v0, %v1394_v25  ;;  %v1361_v61 = vmul.f32 %v5492_v30, %v1356_v54  ;;  %vm1367_vm13 = vweird.f32 %v5492_v30 }
 0x9b7   :  { %vm1368_vm15 = vmor %vm1366_vm14, %vm1367_vm13 }
 0x9b8   :  { %v1399_v39 = vsel %vm1398_vm12, %v5490_v0, %v1395_v2  ;;  %v1362_v52 = vmul.f32 %v5492_v30, %v1361_v61 }
 0x9b9   :  { %v1403_v62 = vmul.f32 %v1399_v39, %v6501_v7 }
 0x9ba   :  { %v1363_v31 = vmul.f32 0.5, %v1362_v52 }
 0x9bb   :  { %v1408_v35 = vmul.f32 %v5371_v20, %v1403_v62 }
 0x9bc   :  { %v1364_v37 = vsub.f32 1.5, %v1363_v31 }
 0x9bd   :  { %v1413_v51 = vadd.f32 %v5372_v60, %v1408_v35 }
 0x9be   :  { %v1365_v45 = vmul.f32 %v5492_v30, %v1364_v37 }
 0x9bf   :  { %1442 = vmatpush.msra.mxu1 %v1413_v51  ;;  %1487 = vmatpush.msra.mxu2 %v1413_v51 }
 0x9c0   :  { %v1369_v9 = vsel %vm1368_vm15, %v5492_v30, %v1365_v45 }
 0x9c1   :  { %1443 = vmatpush.msra.mxu1 %v1412_v53  ;;  %1488 = vmatpush.msra.mxu2 %v1412_v53  ;;  %v1400_v7 = vmul.f32 %v1369_v9, %v6507_v27  ;;  %v1414_v27 = vld [vmem:[%s8290_s0 + $0x878] sm:$0xff] }
 0x9c3   :  { %1444 = vmatpush.msra.mxu1 %v1411_v1  ;;  %1489 = vmatpush.msra.mxu2 %v1411_v1  ;;  %v1405_v42 = vmul.f32 %v5371_v20, %v1400_v7 }
 0x9c5   :  { %v1410_v46 = vadd.f32 %v5372_v60, %v1405_v42 }
 0x9c7   :  { %1445 = vmatpush.msra.mxu1 %v1410_v46  ;;  %1490 = vmatpush.msra.mxu2 %v1410_v46 }
 0x9c8   :  { %5009 = vmatmul.msk.f32.vlgmr.msra.gmra.mxu3 %vm98_vm2, %v1410_v46  ;;  %5001 = vmatmul.msk.f32.vlgmr.msra.gmra.mxu1 %vm98_vm2, %v1414_v27 }
 0x9c9   :  { %5005 = vmatmul.msk.f32.vlgmr.msra.gmra.mxu2 %vm98_vm2, %v1459_v24  ;;  %1622 = vmatpush.msrb.mxu1 %v1515_v34 }
 0x9cb   :  { %1623 = vmatpush.msrb.mxu1 %v1514_v55 }
 0x9cd   :  { %1624 = vmatpush.msrb.mxu1 %v1513_v8 }
 0x9cf   :  { %1625 = vmatpush.msrb.mxu1 %v1512_v56 }
 0x9d0   :  { %5010 = vmatmul.msk.f32.gmra.mxu3 %vm98_vm2, %v1411_v1  ;;  %5002 = vmatmul.msk.f32.gmra.mxu1 %vm98_vm2, %v1415_v29 }
 0x9d1   :  { %5006 = vmatmul.msk.f32.gmra.mxu2 %vm98_vm2, %v1460_v48 }
 0x9d8   :  { %5011 = vmatmul.msk.f32.gmra.mxu3 %vm98_vm2, %v1412_v53  ;;  %5003 = vmatmul.msk.f32.gmra.mxu1 %vm98_vm2, %v1416_v49 }
 0x9d9   :  { %5007 = vmatmul.msk.f32.gmra.mxu2 %vm98_vm2, %v1461_v59 }
 0x9e0   :  { %5012 = vmatmul.msk.f32.gmra.mxu3 %vm98_vm2, %v1413_v51  ;;  %5004 = vmatmul.msk.f32.gmra.mxu1 %vm98_vm2, %v1417_v32 }
 0x9e1   :  { %5008 = vmatmul.msk.f32.gmra.mxu2 %vm98_vm2, %v1462_v63 }
 0xa45   :  { %v1447_v22 = vpop.f32.mrf.mxu1 }
 0xa46   :  { %5013 = vmatmul.msk.f32.vlgmr.msrb.gmra.mxu0 %vm98_vm2, %v1447_v22 }
 0xa4b   :  { %v1545_v19 = vpop.f32.mrf.mxu3 }
 0xa4c   :  { %v1492_v57 = vpop.f32.mrf.mxu2 }
 0xa4d   :  { %5017 = vmatmul.msk.f32.vlgmr.msrb.gmra.mxu1 %vm98_vm2, %v1492_v57  ;;  %v1450_v40 = vpop.f32.mrf.mxu1 }
 0xa4e   :  { %5014 = vmatmul.msk.f32.gmra.mxu0 %vm98_vm2, %v1450_v40 }
 0xa53   :  { %v1548_v16 = vpop.f32.mrf.mxu3 }
 0xa54   :  { %v1495_v21 = vpop.f32.mrf.mxu2 }
 0xa55   :  { %5018 = vmatmul.msk.f32.gmra.mxu1 %vm98_vm2, %v1495_v21  ;;  %v1453_v58 = vpop.f32.mrf.mxu1 }
 0xa56   :  { %5015 = vmatmul.msk.f32.gmra.mxu0 %vm98_vm2, %v1453_v58 }
 0xa5b   :  { %v1551_v18 = vpop.f32.mrf.mxu3 }
 0xa5c   :  { %v1498_v3 = vpop.f32.mrf.mxu2 }
 0xa5d   :  { %5019 = vmatmul.msk.f32.gmra.mxu1 %vm98_vm2, %v1498_v3  ;;  %v1456_v4 = vpop.f32.mrf.mxu1 }
 0xa5e   :  { %5016 = vmatmul.msk.f32.gmra.mxu0 %vm98_vm2, %v1456_v4 }
 0xa63   :  { %v1554_v39 = vpop.f32.mrf.mxu3 }
 0xa64   :  { %v1501_v5 = vpop.f32.mrf.mxu2 }
 0xa65   :  { %5020 = vmatmul.msk.f32.gmra.mxu1 %vm98_vm2, %v1501_v5 }
 0xac3   :  { %v1586_v43 = vpop.f32.mrf.mxu0 }
 0xac4   :  { %v1587_v23 = vadd.f32 %v1586_v43, %v1545_v19 }
 0xaca   :  { %v1627_v17 = vpop.f32.mrf.mxu1 }
 0xacb   :  { %v1589_v38 = vpop.f32.mrf.mxu0  ;;  %v1639_v25 = vadd.f32 %v1627_v17, %v1587_v23 }
 0xacc   :  { %v1590_v13 = vadd.f32 %v1589_v38, %v1548_v16 }
 0xacd   :  { %v1645_v11 = vadd.f32 %v5373_v28, %v1639_v25 }
 0xacf   :  { %v1649_v6 = vsel %vm98_vm2, %v1645_v11, 0.0 }
 0xad2   :  { %v1630_v0 = vpop.f32.mrf.mxu1 }
 0xad3   :  { %v1592_v54 = vpop.f32.mrf.mxu0  ;;  %v1640_v15 = vadd.f32 %v1630_v0, %v1590_v13  ;;  %v5374_v0 = vld [vmem:[%s8290_s0 + $0x258] ss:$0 sm:$0xff]  ;;  %v5375_v13 = vld [vmem:[%s8290_s0 + $0x260] ss:$0 sm:$0xff] }
 0xad4   :  { %v1593_v14 = vadd.f32 %v1592_v54, %v1551_v18 }
 0xad5   :  { %v1646_v2 = vadd.f32 %v5373_v28, %v1640_v15 }
 0xad7   :  { %v1650_v52 = vsel %vm98_vm2, %v1646_v2, 0.0 }
 0xad8   :  { %v1651_v60 = vadd.f32 %v1650_v52, %v1649_v6 }
 0xada   :  { %v1633_v26 = vpop.f32.mrf.mxu1 }
 0xadb   :  { %v1641_v30 = vadd.f32 %v1633_v26, %v1593_v14  ;;  %v1595_v61 = vpop.f32.mrf.mxu0 }
 0xadc   :  { %v1596_v62 = vadd.f32 %v1595_v61, %v1554_v39 }
 0xadd   :  { %v1647_v12 = vadd.f32 %v5373_v28, %v1641_v30 }
 0xadf   :  { %v1652_v31 = vsel %vm98_vm2, %v1647_v12, 0.0 }
 0xae0   :  { %v1653_v37 = vadd.f32 %v1652_v31, %v1651_v60 }
 0xae2   :  { %v1636_v20 = vpop.f32.mrf.mxu1 }
 0xae3   :  { %v1642_v35 = vadd.f32 %v1636_v20, %v1596_v62 }
 0xae5   :  { %v1648_v33 = vadd.f32 %v5373_v28, %v1642_v35 }
 0xae7   :  { %v1654_v51 = vsel %vm98_vm2, %v1648_v33, 0.0 }
 0xae8   :  { %v1655_v50 = vadd.f32 %v1654_v51, %v1653_v37 }
 0xaea   :  { %v1656_v45 = vrot.slane %v1655_v50, 4 }
 0xaec   :  { %v1657_v53 = vadd.f32 %v1656_v45, %v1655_v50 }
 0xaee   :  { %v1658_v9 = vrot.slane %v1657_v53, 2 }
 0xaf0   :  { %v1659_v1 = vadd.f32 %v1658_v9, %v1657_v53 }
 0xaf2   :  { %v1660_v7 = vrot.slane %v1659_v1, 1 }
 0xaf4   :  { %v1661_v10 = vadd.f32 %v1660_v7, %v1659_v1  ;;  %v1732_v1 = vld [vmem:[%s8290_s0 + $0x8b8] sm:$0xff] }
 0xaf6   :  { %v1662_v44 = vmul.f32 %v1661_v10, %v6383_v41  ;;  %v1733_v10 = vld [vmem:[%s8290_s0 + $0x8c0] sm:$0xff] }
 0xaf8   :  { %v1663_v42 = vsub.f32 %v1645_v11, %v1662_v44  ;;  %v1664_v36 = vsub.f32 %v1646_v2, %v1662_v44  ;;  %v1665_v46 = vsub.f32 %v1647_v12, %v1662_v44  ;;  %v1666_v27 = vsub.f32 %v1648_v33, %v1662_v44  ;;  %v1734_v44 = vld [vmem:[%s8290_s0 + $0x8c8] sm:$0xff] }
 0xafa   :  { %v1667_v24 = vmul.f32 %v1663_v42, %v1663_v42  ;;  %v1668_v29 = vmul.f32 %v1664_v36, %v1664_v36  ;;  %v1669_v48 = vmul.f32 %v1665_v46, %v1665_v46  ;;  %v1670_v49 = vmul.f32 %v1666_v27, %v1666_v27 }
 0xafc   :  { %v1671_v59 = vsel %vm98_vm2, %v1667_v24, 0.0  ;;  %v1672_v32 = vsel %vm98_vm2, %v1668_v29, 0.0  ;;  %v1674_v47 = vsel %vm98_vm2, %v1669_v48, 0.0  ;;  %v1676_v55 = vsel %vm98_vm2, %v1670_v49, 0.0 }
 0xafd   :  { %v1673_v63 = vadd.f32 %v1672_v32, %v1671_v59 }
 0xaff   :  { %v1675_v34 = vadd.f32 %v1674_v47, %v1673_v63 }
 0xb01   :  { %v1677_v8 = vadd.f32 %v1676_v55, %v1675_v34  ;;  %v1795_v55 = vld [vmem:[%s8290_s0 + $0x6b8] sm:$0xff] }
 0xb03   :  { %v1678_v56 = vrot.slane %v1677_v8, 4 }
 0xb05   :  { %v1679_v22 = vadd.f32 %v1678_v56, %v1677_v8  ;;  %v1796_v8 = vld [vmem:[%s8290_s0 + $0x6c0] sm:$0xff]  ;;  %v1797_v56 = vld [vmem:[%s8290_s0 + $0x6c8] sm:$0xff] }
 0xb07   :  { %v1680_v57 = vrot.slane %v1679_v22, 2 }
 0xb09   :  { %v1681_v40 = vadd.f32 %v1680_v57, %v1679_v22  ;;  %v1798_v22 = vld [vmem:[%s8290_s0 + $0x6d0] sm:$0xff]  ;;  %v1872_v57 = vld [vmem:[%s8290_s0 + $0x128] sm:$0xff] }
 0xb0a   :  { %1911 = vmatpush.msra.mxu0 %v1872_v57 }
 0xb0b   :  { %v1682_v21 = vrot.slane %v1681_v40, 1 }
 0xb0d   :  { %v1683_v58 = vadd.f32 %v1682_v21, %v1681_v40  ;;  %v1871_v40 = vld [vmem:[%s8290_s0 + $0x120] sm:$0xff]  ;;  %v6680_v21 = vld [vmem:[%s8290_s0 + $0x810] sm:$0xff] }
 0xb0e   :  { %1970 = vrot.lane.b32.xlu1 %v6680_v21, %s5705_s26  ;;  %1912 = vmatpush.msra.mxu0 %v1871_v40 }
 0xb0f   :  { %v1684_v3 = vmul.f32 %v1683_v58, %v6383_v41  ;;  %v1870_v58 = vld [vmem:[%s8290_s0 + $0x118] sm:$0xff] }
 0xb10   :  { %1913 = vmatpush.msra.mxu0 %v1870_v58 }
 0xb11   :  { %v1685_v4 = vadd.f32 1e-05, %v1684_v3  ;;  %v1799_v3 = vld [vmem:[%s8290_s0 + $0x6d8] sm:$0xff] }
 0xb13   :  { %5493 = vrsqrt.f32 %v1685_v4  ;;  %vm1692_vm5 = vweird.f32 %v1685_v4 }
 0xb19   :  { %v5494_v5 = vpop.eup %5493 }
 0xb1a   :  { %v1687_v19 = vmul.f32 %v5494_v5, %v1685_v4  ;;  %vm1693_vm4 = vweird.f32 %v5494_v5  ;;  %v1800_v4 = vld [vmem:[%s8290_s0 + $0x6e0] sm:$0xff] }
 0xb1b   :  { %vm1694_vm6 = vmor %vm1692_vm5, %vm1693_vm4  ;;  %vm2690_vm4 = vcmask 195584   ;;  %vm3180_vm5 = vcmask 785408  }
 0xb1c   :  { %v1688_v43 = vmul.f32 %v5494_v5, %v1687_v19  ;;  %v1802_v19 = vld [vmem:[%s8290_s0 + $0x6f0] sm:$0xff] }
 0xb1e   :  { %v1689_v17 = vmul.f32 0.5, %v1688_v43  ;;  %v1869_v43 = vld [vmem:[%s8290_s0 + $0x110] sm:$0xff] }
 0xb1f   :  { %1914 = vmatpush.msra.mxu0 %v1869_v43 }
 0xb20   :  { %v1690_v38 = vsub.f32 1.5, %v1689_v17  ;;  %v6709_v17 = vld [vmem:[%s8290_s0 + $0x808] sm:$0xff] }
 0xb21   :  { %1968 = vrot.lane.b32.xlu0 %v6709_v17, %s5705_s26 }
 0xb22   :  { %v1691_v16 = vmul.f32 %v5494_v5, %v1690_v38  ;;  %v6714_v38 = vld [vmem:[%s8290_s0 + $0x7f0] sm:$0xff] }
 0xb23   :  { %1962 = vrot.lane.b32.xlu1 %v6714_v38, %s5705_s26 }
 0xb24   :  { %v1695_v54 = vsel %vm1694_vm6, %v5494_v5, %v1691_v16  ;;  %v1801_v5 = vld [vmem:[%s8290_s0 + $0x6e8] sm:$0xff]  ;;  %v6723_v16 = vld [vmem:[%s8290_s0 + $0x7f8] sm:$0xff] }
 0xb25   :  { %v1699_v18 = vmul.f32 %v1695_v54, %v1666_v27  ;;  %v1698_v23 = vmul.f32 %v1695_v54, %v1665_v46  ;;  %v1697_v15 = vmul.f32 %v1695_v54, %v1664_v36  ;;  %v1696_v14 = vmul.f32 %v1695_v54, %v1663_v42  ;;  %v1735_v42 = vld [vmem:[%s8290_s0 + $0x8d0] sm:$0xff]  ;;  %v1736_v36 = vld [vmem:[%s8290_s0 + $0x8d8] sm:$0xff]  ;;  %v1737_v46 = vld [vmem:[%s8290_s0 + $0x8e0] sm:$0xff] }
 0xb26   :  { %v6737_v54 = vld [vmem:[%s8290_s0 + $0x7e0] sm:$0xff] }
 0xb27   :  { %v1705_v26 = vmul.f32 %v5374_v0, %v1699_v18  ;;  %v1704_v25 = vmul.f32 %v5374_v0, %v1698_v23  ;;  %v1703_v28 = vmul.f32 %v5374_v0, %v1697_v15  ;;  %v1702_v30 = vmul.f32 %v5374_v0, %v1696_v14  ;;  %v6728_v0 = vld [vmem:[%s8290_s0 + $0x7d8] sm:$0xff]  ;;  %v1945_v23 = vld [vmem:[%s8290_s0 + $0x800] sm:$0xff]  ;;  %v1942_v14 = vld [vmem:[%s8290_s0 + $0x7e8] sm:$0xff] }
 0xb28   :  { %1966 = vrot.lane.b32.xlu2 %v1945_v23, %s5705_s26 }
 0xb29   :  { %v1711_v2 = vadd.f32 %v5375_v13, %v1705_v26  ;;  %v1710_v61 = vadd.f32 %v5375_v13, %v1704_v25  ;;  %v1709_v11 = vadd.f32 %v5375_v13, %v1703_v28  ;;  %v1708_v12 = vadd.f32 %v5375_v13, %v1702_v30  ;;  %1964 = vrot.lane.b32.xlu0 %v6723_v16, %s5705_s26 }
 0xb2b   :  { %v1722_v39 = vmul.f32 1.442695, %v1711_v2  ;;  %v1720_v52 = vmul.f32 1.442695, %v1710_v61  ;;  %v1718_v62 = vmul.f32 1.442695, %v1709_v11  ;;  %1956 = vrot.lane.b32.xlu1 %v6728_v0, %s5705_s26 }
 0xb2c   :  { %v1716_v20 = vmul.f32 1.442695, %v1708_v12  ;;  %vm1715_vm7 = vcmp.gt.f32.partialorder %v1711_v2, 0.0  ;;  %vm1714_vm8 = vcmp.gt.f32.partialorder %v1710_v61, 0.0  ;;  %vm1713_vm9 = vcmp.gt.f32.partialorder %v1709_v11, 0.0 }
 0xb2d   :  { %5495 = vpow2.f32 %v1722_v39  ;;  %vm1712_vm10 = vcmp.gt.f32.partialorder %v1708_v12, 0.0 }
 0xb2e   :  { %5497 = vpow2.f32 %v1720_v52 }
 0xb2f   :  { %5499 = vpow2.f32 %v1718_v62 }
 0xb30   :  { %5501 = vpow2.f32 %v1716_v20  ;;  %1960 = vrot.lane.b32.xlu2 %v1942_v14, %s5705_s26  ;;  %v5376_v20 = vld [vmem:[%s8290_s0 + $0x130] ss:$0 sm:$0xff] }
 0xb31   :  { %1958 = vrot.lane.b32.xlu0 %v6737_v54, %s5705_s26 }
 0xb33   :  { %v5496_v6 = vpop.eup %5495 }
 0xb34   :  { %v5498_v31 = vpop.eup %5497  ;;  %v5024_v35 = vadd.f32 -1.0, %v5496_v6 }
 0xb35   :  { %v5500_v60 = vpop.eup %5499  ;;  %v5023_v33 = vadd.f32 -1.0, %v5498_v31 }
 0xb36   :  { %v5502_v37 = vpop.eup %5501  ;;  %v1731_v51 = vsel %vm1715_vm7, %v1711_v2, %v5024_v35  ;;  %v5022_v50 = vadd.f32 -1.0, %v5500_v60 }
 0xb37   :  { %1768 = vmatpush.msrb.mxu2 %v1731_v51  ;;  %v1730_v45 = vsel %vm1714_vm8, %v1710_v61, %v5023_v33  ;;  %v5021_v53 = vadd.f32 -1.0, %v5502_v37 }
 0xb38   :  { %v1729_v9 = vsel %vm1713_vm9, %v1709_v11, %v5022_v50 }
 0xb39   :  { %1769 = vmatpush.msrb.mxu2 %v1730_v45  ;;  %v1728_v7 = vsel %vm1712_vm10, %v1708_v12, %v5021_v53 }
 0xb3b   :  { %1770 = vmatpush.msrb.mxu2 %v1729_v9 }
 0xb3d   :  { %1771 = vmatpush.msrb.mxu2 %v1728_v7 }
 0xb3e   :  { %5025 = vmatmul.msk.f32.vlgmr.msrb.gmra.mxu2 %vm98_vm2, %v1732_v1 }
 0xb46   :  { %5026 = vmatmul.msk.f32.gmra.mxu2 %vm98_vm2, %v1733_v10 }
 0xb4e   :  { %5027 = vmatmul.msk.f32.gmra.mxu2 %vm98_vm2, %v1734_v44 }
 0xb56   :  { %5028 = vmatmul.msk.f32.gmra.mxu2 %vm98_vm2, %v1735_v42 }
 0xb5e   :  { %5029 = vmatmul.msk.f32.gmra.mxu2 %vm98_vm2, %v1736_v36 }
 0xb66   :  { %5030 = vmatmul.msk.f32.gmra.mxu2 %vm98_vm2, %v1737_v46 }
 0xb80   :  { %v6766_v60 = vpop.permute.xlu1 %1970 }
 0xb82   :  { %v6757_v62 = vpop.permute.xlu2 %1966 }
 0xb8a   :  { %v6771_v37 = vpop.permute.xlu2 %1960 }
 0xb93   :  { %v6775_v45 = vpop.permute.xlu0 %1968 }
 0xb95   :  { %v6783_v1 = vpop.permute.xlu1 %1962 }
 0xb9b   :  { %v6795_v46 = vpop.permute.xlu0 %1964 }
 0xbc1   :  { %v1773_v27 = vpop.f32.mrf.mxu2 }
 0xbc9   :  { %v1776_v24 = vpop.f32.mrf.mxu2 }
 0xbd1   :  { %v1779_v29 = vpop.f32.mrf.mxu2 }
 0xbd2   :  { %v1791_v63 = vmax.f32 %v1773_v27, %v1779_v29  ;;  %v6801_v29 = vpop.permute.xlu1 %1956 }
 0xbd9   :  { %v1782_v48 = vpop.f32.mrf.mxu2 }
 0xbda   :  { %v1792_v59 = vmax.f32 %v1776_v24, %v1782_v48 }
 0xbe1   :  { %v1785_v49 = vpop.f32.mrf.mxu2 }
 0xbe2   :  { %v6651_v34 = vmax.f32 %v1791_v63, %v1785_v49 }
 0xbe9   :  { %v1788_v32 = vpop.f32.mrf.mxu2 }
 0xbea   :  { %v6649_v47 = vmax.f32 %v1792_v59, %v1788_v32  ;;  %v6811_v32 = vpop.permute.xlu0 %1958 }
 0xbec   :  { %1842 = vmatpush.msrb.mxu3 %v6649_v47 }
 0xbee   :  { %1843 = vmatpush.msrb.mxu3 %v6651_v34 }
 0xbef   :  { %5031 = vmatmul.msk.f32.vlgmr.msrb.gmra.mxu3 %vm1803_vm11, %v1795_v55 }
 0xbf7   :  { %5032 = vmatmul.msk.f32.gmra.mxu3 %vm1803_vm11, %v1796_v8 }
 0xbff   :  { %5033 = vmatmul.msk.f32.gmra.mxu3 %vm1803_vm11, %v1797_v56 }
 0xc07   :  { %5034 = vmatmul.msk.f32.gmra.mxu3 %vm1803_vm11, %v1798_v22 }
 0xc0f   :  { %5035 = vmatmul.msk.f32.gmra.mxu3 %vm1803_vm11, %v1799_v3 }
 0xc17   :  { %5036 = vmatmul.msk.f32.gmra.mxu3 %vm1803_vm11, %v1800_v4  ;;  %v2133_v4 = vld [vmem:[%s8290_s0 + $0x538] sm:$0xff] }
 0xc1f   :  { %5037 = vmatmul.msk.f32.gmra.mxu3 %vm1803_vm11, %v1801_v5 }
 0xc27   :  { %5038 = vmatmul.msk.f32.gmra.mxu3 %vm1803_vm11, %v1802_v19 }
 0xc72   :  { %v1845_v18 = vpop.f32.mrf.mxu3 }
 0xc73   :  { %5039 = vmatmul.msk.f32.vlgmr.msra.gmra.mxu0 %vm98_vm2, %v1845_v18 }
 0xc7a   :  { %v1848_v13 = vpop.f32.mrf.mxu3 }
 0xc7b   :  { %5040 = vmatmul.msk.f32.gmra.mxu0 %vm98_vm2, %v1848_v13 }
 0xc82   :  { %v1851_v15 = vpop.f32.mrf.mxu3 }
 0xc83   :  { %5041 = vmatmul.msk.f32.gmra.mxu0 %vm98_vm2, %v1851_v15 }
 0xc8a   :  { %v1854_v26 = vpop.f32.mrf.mxu3 }
 0xc8b   :  { %5042 = vmatmul.msk.f32.gmra.mxu0 %vm98_vm2, %v1854_v26 }
 0xc92   :  { %v1857_v25 = vpop.f32.mrf.mxu3 }
 0xc93   :  { %5043 = vmatmul.msk.f32.gmra.mxu0 %vm98_vm2, %v1857_v25 }
 0xc9a   :  { %v1860_v28 = vpop.f32.mrf.mxu3 }
 0xc9b   :  { %5044 = vmatmul.msk.f32.gmra.mxu0 %vm98_vm2, %v1860_v28  ;;  %v2136_v28 = vld [vmem:[%s8290_s0 + $0x550] sm:$0xff] }
 0xca2   :  { %v1863_v30 = vpop.f32.mrf.mxu3 }
 0xca3   :  { %5045 = vmatmul.msk.f32.gmra.mxu0 %vm98_vm2, %v1863_v30 }
 0xcaa   :  { %v1866_v2 = vpop.f32.mrf.mxu3 }
 0xcab   :  { %5046 = vmatmul.msk.f32.gmra.mxu0 %vm98_vm2, %v1866_v2 }
 0xcf0   :  { %v1916_v61 = vpop.f32.mrf.mxu0 }
 0xcf1   :  { %v6797_v27 = vadd.f32 %v5376_v20, %v1916_v61 }
 0xcf3   :  { %v1980_v48 = vmul.f32 %v6801_v29, %v6797_v27 }
 0xcf8   :  { %v1919_v11 = vpop.f32.mrf.mxu0 }
 0xcf9   :  { %v6809_v59 = vadd.f32 %v5376_v20, %v1919_v11 }
 0xcfb   :  { %v1981_v63 = vmul.f32 %v6811_v32, %v6809_v59 }
 0xd00   :  { %v1922_v12 = vpop.f32.mrf.mxu0 }
 0xd01   :  { %v6769_v33 = vadd.f32 %v5376_v20, %v1922_v12 }
 0xd03   :  { %v1982_v53 = vmul.f32 %v6771_v37, %v6769_v33 }
 0xd08   :  { %v1925_v39 = vpop.f32.mrf.mxu0 }
 0xd09   :  { %v6785_v7 = vadd.f32 %v5376_v20, %v1925_v39 }
 0xd0b   :  { %v1983_v42 = vmul.f32 %v6783_v1, %v6785_v7 }
 0xd10   :  { %v1928_v52 = vpop.f32.mrf.mxu0 }
 0xd11   :  { %v6799_v24 = vadd.f32 %v5376_v20, %v1928_v52 }
 0xd13   :  { %v1984_v49 = vmul.f32 %v6795_v46, %v6799_v24 }
 0xd18   :  { %v1931_v6 = vpop.f32.mrf.mxu0 }
 0xd19   :  { %v6762_v31 = vadd.f32 %v5376_v20, %v1931_v6 }
 0xd1b   :  { %v1985_v35 = vmul.f32 %v6757_v62, %v6762_v31 }
 0xd1d   :  { %2038 = vrot.lane.b32.xlu1 %v1985_v35, %s5706_s27 }
 0xd20   :  { %v1934_v51 = vpop.f32.mrf.mxu0 }
 0xd21   :  { %v6773_v50 = vadd.f32 %v5376_v20, %v1934_v51 }
 0xd23   :  { %v1986_v9 = vmul.f32 %v6775_v45, %v6773_v50 }
 0xd25   :  { %2040 = vrot.lane.b32.xlu0 %v1986_v9, %s5706_s27  ;;  %2032 = vrot.lane.b32.xlu1 %v1982_v53, %s5706_s27  ;;  %v2140_v9 = vld [vmem:[%s8290_s0 + $0x570] sm:$0xff] }
 0xd28   :  { %v1937_v10 = vpop.f32.mrf.mxu0 }
 0xd29   :  { %v6787_v44 = vadd.f32 %v5376_v20, %v1937_v10 }
 0xd2b   :  { %v1987_v36 = vmul.f32 %v6766_v60, %v6787_v44 }
 0xd2d   :  { %2034 = vrot.lane.b32.xlu0 %v1983_v42, %s5706_s27  ;;  %2042 = vrot.lane.b32.xlu2 %v1987_v36, %s5706_s27  ;;  %v2137_v36 = vld [vmem:[%s8290_s0 + $0x558] sm:$0xff] }
 0xd35   :  { %2028 = vrot.lane.b32.xlu0 %v1980_v48, %s5706_s27  ;;  %2036 = vrot.lane.b32.xlu2 %v1984_v49, %s5706_s27 }
 0xd3d   :  { %2000 = vrot.lane.b32.xlu0 %v6709_v17, %s5707_s1  ;;  %2030 = vrot.lane.b32.xlu2 %v1981_v63, %s5706_s27  ;;  %v2138_v63 = vld [vmem:[%s8290_s0 + $0x560] sm:$0xff] }
 0xd45   :  { %1998 = vrot.lane.b32.xlu0 %v1945_v23, %s5707_s1  ;;  %2002 = vrot.lane.b32.xlu2 %v6680_v21, %s5707_s1  ;;  %v2135_v23 = vld [vmem:[%s8290_s0 + $0x548] sm:$0xff] }
 0xd4d   :  { %1996 = vrot.lane.b32.xlu0 %v6723_v16, %s5707_s1 }
 0xd55   :  { %1994 = vrot.lane.b32.xlu0 %v6714_v38, %s5707_s1  ;;  %v2134_v38 = vld [vmem:[%s8290_s0 + $0x540] sm:$0xff] }
 0xd5d   :  { %1992 = vrot.lane.b32.xlu0 %v1942_v14, %s5707_s1 }
 0xd65   :  { %1990 = vrot.lane.b32.xlu0 %v6737_v54, %s5707_s1 }
 0xd87   :  { %v2043_v55 = vpop.permute.xlu2 %2042 }
 0xd88   :  { %5047 = vmatpush.xpose.msk.msra.mxu1 %vm98_vm2, %v2043_v55 }
 0xd8f   :  { %v2039_v56 = vpop.permute.xlu1 %2038  ;;  %v2037_v22 = vpop.permute.xlu2 %2036 }
 0xd97   :  { %v2041_v8 = vpop.permute.xlu0 %2040  ;;  %v2033_v40 = vpop.permute.xlu1 %2032 }
 0xd98   :  { %5048 = vmatpush.xpose.msk.msra.mxu1 %vm98_vm2, %v2041_v8  ;;  %v2031_v21 = vpop.permute.xlu2 %2030 }
 0xd9c   :  { %5049 = vmatpush.xpose.msk.msra.mxu1 %vm98_vm2, %v2039_v56  ;;  %v2139_v56 = vld [vmem:[%s8290_s0 + $0x568] sm:$0xff] }
 0xd9f   :  { %v2035_v57 = vpop.permute.xlu0 %2034 }
 0xda0   :  { %5050 = vmatpush.xpose.msk.msra.mxu1 %vm98_vm2, %v2037_v22  ;;  %v2003_v12 = vpop.permute.xlu2 %2002 }
 0xda1   :  { %v2019_v20 = vmul.f32 %v2003_v12, %v6787_v44 }
 0xda4   :  { %5051 = vmatpush.xpose.msk.msra.mxu1 %vm98_vm2, %v2035_v57 }
 0xda7   :  { %v2029_v58 = vpop.permute.xlu0 %2028 }
 0xda8   :  { %5052 = vmatpush.xpose.msk.msra.mxu1 %vm98_vm2, %v2033_v40 }
 0xdac   :  { %5053 = vmatpush.xpose.msk.msra.mxu1 %vm98_vm2, %v2031_v21 }
 0xdaf   :  { %v2001_v61 = vpop.permute.xlu0 %2000 }
 0xdb0   :  { %5054 = vmatpush.xpose.msk.msra.mxu1 %vm98_vm2, %v2029_v58  ;;  %v2018_v39 = vmul.f32 %v2001_v61, %v6773_v50 }
 0xdb2   :  { %v5294_v6 = vpack.i.bf16 %v2018_v39, %v2019_v20 }
 0xdb3   :  { %5055 = vmatmul.msk.f32.vlgmr.msra.gmra.mxu1 %vm98_vm2, %v6797_v27 }
 0xdb7   :  { %v1999_v55 = vpop.permute.xlu0 %1998 }
 0xdbb   :  { %5056 = vmatmul.msk.f32.gmra.mxu1 %vm98_vm2, %v6809_v59 }
 0xdbf   :  { %v1997_v58 = vpop.permute.xlu0 %1996 }
 0xdc3   :  { %5057 = vmatmul.msk.f32.gmra.mxu1 %vm98_vm2, %v6769_v33 }
 0xdcb   :  { %5058 = vmatmul.msk.f32.gmra.mxu1 %vm98_vm2, %v6785_v7 }
 0xdd3   :  { %5059 = vmatmul.msk.f32.gmra.mxu1 %vm98_vm2, %v6799_v24 }
 0xddb   :  { %5060 = vmatmul.msk.f32.gmra.mxu1 %vm98_vm2, %v6762_v31 }
 0xde3   :  { %5061 = vmatmul.msk.f32.gmra.mxu1 %vm98_vm2, %v6773_v50 }
 0xdeb   :  { %5062 = vmatmul.msk.f32.gmra.mxu1 %vm98_vm2, %v6787_v44 }
 0xe30   :  { %v2101_v3 = vpop.f32.mrf.mxu1 }
 0xe31   :  { %v2125_v5 = vmul.f32 0.35355338, %v2101_v3  ;;  %v1995_v3 = vpop.permute.xlu0 %1994 }
 0xe33   :  { %v6855_v19 = vadd.f32 %v2133_v4, %v2125_v5  ;;  %v2016_v4 = vmul.f32 %v1997_v58, %v6799_v24  ;;  %v2017_v5 = vmul.f32 %v1999_v55, %v6762_v31 }
 0xe35   :  { %v2149_v43 = vsel %vm1268_vm3, %v6855_v19, -inf }
 0xe36   :  { %2150 = vmax.xlane.f32.xlu1 %v2149_v43  ;;  %v5299_v43 = vpack.i.bf16 %v2016_v4, %v2017_v5 }
 0xe38   :  { %v2104_v17 = vpop.f32.mrf.mxu1 }
 0xe39   :  { %v2126_v16 = vmul.f32 0.35355338, %v2104_v17  ;;  %v1993_v17 = vpop.permute.xlu0 %1992 }
 0xe3b   :  { %v6862_v54 = vadd.f32 %v2134_v38, %v2126_v16  ;;  %v2014_v38 = vmul.f32 %v1993_v17, %v6769_v33  ;;  %v2015_v16 = vmul.f32 %v1995_v3, %v6785_v7 }
 0xe3d   :  { %v2152_v18 = vsel %vm1268_vm3, %v6862_v54, -inf }
 0xe3e   :  { %2153 = vmax.xlane.f32.xlu2 %v2152_v18  ;;  %v5304_v18 = vpack.i.bf16 %v2014_v38, %v2015_v16 }
 0xe40   :  { %v2107_v13 = vpop.f32.mrf.mxu1 }
 0xe41   :  { %v2127_v15 = vmul.f32 0.35355338, %v2107_v13  ;;  %v1991_v20 = vpop.permute.xlu0 %1990 }
 0xe43   :  { %v6869_v14 = vadd.f32 %v2135_v23, %v2127_v15 }
 0xe45   :  { %v2155_v26 = vsel %vm1268_vm3, %v6869_v14, -inf }
 0xe46   :  { %2156 = vmax.xlane.f32.xlu1 %v2155_v26 }
 0xe48   :  { %v2110_v25 = vpop.f32.mrf.mxu1 }
 0xe49   :  { %v2128_v30 = vmul.f32 0.35355338, %v2110_v25 }
 0xe4b   :  { %v6876_v2 = vadd.f32 %v2136_v28, %v2128_v30 }
 0xe4d   :  { %v2158_v11 = vsel %vm1268_vm3, %v6876_v2, -inf }
 0xe4e   :  { %2159 = vmax.xlane.f32.xlu0 %v2158_v11 }
 0xe50   :  { %v2113_v52 = vpop.f32.mrf.mxu1 }
 0xe51   :  { %v2129_v44 = vmul.f32 0.35355338, %v2113_v52 }
 0xe53   :  { %v6895_v48 = vadd.f32 %v2137_v36, %v2129_v44 }
 0xe55   :  { %v2161_v49 = vsel %vm1268_vm3, %v6895_v48, -inf }
 0xe56   :  { %5295 = vrot.lane.b32.xlu2 %v5294_v6, %s5707_s1  ;;  %v2013_v6 = vmul.f32 %v1991_v20, %v6809_v59 }
 0xe58   :  { %v2116_v35 = vpop.f32.mrf.mxu1 }
 0xe5f   :  { %1988 = vrot.lane.b32.xlu1 %v6728_v0, %s5707_s1  ;;  %v2130_v0 = vmul.f32 0.35355338, %v2116_v35 }
 0xe60   :  { %v2119_v51 = vpop.f32.mrf.mxu1 }
 0xe61   :  { %v2131_v8 = vmul.f32 0.35355338, %v2119_v51  ;;  %v6905_v22 = vadd.f32 %v2138_v63, %v2130_v0 }
 0xe63   :  { %v6907_v57 = vadd.f32 %v2139_v56, %v2131_v8  ;;  %v2164_v40 = vsel %vm1268_vm3, %v6905_v22, -inf }
 0xe65   :  { %v2167_v21 = vsel %vm1268_vm3, %v6907_v57, -inf }
 0xe68   :  { %v2122_v53 = vpop.f32.mrf.mxu1 }
 0xe69   :  { %v2132_v10 = vmul.f32 0.35355338, %v2122_v53 }
 0xe6b   :  { %v6888_v42 = vadd.f32 %v2140_v9, %v2132_v10 }
 0xe6d   :  { %v2170_v50 = vsel %vm1268_vm3, %v6888_v42, -inf }
 0xe6e   :  { %2171 = vmax.xlane.f32.xlu0 %v2170_v50 }
 0xe7f   :  { %2162 = vmax.xlane.f32.xlu2 %v2161_v49 }
 0xe87   :  { %2165 = vmax.xlane.f32.xlu2 %v2164_v40 }
 0xe89   :  { %2168 = vmax.xlane.f32.xlu1 %v2167_v21 }
 0xe9f   :  { %5300 = vrot.lane.b32.xlu2 %v5299_v43, %s5707_s1 }
 0xea7   :  { %5305 = vrot.lane.b32.xlu2 %v5304_v18, %s5707_s1 }
 0xea9   :  { %v2151_v13 = vpop.xlane.xlu1 %2150 }
 0xeaa   :  { %v2173_v23 = vsub.f32 %v6855_v19, %v2151_v13 }
 0xeac   :  { %v2181_v15 = vmul.f32 1.442695, %v2173_v23 }
 0xeae   :  { %5503 = vpow2.f32 %v2181_v15 }
 0xeb1   :  { %v2154_v26 = vpop.xlane.xlu2 %2153 }
 0xeb2   :  { %v2174_v24 = vsub.f32 %v6862_v54, %v2154_v26 }
 0xeb4   :  { %v6921_v31 = vpop.eup %5503  ;;  %v2183_v25 = vmul.f32 1.442695, %v2174_v24 }
 0xeb5   :  { %v2197_v28 = vsel %vm1268_vm3, %v6921_v31, 0.0 }
 0xeb6   :  { %5505 = vpow2.f32 %v2183_v25  ;;  %2198 = vadd.xlane.f32.xlu0 %v2197_v28 }
 0xeb9   :  { %v2157_v33 = vpop.xlane.xlu1 %2156  ;;  %v5296_v7 = vpop.permute.xlu2 %5295 }
 0xeba   :  { %v2175_v30 = vsub.f32 %v6869_v14, %v2157_v33  ;;  %v5297_v61 = vunpack.i.l.bf16 %v5296_v7  ;;  %v5298_v12 = vunpack.i.h.bf16 %v5296_v7 }
 0xebc   :  { %v6926_v11 = vpop.eup %5505  ;;  %v2185_v19 = vmul.f32 1.442695, %v2175_v30  ;;  %2301 = vmatpush.msra.mxu2 %v5297_v61 }
 0xebd   :  { %v2200_v54 = vsel %vm1268_vm3, %v6926_v11, 0.0 }
 0xebe   :  { %5507 = vpow2.f32 %v2185_v19  ;;  %2201 = vadd.xlane.f32.xlu0 %v2200_v54  ;;  %2302 = vmatpush.msra.mxu2 %v5298_v12 }
 0xec1   :  { %v2160_v53 = vpop.xlane.xlu0 %2159 }
 0xec2   :  { %v2176_v9 = vsub.f32 %v6876_v2, %v2160_v53 }
 0xec4   :  { %v6930_v39 = vpop.eup %5507  ;;  %v2187_v10 = vmul.f32 1.442695, %v2176_v9 }
 0xec5   :  { %v2203_v52 = vsel %vm1268_vm3, %v6930_v39, 0.0 }
 0xec6   :  { %2204 = vadd.xlane.f32.xlu1 %v2203_v52  ;;  %5509 = vpow2.f32 %v2187_v10 }
 0xecc   :  { %v5510_v63 = vpop.eup %5509 }
 0xecd   :  { %v2206_v2 = vsel %vm1268_vm3, %v5510_v63, 0.0 }
 0xed1   :  { %v1989_v14 = vpop.permute.xlu1 %1988 }
 0xed2   :  { %v2012_v35 = vmul.f32 %v1989_v14, %v6797_v27 }
 0xed4   :  { %v5309_v51 = vpack.i.bf16 %v2012_v35, %v2013_v6 }
 0xed6   :  { %5310 = vrot.lane.b32.xlu2 %v5309_v51, %s5707_s1 }
 0xee1   :  { %v2172_v0 = vpop.xlane.xlu0 %2171 }
 0xee2   :  { %v2180_v8 = vsub.f32 %v6888_v42, %v2172_v0 }
 0xee4   :  { %v2195_v58 = vmul.f32 1.442695, %v2180_v8 }
 0xef2   :  { %v2163_v50 = vpop.xlane.xlu2 %2162 }
 0xef3   :  { %v2177_v44 = vsub.f32 %v6895_v48, %v2163_v50 }
 0xef5   :  { %v2189_v36 = vmul.f32 1.442695, %v2177_v44 }
 0xef7   :  { %5511 = vpow2.f32 %v2189_v36 }
 0xefa   :  { %v2166_v49 = vpop.xlane.xlu2 %2165 }
 0xefb   :  { %v2178_v59 = vsub.f32 %v6905_v22, %v2166_v49  ;;  %v2343_v49 = vld [vmem:[%s8290_s0 + $0x150] sm:$0xff] }
 0xefc   :  { %v2169_v55 = vpop.xlane.xlu1 %2168  ;;  %2364 = vmatpush.msra.mxu3 %v2343_v49  ;;  %v2674_v49 = vld [vmem:[%s8294_s4 + $0x10] sm:$0xff] }
 0xefd   :  { %v5512_v27 = vpop.eup %5511  ;;  %v2191_v56 = vmul.f32 1.442695, %v2178_v59  ;;  %v2179_v40 = vsub.f32 %v6907_v57, %v2169_v55  ;;  %v2341_v55 = vld [vmem:[%s8290_s0 + $0x140] sm:$0xff] }
 0xefe   :  { %v2209_v21 = vsel %vm1268_vm3, %v5512_v27, 0.0 }
 0xeff   :  { %5513 = vpow2.f32 %v2191_v56  ;;  %v2193_v48 = vmul.f32 1.442695, %v2179_v40  ;;  %2207 = vadd.xlane.f32.xlu2 %v2206_v2  ;;  %2210 = vadd.xlane.f32.xlu0 %v2209_v21 }
 0xf01   :  { %5515 = vpow2.f32 %v2193_v48 }
 0xf02   :  { %v5301_v3 = vpop.permute.xlu2 %5300  ;;  %5517 = vpow2.f32 %v2195_v58 }
 0xf03   :  { %v5302_v4 = vunpack.i.l.bf16 %v5301_v3  ;;  %v5303_v5 = vunpack.i.h.bf16 %v5301_v3 }
 0xf05   :  { %v5514_v22 = vpop.eup %5513  ;;  %2303 = vmatpush.msra.mxu2 %v5302_v4 }
 0xf06   :  { %v2212_v42 = vsel %vm1268_vm3, %v5514_v22, 0.0 }
 0xf07   :  { %v5516_v43 = vpop.eup %5515  ;;  %2213 = vadd.xlane.f32.xlu1 %v2212_v42  ;;  %2304 = vmatpush.msra.mxu2 %v5303_v5  ;;  %v5377_v42 = vld [vmem:[%s8290_s0 + $0x158] ss:$0 sm:$0xff] }
 0xf08   :  { %v2215_v57 = vsel %vm1268_vm3, %v5516_v43, 0.0  ;;  %v5518_v38 = vpop.eup %5517 }
 0xf09   :  { %2216 = vadd.xlane.f32.xlu0 %v2215_v57  ;;  %v2218_v13 = vsel %vm1268_vm3, %v5518_v38, 0.0 }
 0xf0a   :  { %v5306_v17 = vpop.permute.xlu2 %5305 }
 0xf0b   :  { %v5307_v16 = vunpack.i.l.bf16 %v5306_v17  ;;  %v5308_v18 = vunpack.i.h.bf16 %v5306_v17 }
 0xf0d   :  { %2305 = vmatpush.msra.mxu2 %v5307_v16 }
 0xf0f   :  { %2219 = vadd.xlane.f32.xlu1 %v2218_v13  ;;  %2306 = vmatpush.msra.mxu2 %v5308_v18 }
 0xf29   :  { %v2199_v23 = vpop.xlane.xlu0 %2198 }
 0xf2a   :  { %5519 = vrcp.f32 %v2199_v23 }
 0xf30   :  { %v5311_v15 = vpop.permute.xlu2 %5310  ;;  %v5520_v26 = vpop.eup %5519 }
 0xf31   :  { %v5312_v24 = vunpack.i.l.bf16 %v5311_v15  ;;  %v2202_v25 = vpop.xlane.xlu0 %2201  ;;  %v5313_v28 = vunpack.i.h.bf16 %v5311_v15  ;;  %v2229_v33 = vmul.f32 %v5520_v26, %v6921_v31  ;;  %v2631_v15 = vld [vmem:[%s8290_s0 + $0x20] sm:$0xf]  ;;  %v2630_v26 = vld [vmem:[%s8290_s0 + $0x18] sm:$0xff] }
 0xf32   :  { %5521 = vrcp.f32 %v2202_v25 }
 0xf33   :  { %2307 = vmatpush.msra.mxu2 %v5312_v24  ;;  %v2629_v24 = vld [vmem:[%s8293_s3 + $0x10] sm:$0xff] }
 0xf35   :  { %2308 = vmatpush.msra.mxu2 %v5313_v28 }
 0xf36   :  { %5063 = vmatmul.msk.f32.vlgmr.msra.gmra.mxu2 %vm1268_vm3, %v2229_v33 }
 0xf38   :  { %v5522_v7 = vpop.eup %5521 }
 0xf39   :  { %v2205_v30 = vpop.xlane.xlu1 %2204  ;;  %v2230_v61 = vmul.f32 %v5522_v7, %v6926_v11 }
 0xf3a   :  { %5523 = vrcp.f32 %v2205_v30 }
 0xf3e   :  { %5064 = vmatmul.msk.f32.gmra.mxu2 %vm1268_vm3, %v2230_v61 }
 0xf40   :  { %v5524_v19 = vpop.eup %5523 }
 0xf41   :  { %v2231_v12 = vmul.f32 %v5524_v19, %v6930_v39 }
 0xf46   :  { %5065 = vmatmul.msk.f32.gmra.mxu2 %vm1268_vm3, %v2231_v12 }
 0xf72   :  { %v2208_v54 = vpop.xlane.xlu2 %2207  ;;  %v2211_v52 = vpop.xlane.xlu0 %2210 }
 0xf73   :  { %5525 = vrcp.f32 %v2208_v54 }
 0xf74   :  { %5527 = vrcp.f32 %v2211_v52 }
 0xf79   :  { %v5526_v20 = vpop.eup %5525 }
 0xf7a   :  { %v2232_v31 = vmul.f32 %v5526_v20, %v5510_v63  ;;  %v2214_v14 = vpop.xlane.xlu1 %2213  ;;  %v5528_v6 = vpop.eup %5527  ;;  %v2342_v63 = vld [vmem:[%s8290_s0 + $0x148] sm:$0xff] }
 0xf7b   :  { %5529 = vrcp.f32 %v2214_v14  ;;  %v2233_v35 = vmul.f32 %v5528_v6, %v5512_v27  ;;  %2365 = vmatpush.msra.mxu3 %v2342_v63  ;;  %v2340_v27 = vld [vmem:[%s8290_s0 + $0x138] sm:$0xff]  ;;  %v2432_v20 = vld [vmem:[%s8290_s0 + $0x188] sm:$0xff] }
 0xf7c   :  { %5066 = vmatmul.msk.f32.gmra.mxu2 %vm1268_vm3, %v2232_v31  ;;  %v2217_v11 = vpop.xlane.xlu0 %2216  ;;  %2453 = vmatpush.msrb.mxu0 %v2432_v20  ;;  %v2431_v31 = vld [vmem:[%s8290_s0 + $0x180] sm:$0xff]  ;;  %v2430_v6 = vld [vmem:[%s8290_s0 + $0x178] sm:$0xff]  ;;  %v2688_v20 = vld [vmem:[%s8290_s0 + $0x748] sm:$0xff] }
 0xf7d   :  { %5531 = vrcp.f32 %v2217_v11  ;;  %2366 = vmatpush.msra.mxu3 %v2341_v55 }
 0xf7e   :  { %2454 = vmatpush.msrb.mxu0 %v2431_v31  ;;  %v2689_v31 = vld [vmem:[%s8290_s0 + $0x750] sm:$0xff] }
 0xf7f   :  { %2367 = vmatpush.msra.mxu3 %v2340_v27 }
 0xf80   :  { %2455 = vmatpush.msrb.mxu0 %v2430_v6  ;;  %v2488_v6 = vld [vmem:[%s8290_s0 + $0x1c8] sm:$0xff] }
 0xf81   :  { %v5530_v51 = vpop.eup %5529  ;;  %5077 = vmatpush.msk.msrb.mxu3 %vm41_vm0, %v2631_v15 }
 0xf82   :  { %v2234_v39 = vmul.f32 %v5530_v51, %v5514_v22  ;;  %v2220_v53 = vpop.xlane.xlu1 %2219 }
 0xf83   :  { %v5532_v9 = vpop.eup %5531  ;;  %5533 = vrcp.f32 %v2220_v53  ;;  %2661 = vmatpush.msrb.mxu3 %v2630_v26 }
 0xf84   :  { %5067 = vmatmul.msk.f32.gmra.mxu2 %vm1268_vm3, %v2233_v35  ;;  %v2235_v10 = vmul.f32 %v5532_v9, %v5516_v43  ;;  %v2429_v35 = vld [vmem:[%s8290_s0 + $0x170] sm:$0xff]  ;;  %v5380_v9 = vld [vmem:[%s8290_s0 + $0x28] ss:$0 sm:$0xff] }
 0xf85   :  { %2456 = vmatpush.msrb.mxu0 %v2429_v35  ;;  %v2487_v35 = vld [vmem:[%s8290_s0 + $0x1c0] sm:$0xff] }
 0xf89   :  { %v5534_v50 = vpop.eup %5533 }
 0xf8a   :  { %v2236_v44 = vmul.f32 %v5534_v50, %v5518_v38 }
 0xf8c   :  { %5068 = vmatmul.msk.f32.gmra.mxu2 %vm1268_vm3, %v2234_v39 }
 0xf94   :  { %5069 = vmatmul.msk.f32.gmra.mxu2 %vm1268_vm3, %v2235_v10 }
 0xf9c   :  { %5070 = vmatmul.msk.f32.gmra.mxu2 %vm1268_vm3, %v2236_v44 }
 0xfb9   :  { %v2310_v36 = vpop.f32.mrf.mxu2 }
 0xfc1   :  { %v2313_v0 = vpop.f32.mrf.mxu2 }
 0xfc9   :  { %v2316_v59 = vpop.f32.mrf.mxu2 }
 0xfca   :  { %v2334_v2 = vadd.f32 %v2316_v59, %v2310_v36  ;;  %v2673_v36 = vld [vmem:[%s8294_s4 + $0x8] sm:$0xff] }
 0xfff   :  { %v2319_v8 = vpop.f32.mrf.mxu2 }
0x1000   :  { %v2335_v3 = vadd.f32 %v2319_v8, %v2313_v0 }
0x1007   :  { %v2322_v56 = vpop.f32.mrf.mxu2 }
0x1008   :  { %v2336_v21 = vadd.f32 %v2334_v2, %v2322_v56  ;;  %v2672_v56 = vld [vmem:[%s8294_s4] sm:$0xff] }
0x100f   :  { %v2325_v40 = vpop.f32.mrf.mxu2 }
0x1010   :  { %v2337_v4 = vadd.f32 %v2335_v3, %v2325_v40 }
0x1017   :  { %v2328_v48 = vpop.f32.mrf.mxu2 }
0x1018   :  { %v2338_v58 = vadd.f32 %v2336_v21, %v2328_v48 }
0x101a   :  { %5071 = vmatmul.msk.f32.vlgmr.msra.gmra.mxu3 %vm98_vm2, %v2338_v58 }
0x101f   :  { %v2331_v22 = vpop.f32.mrf.mxu2 }
0x1020   :  { %v2339_v5 = vadd.f32 %v2337_v4, %v2331_v22 }
0x1022   :  { %5072 = vmatmul.msk.f32.gmra.mxu3 %vm98_vm2, %v2339_v5 }
0x109d   :  { %v2369_v43 = vpop.f32.mrf.mxu3 }
0x109e   :  { %v2370_v57 = vadd.f32 %v5377_v42, %v2369_v43 }
0x10a0   :  { %v2375_v17 = vadd.f32 %v2370_v57, %v6651_v34  ;;  %v2627_v34 = vld [vmem:[%s8293_s3] sm:$0xff] }
0x10a1   :  { %5078 = vmatmul.msk.f32.vlgmr.msrb.gmra.mxu3 %vm28_vm1, %v2627_v34 }
0x10a2   :  { %v2379_v38 = vsel %vm98_vm2, %v2375_v17, 0.0 }
0x10a3   :  { %2380 = vadd.xlane.f32.xlu0 %v2379_v38 }
0x10a5   :  { %v2372_v16 = vpop.f32.mrf.mxu3 }
0x10a6   :  { %v2373_v18 = vadd.f32 %v5377_v42, %v2372_v16  ;;  %v5378_v42 = vld [vmem:[%s8290_s0 + $0x160] ss:$0 sm:$0xff] }
0x10a8   :  { %v2376_v13 = vadd.f32 %v2373_v18, %v6649_v47  ;;  %v2628_v47 = vld [vmem:[%s8293_s3 + $0x8] sm:$0xff] }
0x10a9   :  { %5079 = vmatmul.msk.f32.gmra.mxu3 %vm28_vm1, %v2628_v47 }
0x10aa   :  { %v2382_v23 = vsel %vm98_vm2, %v2376_v13, 0.0 }
0x10ab   :  { %2383 = vadd.xlane.f32.xlu1 %v2382_v23 }
0x10b1   :  { %5080 = vmatmul.msk.f32.gmra.mxu3 %vm28_vm1, %v2629_v24 }
0x1116   :  { %v2381_v25 = vpop.xlane.xlu0 %2380 }
0x1117   :  { %v2385_v28 = vmul.f32 %v2381_v25, %v6383_v41  ;;  %v2678_v25 = vld [vmem:[%s8290_s0 + $0x6f8] sm:$0xff] }
0x1119   :  { %v2387_v33 = vsub.f32 %v2375_v17, %v2385_v28  ;;  %v5379_v17 = vld [vmem:[%s8290_s0 + $0x168] ss:$0 sm:$0xff]  ;;  %v2679_v28 = vld [vmem:[%s8290_s0 + $0x700] sm:$0xff] }
0x111b   :  { %v2389_v7 = vmul.f32 %v2387_v33, %v2387_v33 }
0x111d   :  { %v2391_v30 = vsel %vm98_vm2, %v2389_v7, 0.0  ;;  %v2681_v7 = vld [vmem:[%s8290_s0 + $0x710] sm:$0xff] }
0x111e   :  { %2392 = vadd.xlane.f32.xlu0 %v2391_v30  ;;  %v2384_v61 = vpop.xlane.xlu1 %2383  ;;  %v2682_v30 = vld [vmem:[%s8290_s0 + $0x718] sm:$0xff] }
0x111f   :  { %v2386_v19 = vmul.f32 %v2384_v61, %v6383_v41  ;;  %v2683_v61 = vld [vmem:[%s8290_s0 + $0x720] sm:$0xff] }
0x1121   :  { %v7001_v12 = vsub.f32 %v2376_v13, %v2386_v19  ;;  %v2684_v19 = vld [vmem:[%s8290_s0 + $0x728] sm:$0xff] }
0x1123   :  { %v2390_v54 = vmul.f32 %v7001_v12, %v7001_v12 }
0x1124   :  { %v2663_v14 = vpop.f32.mrf.mxu3 }
0x1125   :  { %v2394_v52 = vsel %vm98_vm2, %v2390_v54, 0.0  ;;  %v2664_v55 = vadd.f32 %v5380_v9, %v2663_v14  ;;  %v2686_v54 = vld [vmem:[%s8290_s0 + $0x738] sm:$0xff]  ;;  %v2489_v14 = vld [vmem:[%s8290_s0 + $0x1d0] sm:$0xff] }
0x1126   :  { %2395 = vadd.xlane.f32.xlu1 %v2394_v52  ;;  %v2687_v52 = vld [vmem:[%s8290_s0 + $0x740] sm:$0xff]  ;;  %2506 = vmatpush.msrb.mxu1 %v2489_v14 }
0x1127   :  { %v7036_v48 = vadd.f32 %v2672_v56, %v2664_v55  ;;  %v2781_v55 = vld [vmem:[%s8290_s0 + $0x280] sm:$0xff] }
0x1128   :  { %2507 = vmatpush.msrb.mxu1 %v2488_v6 }
0x112a   :  { %2508 = vmatpush.msrb.mxu1 %v2487_v35 }
0x112c   :  { %v2666_v39 = vpop.f32.mrf.mxu3 }
0x112d   :  { %v2667_v44 = vadd.f32 %v5380_v9, %v2666_v39  ;;  %v2484_v39 = vld [vmem:[%s8290_s0 + $0x1a8] sm:$0xff] }
0x112f   :  { %v7032_v40 = vadd.f32 %v2673_v36, %v2667_v44 }
0x1134   :  { %v2669_v0 = vpop.f32.mrf.mxu3 }
0x1135   :  { %v2670_v27 = vadd.f32 %v5380_v9, %v2669_v0  ;;  %v2482_v9 = vld [vmem:[%s8290_s0 + $0x198] sm:$0xff]  ;;  %v2783_v0 = vld [vmem:[%s8290_s0 + $0x290] sm:$0xff] }
0x1137   :  { %v7034_v2 = vadd.f32 %v2674_v49, %v2670_v27  ;;  %v2782_v49 = vld [vmem:[%s8290_s0 + $0x288] sm:$0xff] }
0x1139   :  { %2740 = vmatpush.msra.mxu0 %v7034_v2 }
0x113b   :  { %2741 = vmatpush.msra.mxu0 %v7032_v40 }
0x113d   :  { %2742 = vmatpush.msra.mxu0 %v7036_v48 }
0x1191   :  { %v2393_v11 = vpop.xlane.xlu0 %2392 }
0x1192   :  { %v2397_v51 = vmul.f32 %v2393_v11, %v6383_v41  ;;  %v2486_v11 = vld [vmem:[%s8290_s0 + $0x1b8] sm:$0xff] }
0x1193   :  { %2509 = vmatpush.msrb.mxu1 %v2486_v11 }
0x1194   :  { %v2399_v53 = vadd.f32 1e-05, %v2397_v51  ;;  %v2485_v51 = vld [vmem:[%s8290_s0 + $0x1b0] sm:$0xff] }
0x1195   :  { %2510 = vmatpush.msrb.mxu1 %v2485_v51 }
0x1196   :  { %5535 = vrsqrt.f32 %v2399_v53  ;;  %vm2407_vm1 = vweird.f32 %v2399_v53 }
0x1197   :  { %2511 = vmatpush.msrb.mxu1 %v2484_v39 }
0x1199   :  { %v2396_v10 = vpop.xlane.xlu1 %2395 }
0x119a   :  { %v2398_v50 = vmul.f32 %v2396_v10, %v6383_v41  ;;  %v7131_v10 = vld [vmem:[%s8290_s0 + $0x870] sm:$0xff] }
0x119b   :  { %2921 = vrot.lane.b32.xlu0 %v7131_v10, %s5705_s26 }
0x119c   :  { %v5536_v63 = vpop.eup %5535  ;;  %v2400_v59 = vadd.f32 1e-05, %v2398_v50  ;;  %v5381_v50 = vld [vmem:[%s8290_s0 + $0x190] ss:$0 sm:$0xff] }
0x119d   :  { %v2402_v8 = vmul.f32 %v5536_v63, %v2399_v53  ;;  %vm2408_vm0 = vweird.f32 %v5536_v63  ;;  %v2483_v53 = vld [vmem:[%s8290_s0 + $0x1a0] sm:$0xff] }
0x119e   :  { %5537 = vrsqrt.f32 %v2400_v59  ;;  %vm2409_vm12 = vmor %vm2407_vm1, %vm2408_vm0  ;;  %vm2417_vm14 = vweird.f32 %v2400_v59  ;;  %2512 = vmatpush.msrb.mxu1 %v2483_v53 }
0x119f   :  { %v2403_v21 = vmul.f32 %v5536_v63, %v2402_v8  ;;  %v2780_v8 = vld [vmem:[%s8290_s0 + $0x278] sm:$0xff] }
0x11a0   :  { %2513 = vmatpush.msrb.mxu1 %v2482_v9 }
0x11a1   :  { %v2404_v58 = vmul.f32 0.5, %v2403_v21 }
0x11a2   :  { %2834 = vmatpush.msra.mxu1 %v2783_v0 }
0x11a3   :  { %v2405_v3 = vsub.f32 1.5, %v2404_v58 }
0x11a4   :  { %v5538_v4 = vpop.eup %5537  ;;  %2835 = vmatpush.msra.mxu1 %v2782_v49 }
0x11a5   :  { %v2406_v22 = vmul.f32 %v5536_v63, %v2405_v3  ;;  %v2412_v5 = vmul.f32 %v5538_v4, %v2400_v59  ;;  %vm2418_vm13 = vweird.f32 %v5538_v4  ;;  %v7147_v59 = vld [vmem:[%s8290_s0 + $0x858] sm:$0xff] }
0x11a6   :  { %vm2419_vm15 = vmor %vm2417_vm14, %vm2418_vm13  ;;  %2915 = vrot.lane.b32.xlu0 %v7147_v59, %s5705_s26  ;;  %2836 = vmatpush.msra.mxu1 %v2781_v55 }
0x11a7   :  { %v2410_v43 = vsel %vm2409_vm12, %v5536_v63, %v2406_v22  ;;  %v2413_v57 = vmul.f32 %v5538_v4, %v2412_v5 }
0x11a8   :  { %v2421_v38 = vmul.f32 %v2410_v43, %v2387_v33  ;;  %v2680_v33 = vld [vmem:[%s8290_s0 + $0x708] sm:$0xff]  ;;  %2837 = vmatpush.msra.mxu1 %v2780_v8 }
0x11a9   :  { %v2414_v16 = vmul.f32 0.5, %v2413_v57 }
0x11aa   :  { %v2424_v18 = vmul.f32 %v5378_v42, %v2421_v38  ;;  %v7167_v38 = vld [vmem:[%s8290_s0 + $0x860] sm:$0xff] }
0x11ab   :  { %v2415_v13 = vsub.f32 1.5, %v2414_v16  ;;  %v7172_v16 = vld [vmem:[%s8290_s0 + $0x838] sm:$0xff]  ;;  %2917 = vrot.lane.b32.xlu2 %v7167_v38, %s5705_s26 }
0x11ac   :  { %v7047_v23 = vadd.f32 %v5379_v17, %v2424_v18 }
0x11ad   :  { %v2416_v15 = vmul.f32 %v5538_v4, %v2415_v13 }
0x11ae   :  { %5073 = vmatmul.msk.f32.vlgmr.msrb.gmra.mxu0 %vm98_vm2, %v7047_v23 }
0x11af   :  { %v2420_v26 = vsel %vm2419_vm15, %v5538_v4, %v2416_v15  ;;  %v7160_v4 = vld [vmem:[%s8290_s0 + $0x850] sm:$0xff] }
0x11b0   :  { %v2422_v34 = vmul.f32 %v2420_v26, %v7001_v12  ;;  %v2685_v12 = vld [vmem:[%s8290_s0 + $0x730] sm:$0xff]  ;;  %2913 = vrot.lane.b32.xlu0 %v7160_v4, %s5705_s26 }
0x11b2   :  { %v2425_v47 = vmul.f32 %v5378_v42, %v2422_v34 }
0x11b4   :  { %v7052_v24 = vadd.f32 %v5379_v17, %v2425_v47  ;;  %v7182_v47 = vld [vmem:[%s8290_s0 + $0x840] sm:$0xff] }
0x11b5   :  { %2909 = vrot.lane.b32.xlu2 %v7182_v47, %s5705_s26 }
0x11b6   :  { %5074 = vmatmul.msk.f32.gmra.mxu0 %vm98_vm2, %v7052_v24 }
0x11b8   :  { %2907 = vrot.lane.b32.xlu0 %v7172_v16, %s5705_s26 }
0x11be   :  { %5081 = vmatmul.msk.f32.vlgmr.msra.gmra.mxu0 %vm2690_vm4, %v2678_v25  ;;  %v7187_v25 = vld [vmem:[%s8290_s0 + $0x820] sm:$0xff] }
0x11c0   :  { %2901 = vrot.lane.b32.xlu0 %v7187_v25, %s5705_s26 }
0x11c6   :  { %5082 = vmatmul.msk.f32.gmra.mxu0 %vm2690_vm4, %v2679_v28  ;;  %v7192_v28 = vld [vmem:[%s8290_s0 + $0x868] sm:$0xff] }
0x11c7   :  { %2919 = vrot.lane.b32.xlu1 %v7192_v28, %s5705_s26 }
0x11ce   :  { %5083 = vmatmul.msk.f32.gmra.mxu0 %vm2690_vm4, %v2680_v33 }
0x11d6   :  { %5084 = vmatmul.msk.f32.gmra.mxu0 %vm2690_vm4, %v2681_v7 }
0x11de   :  { %5085 = vmatmul.msk.f32.gmra.mxu0 %vm2690_vm4, %v2682_v30 }
0x11e6   :  { %5086 = vmatmul.msk.f32.gmra.mxu0 %vm2690_vm4, %v2683_v61 }
0x11ee   :  { %5087 = vmatmul.msk.f32.gmra.mxu0 %vm2690_vm4, %v2684_v19 }
0x11f6   :  { %5088 = vmatmul.msk.f32.gmra.mxu0 %vm2690_vm4, %v2685_v12  ;;  %v7204_v12 = vld [vmem:[%s8290_s0 + $0x828] sm:$0xff] }
0x11f7   :  { %2903 = vrot.lane.b32.xlu2 %v7204_v12, %s5705_s26 }
0x11fe   :  { %5089 = vmatmul.msk.f32.gmra.mxu0 %vm2690_vm4, %v2686_v54  ;;  %v7209_v54 = vld [vmem:[%s8290_s0 + $0x848] sm:$0xff] }
0x11ff   :  { %2911 = vrot.lane.b32.xlu1 %v7209_v54, %s5705_s26 }
0x1206   :  { %5090 = vmatmul.msk.f32.gmra.mxu0 %vm2690_vm4, %v2687_v52 }
0x120e   :  { %5091 = vmatmul.msk.f32.gmra.mxu0 %vm2690_vm4, %v2688_v20  ;;  %v7219_v20 = vld [vmem:[%s8290_s0 + $0x818] sm:$0xff] }
0x120f   :  { %2899 = vrot.lane.b32.xlu2 %v7219_v20, %s5705_s26 }
0x1216   :  { %5092 = vmatmul.msk.f32.gmra.mxu0 %vm2690_vm4, %v2689_v31  ;;  %v7224_v31 = vld [vmem:[%s8290_s0 + $0x830] sm:$0xff] }
0x1217   :  { %2905 = vrot.lane.b32.xlu1 %v7224_v31, %s5705_s26 }
0x122b   :  { %v2458_v44 = vpop.f32.mrf.mxu0 }
0x122c   :  { %v2459_v36 = vadd.f32 %v5381_v50, %v2458_v44 }
0x122e   :  { %v2464_v63 = vmul.f32 %v2459_v36, %v2459_v36 }
0x1230   :  { %v2466_v27 = vmul.f32 %v2464_v63, %v2459_v36 }
0x1232   :  { %v2468_v56 = vmul.f32 0.044715, %v2466_v27 }
0x1233   :  { %v2461_v21 = vpop.f32.mrf.mxu0 }
0x1234   :  { %v2470_v58 = vadd.f32 %v2468_v56, %v2459_v36  ;;  %v2462_v3 = vadd.f32 %v5381_v50, %v2461_v21  ;;  %v2922_v21 = vpop.permute.xlu0 %2921 }
0x1236   :  { %v2472_v22 = vmul.f32 0.7978846, %v2470_v58  ;;  %v2465_v5 = vmul.f32 %v2462_v3, %v2462_v3 }
0x1238   :  { %5539 = vtanh.f32 %v2472_v22  ;;  %v2467_v42 = vmul.f32 %v2465_v5, %v2462_v3  ;;  %v5383_v22 = vld [vmem:[%s8290_s0 + $0x298] ss:$0 sm:$0xff] }
0x123a   :  { %v2469_v43 = vmul.f32 0.044715, %v2467_v42 }
0x123b   :  { %v2744_v17 = vpop.f32.mrf.mxu0 }
0x123c   :  { %v2471_v57 = vadd.f32 %v2469_v43, %v2462_v3  ;;  %v2916_v43 = vpop.permute.xlu0 %2915 }
0x123e   :  { %v5540_v18 = vpop.eup %5539  ;;  %v2473_v13 = vmul.f32 0.7978846, %v2471_v57 }
0x123f   :  { %v2476_v15 = vadd.f32 1.0, %v5540_v18 }
0x1240   :  { %5541 = vtanh.f32 %v2473_v13 }
0x1241   :  { %v2478_v26 = vmul.f32 0.5, %v2476_v15 }
0x1243   :  { %v2480_v34 = vmul.f32 %v2478_v26, %v2459_v36  ;;  %v2747_v7 = vpop.f32.mrf.mxu0 }
0x1245   :  { %5075 = vmatmul.msk.f32.vlgmr.msrb.gmra.mxu1 %vm1268_vm3, %v2480_v34 }
0x1246   :  { %v5542_v33 = vpop.eup %5541 }
0x1247   :  { %v2477_v30 = vadd.f32 1.0, %v5542_v33 }
0x1249   :  { %v2479_v61 = vmul.f32 0.5, %v2477_v30  ;;  %v2920_v30 = vpop.permute.xlu1 %2919 }
0x124b   :  { %v2481_v19 = vmul.f32 %v2479_v61, %v2462_v3  ;;  %v2750_v52 = vpop.f32.mrf.mxu0  ;;  %v2918_v3 = vpop.permute.xlu2 %2917 }
0x124d   :  { %5076 = vmatmul.msk.f32.gmra.mxu1 %vm1268_vm3, %v2481_v19 }
0x1253   :  { %v2753_v14 = vpop.f32.mrf.mxu0  ;;  %v2910_v18 = vpop.permute.xlu2 %2909 }
0x1255   :  { %5093 = vmatmul.msk.f32.vlgmr.msra.gmra.mxu1 %vm98_vm2, %v2744_v17 }
0x125b   :  { %v2756_v6 = vpop.f32.mrf.mxu0 }
0x125d   :  { %5094 = vmatmul.msk.f32.gmra.mxu1 %vm98_vm2, %v2747_v7  ;;  %v2904_v7 = vpop.permute.xlu2 %2903 }
0x1263   :  { %v2759_v35 = vpop.f32.mrf.mxu0 }
0x1265   :  { %5095 = vmatmul.msk.f32.gmra.mxu1 %vm98_vm2, %v2750_v52  ;;  %v2914_v52 = vpop.permute.xlu0 %2913 }
0x126b   :  { %v2762_v11 = vpop.f32.mrf.mxu0 }
0x126d   :  { %5096 = vmatmul.msk.f32.gmra.mxu1 %vm98_vm2, %v2753_v14 }
0x1273   :  { %v2765_v51 = vpop.f32.mrf.mxu0 }
0x1275   :  { %5097 = vmatmul.msk.f32.gmra.mxu1 %vm98_vm2, %v2756_v6 }
0x127b   :  { %v2768_v39 = vpop.f32.mrf.mxu0 }
0x127d   :  { %5098 = vmatmul.msk.f32.gmra.mxu1 %vm98_vm2, %v2759_v35 }
0x1283   :  { %v2771_v53 = vpop.f32.mrf.mxu0 }
0x1285   :  { %5099 = vmatmul.msk.f32.gmra.mxu1 %vm98_vm2, %v2762_v11 }
0x128b   :  { %v2774_v9 = vpop.f32.mrf.mxu0 }
0x128d   :  { %5100 = vmatmul.msk.f32.gmra.mxu1 %vm98_vm2, %v2765_v51 }
0x1293   :  { %v2777_v50 = vpop.f32.mrf.mxu0 }
0x1295   :  { %5101 = vmatmul.msk.f32.gmra.mxu1 %vm98_vm2, %v2768_v39  ;;  %v2908_v39 = vpop.permute.xlu0 %2907 }
0x129d   :  { %5102 = vmatmul.msk.f32.gmra.mxu1 %vm98_vm2, %v2771_v53 }
0x12a5   :  { %5103 = vmatmul.msk.f32.gmra.mxu1 %vm98_vm2, %v2774_v9 }
0x12ad   :  { %5104 = vmatmul.msk.f32.gmra.mxu1 %vm98_vm2, %v2777_v50 }
0x12c2   :  { %v7241_v44 = vpop.f32.mrf.mxu1 }
0x12ca   :  { %v7243_v36 = vpop.f32.mrf.mxu1 }
0x12d2   :  { %v2839_v0 = vpop.f32.mrf.mxu1 }
0x12da   :  { %v2842_v49 = vpop.f32.mrf.mxu1 }
0x12e2   :  { %v2845_v63 = vpop.f32.mrf.mxu1 }
0x12e3   :  { %v7256_v26 = vadd.f32 %v5383_v22, %v2845_v63 }
0x12e5   :  { %v2937_v61 = vmul.f32 %v2904_v7, %v7256_v26 }
0x12ea   :  { %v2848_v55 = vpop.f32.mrf.mxu1 }
0x12f2   :  { %v2851_v27 = vpop.f32.mrf.mxu1 }
0x12f3   :  { %v7276_v9 = vadd.f32 %v5383_v22, %v2851_v27 }
0x12f5   :  { %v2939_v63 = vmul.f32 %v2908_v39, %v7276_v9  ;;  %v3158_v39 = vld [vmem:[%s8290_s0 + $0x588] sm:$0xff] }
0x12fa   :  { %v2854_v8 = vpop.f32.mrf.mxu1 }
0x12fb   :  { %v7252_v17 = vadd.f32 %v5383_v22, %v2854_v8  ;;  %v2912_v8 = vpop.permute.xlu1 %2911 }
0x12fd   :  { %v2940_v15 = vmul.f32 %v2910_v18, %v7252_v17  ;;  %v3156_v18 = vld [vmem:[%s8290_s0 + $0x578] sm:$0xff] }
0x1302   :  { %v2857_v56 = vpop.f32.mrf.mxu1 }
0x130a   :  { %v2860_v58 = vpop.f32.mrf.mxu1 }
0x130b   :  { %v7264_v14 = vadd.f32 %v5383_v22, %v2860_v58  ;;  %v2902_v58 = vpop.permute.xlu0 %2901 }
0x130d   :  { %v2942_v51 = vmul.f32 %v2914_v52, %v7264_v14 }
0x1312   :  { %v2863_v5 = vpop.f32.mrf.mxu1 }
0x1313   :  { %v7248_v42 = vadd.f32 %v5383_v22, %v2863_v5 }
0x1315   :  { %v2943_v57 = vmul.f32 %v2916_v43, %v7248_v42 }
0x1317   :  { %3023 = vrot.lane.b32.xlu2 %v2943_v57, %s5706_s27 }
0x131a   :  { %v2866_v13 = vpop.f32.mrf.mxu1 }
0x131b   :  { %v7274_v53 = vadd.f32 %v5383_v22, %v2866_v13 }
0x131d   :  { %v2944_v50 = vmul.f32 %v2918_v3, %v7274_v53  ;;  %v2906_v3 = vpop.permute.xlu1 %2905 }
0x131f   :  { %3017 = vrot.lane.b32.xlu2 %v2940_v15, %s5706_s27 }
0x1322   :  { %v2869_v34 = vpop.f32.mrf.mxu1 }
0x1323   :  { %v7258_v33 = vadd.f32 %v5383_v22, %v2869_v34 }
0x1325   :  { %v2945_v19 = vmul.f32 %v2920_v30, %v7258_v33  ;;  %v3157_v30 = vld [vmem:[%s8290_s0 + $0x580] sm:$0xff] }
0x1327   :  { %3011 = vrot.lane.b32.xlu2 %v2937_v61, %s5706_s27  ;;  %3027 = vrot.lane.b32.xlu0 %v2945_v19, %s5706_s27 }
0x132a   :  { %v2872_v6 = vpop.f32.mrf.mxu1 }
0x132b   :  { %v7266_v35 = vadd.f32 %v5383_v22, %v2872_v6 }
0x132d   :  { %v2946_v11 = vmul.f32 %v2922_v21, %v7266_v35  ;;  %v7286_v21 = vadd.f32 %v5383_v22, %v2842_v49  ;;  %v7302_v49 = vadd.f32 %v5383_v22, %v2839_v0 }
0x132f   :  { %3029 = vrot.lane.b32.xlu1 %v2946_v11, %s5706_s27  ;;  %2969 = vrot.lane.b32.xlu2 %v7131_v10, %s5707_s1  ;;  %v7284_v10 = vadd.f32 %v5383_v22, %v2857_v56  ;;  %v2936_v5 = vmul.f32 %v2902_v58, %v7286_v21 }
0x1330   :  { %3021 = vrot.lane.b32.xlu0 %v2942_v51, %s5706_s27 }
0x1331   :  { %v2941_v27 = vmul.f32 %v2912_v8, %v7284_v10 }
0x1337   :  { %3025 = vrot.lane.b32.xlu1 %v2944_v50, %s5706_s27  ;;  %2965 = vrot.lane.b32.xlu2 %v7167_v38, %s5707_s1  ;;  %v7294_v38 = vadd.f32 %v5383_v22, %v2848_v55 }
0x1338   :  { %3015 = vrot.lane.b32.xlu0 %v2939_v63, %s5706_s27 }
0x1339   :  { %v2938_v56 = vmul.f32 %v2906_v3, %v7294_v38  ;;  %v3159_v3 = vld [vmem:[%s8290_s0 + $0x590] sm:$0xff] }
0x133f   :  { %2961 = vrot.lane.b32.xlu2 %v7160_v4, %s5707_s1  ;;  %3019 = vrot.lane.b32.xlu1 %v2941_v27, %s5706_s27  ;;  %v2900_v4 = vpop.permute.xlu2 %2899 }
0x1340   :  { %3009 = vrot.lane.b32.xlu0 %v2936_v5, %s5706_s27  ;;  %v2935_v43 = vmul.f32 %v2900_v4, %v7302_v49 }
0x1347   :  { %2949 = vrot.lane.b32.xlu2 %v7187_v25, %s5707_s1  ;;  %3013 = vrot.lane.b32.xlu1 %v2938_v56, %s5706_s27 }
0x1348   :  { %2967 = vrot.lane.b32.xlu0 %v7192_v28, %s5707_s1 }
0x134f   :  { %3007 = vrot.lane.b32.xlu1 %v2935_v43, %s5706_s27 }
0x1350   :  { %2963 = vrot.lane.b32.xlu0 %v7147_v59, %s5707_s1 }
0x1357   :  { %2951 = vrot.lane.b32.xlu1 %v7204_v12, %s5707_s1 }
0x1358   :  { %2959 = vrot.lane.b32.xlu0 %v7209_v54, %s5707_s1 }
0x135f   :  { %2947 = vrot.lane.b32.xlu1 %v7219_v20, %s5707_s1 }
0x1360   :  { %2957 = vrot.lane.b32.xlu0 %v7182_v47, %s5707_s1 }
0x1368   :  { %2955 = vrot.lane.b32.xlu0 %v7172_v16, %s5707_s1 }
0x1370   :  { %2953 = vrot.lane.b32.xlu0 %v7224_v31, %s5707_s1 }
0x1371   :  { %v3024_v12 = vpop.permute.xlu2 %3023 }
0x1379   :  { %v3018_v16 = vpop.permute.xlu2 %3017 }
0x1381   :  { %v3012_v0 = vpop.permute.xlu2 %3011 }
0x1389   :  { %v2970_v52 = vpop.permute.xlu2 %2969 }
0x1391   :  { %v2966_v58 = vpop.permute.xlu2 %2965 }
0x1399   :  { %v3028_v59 = vpop.permute.xlu0 %3027 }
0x13a1   :  { %v3030_v25 = vpop.permute.xlu1 %3029 }
0x13a2   :  { %5105 = vmatpush.xpose.msk.msrb.mxu2 %vm98_vm2, %v3030_v25  ;;  %v3022_v54 = vpop.permute.xlu0 %3021 }
0x13a6   :  { %5106 = vmatpush.xpose.msk.msrb.mxu2 %vm98_vm2, %v3028_v59  ;;  %v2962_v59 = vpop.permute.xlu2 %2961 }
0x13a9   :  { %v3026_v28 = vpop.permute.xlu1 %3025 }
0x13aa   :  { %5107 = vmatpush.xpose.msk.msrb.mxu2 %vm98_vm2, %v3026_v28  ;;  %v3016_v20 = vpop.permute.xlu0 %3015 }
0x13ae   :  { %5108 = vmatpush.xpose.msk.msrb.mxu2 %vm98_vm2, %v3024_v12  ;;  %v2990_v12 = vmul.f32 %v2962_v59, %v7264_v14 }
0x13b1   :  { %v3020_v47 = vpop.permute.xlu1 %3019 }
0x13b2   :  { %5109 = vmatpush.xpose.msk.msrb.mxu2 %vm98_vm2, %v3022_v54  ;;  %v3010_v55 = vpop.permute.xlu0 %3009 }
0x13b6   :  { %5110 = vmatpush.xpose.msk.msrb.mxu2 %vm98_vm2, %v3020_v47 }
0x13b9   :  { %v3014_v31 = vpop.permute.xlu1 %3013 }
0x13ba   :  { %5111 = vmatpush.xpose.msk.msrb.mxu2 %vm98_vm2, %v3018_v16  ;;  %v2968_v61 = vpop.permute.xlu0 %2967  ;;  %v2994_v16 = vmul.f32 %v2970_v52, %v7266_v35 }
0x13bb   :  { %v2993_v54 = vmul.f32 %v2968_v61, %v7258_v33 }
0x13be   :  { %5112 = vmatpush.xpose.msk.msrb.mxu2 %vm98_vm2, %v3016_v20  ;;  %v5314_v20 = vpack.i.bf16 %v2993_v54, %v2994_v16  ;;  %v2950_v54 = vpop.permute.xlu2 %2949 }
0x13c1   :  { %v3008_v22 = vpop.permute.xlu1 %3007 }
0x13c2   :  { %5113 = vmatpush.xpose.msk.msrb.mxu2 %vm98_vm2, %v3014_v31  ;;  %v2964_v63 = vpop.permute.xlu0 %2963 }
0x13c3   :  { %v2991_v31 = vmul.f32 %v2964_v63, %v7248_v42 }
0x13c6   :  { %5114 = vmatpush.xpose.msk.msrb.mxu2 %vm98_vm2, %v3012_v0 }
0x13ca   :  { %5115 = vmatpush.xpose.msk.msrb.mxu2 %vm98_vm2, %v3010_v55  ;;  %v2960_v43 = vpop.permute.xlu0 %2959  ;;  %v2992_v55 = vmul.f32 %v2966_v58, %v7274_v53 }
0x13cb   :  { %v2989_v28 = vmul.f32 %v2960_v43, %v7284_v10 }
0x13cd   :  { %v5324_v47 = vpack.i.bf16 %v2989_v28, %v2990_v12 }
0x13ce   :  { %5116 = vmatpush.xpose.msk.msrb.mxu2 %vm98_vm2, %v3008_v22  ;;  %v5319_v22 = vpack.i.bf16 %v2991_v31, %v2992_v55 }
0x13d1   :  { %5117 = vmatmul.msk.f32.vlgmr.msrb.gmra.mxu2 %vm98_vm2, %v7302_v49 }
0x13d9   :  { %5118 = vmatmul.msk.f32.gmra.mxu2 %vm98_vm2, %v7286_v21 }
0x13e1   :  { %5119 = vmatmul.msk.f32.gmra.mxu2 %vm98_vm2, %v7256_v26 }
0x13e9   :  { %5120 = vmatmul.msk.f32.gmra.mxu2 %vm98_vm2, %v7294_v38 }
0x13f1   :  { %5121 = vmatmul.msk.f32.gmra.mxu2 %vm98_vm2, %v7276_v9 }
0x13f9   :  { %5122 = vmatmul.msk.f32.gmra.mxu2 %vm98_vm2, %v7252_v17 }
0x1401   :  { %5123 = vmatmul.msk.f32.gmra.mxu2 %vm98_vm2, %v7284_v10 }
0x1409   :  { %5124 = vmatmul.msk.f32.gmra.mxu2 %vm98_vm2, %v7264_v14 }
0x1411   :  { %5125 = vmatmul.msk.f32.gmra.mxu2 %vm98_vm2, %v7248_v42  ;;  %v3161_v42 = vld [vmem:[%s8290_s0 + $0x5a0] sm:$0xff] }
0x1419   :  { %5126 = vmatmul.msk.f32.gmra.mxu2 %vm98_vm2, %v7274_v53 }
0x1421   :  { %5127 = vmatmul.msk.f32.gmra.mxu2 %vm98_vm2, %v7258_v33  ;;  %v3160_v33 = vld [vmem:[%s8290_s0 + $0x598] sm:$0xff] }
0x1429   :  { %5128 = vmatmul.msk.f32.gmra.mxu2 %vm98_vm2, %v7266_v35 }
0x1454   :  { %v3108_v57 = vpop.f32.mrf.mxu2 }
0x1455   :  { %v3144_v13 = vmul.f32 0.35355338, %v3108_v57 }
0x1457   :  { %v7359_v15 = vadd.f32 %v3156_v18, %v3144_v13 }
0x1459   :  { %v3181_v34 = vsel %vm3180_vm5, %v7359_v15, -inf }
0x145a   :  { %3182 = vmax.xlane.f32.xlu1 %v3181_v34 }
0x145c   :  { %v3111_v7 = vpop.f32.mrf.mxu2 }
0x145d   :  { %v3145_v19 = vmul.f32 0.35355338, %v3111_v7  ;;  %v2958_v7 = vpop.permute.xlu0 %2957 }
0x145f   :  { %v7366_v6 = vadd.f32 %v3157_v30, %v3145_v19  ;;  %v3163_v19 = vld [vmem:[%s8290_s0 + $0x5b0] sm:$0xff] }
0x1461   :  { %v3184_v11 = vsel %vm3180_vm5, %v7366_v6, -inf }
0x1462   :  { %3185 = vmax.xlane.f32.xlu2 %v3184_v11 }
0x1464   :  { %v3114_v51 = vpop.f32.mrf.mxu2 }
0x1465   :  { %v3146_v50 = vmul.f32 0.35355338, %v3114_v51  ;;  %v3162_v51 = vld [vmem:[%s8290_s0 + $0x5a8] sm:$0xff] }
0x1467   :  { %v7373_v8 = vadd.f32 %v3158_v39, %v3146_v50  ;;  %v2956_v50 = vpop.permute.xlu0 %2955 }
0x1469   :  { %v3187_v27 = vsel %vm3180_vm5, %v7373_v8, -inf }
0x146a   :  { %3188 = vmax.xlane.f32.xlu0 %v3187_v27  ;;  %v2987_v27 = vmul.f32 %v2956_v50, %v7276_v9  ;;  %v2984_v9 = vmul.f32 %v2950_v54, %v7286_v21  ;;  %v3167_v54 = vld [vmem:[%s8290_s0 + $0x5d0] sm:$0xff] }
0x146c   :  { %v3117_v5 = vpop.f32.mrf.mxu2 }
0x146d   :  { %v3147_v56 = vmul.f32 0.35355338, %v3117_v5  ;;  %v2988_v5 = vmul.f32 %v2958_v7, %v7252_v17 }
0x146f   :  { %v7380_v4 = vadd.f32 %v3159_v3, %v3147_v56  ;;  %v2952_v3 = vpop.permute.xlu1 %2951  ;;  %v5329_v56 = vpack.i.bf16 %v2987_v27, %v2988_v5  ;;  %v2954_v43 = vpop.permute.xlu0 %2953 }
0x1470   :  { %v2985_v59 = vmul.f32 %v2952_v3, %v7256_v26  ;;  %v3166_v3 = vld [vmem:[%s8290_s0 + $0x5c8] sm:$0xff] }
0x1471   :  { %v3190_v25 = vsel %vm3180_vm5, %v7380_v4, -inf }
0x1472   :  { %3191 = vmax.xlane.f32.xlu1 %v3190_v25  ;;  %v2986_v25 = vmul.f32 %v2954_v43, %v7294_v38 }
0x1474   :  { %v3120_v0 = vpop.f32.mrf.mxu2  ;;  %v5334_v28 = vpack.i.bf16 %v2985_v59, %v2986_v25 }
0x1475   :  { %v3148_v14 = vmul.f32 0.35355338, %v3120_v0 }
0x1477   :  { %v7396_v35 = vadd.f32 %v3160_v33, %v3148_v14  ;;  %v2948_v12 = vpop.permute.xlu1 %2947 }
0x1479   :  { %v3193_v53 = vsel %vm3180_vm5, %v7396_v35, -inf }
0x147a   :  { %5325 = vrot.lane.b32.xlu2 %v5324_v47, %s5707_s1  ;;  %v2983_v47 = vmul.f32 %v2948_v12, %v7302_v49 }
0x147c   :  { %v3123_v10 = vpop.f32.mrf.mxu2  ;;  %v5339_v16 = vpack.i.bf16 %v2983_v47, %v2984_v9 }
0x147d   :  { %v3149_v18 = vmul.f32 0.35355338, %v3123_v10 }
0x147e   :  { %5315 = vrot.lane.b32.xlu0 %v5314_v20, %s5707_s1 }
0x147f   :  { %v7403_v13 = vadd.f32 %v3161_v42, %v3149_v18 }
0x1481   :  { %v3196_v61 = vsel %vm3180_vm5, %v7403_v13, -inf }
0x1484   :  { %v3126_v57 = vpop.f32.mrf.mxu2 }
0x1485   :  { %v3150_v11 = vmul.f32 0.35355338, %v3126_v57 }
0x1487   :  { %v7417_v63 = vadd.f32 %v3162_v51, %v3150_v11 }
0x1489   :  { %v3199_v58 = vsel %vm3180_vm5, %v7417_v63, -inf }
0x148b   :  { %5320 = vrot.lane.b32.xlu1 %v5319_v22, %s5707_s1 }
0x148c   :  { %v3129_v34 = vpop.f32.mrf.mxu2 }
0x148d   :  { %v3151_v30 = vmul.f32 0.35355338, %v3129_v34 }
0x148f   :  { %v7410_v52 = vadd.f32 %v3163_v19, %v3151_v30  ;;  %v3164_v19 = vld [vmem:[%s8290_s0 + $0x5b8] sm:$0xff] }
0x1491   :  { %v3202_v39 = vsel %vm3180_vm5, %v7410_v52, -inf }
0x1494   :  { %v3132_v55 = vpop.f32.mrf.mxu2 }
0x1495   :  { %v3152_v30 = vmul.f32 0.35355338, %v3132_v55 }
0x1497   :  { %v7454_v11 = vadd.f32 %v3164_v19, %v3152_v30 }
0x1499   :  { %v3205_v43 = vsel %vm3180_vm5, %v7454_v11, -inf }
0x149c   :  { %v3135_v33 = vpop.f32.mrf.mxu2 }
0x149d   :  { %v3153_v34 = vmul.f32 0.35355338, %v3135_v33 }
0x14a3   :  { %3194 = vmax.xlane.f32.xlu2 %v3193_v53 }
0x14a8   :  { %3197 = vmax.xlane.f32.xlu0 %v3196_v61  ;;  %v3138_v61 = vpop.f32.mrf.mxu2 }
0x14a9   :  { %v3154_v50 = vmul.f32 0.35355338, %v3138_v61 }
0x14ab   :  { %v7467_v25 = vadd.f32 %v3166_v3, %v3154_v50 }
0x14ad   :  { %v3211_v12 = vsel %vm3180_vm5, %v7467_v25, -inf }
0x14b0   :  { %3203 = vmax.xlane.f32.xlu0 %v3202_v39  ;;  %v3141_v59 = vpop.f32.mrf.mxu2 }
0x14b5   :  { %3200 = vmax.xlane.f32.xlu1 %v3199_v58 }
0x14bb   :  { %5330 = vrot.lane.b32.xlu2 %v5329_v56, %s5707_s1 }
0x14c3   :  { %5335 = vrot.lane.b32.xlu2 %v5334_v28, %s5707_s1  ;;  %v3155_v28 = vmul.f32 0.35355338, %v3141_v59 }
0x14c5   :  { %v7474_v9 = vadd.f32 %v3167_v54, %v3155_v28 }
0x14cb   :  { %5340 = vrot.lane.b32.xlu2 %v5339_v16, %s5707_s1 }
0x14cd   :  { %v3183_v17 = vpop.xlane.xlu1 %3182 }
0x14ce   :  { %v3217_v20 = vsub.f32 %v7359_v15, %v3183_v17 }
0x14d0   :  { %v3229_v31 = vmul.f32 1.442695, %v3217_v20 }
0x14d2   :  { %5543 = vpow2.f32 %v3229_v31  ;;  %v3214_v31 = vsel %vm3180_vm5, %v7474_v9, -inf }
0x14d5   :  { %v3186_v38 = vpop.xlane.xlu2 %3185 }
0x14d6   :  { %v3218_v26 = vsub.f32 %v7366_v6, %v3186_v38 }
0x14d8   :  { %v7432_v0 = vpop.eup %5543  ;;  %v3231_v22 = vmul.f32 1.442695, %v3218_v26 }
0x14d9   :  { %v3253_v49 = vsel %vm3180_vm5, %v7432_v0, 0.0 }
0x14da   :  { %5545 = vpow2.f32 %v3231_v22  ;;  %3254 = vadd.xlane.f32.xlu0 %v3253_v49 }
0x14dd   :  { %v3189_v21 = vpop.xlane.xlu0 %3188  ;;  %v5326_v17 = vpop.permute.xlu2 %5325 }
0x14de   :  { %v3219_v10 = vsub.f32 %v7373_v8, %v3189_v21  ;;  %v3165_v8 = vld [vmem:[%s8290_s0 + $0x5c0] sm:$0xff]  ;;  %v5327_v38 = vunpack.i.l.bf16 %v5326_v17  ;;  %v5328_v26 = vunpack.i.h.bf16 %v5326_v17 }
0x14e0   :  { %v7437_v14 = vpop.eup %5545  ;;  %v3233_v15 = vmul.f32 1.442695, %v3219_v10 }
0x14e1   :  { %v3256_v57 = vsel %vm3180_vm5, %v7437_v14, 0.0 }
0x14e2   :  { %5547 = vpow2.f32 %v3233_v15  ;;  %3257 = vadd.xlane.f32.xlu0 %v3256_v57 }
0x14e5   :  { %v3192_v6 = vpop.xlane.xlu1 %3191 }
0x14e6   :  { %v3220_v18 = vsub.f32 %v7380_v4, %v3192_v6  ;;  %v7452_v4 = vadd.f32 %v3165_v8, %v3153_v34 }
0x14e8   :  { %v7442_v42 = vpop.eup %5547  ;;  %v3235_v53 = vmul.f32 1.442695, %v3220_v18  ;;  %v3208_v27 = vsel %vm3180_vm5, %v7452_v4, -inf }
0x14e9   :  { %v3259_v7 = vsel %vm3180_vm5, %v7442_v42, 0.0 }
0x14ea   :  { %5549 = vpow2.f32 %v3235_v53  ;;  %3260 = vadd.xlane.f32.xlu0 %v3259_v7 }
0x14f0   :  { %v7456_v51 = vpop.eup %5549  ;;  %v5316_v39 = vpop.permute.xlu0 %5315 }
0x14f1   :  { %v5317_v58 = vunpack.i.l.bf16 %v5316_v39  ;;  %v3262_v5 = vsel %vm3180_vm5, %v7456_v51, 0.0  ;;  %v5318_v56 = vunpack.i.h.bf16 %v5316_v39 }
0x14f2   :  { %3209 = vmax.xlane.f32.xlu0 %v3208_v27  ;;  %3263 = vadd.xlane.f32.xlu1 %v3262_v5 }
0x14f3   :  { %3401 = vmatpush.msra.mxu3 %v5317_v58 }
0x14f4   :  { %3206 = vmax.xlane.f32.xlu2 %v3205_v43 }
0x14f5   :  { %3402 = vmatpush.msra.mxu3 %v5318_v56 }
0x14fa   :  { %3212 = vmax.xlane.f32.xlu0 %v3211_v12 }
0x14fd   :  { %v5321_v47 = vpop.permute.xlu1 %5320 }
0x14fe   :  { %v5322_v16 = vunpack.i.l.bf16 %v5321_v47  ;;  %v5323_v20 = vunpack.i.h.bf16 %v5321_v47 }
0x1500   :  { %3403 = vmatpush.msra.mxu3 %v5322_v16 }
0x1502   :  { %3215 = vmax.xlane.f32.xlu0 %v3214_v31  ;;  %3404 = vmatpush.msra.mxu3 %v5323_v20 }
0x1504   :  { %3405 = vmatpush.msra.mxu3 %v5327_v38 }
0x1506   :  { %3406 = vmatpush.msra.mxu3 %v5328_v26 }
0x1516   :  { %v3195_v55 = vpop.xlane.xlu2 %3194 }
0x1517   :  { %v3221_v22 = vsub.f32 %v7396_v35, %v3195_v55 }
0x1519   :  { %v3237_v49 = vmul.f32 1.442695, %v3221_v22 }
0x151b   :  { %5551 = vpow2.f32 %v3237_v49  ;;  %v3198_v21 = vpop.xlane.xlu0 %3197 }
0x151c   :  { %v3222_v10 = vsub.f32 %v7403_v13, %v3198_v21 }
0x151e   :  { %v3239_v15 = vmul.f32 1.442695, %v3222_v10  ;;  %v5331_v57 = vpop.permute.xlu2 %5330 }
0x151f   :  { %v5332_v33 = vunpack.i.l.bf16 %v5331_v57  ;;  %v5333_v18 = vunpack.i.h.bf16 %v5331_v57 }
0x1520   :  { %5553 = vpow2.f32 %v3239_v15 }
0x1521   :  { %v7480_v6 = vpop.eup %5551  ;;  %3407 = vmatpush.msra.mxu3 %v5332_v33 }
0x1522   :  { %v3265_v53 = vsel %vm3180_vm5, %v7480_v6, 0.0 }
0x1523   :  { %v3204_v34 = vpop.xlane.xlu0 %3203  ;;  %3266 = vadd.xlane.f32.xlu1 %v3265_v53  ;;  %3408 = vmatpush.msra.mxu3 %v5333_v18 }
0x1524   :  { %v3224_v35 = vsub.f32 %v7410_v52, %v3204_v34 }
0x1526   :  { %v3243_v7 = vmul.f32 1.442695, %v3224_v35  ;;  %v5336_v8 = vpop.permute.xlu2 %5335  ;;  %v7485_v30 = vpop.eup %5553 }
0x1527   :  { %v5337_v13 = vunpack.i.l.bf16 %v5336_v8  ;;  %v5338_v19 = vunpack.i.h.bf16 %v5336_v8  ;;  %v3268_v50 = vsel %vm3180_vm5, %v7485_v30, 0.0 }
0x1528   :  { %v3201_v61 = vpop.xlane.xlu1 %3200  ;;  %5555 = vpow2.f32 %v3243_v7 }
0x1529   :  { %v3223_v39 = vsub.f32 %v7417_v63, %v3201_v61  ;;  %3409 = vmatpush.msra.mxu3 %v5337_v13 }
0x152b   :  { %v3241_v58 = vmul.f32 1.442695, %v3223_v39  ;;  %3269 = vadd.xlane.f32.xlu1 %v3268_v50  ;;  %3410 = vmatpush.msra.mxu3 %v5338_v19 }
0x152d   :  { %5557 = vpow2.f32 %v3241_v58 }
0x152e   :  { %v5341_v27 = vpop.permute.xlu2 %5340  ;;  %v7490_v52 = vpop.eup %5555 }
0x152f   :  { %v5342_v5 = vunpack.i.l.bf16 %v5341_v27  ;;  %v5343_v3 = vunpack.i.h.bf16 %v5341_v27  ;;  %v3274_v56 = vsel %vm3180_vm5, %v7490_v52, 0.0 }
0x1531   :  { %3411 = vmatpush.msra.mxu3 %v5342_v5 }
0x1533   :  { %v7494_v43 = vpop.eup %5557  ;;  %3275 = vadd.xlane.f32.xlu1 %v3274_v56  ;;  %3412 = vmatpush.msra.mxu3 %v5343_v3 }
0x1534   :  { %v3271_v63 = vsel %vm3180_vm5, %v7494_v43, 0.0 }
0x1535   :  { %3272 = vadd.xlane.f32.xlu0 %v3271_v63 }
0x154d   :  { %v3255_v59 = vpop.xlane.xlu0 %3254 }
0x154e   :  { %5559 = vrcp.f32 %v3255_v59 }
0x1554   :  { %v5560_v28 = vpop.eup %5559 }
0x1555   :  { %v3301_v12 = vmul.f32 %v5560_v28, %v7432_v0  ;;  %v3258_v54 = vpop.xlane.xlu0 %3257 }
0x1556   :  { %5561 = vrcp.f32 %v3258_v54 }
0x1557   :  { %5129 = vmatmul.msk.f32.vlgmr.msra.gmra.mxu3 %vm3180_vm5, %v3301_v12 }
0x155c   :  { %v5562_v47 = vpop.eup %5561 }
0x155d   :  { %v3261_v16 = vpop.xlane.xlu0 %3260  ;;  %v3302_v17 = vmul.f32 %v5562_v47, %v7437_v14 }
0x155e   :  { %5563 = vrcp.f32 %v3261_v16 }
0x155f   :  { %5130 = vmatmul.msk.f32.gmra.mxu3 %vm3180_vm5, %v3302_v17 }
0x1564   :  { %v5564_v20 = vpop.eup %5563 }
0x1565   :  { %v3210_v31 = vpop.xlane.xlu0 %3209  ;;  %v3264_v38 = vpop.xlane.xlu1 %3263  ;;  %v3303_v26 = vmul.f32 %v5564_v20, %v7442_v42  ;;  %v5382_v42 = vld [vmem:[%s8290_s0 + $0x1d8] ss:$0 sm:$0xff] }
0x1566   :  { %v3226_v55 = vsub.f32 %v7452_v4, %v3210_v31  ;;  %5565 = vrcp.f32 %v3264_v38  ;;  %v2516_v13 = vadd.f32 %v5382_v42, %v7241_v44 }
0x1567   :  { %v3207_v0 = vpop.xlane.xlu2 %3206  ;;  %5131 = vmatmul.msk.f32.gmra.mxu3 %vm3180_vm5, %v3303_v26 }
0x1568   :  { %v3247_v22 = vmul.f32 1.442695, %v3226_v55  ;;  %v3225_v49 = vsub.f32 %v7454_v11, %v3207_v0  ;;  %v2519_v11 = vadd.f32 %v5382_v42, %v7243_v36  ;;  %v2521_v19 = vadd.f32 %v2516_v13, %v7047_v23 }
0x156a   :  { %5567 = vpow2.f32 %v3247_v22  ;;  %v3245_v21 = vmul.f32 1.442695, %v3225_v49  ;;  %v2522_v34 = vadd.f32 %v2519_v11, %v7052_v24  ;;  %v2525_v24 = vsel %vm98_vm2, %v2521_v19, 0.0 }
0x156c   :  { %v5566_v14 = vpop.eup %5565  ;;  %5569 = vpow2.f32 %v3245_v21  ;;  %v2528_v61 = vsel %vm98_vm2, %v2522_v34, 0.0 }
0x156d   :  { %v3213_v10 = vpop.xlane.xlu0 %3212  ;;  %v3304_v15 = vmul.f32 %v5566_v14, %v7456_v51 }
0x156e   :  { %v3227_v57 = vsub.f32 %v7467_v25, %v3213_v10 }
0x156f   :  { %5132 = vmatmul.msk.f32.gmra.mxu3 %vm3180_vm5, %v3304_v15 }
0x1570   :  { %v7512_v4 = vpop.eup %5567  ;;  %v3249_v33 = vmul.f32 1.442695, %v3227_v57 }
0x1571   :  { %v3280_v18 = vsel %vm3180_vm5, %v7512_v4, 0.0 }
0x1572   :  { %v5570_v53 = vpop.eup %5569  ;;  %5571 = vpow2.f32 %v3249_v33  ;;  %3281 = vadd.xlane.f32.xlu0 %v3280_v18 }
0x1573   :  { %v3277_v51 = vsel %vm3180_vm5, %v5570_v53, 0.0 }
0x1574   :  { %3278 = vadd.xlane.f32.xlu2 %v3277_v51 }
0x1575   :  { %v3216_v25 = vpop.xlane.xlu0 %3215 }
0x1576   :  { %v3228_v35 = vsub.f32 %v7474_v9, %v3216_v25 }
0x1578   :  { %v5572_v7 = vpop.eup %5571  ;;  %v3251_v8 = vmul.f32 1.442695, %v3228_v35 }
0x1579   :  { %v3283_v36 = vsel %vm3180_vm5, %v5572_v7, 0.0 }
0x157a   :  { %5573 = vpow2.f32 %v3251_v8  ;;  %3284 = vadd.xlane.f32.xlu1 %v3283_v36  ;;  %2529 = vadd.xlane.f32.xlu0 %v2528_v61 }
0x1580   :  { %v5574_v39 = vpop.eup %5573 }
0x1581   :  { %v3286_v50 = vsel %vm3180_vm5, %v5574_v39, 0.0 }
0x1582   :  { %3287 = vadd.xlane.f32.xlu2 %v3286_v50  ;;  %2526 = vadd.xlane.f32.xlu1 %v2525_v24 }
0x1596   :  { %v3267_v9 = vpop.xlane.xlu1 %3266 }
0x1597   :  { %5575 = vrcp.f32 %v3267_v9 }
0x159d   :  { %v5576_v58 = vpop.eup %5575 }
0x159e   :  { %v3270_v44 = vpop.xlane.xlu1 %3269  ;;  %v3305_v27 = vmul.f32 %v5576_v58, %v7480_v6 }
0x159f   :  { %5577 = vrcp.f32 %v3270_v44 }
0x15a0   :  { %5133 = vmatmul.msk.f32.gmra.mxu3 %vm3180_vm5, %v3305_v27 }
0x15a5   :  { %v5578_v5 = vpop.eup %5577 }
0x15a6   :  { %v3306_v3 = vmul.f32 %v5578_v5, %v7485_v30  ;;  %v3276_v56 = vpop.xlane.xlu1 %3275 }
0x15a8   :  { %v3273_v23 = vpop.xlane.xlu0 %3272  ;;  %5134 = vmatmul.msk.f32.gmra.mxu3 %vm3180_vm5, %v3306_v3 }
0x15a9   :  { %5579 = vrcp.f32 %v3273_v23  ;;  %v5384_v23 = vld [vmem:[%s8290_s0 + $0x1e0] ss:$0 sm:$0xff] }
0x15aa   :  { %5581 = vrcp.f32 %v3276_v56 }
0x15af   :  { %v5580_v63 = vpop.eup %5579 }
0x15b0   :  { %v3307_v59 = vmul.f32 %v5580_v63, %v7494_v43  ;;  %v5582_v28 = vpop.eup %5581 }
0x15b1   :  { %v3308_v6 = vmul.f32 %v5582_v28, %v7490_v52  ;;  %v5385_v28 = vld [vmem:[%s8290_s0 + $0x1e8] ss:$0 sm:$0xff] }
0x15b2   :  { %5135 = vmatmul.msk.f32.gmra.mxu3 %vm3180_vm5, %v3307_v59 }
0x15ba   :  { %5136 = vmatmul.msk.f32.gmra.mxu3 %vm3180_vm5, %v3308_v6 }
0x15da   :  { %v7543_v33 = vpop.f32.mrf.mxu3 }
0x15e5   :  { %v3282_v12 = vpop.xlane.xlu0 %3281 }
0x15e7   :  { %v3279_v54 = vpop.xlane.xlu2 %3278 }
0x15e8   :  { %5583 = vrcp.f32 %v3279_v54 }
0x15e9   :  { %5585 = vrcp.f32 %v3282_v12 }
0x15ed   :  { %v2530_v30 = vpop.xlane.xlu0 %2529  ;;  %v3285_v47 = vpop.xlane.xlu1 %3284 }
0x15ee   :  { %v5584_v16 = vpop.eup %5583  ;;  %v2532_v17 = vmul.f32 %v2530_v30, %v6383_v41  ;;  %5587 = vrcp.f32 %v3285_v47 }
0x15ef   :  { %v3309_v20 = vmul.f32 %v5584_v16, %v5570_v53  ;;  %v5586_v38 = vpop.eup %5585 }
0x15f0   :  { %v2534_v31 = vsub.f32 %v2522_v34, %v2532_v17  ;;  %v3310_v0 = vmul.f32 %v5586_v38, %v7512_v4  ;;  %v3417_v4 = vpop.f32.mrf.mxu3 }
0x15f1   :  { %5137 = vmatmul.msk.f32.gmra.mxu3 %vm3180_vm5, %v3309_v20 }
0x15f2   :  { %v2536_v43 = vmul.f32 %v2534_v31, %v2534_v31 }
0x15f4   :  { %v2540_v26 = vsel %vm98_vm2, %v2536_v43, 0.0  ;;  %v5588_v14 = vpop.eup %5587 }
0x15f5   :  { %2541 = vadd.xlane.f32.xlu2 %v2540_v26  ;;  %v2527_v52 = vpop.xlane.xlu1 %2526  ;;  %v3288_v21 = vpop.xlane.xlu2 %3287  ;;  %v3311_v15 = vmul.f32 %v5588_v14, %v5572_v7  ;;  %v3455_v14 = vld [vmem:[%s8290_s0 + $0x910] sm:$0xff] }
0x15f6   :  { %v2531_v55 = vmul.f32 %v2527_v52, %v6383_v41  ;;  %5589 = vrcp.f32 %v3288_v21  ;;  %v3454_v21 = vld [vmem:[%s8290_s0 + $0x908] sm:$0xff] }
0x15f8   :  { %v2533_v22 = vsub.f32 %v2521_v19, %v2531_v55  ;;  %v3420_v11 = vpop.f32.mrf.mxu3  ;;  %v3450_v55 = vld [vmem:[%s8290_s0 + $0x8e8] sm:$0xff] }
0x15f9   :  { %5138 = vmatmul.msk.f32.gmra.mxu3 %vm3180_vm5, %v3310_v0  ;;  %v3451_v0 = vld [vmem:[%s8290_s0 + $0x8f0] sm:$0xff] }
0x15fa   :  { %v2535_v49 = vmul.f32 %v2533_v22, %v2533_v22 }
0x15fc   :  { %v2537_v10 = vsel %vm98_vm2, %v2535_v49, 0.0  ;;  %v5590_v57 = vpop.eup %5589  ;;  %v3453_v49 = vld [vmem:[%s8290_s0 + $0x900] sm:$0xff] }
0x15fd   :  { %2538 = vadd.xlane.f32.xlu0 %v2537_v10  ;;  %v3312_v42 = vmul.f32 %v5590_v57, %v5574_v39  ;;  %v3456_v10 = vld [vmem:[%s8290_s0 + $0x918] sm:$0xff]  ;;  %v3458_v57 = vld [vmem:[%s8290_s0 + $0x928] sm:$0xff] }
0x1600   :  { %v3423_v18 = vpop.f32.mrf.mxu3 }
0x1601   :  { %5139 = vmatmul.msk.f32.gmra.mxu3 %vm3180_vm5, %v3311_v15  ;;  %v3457_v15 = vld [vmem:[%s8290_s0 + $0x920] sm:$0xff] }
0x1609   :  { %5140 = vmatmul.msk.f32.gmra.mxu3 %vm3180_vm5, %v3312_v42  ;;  %v3459_v42 = vld [vmem:[%s8290_s0 + $0x930] sm:$0xff] }
0x1623   :  { %v3426_v53 = vpop.f32.mrf.mxu3 }
0x162b   :  { %v3429_v51 = vpop.f32.mrf.mxu3 }
0x1635   :  { %v3432_v25 = vpop.f32.mrf.mxu3 }
0x163d   :  { %v3435_v13 = vpop.f32.mrf.mxu3 }
0x1668   :  { %v2542_v34 = vpop.xlane.xlu2 %2541 }
0x1669   :  { %v2544_v35 = vmul.f32 %v2542_v34, %v6383_v41  ;;  %v3553_v34 = vld [vmem:[%s8290_s0 + $0x448] sm:$0xff] }
0x166b   :  { %v2546_v8 = vadd.f32 1e-05, %v2544_v35 }
0x166d   :  { %5591 = vrsqrt.f32 %v2546_v8  ;;  %vm2563_vm7 = vweird.f32 %v2546_v8 }
0x1670   :  { %v2539_v7 = vpop.xlane.xlu0 %2538 }
0x1671   :  { %v2543_v36 = vmul.f32 %v2539_v7, %v6383_v41 }
0x1673   :  { %v5592_v61 = vpop.eup %5591  ;;  %v2545_v19 = vadd.f32 1e-05, %v2543_v36  ;;  %v3551_v36 = vld [vmem:[%s8290_s0 + $0x438] sm:$0xff] }
0x1674   :  { %v2558_v39 = vmul.f32 %v5592_v61, %v2546_v8  ;;  %v3438_v50 = vpop.f32.mrf.mxu3  ;;  %vm2564_vm6 = vweird.f32 %v5592_v61  ;;  %v3552_v8 = vld [vmem:[%s8290_s0 + $0x440] sm:$0xff] }
0x1675   :  { %5593 = vrsqrt.f32 %v2545_v19  ;;  %vm2565_vm8 = vmor %vm2563_vm7, %vm2564_vm6  ;;  %vm2553_vm10 = vweird.f32 %v2545_v19 }
0x1676   :  { %v2559_v24 = vmul.f32 %v5592_v61, %v2558_v39 }
0x1678   :  { %v2560_v9 = vmul.f32 0.5, %v2559_v24  ;;  %v3557_v24 = vld [vmem:[%s8290_s0 + $0x468] sm:$0xff] }
0x167a   :  { %v2561_v58 = vsub.f32 1.5, %v2560_v9  ;;  %v3556_v9 = vld [vmem:[%s8290_s0 + $0x460] sm:$0xff] }
0x167b   :  { %v5594_v44 = vpop.eup %5593 }
0x167c   :  { %v2562_v27 = vmul.f32 %v5592_v61, %v2561_v58  ;;  %v2548_v5 = vmul.f32 %v5594_v44, %v2545_v19  ;;  %v3441_v3 = vpop.f32.mrf.mxu3  ;;  %vm2554_vm9 = vweird.f32 %v5594_v44  ;;  %v3555_v58 = vld [vmem:[%s8290_s0 + $0x458] sm:$0xff] }
0x167d   :  { %vm2555_vm0 = vmor %vm2553_vm10, %vm2554_vm9 }
0x167e   :  { %v2549_v56 = vmul.f32 %v5594_v44, %v2548_v5  ;;  %v2566_v63 = vsel %vm2565_vm8, %v5592_v61, %v2562_v27  ;;  %v3562_v5 = vld [vmem:[%s8290_s0 + $0x490] sm:$0xff] }
0x167f   :  { %v2568_v59 = vmul.f32 %v2566_v63, %v2534_v31  ;;  %3658 = vmatpush.msrb.mxu3 %v3562_v5  ;;  %v3559_v63 = vld [vmem:[%s8290_s0 + $0x478] sm:$0xff]  ;;  %v5683_v5 = vld [vmem:[%s8290_s0 + $0x6e8] sm:$0xff] }
0x1680   :  { %v2550_v6 = vmul.f32 0.5, %v2549_v56 }
0x1681   :  { %v2571_v12 = vmul.f32 %v5384_v23, %v2568_v59 }
0x1682   :  { %v2551_v54 = vsub.f32 1.5, %v2550_v6  ;;  %v3566_v6 = vld [vmem:[%s8290_s0 + $0x4b0] sm:$0xff] }
0x1683   :  { %v2574_v30 = vadd.f32 %v5385_v28, %v2571_v12  ;;  %v3565_v12 = vld [vmem:[%s8290_s0 + $0x4a8] sm:$0xff] }
0x1684   :  { %v2552_v47 = vmul.f32 %v5594_v44, %v2551_v54  ;;  %v3444_v16 = vpop.f32.mrf.mxu3  ;;  %v3564_v54 = vld [vmem:[%s8290_s0 + $0x4a0] sm:$0xff] }
0x1685   :  { %v2580_v17 = vsel %vm98_vm2, %v2574_v30, 0.0 }
0x1686   :  { %2581 = vadd.xlane.f32.xlu1 %v2580_v17  ;;  %v2556_v20 = vsel %vm2555_vm0, %v5594_v44, %v2552_v47  ;;  %v3563_v47 = vld [vmem:[%s8290_s0 + $0x498] sm:$0xff] }
0x1687   :  { %v2567_v43 = vmul.f32 %v2556_v20, %v2533_v22  ;;  %v3452_v22 = vld [vmem:[%s8290_s0 + $0x8f8] sm:$0xff] }
0x1689   :  { %v2570_v38 = vmul.f32 %v5384_v23, %v2567_v43  ;;  %v3560_v23 = vld [vmem:[%s8290_s0 + $0x480] sm:$0xff] }
0x168b   :  { %v2573_v31 = vadd.f32 %v5385_v28, %v2570_v38 }
0x168c   :  { %v3447_v26 = vpop.f32.mrf.mxu3 }
0x168d   :  { %3502 = vmatpush.msrb.mxu0 %v3447_v26  ;;  %v2577_v52 = vsel %vm98_vm2, %v2573_v31, 0.0 }
0x168e   :  { %2578 = vadd.xlane.f32.xlu2 %v2577_v52 }
0x168f   :  { %3503 = vmatpush.msrb.mxu0 %v3444_v16 }
0x1691   :  { %3504 = vmatpush.msrb.mxu0 %v3441_v3  ;;  %v3561_v3 = vld [vmem:[%s8290_s0 + $0x488] sm:$0xff] }
0x1692   :  { %3659 = vmatpush.msrb.mxu3 %v3561_v3 }
0x1693   :  { %3505 = vmatpush.msrb.mxu0 %v3438_v50  ;;  %v3558_v50 = vld [vmem:[%s8290_s0 + $0x470] sm:$0xff] }
0x1694   :  { %3588 = vmatpush.msrb.mxu1 %v3558_v50  ;;  %3660 = vmatpush.msrb.mxu3 %v3560_v23  ;;  %v5684_v23 = vld [vmem:[%s8290_s0 + $0x6f0] sm:$0xff] }
0x1695   :  { %3506 = vmatpush.msrb.mxu0 %v3435_v13 }
0x1696   :  { %3589 = vmatpush.msrb.mxu1 %v3557_v24  ;;  %3661 = vmatpush.msrb.mxu3 %v3559_v63 }
0x1697   :  { %3507 = vmatpush.msrb.mxu0 %v3432_v25 }
0x1698   :  { %3590 = vmatpush.msrb.mxu1 %v3556_v9  ;;  %v5678_v9 = vld [vmem:[%s8290_s0 + $0x6c0] sm:$0xff] }
0x1699   :  { %3508 = vmatpush.msrb.mxu0 %v3429_v51  ;;  %v3554_v51 = vld [vmem:[%s8290_s0 + $0x450] sm:$0xff] }
0x169a   :  { %3623 = vmatpush.msra.mxu2 %v3554_v51  ;;  %3591 = vmatpush.msrb.mxu1 %v3555_v58  ;;  %v5679_v58 = vld [vmem:[%s8290_s0 + $0x6c8] sm:$0xff] }
0x169b   :  { %3509 = vmatpush.msrb.mxu0 %v3426_v53 }
0x169c   :  { %3624 = vmatpush.msra.mxu2 %v3553_v34  ;;  %3696 = vmatpush.msra.mxu1 %v3566_v6  ;;  %v5387_v34 = vld [vmem:[%s8290_s0 + $0x270] ss:$0 sm:$0xff]  ;;  %v3989_v6 = vld [vmem:[%s8290_s0 + $0x2f8] sm:$0xff] }
0x169d   :  { %3510 = vmatpush.msrb.mxu0 %v3423_v18 }
0x169e   :  { %3625 = vmatpush.msra.mxu2 %v3552_v8  ;;  %3697 = vmatpush.msra.mxu1 %v3565_v12  ;;  %v3988_v12 = vld [vmem:[%s8290_s0 + $0x2f0] sm:$0xff] }
0x169f   :  { %3511 = vmatpush.msrb.mxu0 %v3420_v11  ;;  %v3461_v11 = vld [vmem:[%s8290_s0 + $0x940] sm:$0xff] }
0x16a0   :  { %3626 = vmatpush.msra.mxu2 %v3551_v36  ;;  %3698 = vmatpush.msra.mxu1 %v3564_v54  ;;  %v3987_v54 = vld [vmem:[%s8290_s0 + $0x2e8] sm:$0xff] }
0x16a1   :  { %3512 = vmatpush.msrb.mxu0 %v3417_v4 }
0x16a2   :  { %3699 = vmatpush.msra.mxu1 %v3563_v47 }
0x16a3   :  { %3513 = vmatpush.msrb.mxu0 %v7543_v33  ;;  %v3460_v33 = vld [vmem:[%s8290_s0 + $0x938] sm:$0xff] }
0x16a4   :  { %5141 = vmatmul.msk.f32.vlgmr.msrb.gmra.mxu0 %vm3180_vm5, %v3450_v55 }
0x16a5   :  { %4028 = vmatpush.msra.mxu0 %v3989_v6 }
0x16a7   :  { %4029 = vmatpush.msra.mxu0 %v3988_v12 }
0x16a9   :  { %4030 = vmatpush.msra.mxu0 %v3987_v54 }
0x16ac   :  { %5142 = vmatmul.msk.f32.gmra.mxu0 %vm3180_vm5, %v3451_v0 }
0x16b4   :  { %5143 = vmatmul.msk.f32.gmra.mxu0 %vm3180_vm5, %v3452_v22 }
0x16bc   :  { %5144 = vmatmul.msk.f32.gmra.mxu0 %vm3180_vm5, %v3453_v49 }
0x16c4   :  { %5145 = vmatmul.msk.f32.gmra.mxu0 %vm3180_vm5, %v3454_v21 }
0x16cc   :  { %5146 = vmatmul.msk.f32.gmra.mxu0 %vm3180_vm5, %v3455_v14 }
0x16d4   :  { %5147 = vmatmul.msk.f32.gmra.mxu0 %vm3180_vm5, %v3456_v10 }
0x16dc   :  { %5148 = vmatmul.msk.f32.gmra.mxu0 %vm3180_vm5, %v3457_v15 }
0x16e4   :  { %5149 = vmatmul.msk.f32.gmra.mxu0 %vm3180_vm5, %v3458_v57 }
0x16ec   :  { %5150 = vmatmul.msk.f32.gmra.mxu0 %vm3180_vm5, %v3459_v42 }
0x16f4   :  { %5151 = vmatmul.msk.f32.gmra.mxu0 %vm3180_vm5, %v3460_v33 }
0x16f9   :  { %v2582_v4 = vpop.xlane.xlu1 %2581 }
0x16fa   :  { %v2584_v18 = vmul.f32 %v2582_v4, %v6383_v41 }
0x16fc   :  { %v7604_v53 = vsub.f32 %v2574_v30, %v2584_v18  ;;  %5152 = vmatmul.msk.f32.gmra.mxu0 %vm3180_vm5, %v3461_v11  ;;  %v5386_v11 = vld [vmem:[%s8290_s0 + $0x268] ss:$0 sm:$0xff] }
0x16fe   :  { %v2588_v25 = vmul.f32 %v7604_v53, %v7604_v53 }
0x1700   :  { %v2592_v35 = vsel %vm98_vm2, %v2588_v25, 0.0 }
0x1701   :  { %v2579_v13 = vpop.xlane.xlu2 %2578  ;;  %2593 = vadd.xlane.f32.xlu0 %v2592_v35 }
0x1702   :  { %v2583_v7 = vmul.f32 %v2579_v13, %v6383_v41 }
0x1704   :  { %v7623_v61 = vsub.f32 %v2573_v31, %v2583_v7 }
0x1706   :  { %v2587_v19 = vmul.f32 %v7623_v61, %v7623_v61 }
0x1708   :  { %v2589_v39 = vsel %vm98_vm2, %v2587_v19, 0.0 }
0x1709   :  { %2590 = vadd.xlane.f32.xlu1 %v2589_v39 }
0x1721   :  { %v3515_v44 = vpop.f32.mrf.mxu0 }
0x1722   :  { %5156 = vmatmul.msk.f32.vlgmr.msra.gmra.mxu2 %vm98_vm2, %v3515_v44  ;;  %v5681_v44 = vld [vmem:[%s8290_s0 + $0x6d8] sm:$0xff] }
0x1729   :  { %v3518_v27 = vpop.f32.mrf.mxu0 }
0x172a   :  { %5157 = vmatmul.msk.f32.gmra.mxu2 %vm98_vm2, %v3518_v27  ;;  %v5682_v27 = vld [vmem:[%s8290_s0 + $0x6e0] sm:$0xff] }
0x1731   :  { %v3521_v56 = vpop.f32.mrf.mxu0 }
0x1732   :  { %5158 = vmatmul.msk.f32.gmra.mxu2 %vm98_vm2, %v3521_v56 }
0x1739   :  { %v3524_v59 = vpop.f32.mrf.mxu0 }
0x173a   :  { %5153 = vmatmul.msk.f32.vlgmr.msrb.gmra.mxu1 %vm98_vm2, %v3524_v59 }
0x1741   :  { %v3527_v28 = vpop.f32.mrf.mxu0 }
0x1742   :  { %5154 = vmatmul.msk.f32.gmra.mxu1 %vm98_vm2, %v3527_v28 }
0x1749   :  { %v3530_v30 = vpop.f32.mrf.mxu0 }
0x174a   :  { %5155 = vmatmul.msk.f32.gmra.mxu1 %vm98_vm2, %v3530_v30 }
0x1751   :  { %v3533_v16 = vpop.f32.mrf.mxu0 }
0x1752   :  { %5159 = vmatmul.msk.f32.vlgmr.msrb.gmra.mxu3 %vm98_vm2, %v3533_v16  ;;  %v5388_v16 = vld [vmem:[%s8290_s0 + $0x2a0] ss:$0 sm:$0xff] }
0x1759   :  { %v3536_v17 = vpop.f32.mrf.mxu0 }
0x175a   :  { %5160 = vmatmul.msk.f32.gmra.mxu3 %vm98_vm2, %v3536_v17 }
0x1761   :  { %v3539_v20 = vpop.f32.mrf.mxu0 }
0x1762   :  { %5161 = vmatmul.msk.f32.gmra.mxu3 %vm98_vm2, %v3539_v20 }
0x1769   :  { %v3542_v43 = vpop.f32.mrf.mxu0 }
0x176a   :  { %5162 = vmatmul.msk.f32.vlgmr.msra.gmra.mxu1 %vm98_vm2, %v3542_v43 }
0x1771   :  { %v3545_v38 = vpop.f32.mrf.mxu0 }
0x1772   :  { %5163 = vmatmul.msk.f32.gmra.mxu1 %vm98_vm2, %v3545_v38 }
0x1774   :  { %v2594_v31 = vpop.xlane.xlu0 %2593 }
0x1775   :  { %v2596_v26 = vmul.f32 %v2594_v31, %v6383_v41 }
0x1777   :  { %v2598_v52 = vadd.f32 1e-05, %v2596_v26 }
0x1779   :  { %5595 = vrsqrt.f32 %v2598_v52  ;;  %v3548_v55 = vpop.f32.mrf.mxu0  ;;  %vm2615_vm12 = vweird.f32 %v2598_v52 }
0x177a   :  { %5164 = vmatmul.msk.f32.gmra.mxu1 %vm98_vm2, %v3548_v55 }
0x177c   :  { %v2591_v0 = vpop.xlane.xlu1 %2590 }
0x177d   :  { %v2595_v22 = vmul.f32 %v2591_v0, %v6383_v41 }
0x177f   :  { %v5596_v49 = vpop.eup %5595  ;;  %v2597_v21 = vadd.f32 1e-05, %v2595_v22 }
0x1780   :  { %v2610_v14 = vmul.f32 %v5596_v49, %v2598_v52  ;;  %vm2616_vm1 = vweird.f32 %v5596_v49 }
0x1781   :  { %5597 = vrsqrt.f32 %v2597_v21  ;;  %vm2617_vm13 = vmor %vm2615_vm12, %vm2616_vm1  ;;  %vm2605_vm15 = vweird.f32 %v2597_v21 }
0x1782   :  { %v2611_v10 = vmul.f32 %v5596_v49, %v2610_v14 }
0x1784   :  { %v2612_v15 = vmul.f32 0.5, %v2611_v10 }
0x1786   :  { %v2613_v57 = vsub.f32 1.5, %v2612_v15 }
0x1787   :  { %v5598_v42 = vpop.eup %5597 }
0x1788   :  { %v2614_v33 = vmul.f32 %v5596_v49, %v2613_v57  ;;  %v2600_v4 = vmul.f32 %v5598_v42, %v2597_v21  ;;  %vm2606_vm14 = vweird.f32 %v5598_v42 }
0x1789   :  { %vm2607_vm5 = vmor %vm2605_vm15, %vm2606_vm14 }
0x178a   :  { %v2618_v18 = vsel %vm2617_vm13, %v5596_v49, %v2614_v33  ;;  %v2601_v51 = vmul.f32 %v5598_v42, %v2600_v4 }
0x178b   :  { %v2620_v25 = vmul.f32 %v2618_v18, %v7604_v53  ;;  %v5677_v53 = vld [vmem:[%s8290_s0 + $0x6b8] sm:$0xff] }
0x178c   :  { %v2602_v35 = vmul.f32 0.5, %v2601_v51 }
0x178d   :  { %v2623_v8 = vmul.f32 %v5386_v11, %v2620_v25 }
0x178e   :  { %v2603_v13 = vsub.f32 1.5, %v2602_v35 }
0x178f   :  { %v2626_v7 = vadd.f32 %v5387_v34, %v2623_v8 }
0x1790   :  { %v2604_v36 = vmul.f32 %v5598_v42, %v2603_v13 }
0x1791   :  { %3959 = vmatpush.msrb.mxu1 %v2626_v7 }
0x1792   :  { %v2608_v19 = vsel %vm2607_vm5, %v5598_v42, %v2604_v36 }
0x1793   :  { %v2619_v39 = vmul.f32 %v2608_v19, %v7623_v61  ;;  %v5680_v61 = vld [vmem:[%s8290_s0 + $0x6d0] sm:$0xff] }
0x1795   :  { %v2622_v50 = vmul.f32 %v5386_v11, %v2619_v39 }
0x1797   :  { %v2625_v24 = vadd.f32 %v5387_v34, %v2622_v50 }
0x1799   :  { %3960 = vmatpush.msrb.mxu1 %v2625_v24 }
0x179a   :  { %5189 = vmatmul.msk.f32.vlgmr.msrb.gmra.mxu1 %vm1803_vm11, %v5677_v53 }
0x17a2   :  { %5190 = vmatmul.msk.f32.gmra.mxu1 %vm1803_vm11, %v5678_v9 }
0x17a5   :  { %v3628_v63 = vpop.f32.mrf.mxu2 }
0x17aa   :  { %5191 = vmatmul.msk.f32.gmra.mxu1 %vm1803_vm11, %v5679_v58 }
0x17ad   :  { %v3631_v43 = vpop.f32.mrf.mxu2 }
0x17b2   :  { %5192 = vmatmul.msk.f32.gmra.mxu1 %vm1803_vm11, %v5680_v61 }
0x17b5   :  { %v3634_v14 = vpop.f32.mrf.mxu2 }
0x17b7   :  { %v3593_v3 = vpop.f32.mrf.mxu1 }
0x17b8   :  { %v3629_v30 = vadd.f32 %v3628_v63, %v3593_v3 }
0x17ba   :  { %5193 = vmatmul.msk.f32.gmra.mxu1 %vm1803_vm11, %v5681_v44 }
0x17bf   :  { %v3596_v56 = vpop.f32.mrf.mxu1 }
0x17c0   :  { %v3632_v26 = vadd.f32 %v3631_v43, %v3596_v56 }
0x17c2   :  { %5194 = vmatmul.msk.f32.gmra.mxu1 %vm1803_vm11, %v5682_v27 }
0x17c7   :  { %v3599_v28 = vpop.f32.mrf.mxu1 }
0x17c8   :  { %v3635_v15 = vadd.f32 %v3634_v14, %v3599_v28  ;;  %v5389_v28 = vld [vmem:[%s8290_s0 + $0x300] ss:$0 sm:$0xff] }
0x17ca   :  { %5195 = vmatmul.msk.f32.gmra.mxu1 %vm1803_vm11, %v5683_v5 }
0x17d2   :  { %5196 = vmatmul.msk.f32.gmra.mxu1 %vm1803_vm11, %v5684_v23 }
0x17d5   :  { %v3663_v59 = vpop.f32.mrf.mxu3 }
0x17d6   :  { %v3672_v47 = vadd.f32 %v3663_v59, %v3629_v30 }
0x17dd   :  { %v3666_v38 = vpop.f32.mrf.mxu3 }
0x17de   :  { %v3673_v55 = vadd.f32 %v3666_v38, %v3632_v26 }
0x17e5   :  { %v3669_v10 = vpop.f32.mrf.mxu3 }
0x17e6   :  { %v3674_v42 = vadd.f32 %v3669_v10, %v3635_v15 }
0x17e7   :  { %v3701_v17 = vpop.f32.mrf.mxu1 }
0x17e8   :  { %v3710_v20 = vadd.f32 %v3701_v17, %v3672_v47 }
0x17ea   :  { %v3715_v31 = vadd.f32 %v5388_v16, %v3710_v20 }
0x17ec   :  { %v3718_v52 = vadd.f32 %v3715_v31, %v7036_v48  ;;  %v3986_v48 = vld [vmem:[%s8290_s0 + $0x2e0] sm:$0xff] }
0x17ed   :  { %4031 = vmatpush.msra.mxu0 %v3986_v48  ;;  %v5688_v48 = vld [vmem:[%s8290_s0 + $0x7f8] sm:$0xff] }
0x17ee   :  { %v3723_v0 = vsel %vm98_vm2, %v3718_v52, 0.0 }
0x17ef   :  { %3724 = vadd.xlane.f32.xlu1 %v3723_v0  ;;  %v3704_v22 = vpop.f32.mrf.mxu1 }
0x17f0   :  { %v3711_v49 = vadd.f32 %v3704_v22, %v3673_v55 }
0x17f2   :  { %v3716_v21 = vadd.f32 %v5388_v16, %v3711_v49 }
0x17f4   :  { %v3719_v57 = vadd.f32 %v3716_v21, %v7032_v40 }
0x17f6   :  { %v3726_v33 = vsel %vm98_vm2, %v3719_v57, 0.0 }
0x17f7   :  { %3727 = vadd.xlane.f32.xlu0 %v3726_v33  ;;  %v3707_v4 = vpop.f32.mrf.mxu1 }
0x17f8   :  { %v3712_v11 = vadd.f32 %v3707_v4, %v3674_v42 }
0x17fa   :  { %v3717_v18 = vadd.f32 %v5388_v16, %v3712_v11 }
0x17fc   :  { %v3720_v51 = vadd.f32 %v3717_v18, %v7034_v2 }
0x17fe   :  { %v3729_v25 = vsel %vm98_vm2, %v3720_v51, 0.0 }
0x17ff   :  { %3730 = vadd.xlane.f32.xlu2 %v3729_v25 }
0x1817   :  { %v3962_v34 = vpop.f32.mrf.mxu1 }
0x1818   :  { %5197 = vmatmul.msk.f32.vlgmr.msra.gmra.mxu0 %vm98_vm2, %v3962_v34 }
0x181f   :  { %v3965_v40 = vpop.f32.mrf.mxu1 }
0x1820   :  { %5198 = vmatmul.msk.f32.gmra.mxu0 %vm98_vm2, %v3965_v40 }
0x1827   :  { %v3968_v35 = vpop.f32.mrf.mxu1 }
0x1828   :  { %5199 = vmatmul.msk.f32.gmra.mxu0 %vm98_vm2, %v3968_v35  ;;  %v5690_v35 = vld [vmem:[%s8290_s0 + $0x7e8] sm:$0xff] }
0x182f   :  { %v3971_v8 = vpop.f32.mrf.mxu1 }
0x1830   :  { %5200 = vmatmul.msk.f32.gmra.mxu0 %vm98_vm2, %v3971_v8 }
0x1837   :  { %v3974_v13 = vpop.f32.mrf.mxu1 }
0x1838   :  { %5201 = vmatmul.msk.f32.gmra.mxu0 %vm98_vm2, %v3974_v13 }
0x183f   :  { %v3977_v7 = vpop.f32.mrf.mxu1 }
0x1840   :  { %5202 = vmatmul.msk.f32.gmra.mxu0 %vm98_vm2, %v3977_v7  ;;  %v5691_v7 = vld [vmem:[%s8290_s0 + $0x7e0] sm:$0xff] }
0x1847   :  { %v3980_v2 = vpop.f32.mrf.mxu1 }
0x1848   :  { %5203 = vmatmul.msk.f32.gmra.mxu0 %vm98_vm2, %v3980_v2 }
0x184f   :  { %v3983_v36 = vpop.f32.mrf.mxu1 }
0x1850   :  { %5204 = vmatmul.msk.f32.gmra.mxu0 %vm98_vm2, %v3983_v36 }
0x1862   :  { %v3725_v19 = vpop.xlane.xlu1 %3724 }
0x1863   :  { %v3732_v39 = vmul.f32 %v3725_v19, %v6383_v41 }
0x1865   :  { %v7748_v50 = vsub.f32 %v3718_v52, %v3732_v39 }
0x1867   :  { %v3738_v24 = vmul.f32 %v7748_v50, %v7748_v50 }
0x1869   :  { %v3741_v53 = vsel %vm98_vm2, %v3738_v24, 0.0  ;;  %v5692_v24 = vld [vmem:[%s8290_s0 + $0x7d8] sm:$0xff] }
0x186a   :  { %3742 = vadd.xlane.f32.xlu1 %v3741_v53  ;;  %v3728_v9 = vpop.xlane.xlu0 %3727 }
0x186b   :  { %v3733_v58 = vmul.f32 %v3728_v9, %v6383_v41 }
0x186d   :  { %v7754_v61 = vsub.f32 %v3719_v57, %v3733_v58 }
0x186f   :  { %v3739_v44 = vmul.f32 %v7754_v61, %v7754_v61 }
0x1871   :  { %v3744_v27 = vsel %vm98_vm2, %v3739_v44, 0.0 }
0x1872   :  { %3745 = vadd.xlane.f32.xlu0 %v3744_v27  ;;  %v3731_v5 = vpop.xlane.xlu2 %3730 }
0x1873   :  { %v3734_v3 = vmul.f32 %v3731_v5, %v6383_v41 }
0x1875   :  { %v7760_v23 = vsub.f32 %v3720_v51, %v3734_v3  ;;  %v5689_v51 = vld [vmem:[%s8290_s0 + $0x7f0] sm:$0xff] }
0x1877   :  { %v3740_v56 = vmul.f32 %v7760_v23, %v7760_v23 }
0x1879   :  { %v3747_v63 = vsel %vm98_vm2, %v3740_v56, 0.0 }
0x187a   :  { %3748 = vadd.xlane.f32.xlu2 %v3747_v63 }
0x1895   :  { %v4033_v59 = vpop.f32.mrf.mxu0 }
0x1896   :  { %v4034_v6 = vadd.f32 %v5389_v28, %v4033_v59 }
0x1898   :  { %v7769_v30 = vmul.f32 %v4034_v6, %v6801_v29  ;;  %v4057_v53 = vmul.f32 %v5692_v24, %v4034_v6  ;;  %v3850_v24 = vld [vmem:[%s8290_s0 + $0x2b8] sm:$0xff] }
0x189d   :  { %v4036_v12 = vpop.f32.mrf.mxu0 }
0x189e   :  { %v4037_v54 = vadd.f32 %v5389_v28, %v4036_v12 }
0x18a0   :  { %v7772_v47 = vmul.f32 %v4037_v54, %v6811_v32  ;;  %v4058_v2 = vmul.f32 %v5691_v7, %v4037_v54  ;;  %v5700_v7 = vld [vmem:[%s8290_s0 + $0x730] sm:$0xff] }
0x18a2   :  { %v5359_v16 = vpack.i.bf16 %v7769_v30, %v7772_v47 }
0x18a5   :  { %v4039_v17 = vpop.f32.mrf.mxu0 }
0x18a6   :  { %v4040_v20 = vadd.f32 %v5389_v28, %v4039_v17 }
0x18a8   :  { %v7777_v31 = vmul.f32 %v4040_v20, %v6771_v37  ;;  %v4059_v8 = vmul.f32 %v5690_v35, %v4040_v20  ;;  %v5697_v35 = vld [vmem:[%s8290_s0 + $0x718] sm:$0xff] }
0x18ad   :  { %v4042_v43 = vpop.f32.mrf.mxu0 }
0x18ae   :  { %v4043_v38 = vadd.f32 %v5389_v28, %v4042_v43 }
0x18b0   :  { %v7780_v26 = vmul.f32 %v4043_v38, %v6783_v1  ;;  %v4060_v25 = vmul.f32 %v5689_v51, %v4043_v38  ;;  %v5696_v51 = vld [vmem:[%s8290_s0 + $0x710] sm:$0xff] }
0x18b2   :  { %v5354_v29 = vpack.i.bf16 %v7777_v31, %v7780_v26  ;;  %v4209_v26 = vld [vmem:[%s8290_s0 + $0x630] sm:$0xff] }
0x18b5   :  { %v4045_v52 = vpop.f32.mrf.mxu0 }
0x18b6   :  { %v4046_v55 = vadd.f32 %v5389_v28, %v4045_v52 }
0x18b8   :  { %v7785_v22 = vmul.f32 %v4046_v55, %v6795_v46  ;;  %v5685_v46 = vld [vmem:[%s8290_s0 + $0x810] sm:$0xff]  ;;  %v4061_v11 = vmul.f32 %v5688_v48, %v4046_v55 }
0x18bd   :  { %v4048_v32 = vpop.f32.mrf.mxu0 }
0x18be   :  { %v4049_v0 = vadd.f32 %v5389_v28, %v4048_v32 }
0x18c0   :  { %v7788_v49 = vmul.f32 %v4049_v0, %v6757_v62  ;;  %v5686_v62 = vld [vmem:[%s8290_s0 + $0x808] sm:$0xff] }
0x18c2   :  { %v5349_v37 = vpack.i.bf16 %v7785_v22, %v7788_v49  ;;  %v4203_v22 = vld [vmem:[%s8290_s0 + $0x600] sm:$0xff] }
0x18c5   :  { %v4051_v21 = vpop.f32.mrf.mxu0 }
0x18c6   :  { %v4052_v14 = vadd.f32 %v5389_v28, %v4051_v21 }
0x18c8   :  { %v7793_v15 = vmul.f32 %v4052_v14, %v6775_v45  ;;  %v4063_v33 = vmul.f32 %v5686_v62, %v4052_v14 }
0x18cd   :  { %v4054_v1 = vpop.f32.mrf.mxu0 }
0x18ce   :  { %v4055_v10 = vadd.f32 %v5389_v28, %v4054_v1 }
0x18d0   :  { %v7796_v57 = vmul.f32 %v4055_v10, %v6766_v60  ;;  %v4064_v42 = vmul.f32 %v5685_v46, %v4055_v10  ;;  %v5687_v60 = vld [vmem:[%s8290_s0 + $0x800] sm:$0xff]  ;;  %v5390_v46 = vld [vmem:[%s8290_s0 + $0x2a8] ss:$0 sm:$0xff] }
0x18d1   :  { %v4062_v45 = vmul.f32 %v5687_v60, %v4049_v0 }
0x18d2   :  { %v5344_v4 = vpack.i.bf16 %v7793_v15, %v7796_v57  ;;  %5205 = vmatpush.xpose.msk.msra.mxu1 %vm98_vm2, %v4064_v42 }
0x18d6   :  { %5206 = vmatpush.xpose.msk.msra.mxu1 %vm98_vm2, %v4063_v33  ;;  %v5391_v33 = vld [vmem:[%s8290_s0 + $0x2b0] ss:$0 sm:$0xff] }
0x18da   :  { %5207 = vmatpush.xpose.msk.msra.mxu1 %vm98_vm2, %v4062_v45 }
0x18dd   :  { %v3743_v18 = vpop.xlane.xlu1 %3742 }
0x18de   :  { %v3750_v34 = vmul.f32 %v3743_v18, %v6383_v41  ;;  %5208 = vmatpush.xpose.msk.msra.mxu1 %vm98_vm2, %v4061_v11  ;;  %v5694_v11 = vld [vmem:[%s8290_s0 + $0x700] sm:$0xff]  ;;  %v5695_v18 = vld [vmem:[%s8290_s0 + $0x708] sm:$0xff] }
0x18e0   :  { %v3753_v40 = vadd.f32 1e-05, %v3750_v34  ;;  %v3852_v34 = vld [vmem:[%s8290_s0 + $0x2c8] sm:$0xff] }
0x18e2   :  { %5209 = vmatpush.xpose.msk.msra.mxu1 %vm98_vm2, %v4060_v25  ;;  %5599 = vrsqrt.f32 %v3753_v40  ;;  %vm3762_vm9 = vweird.f32 %v3753_v40  ;;  %v3853_v25 = vld [vmem:[%s8290_s0 + $0x2d0] sm:$0xff] }
0x18e3   :  { %3904 = vmatpush.msra.mxu3 %v3853_v25 }
0x18e5   :  { %v3746_v13 = vpop.xlane.xlu0 %3745  ;;  %3905 = vmatpush.msra.mxu3 %v3852_v34 }
0x18e6   :  { %v3751_v36 = vmul.f32 %v3746_v13, %v6383_v41  ;;  %5210 = vmatpush.xpose.msk.msra.mxu1 %vm98_vm2, %v4059_v8  ;;  %v5698_v8 = vld [vmem:[%s8290_s0 + $0x720] sm:$0xff]  ;;  %v5699_v13 = vld [vmem:[%s8290_s0 + $0x728] sm:$0xff] }
0x18e8   :  { %v3754_v19 = vadd.f32 1e-05, %v3751_v36  ;;  %v5600_v39 = vpop.eup %5599  ;;  %v5702_v36 = vld [vmem:[%s8290_s0 + $0x740] sm:$0xff] }
0x18e9   :  { %v3757_v9 = vmul.f32 %v5600_v39, %v3753_v40  ;;  %vm3763_vm6 = vweird.f32 %v5600_v39  ;;  %v3851_v40 = vld [vmem:[%s8290_s0 + $0x2c0] sm:$0xff] }
0x18ea   :  { %5601 = vrsqrt.f32 %v3754_v19  ;;  %5211 = vmatpush.xpose.msk.msra.mxu1 %vm98_vm2, %v4058_v2  ;;  %vm3772_vm7 = vweird.f32 %v3754_v19  ;;  %vm3764_vm0 = vmor %vm3762_vm9, %vm3763_vm6  ;;  %3906 = vmatpush.msra.mxu3 %v3851_v40  ;;  %v5701_v2 = vld [vmem:[%s8290_s0 + $0x738] sm:$0xff] }
0x18eb   :  { %v3758_v3 = vmul.f32 %v5600_v39, %v3757_v9 }
0x18ec   :  { %3907 = vmatpush.msra.mxu3 %v3850_v24 }
0x18ed   :  { %v3749_v58 = vpop.xlane.xlu2 %3748  ;;  %v3759_v59 = vmul.f32 0.5, %v3758_v3 }
0x18ee   :  { %v3752_v44 = vmul.f32 %v3749_v58, %v6383_v41  ;;  %5212 = vmatpush.xpose.msk.msra.mxu1 %vm98_vm2, %v4057_v53 }
0x18ef   :  { %v3760_v6 = vsub.f32 1.5, %v3759_v59 }
0x18f0   :  { %v5602_v27 = vpop.eup %5601  ;;  %v3755_v5 = vadd.f32 1e-05, %v3752_v44 }
0x18f1   :  { %v3767_v56 = vmul.f32 %v5602_v27, %v3754_v19  ;;  %vm3773_vm11 = vweird.f32 %v5602_v27  ;;  %v3761_v38 = vmul.f32 %v5600_v39, %v3760_v6  ;;  %v5703_v19 = vld [vmem:[%s8290_s0 + $0x748] sm:$0xff] }
0x18f2   :  { %5603 = vrsqrt.f32 %v3755_v5  ;;  %vm3774_vm8 = vmor %vm3772_vm7, %vm3773_vm11  ;;  %vm3782_vm1 = vweird.f32 %v3755_v5 }
0x18f3   :  { %v3768_v63 = vmul.f32 %v5602_v27, %v3767_v56  ;;  %v3765_v0 = vsel %vm3764_vm0, %v5600_v39, %v3761_v38  ;;  %v5704_v39 = vld [vmem:[%s8290_s0 + $0x750] sm:$0xff] }
0x18f4   :  { %v3786_v42 = vmul.f32 %v3765_v0, %v7748_v50  ;;  %v5693_v50 = vld [vmem:[%s8290_s0 + $0x6f8] sm:$0xff] }
0x18f5   :  { %v3769_v28 = vmul.f32 0.5, %v3768_v63 }
0x18f6   :  { %v3790_v48 = vmul.f32 %v5390_v46, %v3786_v42 }
0x18f7   :  { %v3770_v12 = vsub.f32 1.5, %v3769_v28 }
0x18f8   :  { %v5604_v54 = vpop.eup %5603 }
0x18f9   :  { %v3777_v17 = vmul.f32 %v5604_v54, %v3755_v5  ;;  %v3771_v20 = vmul.f32 %v5602_v27, %v3770_v12  ;;  %vm3783_vm10 = vweird.f32 %v5604_v54  ;;  %v5392_v12 = vld [vmem:[%s8290_s0 + $0x2d8] ss:$0 sm:$0xff] }
0x18fa   :  { %vm3784_vm12 = vmor %vm3782_vm1, %vm3783_vm10 }
0x18fb   :  { %v3778_v43 = vmul.f32 %v5604_v54, %v3777_v17  ;;  %v3775_v55 = vsel %vm3774_vm8, %v5602_v27, %v3771_v20 }
0x18fc   :  { %v3787_v14 = vmul.f32 %v3775_v55, %v7754_v61 }
0x18fd   :  { %v3779_v52 = vmul.f32 0.5, %v3778_v43 }
0x18fe   :  { %v3791_v60 = vmul.f32 %v5390_v46, %v3787_v14 }
0x18ff   :  { %v3780_v32 = vsub.f32 1.5, %v3779_v52 }
0x1900   :  { %v7847_v61 = vadd.f32 %v5391_v33, %v3791_v60 }
0x1901   :  { %v3781_v21 = vmul.f32 %v5604_v54, %v3780_v32 }
0x1903   :  { %v3785_v1 = vsel %vm3784_vm12, %v5604_v54, %v3781_v21 }
0x1904   :  { %v3788_v10 = vmul.f32 %v3785_v1, %v7760_v23  ;;  %v7850_v23 = vadd.f32 %v5391_v33, %v3790_v48 }
0x1906   :  { %v3792_v62 = vmul.f32 %v5390_v46, %v3788_v10 }
0x1908   :  { %v7844_v45 = vadd.f32 %v5391_v33, %v3792_v62 }
0x190a   :  { %3810 = vmatpush.msrb.mxu2 %v7844_v45 }
0x190c   :  { %3811 = vmatpush.msrb.mxu2 %v7847_v61 }
0x190e   :  { %3812 = vmatpush.msrb.mxu2 %v7850_v23 }
0x190f   :  { %5165 = vmatmul.msk.f32.vlgmr.msrb.gmra.mxu2 %vm2690_vm4, %v5693_v50 }
0x1917   :  { %5166 = vmatmul.msk.f32.gmra.mxu2 %vm2690_vm4, %v5694_v11 }
0x191f   :  { %5167 = vmatmul.msk.f32.gmra.mxu2 %vm2690_vm4, %v5695_v18  ;;  %v4198_v18 = vld [vmem:[%s8290_s0 + $0x5d8] sm:$0xff] }
0x1927   :  { %5168 = vmatmul.msk.f32.gmra.mxu2 %vm2690_vm4, %v5696_v51 }
0x192f   :  { %5169 = vmatmul.msk.f32.gmra.mxu2 %vm2690_vm4, %v5697_v35 }
0x1937   :  { %5170 = vmatmul.msk.f32.gmra.mxu2 %vm2690_vm4, %v5698_v8 }
0x193f   :  { %5171 = vmatmul.msk.f32.gmra.mxu2 %vm2690_vm4, %v5699_v13  ;;  %v4199_v13 = vld [vmem:[%s8290_s0 + $0x5e0] sm:$0xff] }
0x1947   :  { %5172 = vmatmul.msk.f32.gmra.mxu2 %vm2690_vm4, %v5700_v7 }
0x194f   :  { %5173 = vmatmul.msk.f32.gmra.mxu2 %vm2690_vm4, %v5701_v2 }
0x1957   :  { %5174 = vmatmul.msk.f32.gmra.mxu2 %vm2690_vm4, %v5702_v36 }
0x195f   :  { %5175 = vmatmul.msk.f32.gmra.mxu2 %vm2690_vm4, %v5703_v19 }
0x1967   :  { %5176 = vmatmul.msk.f32.gmra.mxu2 %vm2690_vm4, %v5704_v39 }
0x1992   :  { %v3814_v53 = vpop.f32.mrf.mxu2 }
0x1993   :  { %5177 = vmatmul.msk.f32.vlgmr.msra.gmra.mxu3 %vm98_vm2, %v3814_v53  ;;  %v4200_v53 = vld [vmem:[%s8290_s0 + $0x5e8] sm:$0xff] }
0x199a   :  { %v3817_v9 = vpop.f32.mrf.mxu2 }
0x199b   :  { %5178 = vmatmul.msk.f32.gmra.mxu3 %vm98_vm2, %v3817_v9 }
0x19a2   :  { %v3820_v58 = vpop.f32.mrf.mxu2 }
0x19a3   :  { %5179 = vmatmul.msk.f32.gmra.mxu3 %vm98_vm2, %v3820_v58 }
0x19aa   :  { %v3823_v44 = vpop.f32.mrf.mxu2 }
0x19ab   :  { %5180 = vmatmul.msk.f32.gmra.mxu3 %vm98_vm2, %v3823_v44 }
0x19b2   :  { %v3826_v27 = vpop.f32.mrf.mxu2 }
0x19b3   :  { %5181 = vmatmul.msk.f32.gmra.mxu3 %vm98_vm2, %v3826_v27 }
0x19ba   :  { %v3829_v5 = vpop.f32.mrf.mxu2 }
0x19bb   :  { %5182 = vmatmul.msk.f32.gmra.mxu3 %vm98_vm2, %v3829_v5  ;;  %v4201_v5 = vld [vmem:[%s8290_s0 + $0x5f0] sm:$0xff] }
0x19c2   :  { %v3832_v3 = vpop.f32.mrf.mxu2 }
0x19c3   :  { %5183 = vmatmul.msk.f32.gmra.mxu3 %vm98_vm2, %v3832_v3 }
0x19ca   :  { %v3835_v56 = vpop.f32.mrf.mxu2 }
0x19cb   :  { %5184 = vmatmul.msk.f32.gmra.mxu3 %vm98_vm2, %v3835_v56 }
0x19d2   :  { %v3838_v63 = vpop.f32.mrf.mxu2 }
0x19d3   :  { %5185 = vmatmul.msk.f32.gmra.mxu3 %vm98_vm2, %v3838_v63 }
0x19da   :  { %v3841_v59 = vpop.f32.mrf.mxu2 }
0x19db   :  { %5186 = vmatmul.msk.f32.gmra.mxu3 %vm98_vm2, %v3841_v59 }
0x19e2   :  { %v3844_v28 = vpop.f32.mrf.mxu2 }
0x19e3   :  { %5187 = vmatmul.msk.f32.gmra.mxu3 %vm98_vm2, %v3844_v28  ;;  %v4202_v28 = vld [vmem:[%s8290_s0 + $0x5f8] sm:$0xff] }
0x19ea   :  { %v3847_v17 = vpop.f32.mrf.mxu2 }
0x19eb   :  { %5188 = vmatmul.msk.f32.gmra.mxu3 %vm98_vm2, %v3847_v17 }
0x1a16   :  { %v3909_v54 = vpop.f32.mrf.mxu3 }
0x1a17   :  { %v3910_v6 = vadd.f32 %v5392_v12, %v3909_v54 }
0x1a19   :  { %5213 = vmatmul.msk.f32.vlgmr.msra.gmra.mxu1 %vm98_vm2, %v3910_v6 }
0x1a1e   :  { %v3912_v20 = vpop.f32.mrf.mxu3 }
0x1a1f   :  { %v3913_v43 = vadd.f32 %v5392_v12, %v3912_v20 }
0x1a21   :  { %5214 = vmatmul.msk.f32.gmra.mxu1 %vm98_vm2, %v3913_v43  ;;  %v4204_v43 = vld [vmem:[%s8290_s0 + $0x608] sm:$0xff] }
0x1a26   :  { %v3915_v38 = vpop.f32.mrf.mxu3 }
0x1a27   :  { %v3916_v52 = vadd.f32 %v5392_v12, %v3915_v38 }
0x1a29   :  { %5215 = vmatmul.msk.f32.gmra.mxu1 %vm98_vm2, %v3916_v52 }
0x1a2e   :  { %v3918_v55 = vpop.f32.mrf.mxu3 }
0x1a2f   :  { %v3919_v32 = vadd.f32 %v5392_v12, %v3918_v55 }
0x1a31   :  { %5216 = vmatmul.msk.f32.gmra.mxu1 %vm98_vm2, %v3919_v32 }
0x1a36   :  { %v3921_v0 = vpop.f32.mrf.mxu3 }
0x1a37   :  { %v3922_v21 = vadd.f32 %v5392_v12, %v3921_v0 }
0x1a39   :  { %5217 = vmatmul.msk.f32.gmra.mxu1 %vm98_vm2, %v3922_v21  ;;  %v4205_v21 = vld [vmem:[%s8290_s0 + $0x610] sm:$0xff] }
0x1a3e   :  { %v3924_v14 = vpop.f32.mrf.mxu3 }
0x1a3f   :  { %v3925_v1 = vadd.f32 %v5392_v12, %v3924_v14 }
0x1a41   :  { %5218 = vmatmul.msk.f32.gmra.mxu1 %vm98_vm2, %v3925_v1 }
0x1a46   :  { %v3927_v10 = vpop.f32.mrf.mxu3 }
0x1a47   :  { %v3928_v46 = vadd.f32 %v5392_v12, %v3927_v10 }
0x1a49   :  { %5219 = vmatmul.msk.f32.gmra.mxu1 %vm98_vm2, %v3928_v46 }
0x1a4e   :  { %v3930_v42 = vpop.f32.mrf.mxu3 }
0x1a4f   :  { %v3931_v62 = vadd.f32 %v5392_v12, %v3930_v42 }
0x1a51   :  { %5220 = vmatmul.msk.f32.gmra.mxu1 %vm98_vm2, %v3931_v62 }
0x1a56   :  { %v3933_v33 = vpop.f32.mrf.mxu3 }
0x1a57   :  { %v3934_v60 = vadd.f32 %v5392_v12, %v3933_v33 }
0x1a59   :  { %5221 = vmatmul.msk.f32.gmra.mxu1 %vm98_vm2, %v3934_v60 }
0x1a5e   :  { %v3936_v48 = vpop.f32.mrf.mxu3 }
0x1a5f   :  { %v3937_v50 = vadd.f32 %v5392_v12, %v3936_v48 }
0x1a61   :  { %5222 = vmatmul.msk.f32.gmra.mxu1 %vm98_vm2, %v3937_v50 }
0x1a66   :  { %v3939_v51 = vpop.f32.mrf.mxu3 }
0x1a67   :  { %v3940_v34 = vadd.f32 %v5392_v12, %v3939_v51 }
0x1a69   :  { %5223 = vmatmul.msk.f32.gmra.mxu1 %vm98_vm2, %v3940_v34  ;;  %v4207_v34 = vld [vmem:[%s8290_s0 + $0x620] sm:$0xff] }
0x1a6e   :  { %v3942_v7 = vpop.f32.mrf.mxu3 }
0x1a6f   :  { %v3943_v36 = vadd.f32 %v5392_v12, %v3942_v7 }
0x1a71   :  { %5224 = vmatmul.msk.f32.gmra.mxu1 %vm98_vm2, %v3943_v36 }
0x1a96   :  { %v4150_v11 = vpop.f32.mrf.mxu1 }
0x1a97   :  { %v4186_v25 = vmul.f32 0.35355338, %v4150_v11 }
0x1a99   :  { %v4210_v40 = vadd.f32 %v4198_v18, %v4186_v25 }
0x1a9b   :  { %v4222_v35 = vsel %vm1268_vm3, %v4210_v40, -inf }
0x1a9c   :  { %4223 = vmax.xlane.f32.xlu2 %v4222_v35 }
0x1a9e   :  { %v4153_v8 = vpop.f32.mrf.mxu1 }
0x1a9f   :  { %v4187_v2 = vmul.f32 0.35355338, %v4153_v8 }
0x1aa1   :  { %v4211_v19 = vadd.f32 %v4199_v13, %v4187_v2 }
0x1aa3   :  { %v4225_v39 = vsel %vm1268_vm3, %v4211_v19, -inf }
0x1aa4   :  { %4226 = vmax.xlane.f32.xlu0 %v4225_v39 }
0x1aa6   :  { %v4156_v24 = vpop.f32.mrf.mxu1 }
0x1aa7   :  { %v4188_v9 = vmul.f32 0.35355338, %v4156_v24 }
0x1aa9   :  { %v4212_v58 = vadd.f32 %v4200_v53, %v4188_v9 }
0x1aab   :  { %v4228_v44 = vsel %vm1268_vm3, %v4212_v58, -inf }
0x1aac   :  { %4229 = vmax.xlane.f32.xlu1 %v4228_v44 }
0x1aae   :  { %v4159_v27 = vpop.f32.mrf.mxu1 }
0x1aaf   :  { %v4189_v3 = vmul.f32 0.35355338, %v4159_v27 }
0x1ab1   :  { %v4213_v56 = vadd.f32 %v4201_v5, %v4189_v3 }
0x1ab3   :  { %v4231_v63 = vsel %vm1268_vm3, %v4213_v56, -inf }
0x1ab4   :  { %4232 = vmax.xlane.f32.xlu2 %v4231_v63 }
0x1ab6   :  { %v4162_v59 = vpop.f32.mrf.mxu1 }
0x1ab7   :  { %v4190_v12 = vmul.f32 0.35355338, %v4162_v59 }
0x1ab9   :  { %v4214_v54 = vadd.f32 %v4202_v28, %v4190_v12 }
0x1abb   :  { %v4234_v6 = vsel %vm1268_vm3, %v4214_v54, -inf }
0x1abc   :  { %4235 = vmax.xlane.f32.xlu0 %v4234_v6 }
0x1abe   :  { %v4165_v17 = vpop.f32.mrf.mxu1 }
0x1abf   :  { %v4191_v32 = vmul.f32 0.35355338, %v4165_v17 }
0x1ac5   :  { %5350 = vrot.lane.b32.xlu1 %v5349_v37, %s5706_s27  ;;  %v7978_v37 = vadd.f32 %v4203_v22, %v4191_v32 }
0x1ac6   :  { %v4168_v20 = vpop.f32.mrf.mxu1 }
0x1ac7   :  { %v4192_v38 = vmul.f32 0.35355338, %v4168_v20  ;;  %v4237_v14 = vsel %vm1268_vm3, %v7978_v37, -inf }
0x1ac9   :  { %v7967_v52 = vadd.f32 %v4204_v43, %v4192_v38 }
0x1acb   :  { %v4240_v55 = vsel %vm1268_vm3, %v7967_v52, -inf }
0x1acc   :  { %5345 = vrot.lane.b32.xlu2 %v5344_v4, %s5706_s27  ;;  %4241 = vmax.xlane.f32.xlu0 %v4240_v55  ;;  %v4206_v55 = vld [vmem:[%s8290_s0 + $0x618] sm:$0xff] }
0x1ace   :  { %v4171_v49 = vpop.f32.mrf.mxu1 }
0x1acf   :  { %v4193_v0 = vmul.f32 0.35355338, %v4171_v49  ;;  %v4208_v49 = vld [vmem:[%s8290_s0 + $0x628] sm:$0xff] }
0x1ad1   :  { %v7985_v1 = vadd.f32 %v4205_v21, %v4193_v0 }
0x1ad3   :  { %v4243_v15 = vsel %vm1268_vm3, %v7985_v1, -inf }
0x1ad6   :  { %v4174_v46 = vpop.f32.mrf.mxu1 }
0x1ad7   :  { %v4194_v38 = vmul.f32 0.35355338, %v4174_v46 }
0x1ad9   :  { %v8039_v32 = vadd.f32 %v4206_v55, %v4194_v38 }
0x1ade   :  { %v4177_v11 = vpop.f32.mrf.mxu1 }
0x1aef   :  { %4238 = vmax.xlane.f32.xlu1 %v4237_v14 }
0x1af5   :  { %4244 = vmax.xlane.f32.xlu2 %v4243_v15 }
0x1b08   :  { %5360 = vrot.lane.b32.xlu1 %v5359_v16, %s5706_s27  ;;  %v4195_v16 = vmul.f32 0.35355338, %v4177_v11 }
0x1b0a   :  { %v8004_v13 = vadd.f32 %v4207_v34, %v4195_v16 }
0x1b0c   :  { %v4249_v53 = vsel %vm1268_vm3, %v8004_v13, -inf }
0x1b0f   :  { %v4224_v57 = vpop.xlane.xlu2 %4223 }
0x1b10   :  { %v4258_v4 = vsub.f32 %v4210_v40, %v4224_v57  ;;  %v4180_v40 = vpop.f32.mrf.mxu1 }
0x1b11   :  { %v4196_v22 = vmul.f32 0.35355338, %v4180_v40 }
0x1b12   :  { %v4270_v10 = vmul.f32 1.442695, %v4258_v4 }
0x1b13   :  { %v8046_v0 = vadd.f32 %v4208_v49, %v4196_v22 }
0x1b14   :  { %5605 = vpow2.f32 %v4270_v10 }
0x1b15   :  { %v4252_v21 = vsel %vm1268_vm3, %v8046_v0, -inf }
0x1b17   :  { %v4227_v33 = vpop.xlane.xlu0 %4226 }
0x1b18   :  { %v4259_v48 = vsub.f32 %v4211_v19, %v4227_v33  ;;  %v4183_v44 = vpop.f32.mrf.mxu1 }
0x1b19   :  { %v4197_v3 = vmul.f32 0.35355338, %v4183_v44 }
0x1b1a   :  { %v7993_v42 = vpop.eup %5605  ;;  %v4272_v51 = vmul.f32 1.442695, %v4259_v48 }
0x1b1b   :  { %v4294_v62 = vsel %vm1268_vm3, %v7993_v42, 0.0  ;;  %v8027_v28 = vadd.f32 %v4209_v26, %v4197_v3 }
0x1b1c   :  { %4295 = vadd.xlane.f32.xlu0 %v4294_v62 }
0x1b1f   :  { %v4230_v60 = vpop.xlane.xlu1 %4229 }
0x1b20   :  { %v4260_v50 = vsub.f32 %v4212_v58, %v4230_v60 }
0x1b22   :  { %v4274_v18 = vmul.f32 1.442695, %v4260_v50 }
0x1b24   :  { %5607 = vpow2.f32 %v4274_v18 }
0x1b25   :  { %5609 = vpow2.f32 %v4272_v51 }
0x1b27   :  { %v4233_v30 = vpop.xlane.xlu2 %4232 }
0x1b28   :  { %v4261_v47 = vsub.f32 %v4213_v56, %v4233_v30 }
0x1b2a   :  { %v7997_v25 = vpop.eup %5607  ;;  %v4276_v8 = vmul.f32 1.442695, %v4261_v47 }
0x1b2b   :  { %v4300_v35 = vsel %vm1268_vm3, %v7997_v25, 0.0  ;;  %v8006_v7 = vpop.eup %5609 }
0x1b2c   :  { %4301 = vadd.xlane.f32.xlu2 %v4300_v35  ;;  %5611 = vpow2.f32 %v4276_v8  ;;  %v4297_v24 = vsel %vm1268_vm3, %v8006_v7, 0.0 }
0x1b2f   :  { %v5346_v2 = vpop.permute.xlu2 %5345  ;;  %v4236_v36 = vpop.xlane.xlu0 %4235 }
0x1b30   :  { %v5347_v19 = vunpack.i.l.bf16 %v5346_v2  ;;  %v4262_v39 = vsub.f32 %v4214_v54, %v4236_v36  ;;  %5355 = vrot.lane.b32.xlu0 %v5354_v29, %s5706_s27  ;;  %v5348_v9 = vunpack.i.h.bf16 %v5346_v2  ;;  %v4255_v54 = vsel %vm1268_vm3, %v8027_v28, -inf }
0x1b32   :  { %v4278_v58 = vmul.f32 1.442695, %v4262_v39  ;;  %4430 = vmatpush.msra.mxu2 %v5347_v19  ;;  %4298 = vadd.xlane.f32.xlu1 %v4297_v24  ;;  %v8016_v27 = vpop.eup %5611 }
0x1b33   :  { %v4303_v29 = vsel %vm1268_vm3, %v8016_v27, 0.0 }
0x1b34   :  { %5613 = vpow2.f32 %v4278_v58  ;;  %4431 = vmatpush.msra.mxu2 %v5348_v9  ;;  %4250 = vmax.xlane.f32.xlu2 %v4249_v53 }
0x1b37   :  { %v5351_v5 = vpop.permute.xlu1 %5350 }
0x1b38   :  { %v5352_v31 = vunpack.i.l.bf16 %v5351_v5  ;;  %v5353_v63 = vunpack.i.h.bf16 %v5351_v5 }
0x1b3a   :  { %v8023_v56 = vpop.eup %5613  ;;  %4432 = vmatpush.msra.mxu2 %v5352_v31  ;;  %4304 = vadd.xlane.f32.xlu1 %v4303_v29 }
0x1b3b   :  { %v4306_v59 = vsel %vm1268_vm3, %v8023_v56, 0.0 }
0x1b3c   :  { %4433 = vmatpush.msra.mxu2 %v5353_v63  ;;  %4307 = vadd.xlane.f32.xlu2 %v4306_v59 }
0x1b3f   :  { %v4242_v12 = vpop.xlane.xlu0 %4241 }
0x1b40   :  { %v4264_v6 = vsub.f32 %v7967_v52, %v4242_v12  ;;  %v4246_v52 = vsel %vm1268_vm3, %v8039_v32, -inf }
0x1b42   :  { %v4282_v17 = vmul.f32 1.442695, %v4264_v6  ;;  %4256 = vmax.xlane.f32.xlu1 %v4255_v54 }
0x1b44   :  { %5615 = vpow2.f32 %v4282_v17 }
0x1b4a   :  { %v8032_v20 = vpop.eup %5615 }
0x1b4b   :  { %v4312_v43 = vsel %vm1268_vm3, %v8032_v20, 0.0 }
0x1b4c   :  { %4313 = vadd.xlane.f32.xlu2 %v4312_v43 }
0x1b5a   :  { %4247 = vmax.xlane.f32.xlu0 %v4246_v52 }
0x1b62   :  { %v4239_v14 = vpop.xlane.xlu1 %4238  ;;  %4253 = vmax.xlane.f32.xlu0 %v4252_v21 }
0x1b63   :  { %v4263_v15 = vsub.f32 %v7978_v37, %v4239_v14 }
0x1b65   :  { %v4280_v57 = vmul.f32 1.442695, %v4263_v15 }
0x1b67   :  { %5617 = vpow2.f32 %v4280_v57 }
0x1b68   :  { %v4245_v4 = vpop.xlane.xlu2 %4244 }
0x1b69   :  { %v4265_v10 = vsub.f32 %v7985_v1, %v4245_v4 }
0x1b6b   :  { %v4284_v46 = vmul.f32 1.442695, %v4265_v10 }
0x1b6d   :  { %v8052_v62 = vpop.eup %5617  ;;  %5619 = vpow2.f32 %v4284_v46 }
0x1b6e   :  { %v4309_v33 = vsel %vm1268_vm3, %v8052_v62, 0.0 }
0x1b6f   :  { %4310 = vadd.xlane.f32.xlu0 %v4309_v33  ;;  %v4487_v33 = vld [vmem:[%s8290_s0 + $0x320] sm:$0xff] }
0x1b70   :  { %4511 = vmatpush.msrb.mxu3 %v4487_v33 }
0x1b73   :  { %v8056_v60 = vpop.eup %5619 }
0x1b74   :  { %v4315_v48 = vsel %vm1268_vm3, %v8056_v60, 0.0 }
0x1b75   :  { %4316 = vadd.xlane.f32.xlu1 %v4315_v48 }
0x1b7a   :  { %v5361_v50 = vpop.permute.xlu1 %5360 }
0x1b7b   :  { %v5362_v16 = vunpack.i.l.bf16 %v5361_v50  ;;  %v5363_v35 = vunpack.i.h.bf16 %v5361_v50 }
0x1b8f   :  { %v4296_v37 = vpop.xlane.xlu0 %4295 }
0x1b90   :  { %5621 = vrcp.f32 %v4296_v37 }
0x1b96   :  { %v5622_v47 = vpop.eup %5621 }
0x1b97   :  { %v4342_v8 = vmul.f32 %v5622_v47, %v7993_v42 }
0x1b9f   :  { %v4302_v11 = vpop.xlane.xlu2 %4301 }
0x1ba2   :  { %v5356_v18 = vpop.permute.xlu0 %5355 }
0x1ba3   :  { %v5357_v1 = vunpack.i.l.bf16 %v5356_v18  ;;  %v5358_v51 = vunpack.i.h.bf16 %v5356_v18 }
0x1ba5   :  { %4434 = vmatpush.msra.mxu2 %v5357_v1  ;;  %v4299_v30 = vpop.xlane.xlu1 %4298 }
0x1ba6   :  { %5623 = vrcp.f32 %v4299_v30 }
0x1ba7   :  { %4435 = vmatpush.msra.mxu2 %v5358_v51  ;;  %v4251_v34 = vpop.xlane.xlu2 %4250 }
0x1ba8   :  { %v4267_v40 = vsub.f32 %v8004_v13, %v4251_v34 }
0x1ba9   :  { %4436 = vmatpush.msra.mxu2 %v5362_v16  ;;  %v4486_v16 = vld [vmem:[%s8290_s0 + $0x318] sm:$0xff] }
0x1baa   :  { %v4288_v2 = vmul.f32 1.442695, %v4267_v40  ;;  %4512 = vmatpush.msrb.mxu3 %v4486_v16  ;;  %v4485_v40 = vld [vmem:[%s8290_s0 + $0x310] sm:$0xff] }
0x1bab   :  { %4437 = vmatpush.msra.mxu2 %v5363_v35  ;;  %v4484_v35 = vld [vmem:[%s8290_s0 + $0x308] sm:$0xff] }
0x1bac   :  { %5625 = vpow2.f32 %v4288_v2  ;;  %5225 = vmatmul.msk.f32.vlgmr.msra.gmra.mxu2 %vm1268_vm3, %v4342_v8  ;;  %v5624_v36 = vpop.eup %5623  ;;  %4513 = vmatpush.msrb.mxu3 %v4485_v40 }
0x1bad   :  { %5627 = vrcp.f32 %v4302_v11  ;;  %v4343_v39 = vmul.f32 %v5624_v36, %v8006_v7  ;;  %v4305_v13 = vpop.xlane.xlu1 %4304 }
0x1bae   :  { %5629 = vrcp.f32 %v4305_v13  ;;  %4514 = vmatpush.msrb.mxu3 %v4484_v35 }
0x1baf   :  { %v4308_v9 = vpop.xlane.xlu2 %4307 }
0x1bb0   :  { %5631 = vrcp.f32 %v4308_v9 }
0x1bb2   :  { %v8063_v19 = vpop.eup %5625 }
0x1bb3   :  { %v4321_v24 = vsel %vm1268_vm3, %v8063_v19, 0.0  ;;  %v5628_v53 = vpop.eup %5627 }
0x1bb4   :  { %5226 = vmatmul.msk.f32.gmra.mxu2 %vm1268_vm3, %v4343_v39  ;;  %4322 = vadd.xlane.f32.xlu2 %v4321_v24  ;;  %v4344_v42 = vmul.f32 %v5628_v53, %v7997_v25  ;;  %v5630_v58 = vpop.eup %5629 }
0x1bb5   :  { %v4345_v44 = vmul.f32 %v5630_v58, %v8016_v27  ;;  %v4257_v3 = vpop.xlane.xlu1 %4256 }
0x1bb6   :  { %v5632_v7 = vpop.eup %5631  ;;  %v4269_v25 = vsub.f32 %v8027_v28, %v4257_v3 }
0x1bb7   :  { %v4346_v5 = vmul.f32 %v5632_v7, %v8023_v56 }
0x1bb8   :  { %v4292_v63 = vmul.f32 1.442695, %v4269_v25 }
0x1bbc   :  { %5227 = vmatmul.msk.f32.gmra.mxu2 %vm1268_vm3, %v4344_v42 }
0x1bbf   :  { %v4314_v55 = vpop.xlane.xlu2 %4313 }
0x1bc4   :  { %5228 = vmatmul.msk.f32.gmra.mxu2 %vm1268_vm3, %v4345_v44 }
0x1bcc   :  { %5229 = vmatmul.msk.f32.gmra.mxu2 %vm1268_vm3, %v4346_v5 }
0x1bcd   :  { %v4248_v31 = vpop.xlane.xlu0 %4247 }
0x1bce   :  { %v4266_v26 = vsub.f32 %v8039_v32, %v4248_v31  ;;  %v5393_v31 = vld [vmem:[%s8290_s0 + $0x328] ss:$0 sm:$0xff] }
0x1bd0   :  { %v4286_v29 = vmul.f32 1.442695, %v4266_v26 }
0x1bd2   :  { %5633 = vpow2.f32 %v4286_v29 }
0x1bd3   :  { %5635 = vpow2.f32 %v4292_v63 }
0x1bd5   :  { %v4254_v59 = vpop.xlane.xlu0 %4253 }
0x1bd6   :  { %v4268_v12 = vsub.f32 %v8046_v0, %v4254_v59 }
0x1bd8   :  { %v5634_v27 = vpop.eup %5633  ;;  %v4290_v54 = vmul.f32 1.442695, %v4268_v12 }
0x1bd9   :  { %v4318_v6 = vsel %vm1268_vm3, %v5634_v27, 0.0  ;;  %v5636_v56 = vpop.eup %5635 }
0x1bda   :  { %5637 = vpow2.f32 %v4290_v54  ;;  %4319 = vadd.xlane.f32.xlu0 %v4318_v6  ;;  %v4327_v38 = vsel %vm1268_vm3, %v5636_v56, 0.0 }
0x1be0   :  { %v5638_v17 = vpop.eup %5637 }
0x1be1   :  { %v4324_v43 = vsel %vm1268_vm3, %v5638_v17, 0.0 }
0x1be2   :  { %v4311_v28 = vpop.xlane.xlu0 %4310  ;;  %4325 = vadd.xlane.f32.xlu1 %v4324_v43  ;;  %4328 = vadd.xlane.f32.xlu0 %v4327_v38 }
0x1be3   :  { %5639 = vrcp.f32 %v4311_v28 }
0x1be4   :  { %5641 = vrcp.f32 %v4314_v55 }
0x1be8   :  { %v4317_v52 = vpop.xlane.xlu1 %4316 }
0x1be9   :  { %v5640_v32 = vpop.eup %5639  ;;  %5643 = vrcp.f32 %v4317_v52 }
0x1bea   :  { %v4347_v22 = vmul.f32 %v5640_v32, %v8052_v62  ;;  %v5642_v49 = vpop.eup %5641 }
0x1beb   :  { %v4348_v0 = vmul.f32 %v5642_v49, %v8032_v20 }
0x1bec   :  { %5230 = vmatmul.msk.f32.gmra.mxu2 %vm1268_vm3, %v4347_v22 }
0x1bef   :  { %v5644_v21 = vpop.eup %5643 }
0x1bf0   :  { %v4349_v14 = vmul.f32 %v5644_v21, %v8056_v60 }
0x1bf4   :  { %5231 = vmatmul.msk.f32.gmra.mxu2 %vm1268_vm3, %v4348_v0 }
0x1bfc   :  { %5232 = vmatmul.msk.f32.gmra.mxu2 %vm1268_vm3, %v4349_v14 }
0x1c27   :  { %v4323_v57 = vpop.xlane.xlu2 %4322 }
0x1c2f   :  { %v4439_v18 = vpop.f32.mrf.mxu2 }
0x1c37   :  { %v4442_v1 = vpop.f32.mrf.mxu2 }
0x1c3f   :  { %v4445_v51 = vpop.f32.mrf.mxu2 }
0x1c47   :  { %v4448_v30 = vpop.f32.mrf.mxu2 }
0x1c4d   :  { %v4320_v15 = vpop.xlane.xlu0 %4319 }
0x1c4e   :  { %5645 = vrcp.f32 %v4320_v15 }
0x1c4f   :  { %5647 = vrcp.f32 %v4323_v57  ;;  %v4451_v47 = vpop.f32.mrf.mxu2 }
0x1c50   :  { %v4476_v53 = vadd.f32 %v4451_v47, %v4442_v1  ;;  %v4687_v1 = vld [vmem:[%s8290_s0 + $0x3e0] sm:$0xff]  ;;  %v4685_v47 = vld [vmem:[%s8290_s0 + $0x3d0] sm:$0xff] }
0x1c51   :  { %4690 = vmatpush.msra.mxu3 %v4687_v1 }
0x1c54   :  { %v5646_v4 = vpop.eup %5645 }
0x1c55   :  { %v4350_v10 = vmul.f32 %v5646_v4, %v5634_v27  ;;  %v4326_v46 = vpop.xlane.xlu1 %4325  ;;  %v5648_v62 = vpop.eup %5647  ;;  %v4607_v4 = vld [vmem:[%s8290_s0 + $0x358] sm:$0xff] }
0x1c56   :  { %5649 = vrcp.f32 %v4326_v46  ;;  %v4351_v20 = vmul.f32 %v5648_v62, %v8063_v19  ;;  %v4329_v60 = vpop.xlane.xlu0 %4328  ;;  %v4475_v19 = vadd.f32 %v4448_v30, %v4439_v18  ;;  %4631 = vmatpush.msrb.mxu0 %v4607_v4  ;;  %v4605_v46 = vld [vmem:[%s8290_s0 + $0x348] sm:$0xff]  ;;  %v4604_v62 = vld [vmem:[%s8290_s0 + $0x340] sm:$0xff] }
0x1c57   :  { %5233 = vmatmul.msk.f32.gmra.mxu2 %vm1268_vm3, %v4350_v10  ;;  %5651 = vrcp.f32 %v4329_v60  ;;  %v4606_v10 = vld [vmem:[%s8290_s0 + $0x350] sm:$0xff] }
0x1c58   :  { %4632 = vmatpush.msrb.mxu0 %v4606_v10 }
0x1c5a   :  { %4633 = vmatpush.msrb.mxu0 %v4605_v46 }
0x1c5c   :  { %v5650_v48 = vpop.eup %5649  ;;  %4634 = vmatpush.msrb.mxu0 %v4604_v62 }
0x1c5d   :  { %v4352_v37 = vmul.f32 %v5650_v48, %v5638_v17  ;;  %v5652_v50 = vpop.eup %5651 }
0x1c5e   :  { %v4353_v11 = vmul.f32 %v5652_v50, %v5636_v56 }
0x1c5f   :  { %5234 = vmatmul.msk.f32.gmra.mxu2 %vm1268_vm3, %v4351_v20 }
0x1c67   :  { %5235 = vmatmul.msk.f32.gmra.mxu2 %vm1268_vm3, %v4352_v37 }
0x1c6f   :  { %5236 = vmatmul.msk.f32.gmra.mxu2 %vm1268_vm3, %v4353_v11  ;;  %v4454_v34 = vpop.f32.mrf.mxu2 }
0x1c70   :  { %v4477_v44 = vadd.f32 %v4454_v34, %v4445_v51  ;;  %v4686_v51 = vld [vmem:[%s8290_s0 + $0x3d8] sm:$0xff] }
0x1c71   :  { %4691 = vmatpush.msra.mxu3 %v4686_v51 }
0x1c73   :  { %4692 = vmatpush.msra.mxu3 %v4685_v47 }
0x1c77   :  { %v4457_v8 = vpop.f32.mrf.mxu2 }
0x1c78   :  { %v4478_v39 = vadd.f32 %v4475_v19, %v4457_v8 }
0x1c7f   :  { %v4460_v2 = vpop.f32.mrf.mxu2 }
0x1c80   :  { %v4479_v42 = vadd.f32 %v4476_v53, %v4460_v2  ;;  %v5395_v53 = vld [vmem:[%s8290_s0 + $0x338] ss:$0 sm:$0xff] }
0x1cda   :  { %v4463_v36 = vpop.f32.mrf.mxu2 }
0x1cdb   :  { %v4480_v7 = vadd.f32 %v4477_v44, %v4463_v36 }
0x1ce2   :  { %v4466_v24 = vpop.f32.mrf.mxu2 }
0x1ce3   :  { %v4481_v13 = vadd.f32 %v4478_v39, %v4466_v24  ;;  %v5394_v39 = vld [vmem:[%s8290_s0 + $0x330] ss:$0 sm:$0xff] }
0x1ce5   :  { %5237 = vmatmul.msk.f32.vlgmr.msrb.gmra.mxu3 %vm98_vm2, %v4481_v13 }
0x1cea   :  { %v4469_v9 = vpop.f32.mrf.mxu2 }
0x1ceb   :  { %v4482_v58 = vadd.f32 %v4479_v42, %v4469_v9 }
0x1ced   :  { %5238 = vmatmul.msk.f32.gmra.mxu3 %vm98_vm2, %v4482_v58 }
0x1cf2   :  { %v4472_v5 = vpop.f32.mrf.mxu2 }
0x1cf3   :  { %v4483_v3 = vadd.f32 %v4480_v7, %v4472_v5 }
0x1cf5   :  { %5239 = vmatmul.msk.f32.gmra.mxu3 %vm98_vm2, %v4483_v3 }
0x1d68   :  { %v4516_v26 = vpop.f32.mrf.mxu3 }
0x1d69   :  { %v4517_v25 = vadd.f32 %v5393_v31, %v4516_v26 }
0x1d6b   :  { %v4525_v29 = vadd.f32 %v4517_v25, %v7850_v23 }
0x1d6d   :  { %v4530_v63 = vsel %vm98_vm2, %v4525_v29, 0.0 }
0x1d6e   :  { %4531 = vadd.xlane.f32.xlu2 %v4530_v63 }
0x1d70   :  { %v4519_v59 = vpop.f32.mrf.mxu3 }
0x1d71   :  { %v4520_v12 = vadd.f32 %v5393_v31, %v4519_v59 }
0x1d73   :  { %v4526_v27 = vadd.f32 %v4520_v12, %v7847_v61 }
0x1d75   :  { %v4533_v54 = vsel %vm98_vm2, %v4526_v27, 0.0 }
0x1d76   :  { %4534 = vadd.xlane.f32.xlu1 %v4533_v54 }
0x1d78   :  { %v4522_v6 = vpop.f32.mrf.mxu3 }
0x1d79   :  { %v4523_v56 = vadd.f32 %v5393_v31, %v4522_v6 }
0x1d7b   :  { %v4527_v17 = vadd.f32 %v4523_v56, %v7844_v45 }
0x1d7d   :  { %v4536_v43 = vsel %vm98_vm2, %v4527_v17, 0.0 }
0x1d7e   :  { %4537 = vadd.xlane.f32.xlu0 %v4536_v43 }
0x1de1   :  { %v4532_v38 = vpop.xlane.xlu2 %4531 }
0x1de2   :  { %v4539_v23 = vmul.f32 %v4532_v38, %v6383_v41  ;;  %v4684_v38 = vld [vmem:[%s8290_s0 + $0x3c8] sm:$0xff] }
0x1de3   :  { %4693 = vmatpush.msra.mxu3 %v4684_v38 }
0x1de4   :  { %v4542_v28 = vsub.f32 %v4525_v29, %v4539_v23  ;;  %v4683_v23 = vld [vmem:[%s8290_s0 + $0x3c0] sm:$0xff] }
0x1de5   :  { %4694 = vmatpush.msra.mxu3 %v4683_v23 }
0x1de6   :  { %v4545_v55 = vmul.f32 %v4542_v28, %v4542_v28 }
0x1de8   :  { %v4548_v32 = vsel %vm98_vm2, %v4545_v55, 0.0  ;;  %v4681_v55 = vld [vmem:[%s8290_s0 + $0x3b0] sm:$0xff] }
0x1de9   :  { %4549 = vadd.xlane.f32.xlu2 %v4548_v32  ;;  %v4535_v22 = vpop.xlane.xlu1 %4534  ;;  %v4680_v32 = vld [vmem:[%s8290_s0 + $0x3a8] sm:$0xff] }
0x1dea   :  { %v4540_v61 = vmul.f32 %v4535_v22, %v6383_v41  ;;  %v4679_v22 = vld [vmem:[%s8290_s0 + $0x3a0] sm:$0xff] }
0x1dec   :  { %v8119_v52 = vsub.f32 %v4526_v27, %v4540_v61  ;;  %v4678_v61 = vld [vmem:[%s8290_s0 + $0x398] sm:$0xff] }
0x1dee   :  { %v4546_v49 = vmul.f32 %v8119_v52, %v8119_v52 }
0x1df0   :  { %v4551_v45 = vsel %vm98_vm2, %v4546_v49, 0.0  ;;  %v4676_v49 = vld [vmem:[%s8290_s0 + $0x388] sm:$0xff] }
0x1df1   :  { %4552 = vadd.xlane.f32.xlu1 %v4551_v45  ;;  %v4538_v0 = vpop.xlane.xlu0 %4537  ;;  %v4675_v45 = vld [vmem:[%s8290_s0 + $0x380] sm:$0xff] }
0x1df2   :  { %v4541_v21 = vmul.f32 %v4538_v0, %v6383_v41  ;;  %v4674_v0 = vld [vmem:[%s8290_s0 + $0x378] sm:$0xff] }
0x1df4   :  { %v8125_v14 = vsub.f32 %v4527_v17, %v4541_v21  ;;  %v4673_v21 = vld [vmem:[%s8290_s0 + $0x370] sm:$0xff] }
0x1df6   :  { %v4547_v15 = vmul.f32 %v8125_v14, %v8125_v14 }
0x1df8   :  { %v4554_v57 = vsel %vm98_vm2, %v4547_v15, 0.0  ;;  %v5396_v15 = vld [vmem:[%s8290_s0 + $0x360] ss:$0 sm:$0xff] }
0x1df9   :  { %4555 = vadd.xlane.f32.xlu0 %v4554_v57 }
0x1e5c   :  { %v4550_v20 = vpop.xlane.xlu2 %4549 }
0x1e5d   :  { %v4557_v33 = vmul.f32 %v4550_v20, %v6383_v41 }
0x1e5f   :  { %v4560_v60 = vadd.f32 1e-05, %v4557_v33 }
0x1e61   :  { %5653 = vrsqrt.f32 %v4560_v60  ;;  %vm4569_vm4 = vweird.f32 %v4560_v60 }
0x1e64   :  { %v4553_v48 = vpop.xlane.xlu1 %4552 }
0x1e65   :  { %v4558_v37 = vmul.f32 %v4553_v48, %v6383_v41 }
0x1e67   :  { %v5654_v50 = vpop.eup %5653  ;;  %v4561_v11 = vadd.f32 1e-05, %v4558_v37 }
0x1e68   :  { %v4564_v18 = vmul.f32 %v5654_v50, %v4560_v60  ;;  %vm4570_vm3 = vweird.f32 %v5654_v50 }
0x1e69   :  { %5655 = vrsqrt.f32 %v4561_v11  ;;  %vm4571_vm13 = vmor %vm4569_vm4, %vm4570_vm3  ;;  %vm4579_vm15 = vweird.f32 %v4561_v11 }
0x1e6a   :  { %v4565_v30 = vmul.f32 %v5654_v50, %v4564_v18 }
0x1e6c   :  { %v4566_v16 = vmul.f32 0.5, %v4565_v30  ;;  %v4556_v34 = vpop.xlane.xlu0 %4555 }
0x1e6d   :  { %v4559_v40 = vmul.f32 %v4556_v34, %v6383_v41 }
0x1e6e   :  { %v4567_v35 = vsub.f32 1.5, %v4566_v16 }
0x1e6f   :  { %v5656_v8 = vpop.eup %5655  ;;  %v4562_v2 = vadd.f32 1e-05, %v4559_v40 }
0x1e70   :  { %v4568_v36 = vmul.f32 %v5654_v50, %v4567_v35  ;;  %v4574_v19 = vmul.f32 %v5656_v8, %v4561_v11  ;;  %vm4580_vm14 = vweird.f32 %v5656_v8 }
0x1e71   :  { %5657 = vrsqrt.f32 %v4562_v2  ;;  %vm4581_vm5 = vmor %vm4579_vm15, %vm4580_vm14  ;;  %vm4589_vm6 = vweird.f32 %v4562_v2 }
0x1e72   :  { %v4572_v24 = vsel %vm4571_vm13, %v5654_v50, %v4568_v36  ;;  %v4575_v13 = vmul.f32 %v5656_v8, %v4574_v19 }
0x1e73   :  { %v4593_v42 = vmul.f32 %v4572_v24, %v4542_v28  ;;  %v4682_v28 = vld [vmem:[%s8290_s0 + $0x3b8] sm:$0xff] }
0x1e74   :  { %v4576_v9 = vmul.f32 0.5, %v4575_v13  ;;  %4695 = vmatpush.msra.mxu3 %v4682_v28 }
0x1e75   :  { %v4597_v58 = vmul.f32 %v5394_v39, %v4593_v42 }
0x1e76   :  { %v4577_v44 = vsub.f32 1.5, %v4576_v9  ;;  %4696 = vmatpush.msra.mxu3 %v4681_v55 }
0x1e77   :  { %v5658_v7 = vpop.eup %5657  ;;  %v8160_v5 = vadd.f32 %v5395_v53, %v4597_v58 }
0x1e78   :  { %v4578_v3 = vmul.f32 %v5656_v8, %v4577_v44  ;;  %v4584_v31 = vmul.f32 %v5658_v7, %v4562_v2  ;;  %vm4590_vm11 = vweird.f32 %v5658_v7  ;;  %4697 = vmatpush.msra.mxu3 %v4680_v32 }
0x1e79   :  { %5240 = vmatmul.msk.f32.vlgmr.msrb.gmra.mxu0 %vm98_vm2, %v8160_v5  ;;  %vm4591_vm7 = vmor %vm4589_vm6, %vm4590_vm11 }
0x1e7a   :  { %v4582_v26 = vsel %vm4581_vm5, %v5656_v8, %v4578_v3  ;;  %v4585_v25 = vmul.f32 %v5658_v7, %v4584_v31  ;;  %4698 = vmatpush.msra.mxu3 %v4679_v22 }
0x1e7b   :  { %v4594_v29 = vmul.f32 %v4582_v26, %v8119_v52  ;;  %v4677_v52 = vld [vmem:[%s8290_s0 + $0x390] sm:$0xff] }
0x1e7c   :  { %v4586_v63 = vmul.f32 0.5, %v4585_v25  ;;  %4699 = vmatpush.msra.mxu3 %v4678_v61 }
0x1e7d   :  { %v4598_v59 = vmul.f32 %v5394_v39, %v4594_v29 }
0x1e7e   :  { %v4587_v12 = vsub.f32 1.5, %v4586_v63  ;;  %4700 = vmatpush.msra.mxu3 %v4677_v52 }
0x1e7f   :  { %v8165_v27 = vadd.f32 %v5395_v53, %v4598_v59 }
0x1e80   :  { %v4588_v54 = vmul.f32 %v5658_v7, %v4587_v12  ;;  %4701 = vmatpush.msra.mxu3 %v4676_v49 }
0x1e81   :  { %5241 = vmatmul.msk.f32.gmra.mxu0 %vm98_vm2, %v8165_v27 }
0x1e82   :  { %v4592_v6 = vsel %vm4591_vm7, %v5658_v7, %v4588_v54  ;;  %4702 = vmatpush.msra.mxu3 %v4675_v45  ;;  %v5397_v7 = vld [vmem:[%s8290_s0 + $0x3e8] ss:$0 sm:$0xff] }
0x1e83   :  { %v4595_v56 = vmul.f32 %v4592_v6, %v8125_v14  ;;  %v4672_v14 = vld [vmem:[%s8290_s0 + $0x368] sm:$0xff] }
0x1e84   :  { %4703 = vmatpush.msra.mxu3 %v4674_v0 }
0x1e85   :  { %v4599_v17 = vmul.f32 %v5394_v39, %v4595_v56 }
0x1e86   :  { %4704 = vmatpush.msra.mxu3 %v4673_v21 }
0x1e87   :  { %v8170_v43 = vadd.f32 %v5395_v53, %v4599_v17 }
0x1e88   :  { %4705 = vmatpush.msra.mxu3 %v4672_v14 }
0x1e89   :  { %5242 = vmatmul.msk.f32.gmra.mxu0 %vm98_vm2, %v8170_v43 }
0x1ef6   :  { %v4636_v57 = vpop.f32.mrf.mxu0 }
0x1ef7   :  { %v4637_v4 = vadd.f32 %v5396_v15, %v4636_v57 }
0x1ef9   :  { %v4645_v10 = vmul.f32 %v4637_v4, %v4637_v4 }
0x1efb   :  { %v4648_v46 = vmul.f32 %v4645_v10, %v4637_v4 }
0x1efd   :  { %v4651_v62 = vmul.f32 0.044715, %v4648_v46 }
0x1efe   :  { %v4639_v20 = vpop.f32.mrf.mxu0 }
0x1eff   :  { %v4654_v33 = vadd.f32 %v4651_v62, %v4637_v4  ;;  %v4640_v60 = vadd.f32 %v5396_v15, %v4639_v20 }
0x1f01   :  { %v4657_v48 = vmul.f32 0.7978846, %v4654_v33  ;;  %v4646_v37 = vmul.f32 %v4640_v60, %v4640_v60 }
0x1f03   :  { %5659 = vtanh.f32 %v4657_v48  ;;  %v4649_v50 = vmul.f32 %v4646_v37, %v4640_v60 }
0x1f05   :  { %v4652_v11 = vmul.f32 0.044715, %v4649_v50 }
0x1f06   :  { %v4642_v18 = vpop.f32.mrf.mxu0 }
0x1f07   :  { %v4655_v1 = vadd.f32 %v4652_v11, %v4640_v60  ;;  %v4643_v51 = vadd.f32 %v5396_v15, %v4642_v18 }
0x1f09   :  { %v5660_v30 = vpop.eup %5659  ;;  %v4647_v47 = vmul.f32 %v4643_v51, %v4643_v51  ;;  %v4658_v16 = vmul.f32 0.7978846, %v4655_v1 }
0x1f0a   :  { %v4663_v34 = vadd.f32 1.0, %v5660_v30  ;;  %v5398_v30 = vld [vmem:[%s8290_s0 + $0x3f0] ss:$0 sm:$0xff] }
0x1f0b   :  { %v4650_v40 = vmul.f32 %v4647_v47, %v4643_v51  ;;  %5661 = vtanh.f32 %v4658_v16 }
0x1f0c   :  { %v4666_v35 = vmul.f32 0.5, %v4663_v34 }
0x1f0d   :  { %v4653_v8 = vmul.f32 0.044715, %v4650_v40  ;;  %v5399_v40 = vld [vmem:[%s8290_s0 + $0x3f8] ss:$0 sm:$0xff] }
0x1f0e   :  { %v4669_v2 = vmul.f32 %v4666_v35, %v4637_v4 }
0x1f0f   :  { %v4656_v36 = vadd.f32 %v4653_v8, %v4643_v51 }
0x1f10   :  { %4706 = vmatmul.f32.vlgmr.msra.gmra.mxu3 %v4669_v2 }
0x1f11   :  { %v5662_v19 = vpop.eup %5661  ;;  %v4659_v39 = vmul.f32 0.7978846, %v4656_v36 }
0x1f12   :  { %v4664_v24 = vadd.f32 1.0, %v5662_v19 }
0x1f13   :  { %5663 = vtanh.f32 %v4659_v39 }
0x1f14   :  { %v4667_v13 = vmul.f32 0.5, %v4664_v24 }
0x1f16   :  { %v4670_v53 = vmul.f32 %v4667_v13, %v4640_v60 }
0x1f18   :  { %4709 = vmatmul.f32.gmra.mxu3 %v4670_v53 }
0x1f19   :  { %v5664_v42 = vpop.eup %5663 }
0x1f1a   :  { %v4665_v9 = vadd.f32 1.0, %v5664_v42 }
0x1f1c   :  { %v4668_v58 = vmul.f32 0.5, %v4665_v9 }
0x1f1e   :  { %v4671_v44 = vmul.f32 %v4668_v58, %v4643_v51 }
0x1f20   :  { %4712 = vmatmul.f32.gmra.mxu3 %v4671_v44 }
0x1f93   :  { %v4707_v3 = vpop.f32.mrf.mxu3 }
0x1f94   :  { %v4708_v31 = vadd.f32 %v5397_v7, %v4707_v3 }
0x1f96   :  { %v4716_v26 = vadd.f32 %v4708_v31, %v8160_v5 }
0x1f98   :  { %v4721_v25 = vsel %vm98_vm2, %v4716_v26, 0.0 }
0x1f99   :  { %4722 = vadd.xlane.f32.xlu2 %v4721_v25 }
0x1f9b   :  { %v4710_v29 = vpop.f32.mrf.mxu3 }
0x1f9c   :  { %v4711_v63 = vadd.f32 %v5397_v7, %v4710_v29 }
0x1f9e   :  { %v4717_v59 = vadd.f32 %v4711_v63, %v8165_v27 }
0x1fa0   :  { %v4724_v12 = vsel %vm98_vm2, %v4717_v59, 0.0 }
0x1fa1   :  { %4725 = vadd.xlane.f32.xlu1 %v4724_v12 }
0x1fa3   :  { %v4713_v54 = vpop.f32.mrf.mxu3 }
0x1fa4   :  { %v4714_v6 = vadd.f32 %v5397_v7, %v4713_v54 }
0x1fa6   :  { %v4718_v56 = vadd.f32 %v4714_v6, %v8170_v43 }
0x1fa8   :  { %v4727_v17 = vsel %vm98_vm2, %v4718_v56, 0.0 }
0x1fa9   :  { %4728 = vadd.xlane.f32.xlu0 %v4727_v17 }
0x200c   :  { %v4723_v38 = vpop.xlane.xlu2 %4722 }
0x200d   :  { %v4730_v5 = vmul.f32 %v4723_v38, %v6383_v41 }
0x200f   :  { %v4733_v23 = vsub.f32 %v4716_v26, %v4730_v5 }
0x2011   :  { %v4736_v28 = vmul.f32 %v4733_v23, %v4733_v23 }
0x2013   :  { %v4739_v55 = vsel %vm98_vm2, %v4736_v28, 0.0 }
0x2014   :  { %v4726_v32 = vpop.xlane.xlu1 %4725  ;;  %4740 = vadd.xlane.f32.xlu2 %v4739_v55 }
0x2015   :  { %v4731_v27 = vmul.f32 %v4726_v32, %v6383_v41 }
0x2017   :  { %v4734_v22 = vsub.f32 %v4717_v59, %v4731_v27 }
0x2019   :  { %v4737_v61 = vmul.f32 %v4734_v22, %v4734_v22 }
0x201b   :  { %v4742_v52 = vsel %vm98_vm2, %v4737_v61, 0.0 }
0x201c   :  { %4743 = vadd.xlane.f32.xlu1 %v4742_v52  ;;  %v4729_v43 = vpop.xlane.xlu0 %4728 }
0x201d   :  { %v4732_v49 = vmul.f32 %v4729_v43, %v6383_v41 }
0x201f   :  { %v4735_v45 = vsub.f32 %v4718_v56, %v4732_v49  ;;  %v4874_v49 = vld [vmem:[%s8290_s0 + $0x428] sm:$0xff] }
0x2020   :  { %4898 = vmatpush.msra.mxu0 %v4874_v49 }
0x2021   :  { %v4738_v0 = vmul.f32 %v4735_v45, %v4735_v45 }
0x2023   :  { %v4745_v21 = vsel %vm98_vm2, %v4738_v0, 0.0  ;;  %v4872_v0 = vld [vmem:[%s8290_s0 + $0x418] sm:$0xff] }
0x2024   :  { %4746 = vadd.xlane.f32.xlu0 %v4745_v21  ;;  %v4871_v21 = vld [vmem:[%s8290_s0 + $0x410] sm:$0xff] }
0x2087   :  { %v4741_v14 = vpop.xlane.xlu2 %4740 }
0x2088   :  { %v4748_v15 = vmul.f32 %v4741_v14, %v6383_v41 }
0x208a   :  { %v4751_v57 = vadd.f32 1e-05, %v4748_v15 }
0x208c   :  { %5665 = vrsqrt.f32 %v4751_v57  ;;  %vm4760_vm9 = vweird.f32 %v4751_v57 }
0x208f   :  { %v4744_v4 = vpop.xlane.xlu1 %4743 }
0x2090   :  { %v4749_v10 = vmul.f32 %v4744_v4, %v6383_v41 }
0x2092   :  { %v5666_v46 = vpop.eup %5665  ;;  %v4752_v62 = vadd.f32 1e-05, %v4749_v10 }
0x2093   :  { %v4755_v20 = vmul.f32 %v5666_v46, %v4751_v57  ;;  %vm4761_vm8 = vweird.f32 %v5666_v46 }
0x2094   :  { %5667 = vrsqrt.f32 %v4752_v62  ;;  %vm4762_vm10 = vmor %vm4760_vm9, %vm4761_vm8  ;;  %vm4770_vm1 = vweird.f32 %v4752_v62 }
0x2095   :  { %v4756_v33 = vmul.f32 %v5666_v46, %v4755_v20 }
0x2097   :  { %v4757_v60 = vmul.f32 0.5, %v4756_v33  ;;  %v4747_v48 = vpop.xlane.xlu0 %4746 }
0x2098   :  { %v4750_v37 = vmul.f32 %v4747_v48, %v6383_v41 }
0x2099   :  { %v4758_v50 = vsub.f32 1.5, %v4757_v60 }
0x209a   :  { %v5668_v11 = vpop.eup %5667  ;;  %v4753_v18 = vadd.f32 1e-05, %v4750_v37 }
0x209b   :  { %v4759_v1 = vmul.f32 %v5666_v46, %v4758_v50  ;;  %v4765_v51 = vmul.f32 %v5668_v11, %v4752_v62  ;;  %vm4771_vm0 = vweird.f32 %v5668_v11 }
0x209c   :  { %5669 = vrsqrt.f32 %v4753_v18  ;;  %vm4772_vm12 = vmor %vm4770_vm1, %vm4771_vm0  ;;  %vm4780_vm4 = vweird.f32 %v4753_v18  ;;  %vm4912_vm0 = vcmask 31744  }
0x209d   :  { %v4766_v47 = vmul.f32 %v5668_v11, %v4765_v51  ;;  %v4763_v16 = vsel %vm4762_vm10, %v5666_v46, %v4759_v1 }
0x209e   :  { %v4784_v34 = vmul.f32 %v4763_v16, %v4733_v23 }
0x209f   :  { %v4767_v35 = vmul.f32 0.5, %v4766_v47 }
0x20a0   :  { %v4788_v8 = vmul.f32 %v5398_v30, %v4784_v34  ;;  %v5401_v34 = vld [vmem:[%s8290_s0 + $0x408] ss:$0 sm:$0xff] }
0x20a1   :  { %v4768_v2 = vsub.f32 1.5, %v4767_v35 }
0x20a2   :  { %v5670_v36 = vpop.eup %5669  ;;  %v4792_v19 = vadd.f32 %v5399_v40, %v4788_v8 }
0x20a3   :  { %v4769_v39 = vmul.f32 %v5668_v11, %v4768_v2  ;;  %v4775_v24 = vmul.f32 %v5670_v36, %v4753_v18  ;;  %vm4781_vm3 = vweird.f32 %v5670_v36 }
0x20a4   :  { %v4797_v13 = vsel %vm98_vm2, %v4792_v19, 0.0  ;;  %vm4782_vm13 = vmor %vm4780_vm4, %vm4781_vm3 }
0x20a5   :  { %v4776_v53 = vmul.f32 %v5670_v36, %v4775_v24  ;;  %4798 = vadd.xlane.f32.xlu2 %v4797_v13  ;;  %v4773_v42 = vsel %vm4772_vm12, %v5668_v11, %v4769_v39 }
0x20a6   :  { %v4785_v9 = vmul.f32 %v4773_v42, %v4734_v22 }
0x20a7   :  { %v4777_v58 = vmul.f32 0.5, %v4776_v53 }
0x20a8   :  { %v4789_v44 = vmul.f32 %v5398_v30, %v4785_v9 }
0x20a9   :  { %v4778_v7 = vsub.f32 1.5, %v4777_v58 }
0x20aa   :  { %v4793_v3 = vadd.f32 %v5399_v40, %v4789_v44 }
0x20ab   :  { %v4779_v31 = vmul.f32 %v5670_v36, %v4778_v7 }
0x20ac   :  { %v4800_v26 = vsel %vm98_vm2, %v4793_v3, 0.0 }
0x20ad   :  { %4801 = vadd.xlane.f32.xlu1 %v4800_v26  ;;  %v4783_v25 = vsel %vm4782_vm13, %v5670_v36, %v4779_v31 }
0x20ae   :  { %v4786_v29 = vmul.f32 %v4783_v25, %v4735_v45  ;;  %v4873_v45 = vld [vmem:[%s8290_s0 + $0x420] sm:$0xff] }
0x20af   :  { %4899 = vmatpush.msra.mxu0 %v4873_v45 }
0x20b0   :  { %v4790_v63 = vmul.f32 %v5398_v30, %v4786_v29  ;;  %v5400_v30 = vld [vmem:[%s8290_s0 + $0x400] ss:$0 sm:$0xff]  ;;  %v5402_v29 = vld [vmem:[%s8290_s0 + $0x430] ss:$0 sm:$0xff] }
0x20b1   :  { %4900 = vmatpush.msra.mxu0 %v4872_v0 }
0x20b2   :  { %v4794_v59 = vadd.f32 %v5399_v40, %v4790_v63 }
0x20b3   :  { %4901 = vmatpush.msra.mxu0 %v4871_v21 }
0x20b4   :  { %v4803_v12 = vsel %vm98_vm2, %v4794_v59, 0.0 }
0x20b5   :  { %4804 = vadd.xlane.f32.xlu0 %v4803_v12 }
0x2118   :  { %v4799_v54 = vpop.xlane.xlu2 %4798 }
0x2119   :  { %v4806_v6 = vmul.f32 %v4799_v54, %v6383_v41 }
0x211b   :  { %v4809_v56 = vsub.f32 %v4792_v19, %v4806_v6 }
0x211d   :  { %v4812_v17 = vmul.f32 %v4809_v56, %v4809_v56 }
0x211f   :  { %v4815_v38 = vsel %vm98_vm2, %v4812_v17, 0.0 }
0x2120   :  { %v4802_v5 = vpop.xlane.xlu1 %4801  ;;  %4816 = vadd.xlane.f32.xlu2 %v4815_v38 }
0x2121   :  { %v4807_v23 = vmul.f32 %v4802_v5, %v6383_v41 }
0x2123   :  { %v4810_v28 = vsub.f32 %v4793_v3, %v4807_v23 }
0x2125   :  { %v4813_v55 = vmul.f32 %v4810_v28, %v4810_v28 }
0x2127   :  { %v4818_v32 = vsel %vm98_vm2, %v4813_v55, 0.0 }
0x2128   :  { %4819 = vadd.xlane.f32.xlu1 %v4818_v32  ;;  %v4805_v27 = vpop.xlane.xlu0 %4804 }
0x2129   :  { %v4808_v22 = vmul.f32 %v4805_v27, %v6383_v41 }
0x212b   :  { %v8248_v61 = vsub.f32 %v4794_v59, %v4808_v22 }
0x212d   :  { %v4814_v52 = vmul.f32 %v8248_v61, %v8248_v61 }
0x212f   :  { %v4821_v43 = vsel %vm98_vm2, %v4814_v52, 0.0 }
0x2130   :  { %4822 = vadd.xlane.f32.xlu0 %v4821_v43 }
0x2193   :  { %v4817_v14 = vpop.xlane.xlu2 %4816 }
0x2194   :  { %v4824_v15 = vmul.f32 %v4817_v14, %v6383_v41 }
0x2196   :  { %v4827_v57 = vadd.f32 1e-05, %v4824_v15 }
0x2198   :  { %5671 = vrsqrt.f32 %v4827_v57  ;;  %vm4836_vm15 = vweird.f32 %v4827_v57 }
0x219b   :  { %v4820_v4 = vpop.xlane.xlu1 %4819 }
0x219c   :  { %v4825_v10 = vmul.f32 %v4820_v4, %v6383_v41 }
0x219e   :  { %v5672_v46 = vpop.eup %5671  ;;  %v4828_v62 = vadd.f32 1e-05, %v4825_v10 }
0x219f   :  { %v4831_v20 = vmul.f32 %v5672_v46, %v4827_v57  ;;  %vm4837_vm14 = vweird.f32 %v5672_v46 }
0x21a0   :  { %5673 = vrsqrt.f32 %v4828_v62  ;;  %vm4838_vm5 = vmor %vm4836_vm15, %vm4837_vm14  ;;  %vm4846_vm6 = vweird.f32 %v4828_v62 }
0x21a1   :  { %v4832_v33 = vmul.f32 %v5672_v46, %v4831_v20 }
0x21a3   :  { %v4833_v60 = vmul.f32 0.5, %v4832_v33  ;;  %v4823_v48 = vpop.xlane.xlu0 %4822 }
0x21a4   :  { %v4826_v37 = vmul.f32 %v4823_v48, %v6383_v41 }
0x21a5   :  { %v4834_v50 = vsub.f32 1.5, %v4833_v60 }
0x21a6   :  { %v5674_v11 = vpop.eup %5673  ;;  %v4829_v18 = vadd.f32 1e-05, %v4826_v37 }
0x21a7   :  { %v4835_v1 = vmul.f32 %v5672_v46, %v4834_v50  ;;  %v4841_v51 = vmul.f32 %v5674_v11, %v4828_v62  ;;  %vm4847_vm11 = vweird.f32 %v5674_v11 }
0x21a8   :  { %5675 = vrsqrt.f32 %v4829_v18  ;;  %vm4848_vm7 = vmor %vm4846_vm6, %vm4847_vm11  ;;  %vm4856_vm9 = vweird.f32 %v4829_v18 }
0x21a9   :  { %v4839_v47 = vsel %vm4838_vm5, %v5672_v46, %v4835_v1  ;;  %v4842_v16 = vmul.f32 %v5674_v11, %v4841_v51 }
0x21aa   :  { %v4860_v41 = vmul.f32 %v4839_v47, %v4809_v56 }
0x21ab   :  { %v4843_v40 = vmul.f32 0.5, %v4842_v16 }
0x21ac   :  { %v4864_v35 = vmul.f32 %v5400_v30, %v4860_v41 }
0x21ad   :  { %v4844_v8 = vsub.f32 1.5, %v4843_v40 }
0x21ae   :  { %v5676_v2 = vpop.eup %5675  ;;  %v4868_v36 = vadd.f32 %v5401_v34, %v4864_v35 }
0x21af   :  { %v4845_v19 = vmul.f32 %v5674_v11, %v4844_v8  ;;  %v4851_v39 = vmul.f32 %v5676_v2, %v4829_v18  ;;  %vm4857_vm8 = vweird.f32 %v5676_v2 }
0x21b0   :  { %5243 = vmatmul.msk.f32.vlgmr.msra.gmra.mxu0 %vm98_vm2, %v4868_v36  ;;  %vm4858_vm10 = vmor %vm4856_vm9, %vm4857_vm8 }
0x21b1   :  { %v4849_v24 = vsel %vm4848_vm7, %v5674_v11, %v4845_v19  ;;  %v4852_v13 = vmul.f32 %v5676_v2, %v4851_v39 }
0x21b2   :  { %v4861_v53 = vmul.f32 %v4849_v24, %v4810_v28 }
0x21b3   :  { %v4853_v42 = vmul.f32 0.5, %v4852_v13 }
0x21b4   :  { %v4865_v9 = vmul.f32 %v5400_v30, %v4861_v53 }
0x21b5   :  { %v4854_v58 = vsub.f32 1.5, %v4853_v42 }
0x21b6   :  { %v4869_v44 = vadd.f32 %v5401_v34, %v4865_v9 }
0x21b7   :  { %v4855_v7 = vmul.f32 %v5676_v2, %v4854_v58 }
0x21b8   :  { %5244 = vmatmul.msk.f32.gmra.mxu0 %vm98_vm2, %v4869_v44 }
0x21b9   :  { %v4859_v3 = vsel %vm4858_vm10, %v5676_v2, %v4855_v7 }
0x21ba   :  { %v4862_v31 = vmul.f32 %v4859_v3, %v8248_v61 }
0x21bc   :  { %v4866_v26 = vmul.f32 %v5400_v30, %v4862_v31 }
0x21be   :  { %v4870_v25 = vadd.f32 %v5401_v34, %v4866_v26 }
0x21c0   :  { %5245 = vmatmul.msk.f32.gmra.mxu0 %vm98_vm2, %v4870_v25 }
0x222d   :  { %v4903_v63 = vpop.f32.mrf.mxu0 }
0x222e   :  { %v4904_v59 = vadd.f32 %v5402_v29, %v4903_v63 }
0x2230   :  { %4913 = vst.msk [vmem:[%s8295_s5] sm:$0xff] %vm4912_vm0, %v4904_v59 }
0x2235   :  { %v4906_v12 = vpop.f32.mrf.mxu0 }
0x2236   :  { %v4907_v54 = vadd.f32 %v5402_v29, %v4906_v12 }
0x2238   :  { %4914 = vst.msk [vmem:[%s8295_s5 + $0x8] sm:$0xff] %vm4912_vm0, %v4907_v54 }
0x223d   :  { %v4909_v6 = vpop.f32.mrf.mxu0 }
0x223e   :  { %v4910_v56 = vadd.f32 %v5402_v29, %v4909_v6 }
0x2240   :  { %4915 = vst.msk [vmem:[%s8295_s5 + $0x10] sm:$0xff] %vm4912_vm0, %v4910_v56 }

</bundles_post_ra>
